<compile_context>
chip_gen: v7x
topology: tpu7x:2x2x1
jax: 0.10.0
libtpu: 0.0.40
codegen_flags: <defaults>
</compile_context>

<pallas_src>
import math
from functools import partial

import numpy as np
import jax
import jax.numpy as jnp
from jax.experimental import pallas as pl
from jax.experimental.pallas import tpu as pltpu

NEG_INF = -1.0e9                     # matches torch masked_fill(-1000000000.0)
VMEM_LIMIT = 48 * 1024 * 1024        # safe on v5e/v6e/v7x (re-derive for huge S/V)


# ---------------------------------------------------------------------------
# Content-selection weights.
#   scores = (X @ X^T) / sqrt(H)          (keys masked with -1e9)
#   step_w[g, :] = max over predicate rows of group g of scores[row, :]
#   cross[t, :]  = step_w[gid[t], :]      (zero row for padded target tokens)
#
# grid = (B, query_tiles): batch axis "parallel" (megacore), query-row axis is
# an "arbitrary" reduction with a (G, S) running-max scratch. The key axis is
# collapsed (full bf16 key slab resident), so Q is streamed once and the
# output tile is a lane-dense (T, S) slab.
# ---------------------------------------------------------------------------
def _content_selection_kernel(q_ref, k_ref, msk_ref, gmt_ref, oh_ref,
                              out_ref, sw_ref):
    qi = pl.program_id(1)
    nq = pl.num_programs(1)

    @pl.when(qi == 0)
    def _init():
        sw_ref[...] = jnp.full(sw_ref.shape, NEG_INF, dtype=sw_ref.dtype)

    q = q_ref[0]            # (TQ, H) bf16
    k = k_ref[0]            # (S,  H) bf16 — full key slab
    gmt = gmt_ref[0]        # (TQ, G) 1.0 = query row is a predicate of group g

    # bf16 operands, f32 accumulation on the MXU; scale the f32 scores here.
    scale = 1.0 / math.sqrt(q.shape[-1])
    scores = jax.lax.dot_general(
        q, k, (((1,), (1,)), ((), ())),
        preferred_element_type=jnp.float32) * scale            # (TQ, S) f32

    # Per-group max over this tile's predicate query rows: unrolled loop over
    # the small group count keeps the live set at ~one scores worth of vregs
    # (no (G, TQ, S) broadcast temp / spills).
    n_grp = sw_ref.shape[0]
    rows = []
    for g in range(n_grp):
        masked = jnp.where(gmt[:, g:g + 1] > 0, scores, NEG_INF)
        rows.append(jnp.max(masked, axis=0, keepdims=True))    # (1, S)
    tile_max = jnp.concatenate(rows, axis=0)                   # (G, S)
    sw_ref[...] = jnp.maximum(sw_ref[...], tile_max)

    @pl.when(qi == nq - 1)
    def _finalize():
        # Key mask applied once (column mask commutes with the row max).
        msk = msk_ref[0]                                       # (1, S)
        sw = jnp.where(msk > 0, sw_ref[...], NEG_INF)          # (G, S)

        # step_weights_expand: per-target-token copy of its group's row via
        # G broadcast-selects (exact, VPU) -> one unmasked (T, S) store.
        # Padded target tokens have an all-zero one-hot row -> zeros out.
        onehot = oh_ref[0]                                     # (T, G) 0/1
        acc = jnp.zeros(out_ref.shape, jnp.float32)            # (T, S)
        for g in range(n_grp):
            acc = jnp.where(onehot[:, g:g + 1] > 0, sw[g:g + 1, :], acc)
        out_ref[...] = acc


@partial(jax.jit, static_argnames=("tq",))
def content_selection_weights(top_vec, mask_src, group_mask, tgt_group_id,
                              *, tq=256):
    B, S, H = top_vec.shape
    G = group_mask.shape[1]
    T = tgt_group_id.shape[1]
    tq = min(tq, S)
    assert S % tq == 0, "S must be a multiple of the query tile"
    nq = S // tq

    # Single bf16 cast of top_vec, reused as both Q and K (no pre-scaling, no
    # duplicated wrapper passes over the (B, S, H) activations).
    x_bf = top_vec.astype(jnp.bfloat16)
    msk = mask_src.astype(jnp.float32).reshape(B, 1, S)
    gmt = jnp.transpose(group_mask, (0, 2, 1)).astype(jnp.float32)   # (B, S, G)
    gid = tgt_group_id.astype(jnp.int32)
    onehot = (gid[:, :, None] ==
              jnp.arange(G, dtype=jnp.int32)[None, None, :]).astype(jnp.float32)

    return pl.pallas_call(
        _content_selection_kernel,
        out_shape=jax.ShapeDtypeStruct((B, T, S), jnp.float32),
        grid_spec=pltpu.PrefetchScalarGridSpec(
            num_scalar_prefetch=0,
            grid=(B, nq),
            in_specs=[
                pl.BlockSpec((1, tq, H), lambda b, q: (b, q, 0)),   # Q tile
                pl.BlockSpec((1, S, H), lambda b, q: (b, 0, 0)),    # full K slab
                pl.BlockSpec((1, 1, S), lambda b, q: (b, 0, 0)),    # key mask
                pl.BlockSpec((1, tq, G), lambda b, q: (b, q, 0)),   # group mask^T
                pl.BlockSpec((1, T, G), lambda b, q: (b, 0, 0)),    # gid one-hot
            ],
            out_specs=pl.BlockSpec((pl.Squeezed(), T, S),
                                   lambda b, q: (b, 0, 0)),
            scratch_shapes=[pltpu.VMEM((G, S), jnp.float32)],
        ),
        compiler_params=pltpu.CompilerParams(
            dimension_semantics=("parallel", "arbitrary"),
            vmem_limit_bytes=VMEM_LIMIT),
    )(x_bf, x_bf, msk, gmt, onehot)


# ---------------------------------------------------------------------------
# Generator: Linear(H, V) + LogSoftmax.
# Rows flattened to (B*T, H); single vocab sweep streams each (H, TV) bf16
# weight tile exactly once, writes the unnormalized logits tile and keeps
# running max / sum-exp scratch; the per-row logsumexp is emitted as a second
# output. A tiny follow-up kernel subtracts the lse in place (aliased output).
# ---------------------------------------------------------------------------
def _generator_kernel(h_ref, w_ref, b_ref, logits_ref, lse_ref, m_ref, l_ref):
    v = pl.program_id(0)

    @pl.when(v == 0)
    def _init():
        m_ref[...] = jnp.full(m_ref.shape, -jnp.inf, dtype=m_ref.dtype)
        l_ref[...] = jnp.zeros(l_ref.shape, dtype=l_ref.dtype)

    logits = jnp.dot(h_ref[...], w_ref[...],
                     preferred_element_type=jnp.float32) + b_ref[...]  # (R, TV)
    logits_ref[...] = logits

    m_prev = m_ref[...]
    m_new = jnp.maximum(m_prev, jnp.max(logits, axis=-1, keepdims=True))
    l_ref[...] = (l_ref[...] * jnp.exp(m_prev - m_new)
                  + jnp.sum(jnp.exp(logits - m_new), axis=-1, keepdims=True))
    m_ref[...] = m_new

    @pl.when(v == pl.num_programs(0) - 1)
    def _fin():
        lse_ref[...] = m_ref[...] + jnp.log(l_ref[...])


def _logsub_kernel(logits_ref, lse_ref, out_ref):
    out_ref[...] = logits_ref[...] - lse_ref[...]


@partial(jax.jit, static_argnames=("tv", "tv_sub"))
def generator_log_probs(dec_hidden, w, bias, *, tv=1024, tv_sub=2048):
    B, T, H = dec_hidden.shape
    V = w.shape[1]
    R = B * T
    tv = min(tv, V)
    tv_sub = min(tv_sub, V)
    assert V % tv == 0 and V % tv_sub == 0, "V must be a multiple of the tiles"
    nv = V // tv

    h_bf = dec_hidden.reshape(R, H).astype(jnp.bfloat16)
    w_bf = w.astype(jnp.bfloat16)
    bias2d = bias.reshape(1, V).astype(jnp.float32)

    # Pass 1: logits + per-row logsumexp, weight streamed once.
    # TODO(synk): on v7x, tile the row axis / split V across the two
    # TensorCores with partial (m, l) for megacore use.
    logits, lse = pl.pallas_call(
        _generator_kernel,
        out_shape=(jax.ShapeDtypeStruct((R, V), jnp.float32),
                   jax.ShapeDtypeStruct((R, 1), jnp.float32)),
        grid_spec=pltpu.PrefetchScalarGridSpec(
            num_scalar_prefetch=0,
            grid=(nv,),
            in_specs=[
                pl.BlockSpec((R, H), lambda v: (0, 0)),
                pl.BlockSpec((H, tv), lambda v: (0, v)),
                pl.BlockSpec((1, tv), lambda v: (0, v)),
            ],
            out_specs=[pl.BlockSpec((R, tv), lambda v: (0, v)),
                       pl.BlockSpec((R, 1), lambda v: (0, 0))],
            scratch_shapes=[pltpu.VMEM((R, 1), jnp.float32),
                            pltpu.VMEM((R, 1), jnp.float32)],
        ),
        compiler_params=pltpu.CompilerParams(
            dimension_semantics=("arbitrary",),
            vmem_limit_bytes=VMEM_LIMIT),
    )(h_bf, w_bf, bias2d)

    # Pass 2: in-place lse subtraction over the logits only (no weight reads).
    logp = pl.pallas_call(
        _logsub_kernel,
        out_shape=jax.ShapeDtypeStruct((R, V), jnp.float32),
        grid_spec=pltpu.PrefetchScalarGridSpec(
            num_scalar_prefetch=0,
            grid=(V // tv_sub,),
            in_specs=[
                pl.BlockSpec((R, tv_sub), lambda v: (0, v)),
                pl.BlockSpec((R, 1), lambda v: (0, 0)),
            ],
            out_specs=pl.BlockSpec((R, tv_sub), lambda v: (0, v)),
        ),
        input_output_aliases={0: 0},
        compiler_params=pltpu.CompilerParams(
            dimension_semantics=("parallel",),
            vmem_limit_bytes=VMEM_LIMIT),
    )(logits, lse)

    return logp.reshape(B, T, V)


if __name__ == "__main__":
    key = jax.random.PRNGKey(0)
    B, S, T, H, G, V = 2, 512, 16, 128, 8, 2048
    k_enc, k_dec, k_w = jax.random.split(key, 3)

    # synthetic encoder / decoder hidden states (stand-ins for the HF T5 stacks)
    top_vec = jax.random.normal(k_enc, (B, S, H), dtype=jnp.float32)
    dec_hidden = jax.random.normal(k_dec, (B, T, H), dtype=jnp.float32)

    # src padding mask (1.0 = valid token)
    src_len = np.array([470, 390])
    mask_src = (np.arange(S)[None, :] < src_len[:, None]).astype(np.float32)

    # group_mask[b, g, s] = 1 iff src token s is a predicate token of alignment
    # group g (dense encoding of src_predicate_token_idx + alignments).
    rng = np.random.default_rng(0)
    gm = np.zeros((B, G, S), dtype=np.float32)
    for b in range(B):
        for g in range(G):
            n_pred = int(rng.integers(1, 4))
            pos = rng.choice(int(src_len[b]), size=n_pred, replace=False)
            gm[b, g, pos] = 1.0

    # per-target-token group id (row of mask_tgt_sent the token belongs to);
    # padded target tokens get sentinel id G -> zero row (mask_padding).
    counts = np.array([[3, 2, 1, 2, 2, 1, 2, 2],
                       [2, 2, 2, 1, 3, 2, 2, 1]], dtype=np.int64)
    gid = np.full((B, T), G, dtype=np.int32)
    for b in range(B):
        t0 = 0
        for g in range(G):
            gid[b, t0:t0 + int(counts[b, g])] = g
            t0 += int(counts[b, g])

    mask_src_j = jnp.asarray(mask_src)
    group_mask = jnp.asarray(gm)
    gid_j = jnp.asarray(gid)

    # generator params: Linear(H, V) with xavier_uniform weight, zero bias
    bound = math.sqrt(6.0 / (H + V))
    gen_w = jax.random.uniform(k_w, (H, V), jnp.float32,
                               minval=-bound, maxval=bound)
    gen_b = jnp.zeros((1, V), jnp.float32)

    cross = content_selection_weights(top_vec, mask_src_j, group_mask, gid_j)
    logp = generator_log_probs(dec_hidden, gen_w, gen_b)
    jax.block_until_ready((cross, logp))

    # --- pure-JAX reference (same semantics as the PyTorch module) ---
    x_bf = top_vec.astype(jnp.bfloat16)
    scores = jnp.einsum("bqh,bkh->bqk", x_bf, x_bf,
                        preferred_element_type=jnp.float32) * (1.0 / math.sqrt(H))
    scores = jnp.where(mask_src_j[:, None, :] > 0, scores, NEG_INF)     # key mask
    masked = jnp.where(group_mask[:, :, :, None] > 0,
                       scores[:, None, :, :], NEG_INF)                  # (B,G,S,S)
    step_w_ref = masked.max(axis=2)                                     # (B,G,S)
    g_safe = jnp.minimum(gid_j, G - 1)
    gathered = jnp.take_along_axis(step_w_ref, g_safe[:, :, None], axis=1)
    cross_ref = jnp.where((gid_j < G)[:, :, None], gathered, 0.0)

    logits_ref = jnp.einsum("bth,hv->btv", dec_hidden.astype(jnp.bfloat16),
                            gen_w.astype(jnp.bfloat16),
                            preferred_element_type=jnp.float32) + gen_b
    logp_ref = jax.nn.log_softmax(logits_ref, axis=-1)

    np.testing.assert_allclose(np.asarray(cross), np.asarray(cross_ref),
                               rtol=2e-3, atol=2e-3)
    np.testing.assert_allclose(np.asarray(logp), np.asarray(logp_ref),
                               rtol=2e-3, atol=2e-3)
    print("KERNEL_OK")
</pallas_src>

<mosaic_0001>
module attributes {stable_mosaic.version = 11 : i64} {
  func.func @_content_selection_kernel(%arg0: i32, %arg1: i32, %arg2: memref<1x256x128xbf16, #tpu.memory_space<vmem>>, %arg3: memref<1x512x128xbf16, #tpu.memory_space<vmem>>, %arg4: memref<1x1x512xf32, #tpu.memory_space<vmem>>, %arg5: memref<1x256x8xf32, #tpu.memory_space<vmem>>, %arg6: memref<1x16x8xf32, #tpu.memory_space<vmem>>, %arg7: memref<1x16x512xf32, #tpu.memory_space<vmem>>, %arg8: memref<8x512xf32, #tpu.memory_space<vmem>>) attributes {dimension_semantics = [#tpu.dimension_semantics<parallel>, #tpu.dimension_semantics<arbitrary>], iteration_bounds = array<i64: 2, 2>, scalar_prefetch = 0 : i64, scratch_operands = 1 : i64, tpu.core_type = #tpu.core_type<tc>, window_params = [{transform_indices = @transform_0, window_bounds = array<i64: 1, 256, 128>}, {transform_indices = @transform_1, window_bounds = array<i64: 1, 512, 128>}, {transform_indices = @transform_2, window_bounds = array<i64: 1, 1, 512>}, {transform_indices = @transform_3, window_bounds = array<i64: 1, 256, 8>}, {transform_indices = @transform_4, window_bounds = array<i64: 1, 16, 8>}, {transform_indices = @transform_5, window_bounds = array<i64: 1, 16, 512>}]} {
    %c0_i32 = arith.constant 0 : i32
    %0 = arith.cmpi eq, %arg1, %c0_i32 : i32
    %1 = arith.extui %0 : i1 to i32
    %c0_i32_0 = arith.constant 0 : i32
    %2 = arith.cmpi ne, %1, %c0_i32_0 : i32
    scf.if %2 {
      %cst_39 = arith.constant -1.000000e+09 : f32
      %91 = vector.broadcast %cst_39 : f32 to vector<8x512xf32>
      %c0_40 = arith.constant 0 : index
      %c0_41 = arith.constant 0 : index
      %92 = vector.load %arg8[%c0_40, %c0_41] : memref<8x512xf32, #tpu.memory_space<vmem>>, vector<8x512xf32>
      tpu.vector_store %arg8[%c0_40, %c0_41], %91 {strides = array<i32>} : memref<8x512xf32, #tpu.memory_space<vmem>>, vector<8x512xf32>,
    } else {
    }
    %c0 = arith.constant 0 : index
    %c0_1 = arith.constant 0 : index
    %c0_2 = arith.constant 0 : index
    %3 = vector.load %arg2[%c0, %c0_1, %c0_2] : memref<1x256x128xbf16, #tpu.memory_space<vmem>>, vector<1x256x128xbf16>
    %4 = vector.shape_cast %3 : vector<1x256x128xbf16> to vector<256x128xbf16>
    %c0_3 = arith.constant 0 : index
    %c0_4 = arith.constant 0 : index
    %c0_5 = arith.constant 0 : index
    %5 = vector.load %arg3[%c0_3, %c0_4, %c0_5] : memref<1x512x128xbf16, #tpu.memory_space<vmem>>, vector<1x512x128xbf16>
    %6 = vector.shape_cast %5 : vector<1x512x128xbf16> to vector<512x128xbf16>
    %c0_6 = arith.constant 0 : index
    %c0_7 = arith.constant 0 : index
    %c0_8 = arith.constant 0 : index
    %7 = vector.load %arg5[%c0_6, %c0_7, %c0_8] : memref<1x256x8xf32, #tpu.memory_space<vmem>>, vector<1x256x8xf32>
    %8 = vector.shape_cast %7 : vector<1x256x8xf32> to vector<256x8xf32>
    %cst = arith.constant dense<0.000000e+00> : vector<256x512xf32>
    %9 = tpu.matmul %4, %6, %cst {dimension_numbers = #tpu.dot_dimension_numbers<[1], [1], [0], [0], [0, 0, 1, 0], [], []>} : vector<256x128xbf16>, vector<512x128xbf16>, vector<256x512xf32> -> vector<256x512xf32>
    %cst_9 = arith.constant 0.0883883461 : f32
    %10 = vector.broadcast %cst_9 : f32 to vector<256x512xf32>
    %11 = arith.mulf %9, %10 : vector<256x512xf32>
    %12 = vector.extract_strided_slice %8 {offsets = [0, 0], sizes = [256, 1], strides = [1, 1]} : vector<256x8xf32> to vector<256x1xf32>
    %cst_10 = arith.constant 0.000000e+00 : f32
    %13 = vector.broadcast %cst_10 : f32 to vector<256x1xf32>
    %14 = arith.cmpf ogt, %12, %13 : vector<256x1xf32>
    %cst_11 = arith.constant -1.000000e+09 : f32
    %15 = vector.shape_cast %14 : vector<256x1xi1> to vector<256x1xi1>
    %16 = vector.broadcast %15 : vector<256x1xi1> to vector<256x512xi1>
    %17 = vector.broadcast %cst_11 : f32 to vector<256x512xf32>
    %18 = arith.select %16, %11, %17 : vector<256x512xi1>, vector<256x512xf32>
    %cst_12 = arith.constant dense<0xFF800000> : vector<512xf32>
    %19 = vector.multi_reduction <maximumf>, %18, %cst_12 [0] : vector<256x512xf32> to vector<512xf32>
    %20 = vector.shape_cast %19 : vector<512xf32> to vector<1x512xf32>
    %21 = vector.extract_strided_slice %8 {offsets = [0, 1], sizes = [256, 1], strides = [1, 1]} : vector<256x8xf32> to vector<256x1xf32>
    %cst_13 = arith.constant 0.000000e+00 : f32
    %22 = vector.broadcast %cst_13 : f32 to vector<256x1xf32>
    %23 = arith.cmpf ogt, %21, %22 : vector<256x1xf32>
    %cst_14 = arith.constant -1.000000e+09 : f32
    %24 = vector.shape_cast %23 : vector<256x1xi1> to vector<256x1xi1>
    %25 = vector.broadcast %24 : vector<256x1xi1> to vector<256x512xi1>
    %26 = vector.broadcast %cst_14 : f32 to vector<256x512xf32>
    %27 = arith.select %25, %11, %26 : vector<256x512xi1>, vector<256x512xf32>
    %cst_15 = arith.constant dense<0xFF800000> : vector<512xf32>
    %28 = vector.multi_reduction <maximumf>, %27, %cst_15 [0] : vector<256x512xf32> to vector<512xf32>
    %29 = vector.shape_cast %28 : vector<512xf32> to vector<1x512xf32>
    %30 = vector.extract_strided_slice %8 {offsets = [0, 2], sizes = [256, 1], strides = [1, 1]} : vector<256x8xf32> to vector<256x1xf32>
    %cst_16 = arith.constant 0.000000e+00 : f32
    %31 = vector.broadcast %cst_16 : f32 to vector<256x1xf32>
    %32 = arith.cmpf ogt, %30, %31 : vector<256x1xf32>
    %cst_17 = arith.constant -1.000000e+09 : f32
    %33 = vector.shape_cast %32 : vector<256x1xi1> to vector<256x1xi1>
    %34 = vector.broadcast %33 : vector<256x1xi1> to vector<256x512xi1>
    %35 = vector.broadcast %cst_17 : f32 to vector<256x512xf32>
    %36 = arith.select %34, %11, %35 : vector<256x512xi1>, vector<256x512xf32>
    %cst_18 = arith.constant dense<0xFF800000> : vector<512xf32>
    %37 = vector.multi_reduction <maximumf>, %36, %cst_18 [0] : vector<256x512xf32> to vector<512xf32>
    %38 = vector.shape_cast %37 : vector<512xf32> to vector<1x512xf32>
    %39 = vector.extract_strided_slice %8 {offsets = [0, 3], sizes = [256, 1], strides = [1, 1]} : vector<256x8xf32> to vector<256x1xf32>
    %cst_19 = arith.constant 0.000000e+00 : f32
    %40 = vector.broadcast %cst_19 : f32 to vector<256x1xf32>
    %41 = arith.cmpf ogt, %39, %40 : vector<256x1xf32>
    %cst_20 = arith.constant -1.000000e+09 : f32
    %42 = vector.shape_cast %41 : vector<256x1xi1> to vector<256x1xi1>
    %43 = vector.broadcast %42 : vector<256x1xi1> to vector<256x512xi1>
    %44 = vector.broadcast %cst_20 : f32 to vector<256x512xf32>
    %45 = arith.select %43, %11, %44 : vector<256x512xi1>, vector<256x512xf32>
    %cst_21 = arith.constant dense<0xFF800000> : vector<512xf32>
    %46 = vector.multi_reduction <maximumf>, %45, %cst_21 [0] : vector<256x512xf32> to vector<512xf32>
    %47 = vector.shape_cast %46 : vector<512xf32> to vector<1x512xf32>
    %48 = vector.extract_strided_slice %8 {offsets = [0, 4], sizes = [256, 1], strides = [1, 1]} : vector<256x8xf32> to vector<256x1xf32>
    %cst_22 = arith.constant 0.000000e+00 : f32
    %49 = vector.broadcast %cst_22 : f32 to vector<256x1xf32>
    %50 = arith.cmpf ogt, %48, %49 : vector<256x1xf32>
    %cst_23 = arith.constant -1.000000e+09 : f32
    %51 = vector.shape_cast %50 : vector<256x1xi1> to vector<256x1xi1>
    %52 = vector.broadcast %51 : vector<256x1xi1> to vector<256x512xi1>
    %53 = vector.broadcast %cst_23 : f32 to vector<256x512xf32>
    %54 = arith.select %52, %11, %53 : vector<256x512xi1>, vector<256x512xf32>
    %cst_24 = arith.constant dense<0xFF800000> : vector<512xf32>
    %55 = vector.multi_reduction <maximumf>, %54, %cst_24 [0] : vector<256x512xf32> to vector<512xf32>
    %56 = vector.shape_cast %55 : vector<512xf32> to vector<1x512xf32>
    %57 = vector.extract_strided_slice %8 {offsets = [0, 5], sizes = [256, 1], strides = [1, 1]} : vector<256x8xf32> to vector<256x1xf32>
    %cst_25 = arith.constant 0.000000e+00 : f32
    %58 = vector.broadcast %cst_25 : f32 to vector<256x1xf32>
    %59 = arith.cmpf ogt, %57, %58 : vector<256x1xf32>
    %cst_26 = arith.constant -1.000000e+09 : f32
    %60 = vector.shape_cast %59 : vector<256x1xi1> to vector<256x1xi1>
    %61 = vector.broadcast %60 : vector<256x1xi1> to vector<256x512xi1>
    %62 = vector.broadcast %cst_26 : f32 to vector<256x512xf32>
    %63 = arith.select %61, %11, %62 : vector<256x512xi1>, vector<256x512xf32>
    %cst_27 = arith.constant dense<0xFF800000> : vector<512xf32>
    %64 = vector.multi_reduction <maximumf>, %63, %cst_27 [0] : vector<256x512xf32> to vector<512xf32>
    %65 = vector.shape_cast %64 : vector<512xf32> to vector<1x512xf32>
    %66 = vector.extract_strided_slice %8 {offsets = [0, 6], sizes = [256, 1], strides = [1, 1]} : vector<256x8xf32> to vector<256x1xf32>
    %cst_28 = arith.constant 0.000000e+00 : f32
    %67 = vector.broadcast %cst_28 : f32 to vector<256x1xf32>
    %68 = arith.cmpf ogt, %66, %67 : vector<256x1xf32>
    %cst_29 = arith.constant -1.000000e+09 : f32
    %69 = vector.shape_cast %68 : vector<256x1xi1> to vector<256x1xi1>
    %70 = vector.broadcast %69 : vector<256x1xi1> to vector<256x512xi1>
    %71 = vector.broadcast %cst_29 : f32 to vector<256x512xf32>
    %72 = arith.select %70, %11, %71 : vector<256x512xi1>, vector<256x512xf32>
    %cst_30 = arith.constant dense<0xFF800000> : vector<512xf32>
    %73 = vector.multi_reduction <maximumf>, %72, %cst_30 [0] : vector<256x512xf32> to vector<512xf32>
    %74 = vector.shape_cast %73 : vector<512xf32> to vector<1x512xf32>
    %75 = vector.extract_strided_slice %8 {offsets = [0, 7], sizes = [256, 1], strides = [1, 1]} : vector<256x8xf32> to vector<256x1xf32>
    %cst_31 = arith.constant 0.000000e+00 : f32
    %76 = vector.broadcast %cst_31 : f32 to vector<256x1xf32>
    %77 = arith.cmpf ogt, %75, %76 : vector<256x1xf32>
    %cst_32 = arith.constant -1.000000e+09 : f32
    %78 = vector.shape_cast %77 : vector<256x1xi1> to vector<256x1xi1>
    %79 = vector.broadcast %78 : vector<256x1xi1> to vector<256x512xi1>
    %80 = vector.broadcast %cst_32 : f32 to vector<256x512xf32>
    %81 = arith.select %79, %11, %80 : vector<256x512xi1>, vector<256x512xf32>
    %cst_33 = arith.constant dense<0xFF800000> : vector<512xf32>
    %82 = vector.multi_reduction <maximumf>, %81, %cst_33 [0] : vector<256x512xf32> to vector<512xf32>
    %83 = vector.shape_cast %82 : vector<512xf32> to vector<1x512xf32>
    %84 = tpu.concatenate %20, %29, %38, %47, %56, %65, %74, %83 in 0 : vector<1x512xf32>, vector<1x512xf32>, vector<1x512xf32>, vector<1x512xf32>, vector<1x512xf32>, vector<1x512xf32>, vector<1x512xf32>, vector<1x512xf32> -> vector<8x512xf32>
    %c0_34 = arith.constant 0 : index
    %c0_35 = arith.constant 0 : index
    %85 = vector.load %arg8[%c0_34, %c0_35] : memref<8x512xf32, #tpu.memory_space<vmem>>, vector<8x512xf32>
    %86 = arith.maximumf %85, %84 : vector<8x512xf32>
    %c0_36 = arith.constant 0 : index
    %c0_37 = arith.constant 0 : index
    %87 = vector.load %arg8[%c0_36, %c0_37] : memref<8x512xf32, #tpu.memory_space<vmem>>, vector<8x512xf32>
    tpu.vector_store %arg8[%c0_36, %c0_37], %86 {strides = array<i32>} : memref<8x512xf32, #tpu.memory_space<vmem>>, vector<8x512xf32>,
    %c1_i32 = arith.constant 1 : i32
    %88 = arith.cmpi eq, %arg1, %c1_i32 : i32
    %89 = arith.extui %88 : i1 to i32
    %c0_i32_38 = arith.constant 0 : i32
    %90 = arith.cmpi ne, %89, %c0_i32_38 : i32
    scf.if %90 {
      %c0_39 = arith.constant 0 : index
      %c0_40 = arith.constant 0 : index
      %c0_41 = arith.constant 0 : index
      %91 = vector.load %arg4[%c0_39, %c0_40, %c0_41] : memref<1x1x512xf32, #tpu.memory_space<vmem>>, vector<1x1x512xf32>
      %92 = vector.shape_cast %91 : vector<1x1x512xf32> to vector<1x512xf32>
      %cst_42 = arith.constant 0.000000e+00 : f32
      %93 = vector.broadcast %cst_42 : f32 to vector<1x512xf32>
      %94 = arith.cmpf ogt, %92, %93 : vector<1x512xf32>
      %c0_43 = arith.constant 0 : index
      %c0_44 = arith.constant 0 : index
      %95 = vector.load %arg8[%c0_43, %c0_44] : memref<8x512xf32, #tpu.memory_space<vmem>>, vector<8x512xf32>
      %cst_45 = arith.constant -1.000000e+09 : f32
      %96 = vector.shape_cast %94 : vector<1x512xi1> to vector<1x512xi1>
      %97 = vector.broadcast %96 : vector<1x512xi1> to vector<8x512xi1>
      %98 = vector.broadcast %cst_45 : f32 to vector<8x512xf32>
      %99 = arith.select %97, %95, %98 : vector<8x512xi1>, vector<8x512xf32>
      %c0_46 = arith.constant 0 : index
      %c0_47 = arith.constant 0 : index
      %c0_48 = arith.constant 0 : index
      %100 = vector.load %arg6[%c0_46, %c0_47, %c0_48] : memref<1x16x8xf32, #tpu.memory_space<vmem>>, vector<1x16x8xf32>
      %101 = vector.shape_cast %100 : vector<1x16x8xf32> to vector<16x8xf32>
      %cst_49 = arith.constant 0.000000e+00 : f32
      %102 = vector.broadcast %cst_49 : f32 to vector<16x512xf32>
      %103 = vector.extract_strided_slice %101 {offsets = [0, 0], sizes = [16, 1], strides = [1, 1]} : vector<16x8xf32> to vector<16x1xf32>
      %cst_50 = arith.constant 0.000000e+00 : f32
      %104 = vector.broadcast %cst_50 : f32 to vector<16x1xf32>
      %105 = arith.cmpf ogt, %103, %104 : vector<16x1xf32>
      %106 = vector.extract_strided_slice %99 {offsets = [0, 0], sizes = [1, 512], strides = [1, 1]} : vector<8x512xf32> to vector<1x512xf32>
      %107 = vector.shape_cast %105 : vector<16x1xi1> to vector<16x1xi1>
      %108 = vector.broadcast %107 : vector<16x1xi1> to vector<16x512xi1>
      %109 = vector.shape_cast %106 : vector<1x512xf32> to vector<1x512xf32>
      %110 = vector.broadcast %109 : vector<1x512xf32> to vector<16x512xf32>
      %111 = arith.select %108, %110, %102 : vector<16x512xi1>, vector<16x512xf32>
      %112 = vector.extract_strided_slice %101 {offsets = [0, 1], sizes = [16, 1], strides = [1, 1]} : vector<16x8xf32> to vector<16x1xf32>
      %cst_51 = arith.constant 0.000000e+00 : f32
      %113 = vector.broadcast %cst_51 : f32 to vector<16x1xf32>
      %114 = arith.cmpf ogt, %112, %113 : vector<16x1xf32>
      %115 = vector.extract_strided_slice %99 {offsets = [1, 0], sizes = [1, 512], strides = [1, 1]} : vector<8x512xf32> to vector<1x512xf32>
      %116 = vector.shape_cast %114 : vector<16x1xi1> to vector<16x1xi1>
      %117 = vector.broadcast %116 : vector<16x1xi1> to vector<16x512xi1>
      %118 = vector.shape_cast %115 : vector<1x512xf32> to vector<1x512xf32>
      %119 = vector.broadcast %118 : vector<1x512xf32> to vector<16x512xf32>
      %120 = arith.select %117, %119, %111 : vector<16x512xi1>, vector<16x512xf32>
      %121 = vector.extract_strided_slice %101 {offsets = [0, 2], sizes = [16, 1], strides = [1, 1]} : vector<16x8xf32> to vector<16x1xf32>
      %cst_52 = arith.constant 0.000000e+00 : f32
      %122 = vector.broadcast %cst_52 : f32 to vector<16x1xf32>
      %123 = arith.cmpf ogt, %121, %122 : vector<16x1xf32>
      %124 = vector.extract_strided_slice %99 {offsets = [2, 0], sizes = [1, 512], strides = [1, 1]} : vector<8x512xf32> to vector<1x512xf32>
      %125 = vector.shape_cast %123 : vector<16x1xi1> to vector<16x1xi1>
      %126 = vector.broadcast %125 : vector<16x1xi1> to vector<16x512xi1>
      %127 = vector.shape_cast %124 : vector<1x512xf32> to vector<1x512xf32>
      %128 = vector.broadcast %127 : vector<1x512xf32> to vector<16x512xf32>
      %129 = arith.select %126, %128, %120 : vector<16x512xi1>, vector<16x512xf32>
      %130 = vector.extract_strided_slice %101 {offsets = [0, 3], sizes = [16, 1], strides = [1, 1]} : vector<16x8xf32> to vector<16x1xf32>
      %cst_53 = arith.constant 0.000000e+00 : f32
      %131 = vector.broadcast %cst_53 : f32 to vector<16x1xf32>
      %132 = arith.cmpf ogt, %130, %131 : vector<16x1xf32>
      %133 = vector.extract_strided_slice %99 {offsets = [3, 0], sizes = [1, 512], strides = [1, 1]} : vector<8x512xf32> to vector<1x512xf32>
      %134 = vector.shape_cast %132 : vector<16x1xi1> to vector<16x1xi1>
      %135 = vector.broadcast %134 : vector<16x1xi1> to vector<16x512xi1>
      %136 = vector.shape_cast %133 : vector<1x512xf32> to vector<1x512xf32>
      %137 = vector.broadcast %136 : vector<1x512xf32> to vector<16x512xf32>
      %138 = arith.select %135, %137, %129 : vector<16x512xi1>, vector<16x512xf32>
      %139 = vector.extract_strided_slice %101 {offsets = [0, 4], sizes = [16, 1], strides = [1, 1]} : vector<16x8xf32> to vector<16x1xf32>
      %cst_54 = arith.constant 0.000000e+00 : f32
      %140 = vector.broadcast %cst_54 : f32 to vector<16x1xf32>
      %141 = arith.cmpf ogt, %139, %140 : vector<16x1xf32>
      %142 = vector.extract_strided_slice %99 {offsets = [4, 0], sizes = [1, 512], strides = [1, 1]} : vector<8x512xf32> to vector<1x512xf32>
      %143 = vector.shape_cast %141 : vector<16x1xi1> to vector<16x1xi1>
      %144 = vector.broadcast %143 : vector<16x1xi1> to vector<16x512xi1>
      %145 = vector.shape_cast %142 : vector<1x512xf32> to vector<1x512xf32>
      %146 = vector.broadcast %145 : vector<1x512xf32> to vector<16x512xf32>
      %147 = arith.select %144, %146, %138 : vector<16x512xi1>, vector<16x512xf32>
      %148 = vector.extract_strided_slice %101 {offsets = [0, 5], sizes = [16, 1], strides = [1, 1]} : vector<16x8xf32> to vector<16x1xf32>
      %cst_55 = arith.constant 0.000000e+00 : f32
      %149 = vector.broadcast %cst_55 : f32 to vector<16x1xf32>
      %150 = arith.cmpf ogt, %148, %149 : vector<16x1xf32>
      %151 = vector.extract_strided_slice %99 {offsets = [5, 0], sizes = [1, 512], strides = [1, 1]} : vector<8x512xf32> to vector<1x512xf32>
      %152 = vector.shape_cast %150 : vector<16x1xi1> to vector<16x1xi1>
      %153 = vector.broadcast %152 : vector<16x1xi1> to vector<16x512xi1>
      %154 = vector.shape_cast %151 : vector<1x512xf32> to vector<1x512xf32>
      %155 = vector.broadcast %154 : vector<1x512xf32> to vector<16x512xf32>
      %156 = arith.select %153, %155, %147 : vector<16x512xi1>, vector<16x512xf32>
      %157 = vector.extract_strided_slice %101 {offsets = [0, 6], sizes = [16, 1], strides = [1, 1]} : vector<16x8xf32> to vector<16x1xf32>
      %cst_56 = arith.constant 0.000000e+00 : f32
      %158 = vector.broadcast %cst_56 : f32 to vector<16x1xf32>
      %159 = arith.cmpf ogt, %157, %158 : vector<16x1xf32>
      %160 = vector.extract_strided_slice %99 {offsets = [6, 0], sizes = [1, 512], strides = [1, 1]} : vector<8x512xf32> to vector<1x512xf32>
      %161 = vector.shape_cast %159 : vector<16x1xi1> to vector<16x1xi1>
      %162 = vector.broadcast %161 : vector<16x1xi1> to vector<16x512xi1>
      %163 = vector.shape_cast %160 : vector<1x512xf32> to vector<1x512xf32>
      %164 = vector.broadcast %163 : vector<1x512xf32> to vector<16x512xf32>
      %165 = arith.select %162, %164, %156 : vector<16x512xi1>, vector<16x512xf32>
      %166 = vector.extract_strided_slice %101 {offsets = [0, 7], sizes = [16, 1], strides = [1, 1]} : vector<16x8xf32> to vector<16x1xf32>
      %cst_57 = arith.constant 0.000000e+00 : f32
      %167 = vector.broadcast %cst_57 : f32 to vector<16x1xf32>
      %168 = arith.cmpf ogt, %166, %167 : vector<16x1xf32>
      %169 = vector.extract_strided_slice %99 {offsets = [7, 0], sizes = [1, 512], strides = [1, 1]} : vector<8x512xf32> to vector<1x512xf32>
      %170 = vector.shape_cast %168 : vector<16x1xi1> to vector<16x1xi1>
      %171 = vector.broadcast %170 : vector<16x1xi1> to vector<16x512xi1>
      %172 = vector.shape_cast %169 : vector<1x512xf32> to vector<1x512xf32>
      %173 = vector.broadcast %172 : vector<1x512xf32> to vector<16x512xf32>
      %174 = arith.select %171, %173, %165 : vector<16x512xi1>, vector<16x512xf32>
      %c0_58 = arith.constant 0 : index
      %c0_59 = arith.constant 0 : index
      %c0_60 = arith.constant 0 : index
      %175 = vector.load %arg7[%c0_58, %c0_59, %c0_60] : memref<1x16x512xf32, #tpu.memory_space<vmem>>, vector<1x16x512xf32>
      %176 = vector.shape_cast %175 : vector<1x16x512xf32> to vector<16x512xf32>
      %177 = vector.shape_cast %174 : vector<16x512xf32> to vector<1x16x512xf32>
      tpu.vector_store %arg7[%c0_58, %c0_59, %c0_60], %177 {strides = array<i32>} : memref<1x16x512xf32, #tpu.memory_space<vmem>>, vector<1x16x512xf32>,
    } else {
    }
    return
  }
  func.func @transform_0(%arg0: i32, %arg1: i32) -> (i32, i32, i32) {
    %c0_i32 = arith.constant 0 : i32
    %c0_i32_0 = arith.constant 0 : i32
    return %arg0, %arg1, %c0_i32 : i32, i32, i32
  }
  func.func @transform_1(%arg0: i32, %arg1: i32) -> (i32, i32, i32) {
    %c0_i32 = arith.constant 0 : i32
    %c0_i32_0 = arith.constant 0 : i32
    %c0_i32_1 = arith.constant 0 : i32
    return %arg0, %c0_i32, %c0_i32_0 : i32, i32, i32
  }
  func.func @transform_2(%arg0: i32, %arg1: i32) -> (i32, i32, i32) {
    %c0_i32 = arith.constant 0 : i32
    %c0_i32_0 = arith.constant 0 : i32
    %c0_i32_1 = arith.constant 0 : i32
    return %arg0, %c0_i32, %c0_i32_0 : i32, i32, i32
  }
  func.func @transform_3(%arg0: i32, %arg1: i32) -> (i32, i32, i32) {
    %c0_i32 = arith.constant 0 : i32
    %c0_i32_0 = arith.constant 0 : i32
    return %arg0, %arg1, %c0_i32 : i32, i32, i32
  }
  func.func @transform_4(%arg0: i32, %arg1: i32) -> (i32, i32, i32) {
    %c0_i32 = arith.constant 0 : i32
    %c0_i32_0 = arith.constant 0 : i32
    %c0_i32_1 = arith.constant 0 : i32
    return %arg0, %c0_i32, %c0_i32_0 : i32, i32, i32
  }
  func.func @transform_5(%arg0: i32, %arg1: i32) -> (i32, i32, i32) {
    %c0_i32 = arith.constant 0 : i32
    %c0_i32_0 = arith.constant 0 : i32
    %c0_i32_1 = arith.constant 0 : i32
    return %arg0, %c0_i32, %c0_i32_0 : i32, i32, i32
  }
}

</mosaic_0001>

<bundles_post_ra>
// kernel: content_selection_weights.1
= control target key start
LH: loop header
LB: loop body
LE: loop exit
PB: predicated region body
PF: predicated region fallthrough
CT: control target
= control target key end

     0   :  { %s11553_s0 = inlined_call_operand.vmem [shape: bf16[2,512,128], index: 0, kind: input, shape index: {}, may-alias: {0,1}]   ;;  %s11554_s1 = inlined_call_operand.vmem [shape: bf16[2,512,128], index: 1, kind: input, shape index: {}, may-alias: {0,1}]   ;;  %s11555_s2 = inlined_call_operand.vmem [shape: f32[2,1,512], index: 2, kind: input, shape index: {}]   ;;  %s11556_s3 = inlined_call_operand.vmem [shape: f32[2,512,8], index: 3, kind: input, shape index: {}]   ;;  %s11557_s4 = inlined_call_operand.vmem [shape: f32[2,16,8], index: 4, kind: input, shape index: {}]   ;;  %s11558_s5 = inlined_call_operand.hbm [shape: f32[2,16,512], index: 5, kind: output, shape index: {}]  }
   0x1   :  { %12030 = sst [smem:[#allocation206_spill]] %s11554_s1 }
   0x2   :  { %10 = vsyncpa [#allocation4], 0 }
   0x3   :  { %12 = vsyncpa [#allocation4 + $0x1], 0  ;;  %s5563_s18 = smov 0   ;;  %s5565_s19 = smov 0  }
   0x4   :  { %s5567_s20 = smov 0   ;;  %s5569_s21 = smov 0  }
   0x5   :  { %s5571_s22 = smov 0   ;;  %s5573_s23 = smov 0  }
   0x6   :  { %s5575_s24 = smov 0   ;;  %s5577_s25 = smov 0  }
   0x7 LB: > { %12031 = sst [smem:[#allocation6_spill]] %s5491_s20  ;;  %s5078_s26 = sadd.s32 4294967295, %s5511_s25   ;;  %s5511_s25 = sphi %s5577_s25, %s18_s25   ;;  %s5507_s24 = sphi %s5575_s24, %s13173_s24   ;;  %s5503_s23 = sphi %s5573_s23, %s13172_s23   ;;  %s5499_s22 = sphi %s5571_s22, %s13171_s22   ;;  %s5495_s21 = sphi %s5569_s21, %s13170_s21   ;;  %s5491_s20 = sphi %s5567_s20, %s13169_s20   ;;  %s5487_s19 = sphi %s5565_s19, %s13175_s19   ;;  %s5483_s18 = sphi %s5563_s18, %s13174_s18  }
   0x8   : > { %12032 = sst [smem:[#allocation7_spill]] %s5503_s23  ;;  %s5079_s27 = sadd.s32 4294967294, %s5511_s25  }
   0x9   : > { %12033 = sst [smem:[#allocation8_spill]] %s5507_s24  ;;  %s27_s28 = sadd.s32 1, %s5503_s23 }
   0xa   : > { %p28_p0 = scmp.ge.s32.totalorder %s27_s28, 2  ;;  %s30_s29 = sadd.s32 1, %s5507_s24 }
   0xb   : > { %p181_p1 = scmp.ne.s32.totalorder %s5491_s20, %s5487_s19  ;;  %p182_p2 = scmp.eq.s32.totalorder %s5078_s26, 3 }
   0xc   : > { %s13177_s28 = smov (%p28_p0, %s27_s28), 0  ;;  %s13179_s29 = smov (!%p28_p0, %s30_s29), %s5507_s24 }
   0xd   : > { %12034 = sst [smem:[#allocation9_spill]] %s13177_s28  ;;  %p5612_p3 = por %p182_p2, %p181_p1 }
   0xe   : > { %p187_p4 = scmp.ne.s32.totalorder %s5487_s19, %s5483_s18  ;;  %p32_p5 = scmp.ge.s32.totalorder %s13179_s29, 2 }
   0xf   : > { %p188_p6 = scmp.eq.s32.totalorder %s5079_s27, 3  ;;  %p5082_p7 = scmp.ge.s32.totalorder %s5511_s25, 1 }
  0x10   : > { %p255_p8 = scmp.lt.s32.totalorder %s5511_s25, 5  ;;  %s13181_s29 = smov (%p32_p5, %s13179_s29), 0 }
  0x11   : > { %12036 = sst [smem:[#allocation10_spill]] %s13181_s29  ;;  %p5622_p9 = por %p188_p6, %p187_p4 }
  0x12   : > { %p256_p10 = pnand %p5082_p7, %p255_p8  ;;  %s168_s7 = ssub.s32 %s5507_s24, %s13181_s29 }
  0x13   : > { %s12037_s6 = scalar_select %p5622_p9, 1, 0 }
  0x14   : > { %s171_s8 = sadd.s32 1, %s5491_s20  ;;  %p169_p11 = scmp.eq.s32.totalorder %s168_s7, 0 }
  0x15   : > { %12038 = sst [smem:[#allocation11_spill]] %s12037_s6  ;;  %259 = sbr.rel (%p256_p10) target bundleno = 1244 (0x4dc), region = 40 }
  0x16   : > { %s5630_s9 = scalar_select %p169_p11, %s5491_s20, %s171_s8  }
  0x18   : > { %12039 = sst [smem:[#allocation12_spill]] %s5630_s9 }
  0x1c   : > { %s11561_s10 = sand.u32 1, %s5487_s19   ;;  %s5084_s11 = sshll.u32 %s5495_s21, 5 }
  0x1d   : > { %s5083_s12 = sshll.u32 %s11561_s10, 6  ;;  %p311_p12 = scmp.lt.s32.totalorder %s5499_s22, 1 }
  0x1e   : > { %p313_p13 = scmp.lt.s32.totalorder %s5084_s11, 63  ;;  %s12040_s1 = sld [smem:[#allocation206_spill]] }
  0x1f   : > { %s312_s13 = scalar_select %p311_p12, %s5499_s22, 1 }
  0x20   : > { %s13183_s11 = smov (!%p313_p13, %s5084_s11), 63  ;;  %s5663_s28 = scalar_lea.vmem [#allocation3], %s5083_s12 }
  0x21   : > { %s5085_s14 = sshll.u32 %s312_s13, 6  ;;  %s5150_s15 = sshll.u32 %s312_s13, 8 }
  0x22   : > { %s316_s16 = sadd.s32 %s5085_s14, %s13183_s11  ;;  %s5089_s8 = sshll.u32 %s312_s13, 2 }
  0x23   : > { %s5086_s7 = sshll.u32 %s316_s16, 2  ;;  %s5651_s9 = scalar_lea.vmem %s11555_s2, %s5089_s8 }
  0x24   : > { %s5641_s27 = scalar_lea.vmem %s12040_s1, %s5150_s15  ;;  %s5646_s24 = scalar_lea.vmem %s11553_s0, %s5086_s7 }
  0x25   : > { %s5092_s20 = sshll.u32 %s316_s16, 3  ;;  %s5151_s6 = sshll.u32 %s312_s13, 4 }
  0x26   : > { %s5656_s17 = scalar_lea.vmem %s11556_s3, %s5092_s20  ;;  %s5661_s1 = scalar_lea.vmem %s11557_s4, %s5151_s6 }
  0x27   : > { %p5095_p0 = scmp.ne.s32.totalorder %s5495_s21, 0 }
  0x28   : > { %v5513_v0 = vmov (!%p5095_p0), -1e+09  }
  0x29   : > { %348 = sbr.rel (%p5095_p0) target bundleno = 48 (0x30), region = 44  ;;  %349 = vst [vmem:[#allocation2] sm:$0xff] (!%p5095_p0), %v5513_v0  ;;  %350 = vst [vmem:[#allocation2 + $0x8] sm:$0xff] (!%p5095_p0), %v5513_v0 }
  0x2a   : > { %351 = vst [vmem:[#allocation2 + $0x10] sm:$0xff] (!%p5095_p0), %v5513_v0  ;;  %352 = vst [vmem:[#allocation2 + $0x18] sm:$0xff] (!%p5095_p0), %v5513_v0 }
  0x30 PF: > { %v451_v1 = vld [vmem:[%s5656_s17 + $0x10] sm:$0xff]  ;;  %v449_v2 = vld [vmem:[%s5656_s17] sm:$0xff]  ;;  %v5514_v3 = vmov 0   ;;  %v452_v10 = vld [vmem:[%s5656_s17 + $0x18] sm:$0xff]  ;;  %p5144_p1 = scmp.ne.s32.totalorder %s5495_s21, 1 }
  0x31   : > { %5340 = vset.pattern.permute.xlu1 %v5514_v3  ;;  %5339 = vset.pattern.permute.xlu0 %v5514_v3  ;;  %vm1285_vm0 = vcmp.gt.f32.partialorder %v451_v1, 0.0  ;;  %vm1283_vm1 = vcmp.gt.f32.partialorder %v449_v2, 0.0  ;;  %v5356_v4 = vld [vmem:[%s5641_s27 + $0x40] sm:$0xff]   ;;  %v450_v11 = vld [vmem:[%s5656_s17 + $0x8] sm:$0xff]  ;;  %vm1286_vm2 = vcmp.gt.f32.partialorder %v452_v10, 0.0  ;;  %v456_v22 = vld [vmem:[%s5656_s17 + $0x38] sm:$0xff] }
  0x32   : > { %v5357_v5 = vld [vmem:[%s5641_s27 + $0xc0] sm:$0xff]   ;;  %v5673_v6 = vsel %vm1285_vm0, 1, %v5514_v3  ;;  %v5676_v7 = vsel %vm1283_vm1, 1, %v5514_v3  ;;  %5153 = vmatprep.subr.bf16.mxu0 %v5356_v4  ;;  %v454_v12 = vld [vmem:[%s5656_s17 + $0x28] sm:$0xff]  ;;  %vm1284_vm3 = vcmp.gt.f32.partialorder %v450_v11, 0.0  ;;  %v5687_v14 = vsel %vm1286_vm2, 1, %v5514_v3 }
  0x33   : > { %12041 = vst [vmem:[#allocation13_spill] sm:$0xff] %v5673_v6  ;;  %12042 = vst [vmem:[#allocation14_spill] sm:$0xff] %v5676_v7  ;;  %1354 = vperm.xlu1 %5340, %v5673_v6   ;;  %1348 = vperm.xlu0 %5339, %v5676_v7   ;;  %v5358_v8 = vld [vmem:[%s5641_s27] sm:$0xff]   ;;  %vm1288_vm4 = vcmp.gt.f32.partialorder %v454_v12, 0.0  ;;  %v5690_v15 = vsel %vm1284_vm3, 1, %v5514_v3  ;;  %v5360_v17 = vld [vmem:[%s5641_s27 + $0x48] sm:$0xff]  }
  0x34   : > { %5201 = vmatprep.subr.bf16.mxu1 %v5357_v5  ;;  %v5359_v9 = vld [vmem:[%s5641_s27 + $0x80] sm:$0xff]   ;;  %5154 = vmatpush3.bf16.xpose.msra.mxu0 %v5358_v8  ;;  %12043 = vst [vmem:[#allocation15_spill] sm:$0xff] %v5687_v14  ;;  %12044 = vst [vmem:[#allocation16_spill] sm:$0xff] %v5690_v15  ;;  %v5695_v16 = vsel %vm1288_vm4, 1, %v5514_v3  ;;  %v5361_v19 = vld [vmem:[%s5641_s27 + $0xc8] sm:$0xff]   ;;  %vm1290_vm6 = vcmp.gt.f32.partialorder %v456_v22, 0.0 }
  0x35   : > { %5202 = vmatpush3.bf16.xpose.msra.mxu1 %v5359_v9  ;;  %v453_v13 = vld [vmem:[%s5656_s17 + $0x20] sm:$0xff]  ;;  %12045 = vst [vmem:[#allocation17_spill] sm:$0xff] %v5695_v16  ;;  %5155 = vmatprep.subr.bf16.mxu0 %v5360_v17  ;;  %v5362_v20 = vld [vmem:[%s5641_s27 + $0x8] sm:$0xff]   ;;  %v455_v23 = vld [vmem:[%s5656_s17 + $0x30] sm:$0xff]  ;;  %v5711_v26 = vsel %vm1290_vm6, 1, %v5514_v3 }
  0x36   : > { %vm1287_vm5 = vcmp.gt.f32.partialorder %v453_v13, 0.0  ;;  %5203 = vmatprep.subr.bf16.mxu1 %v5361_v19  ;;  %v5363_v21 = vld [vmem:[%s5641_s27 + $0x88] sm:$0xff]   ;;  %vm1289_vm7 = vcmp.gt.f32.partialorder %v455_v23, 0.0  ;;  %v457_v25 = vld [vmem:[%s5656_s17 + $0x40] sm:$0xff]  ;;  %12047 = vst [vmem:[#allocation19_spill] sm:$0xff] %v5711_v26  ;;  %v5364_v28 = vld [vmem:[%s5641_s27 + $0x50] sm:$0xff]  }
  0x37   : > { %1357 = vperm.xlu1 %5340, %v5687_v14   ;;  %1351 = vperm.xlu0 %5339, %v5690_v15   ;;  %v5699_v18 = vsel %vm1287_vm5, 1, %v5514_v3  ;;  %v458_v24 = vld [vmem:[%s5656_s17 + $0x48] sm:$0xff]  ;;  %v5714_v27 = vsel %vm1289_vm7, 1, %v5514_v3  ;;  %vm1291_vm9 = vcmp.gt.f32.partialorder %v457_v25, 0.0  ;;  %v5365_v29 = vld [vmem:[%s5641_s27 + $0xd0] sm:$0xff]   ;;  %v460_v33 = vld [vmem:[%s5656_s17 + $0x58] sm:$0xff] }
  0x38   : > { %12046 = vst [vmem:[#allocation18_spill] sm:$0xff] %v5699_v18  ;;  %12048 = vst [vmem:[#allocation20_spill] sm:$0xff] %v5714_v27  ;;  %vm1292_vm8 = vcmp.gt.f32.partialorder %v458_v24, 0.0  ;;  %v5724_v31 = vsel %vm1291_vm9, 1, %v5514_v3  ;;  %v5366_v32 = vld [vmem:[%s5641_s27 + $0x10] sm:$0xff]   ;;  %vm1294_vm10 = vcmp.gt.f32.partialorder %v460_v33, 0.0 }
  0x39   : > { %v5721_v30 = vsel %vm1292_vm8, 1, %v5514_v3  ;;  %12050 = vst [vmem:[#allocation22_spill] sm:$0xff] %v5724_v31  ;;  %v459_v34 = vld [vmem:[%s5656_s17 + $0x50] sm:$0xff]  ;;  %v462_v36 = vld [vmem:[%s5656_s17 + $0x68] sm:$0xff]  ;;  %v461_v37 = vld [vmem:[%s5656_s17 + $0x60] sm:$0xff]  ;;  %v5735_v38 = vsel %vm1294_vm10, 1, %v5514_v3 }
  0x3a   : > { %12049 = vst [vmem:[#allocation21_spill] sm:$0xff] %v5721_v30  ;;  %v5367_v35 = vld [vmem:[%s5641_s27 + $0x90] sm:$0xff]   ;;  %vm1293_vm11 = vcmp.gt.f32.partialorder %v459_v34, 0.0  ;;  %12051 = vst [vmem:[#allocation23_spill] sm:$0xff] %v5735_v38  ;;  %v5368_v40 = vld [vmem:[%s5641_s27 + $0x58] sm:$0xff]   ;;  %vm1296_vm12 = vcmp.gt.f32.partialorder %v462_v36, 0.0 }
  0x3b   : > { %1363 = vperm.xlu1 %5340, %v5695_v16   ;;  %1360 = vperm.xlu0 %5339, %v5699_v18   ;;  %v5738_v39 = vsel %vm1293_vm11, 1, %v5514_v3  ;;  %v5369_v41 = vld [vmem:[%s5641_s27 + $0xd8] sm:$0xff]   ;;  %vm1295_vm13 = vcmp.gt.f32.partialorder %v461_v37, 0.0  ;;  %v463_v43 = vld [vmem:[%s5656_s17 + $0x70] sm:$0xff]  ;;  %v5749_v46 = vsel %vm1296_vm12, 1, %v5514_v3  ;;  %v466_v48 = vld [vmem:[%s5656_s17 + $0x88] sm:$0xff] }
  0x3c   : > { %5156 = vmatpush3.bf16.xpose.msra.mxu0 %v5362_v20  ;;  %12052 = vst [vmem:[#allocation24_spill] sm:$0xff] %v5738_v39  ;;  %v464_v42 = vld [vmem:[%s5656_s17 + $0x78] sm:$0xff]  ;;  %12053 = vst [vmem:[#allocation25_spill] sm:$0xff] %v5749_v46  ;;  %v5752_v47 = vsel %vm1295_vm13, 1, %v5514_v3  ;;  %v465_v49 = vld [vmem:[%s5656_s17 + $0x80] sm:$0xff]  ;;  %vm1297_vm15 = vcmp.gt.f32.partialorder %v463_v43, 0.0 }
  0x3d   : > { %5204 = vmatpush3.bf16.xpose.msra.mxu1 %v5363_v21  ;;  %5157 = vmatprep.subr.bf16.mxu0 %v5364_v28  ;;  %v5370_v44 = vld [vmem:[%s5641_s27 + $0x18] sm:$0xff]   ;;  %12054 = vst [vmem:[#allocation26_spill] sm:$0xff] %v5752_v47  ;;  %vm1298_vm14 = vcmp.gt.f32.partialorder %v464_v42, 0.0  ;;  %v5372_v50 = vld [vmem:[%s5641_s27 + $0x60] sm:$0xff]   ;;  %vm1300_vm0 = vcmp.gt.f32.partialorder %v466_v48, 0.0  ;;  %v5764_v53 = vsel %vm1297_vm15, 1, %v5514_v3 }
  0x3e   : > { %5205 = vmatprep.subr.bf16.mxu1 %v5365_v29  ;;  %v5371_v45 = vld [vmem:[%s5641_s27 + $0x98] sm:$0xff]   ;;  %v5373_v51 = vld [vmem:[%s5641_s27 + $0xe0] sm:$0xff]   ;;  %v5761_v52 = vsel %vm1298_vm14, 1, %v5514_v3  ;;  %12056 = vst [vmem:[#allocation28_spill] sm:$0xff] %v5764_v53  ;;  %vm1299_vm1 = vcmp.gt.f32.partialorder %v465_v49, 0.0  ;;  %v5768_v55 = vsel %vm1300_vm0, 1, %v5514_v3 }
  0x3f   : > { %1369 = vperm.xlu1 %5340, %v5711_v26   ;;  %1366 = vperm.xlu0 %5339, %v5714_v27   ;;  %12055 = vst [vmem:[#allocation27_spill] sm:$0xff] %v5761_v52  ;;  %v468_v54 = vld [vmem:[%s5656_s17 + $0x98] sm:$0xff]  ;;  %12057 = vst [vmem:[#allocation29_spill] sm:$0xff] %v5768_v55  ;;  %v467_v56 = vld [vmem:[%s5656_s17 + $0x90] sm:$0xff]  ;;  %v5774_v57 = vsel %vm1299_vm1, 1, %v5514_v3 }
  0x40   : > { %12058 = vst [vmem:[#allocation30_spill] sm:$0xff] %v5774_v57  ;;  %v5374_v58 = vld [vmem:[%s5641_s27 + $0x20] sm:$0xff]   ;;  %vm1302_vm2 = vcmp.gt.f32.partialorder %v468_v54, 0.0  ;;  %vm1301_vm3 = vcmp.gt.f32.partialorder %v467_v56, 0.0  ;;  %v5376_v60 = vld [vmem:[%s5641_s27 + $0x68] sm:$0xff]   ;;  %v472_v2 = vld [vmem:[%s5656_s17 + $0xb8] sm:$0xff] }
  0x41   : > { %v5375_v59 = vld [vmem:[%s5641_s27 + $0xa0] sm:$0xff]   ;;  %v470_v61 = vld [vmem:[%s5656_s17 + $0xa8] sm:$0xff]  ;;  %v5785_v0 = vsel %vm1302_vm2, 1, %v5514_v3  ;;  %v5788_v1 = vsel %vm1301_vm3, 1, %v5514_v3  ;;  %v471_v4 = vld [vmem:[%s5656_s17 + $0xb0] sm:$0xff]  ;;  %vm1306_vm6 = vcmp.gt.f32.partialorder %v472_v2, 0.0 }
  0x42   : > { %v469_v62 = vld [vmem:[%s5656_s17 + $0xa0] sm:$0xff]  ;;  %v5377_v63 = vld [vmem:[%s5641_s27 + $0xe8] sm:$0xff]   ;;  %12059 = vst [vmem:[#allocation31_spill] sm:$0xff] %v5785_v0  ;;  %12060 = vst [vmem:[#allocation32_spill] sm:$0xff] %v5788_v1  ;;  %vm1304_vm4 = vcmp.gt.f32.partialorder %v470_v61, 0.0  ;;  %vm1305_vm7 = vcmp.gt.f32.partialorder %v471_v4, 0.0 }
  0x43   : > { %1375 = vperm.xlu1 %5340, %v5721_v30   ;;  %1372 = vperm.xlu0 %5339, %v5724_v31   ;;  %vm1303_vm5 = vcmp.gt.f32.partialorder %v469_v62, 0.0  ;;  %v5795_v5 = vsel %vm1304_vm4, 1, %v5514_v3  ;;  %v5378_v9 = vld [vmem:[%s5641_s27 + $0x28] sm:$0xff]   ;;  %v473_v11 = vld [vmem:[%s5656_s17 + $0xc0] sm:$0xff]  ;;  %v5380_v13 = vld [vmem:[%s5641_s27 + $0x70] sm:$0xff]   ;;  %v5806_v17 = vsel %vm1306_vm6, 1, %v5514_v3 }
  0x44   : > { %5158 = vmatpush3.bf16.xpose.msra.mxu0 %v5366_v32  ;;  %12061 = vst [vmem:[#allocation33_spill] sm:$0xff] %v5795_v5  ;;  %v5798_v8 = vsel %vm1303_vm5, 1, %v5514_v3  ;;  %v474_v10 = vld [vmem:[%s5656_s17 + $0xc8] sm:$0xff]  ;;  %12063 = vst [vmem:[#allocation35_spill] sm:$0xff] %v5806_v17  ;;  %v5381_v19 = vld [vmem:[%s5641_s27 + $0xf0] sm:$0xff]   ;;  %v5812_v20 = vsel %vm1305_vm7, 1, %v5514_v3 }
  0x45   : > { %5206 = vmatpush3.bf16.xpose.msra.mxu1 %v5367_v35  ;;  %5159 = vmatprep.subr.bf16.mxu0 %v5368_v40  ;;  %12062 = vst [vmem:[#allocation34_spill] sm:$0xff] %v5798_v8  ;;  %v5379_v12 = vld [vmem:[%s5641_s27 + $0xa8] sm:$0xff]   ;;  %12064 = vst [vmem:[#allocation36_spill] sm:$0xff] %v5812_v20  ;;  %vm1308_vm8 = vcmp.gt.f32.partialorder %v474_v10, 0.0  ;;  %vm1307_vm9 = vcmp.gt.f32.partialorder %v473_v11, 0.0  ;;  %v476_v21 = vld [vmem:[%s5656_s17 + $0xd8] sm:$0xff] }
  0x46   : > { %5207 = vmatprep.subr.bf16.mxu1 %v5369_v41  ;;  %v475_v22 = vld [vmem:[%s5656_s17 + $0xd0] sm:$0xff]  ;;  %v5817_v23 = vsel %vm1308_vm8, 1, %v5514_v3  ;;  %v5823_v25 = vsel %vm1307_vm9, 1, %v5514_v3  ;;  %v478_v29 = vld [vmem:[%s5656_s17 + $0xe8] sm:$0xff]  ;;  %vm1310_vm10 = vcmp.gt.f32.partialorder %v476_v21, 0.0  ;;  %v477_v32 = vld [vmem:[%s5656_s17 + $0xe0] sm:$0xff] }
  0x47   : > { %1381 = vperm.xlu1 %5340, %v5735_v38   ;;  %1378 = vperm.xlu0 %5339, %v5738_v39   ;;  %12065 = vst [vmem:[#allocation37_spill] sm:$0xff] %v5817_v23  ;;  %v5382_v24 = vld [vmem:[%s5641_s27 + $0x30] sm:$0xff]   ;;  %12066 = vst [vmem:[#allocation38_spill] sm:$0xff] %v5823_v25  ;;  %vm1309_vm11 = vcmp.gt.f32.partialorder %v475_v22, 0.0  ;;  %v5384_v33 = vld [vmem:[%s5641_s27 + $0x78] sm:$0xff]   ;;  %v5834_v36 = vsel %vm1310_vm10, 1, %v5514_v3 }
  0x48   : > { %v5383_v28 = vld [vmem:[%s5641_s27 + $0xb0] sm:$0xff]   ;;  %v5388_v34 = vld [vmem:[%s5646_s24] sm:$0xff]   ;;  %v5385_v35 = vld [vmem:[%s5641_s27 + $0xf8] sm:$0xff]   ;;  %12067 = vst [vmem:[#allocation39_spill] sm:$0xff] %v5834_v36  ;;  %v5837_v37 = vsel %vm1309_vm11, 1, %v5514_v3  ;;  %vm1312_vm12 = vcmp.gt.f32.partialorder %v478_v29, 0.0 }
  0x49   : > { %5169 = vmatprep.mubr.bf16.mxu0 %v5388_v34  ;;  %5217 = vmatprep.mubr.bf16.mxu1 %v5388_v34  ;;  %12068 = vst [vmem:[#allocation40_spill] sm:$0xff] %v5837_v37  ;;  %vm1311_vm13 = vcmp.gt.f32.partialorder %v477_v32, 0.0  ;;  %v480_v40 = vld [vmem:[%s5656_s17 + $0xf8] sm:$0xff]  ;;  %v479_v41 = vld [vmem:[%s5656_s17 + $0xf0] sm:$0xff]  ;;  %v5844_v42 = vsel %vm1312_vm12, 1, %v5514_v3  ;;  %v5392_v56 = vld [vmem:[%s5646_s24 + $0x20] sm:$0xff]  }
  0x4a   : > { %12069 = vst [vmem:[#allocation41_spill] sm:$0xff] %v5844_v42  ;;  %v5386_v43 = vld [vmem:[%s5641_s27 + $0x38] sm:$0xff]   ;;  %vm1314_vm14 = vcmp.gt.f32.partialorder %v480_v40, 0.0  ;;  %vm1313_vm15 = vcmp.gt.f32.partialorder %v479_v41, 0.0  ;;  %v5396_v61 = vld [vmem:[%s5646_s24 + $0x40] sm:$0xff]   ;;  %v5397_v2 = vld [vmem:[%s5646_s24 + $0x48] sm:$0xff]  }
  0x4b   : > { %1387 = vperm.xlu1 %5340, %v5749_v46   ;;  %1384 = vperm.xlu0 %5339, %v5752_v47   ;;  %v5854_v48 = vsel %vm1314_vm14, 1, %v5514_v3  ;;  %v5857_v49 = vsel %vm1313_vm15, 1, %v5514_v3  ;;  %v5391_v54 = vld [vmem:[%s5646_s24 + $0x18] sm:$0xff]   ;;  %v5516_v4 = vmov 2   ;;  %v5398_v11 = vld [vmem:[%s5646_s24 + $0x50] sm:$0xff]  }
  0x4c   : > { %5160 = vmatpush3.bf16.xpose.msra.mxu0 %v5370_v44  ;;  %v5848_v44 = vsel %vm1311_vm13, 1, %v5514_v3  ;;  %12071 = vst [vmem:[#allocation43_spill] sm:$0xff] %v5854_v48  ;;  %12072 = vst [vmem:[#allocation44_spill] sm:$0xff] %v5857_v49  ;;  %v5390_v3 = vld [vmem:[%s5646_s24 + $0x10] sm:$0xff]   ;;  %v5399_v22 = vld [vmem:[%s5646_s24 + $0x58] sm:$0xff]  }
  0x4d   : > { %5208 = vmatpush3.bf16.xpose.msra.mxu1 %v5371_v45  ;;  %5161 = vmatprep.subr.bf16.mxu0 %v5372_v50  ;;  %12070 = vst [vmem:[#allocation42_spill] sm:$0xff] %v5848_v44  ;;  %v5387_v45 = vld [vmem:[%s5641_s27 + $0xb8] sm:$0xff]   ;;  %v5389_v50 = vld [vmem:[%s5646_s24 + $0x8] sm:$0xff]  }
  0x4e   : > { %5209 = vmatprep.subr.bf16.mxu1 %v5373_v51  ;;  %v5515_v51 = vmov 1  }
  0x4f   : > { %1393 = vperm.xlu1 %5340, %v5761_v52   ;;  %1390 = vperm.xlu0 %5339, %v5764_v53  }
  0x53   : > { %1399 = vperm.xlu1 %5340, %v5768_v55   ;;  %1396 = vperm.xlu0 %5339, %v5774_v57  }
  0x54   : > { %5162 = vmatpush3.bf16.xpose.msra.mxu0 %v5374_v58  ;;  %v5393_v58 = vld [vmem:[%s5646_s24 + $0x28] sm:$0xff]  }
  0x55   : > { %5210 = vmatpush3.bf16.xpose.msra.mxu1 %v5375_v59  ;;  %5163 = vmatprep.subr.bf16.mxu0 %v5376_v60  ;;  %v5394_v59 = vld [vmem:[%s5646_s24 + $0x30] sm:$0xff]   ;;  %v5395_v60 = vld [vmem:[%s5646_s24 + $0x38] sm:$0xff]  }
  0x56   : > { %5211 = vmatprep.subr.bf16.mxu1 %v5377_v63 }
  0x57   : > { %1405 = vperm.xlu1 %5340, %v5785_v0   ;;  %1402 = vperm.xlu0 %5339, %v5788_v1  }
  0x5b   : > { %1411 = vperm.xlu1 %5340, %v5795_v5   ;;  %1408 = vperm.xlu0 %5339, %v5798_v8  }
  0x5c   : > { %5164 = vmatpush3.bf16.xpose.msra.mxu0 %v5378_v9 }
  0x5d   : > { %5212 = vmatpush3.bf16.xpose.msra.mxu1 %v5379_v12  ;;  %5165 = vmatprep.subr.bf16.mxu0 %v5380_v13 }
  0x5e   : > { %5213 = vmatprep.subr.bf16.mxu1 %v5381_v19 }
  0x5f   : > { %1417 = vperm.xlu1 %5340, %v5806_v17   ;;  %1414 = vperm.xlu0 %5339, %v5812_v20  }
  0x63   : > { %1423 = vperm.xlu1 %5340, %v5817_v23   ;;  %1420 = vperm.xlu0 %5339, %v5823_v25  }
  0x64   : > { %5166 = vmatpush3.bf16.xpose.msra.mxu0 %v5382_v24 }
  0x65   : > { %5214 = vmatpush3.bf16.xpose.msra.mxu1 %v5383_v28  ;;  %5167 = vmatprep.subr.bf16.mxu0 %v5384_v33  ;;  %v5400_v33 = vld [vmem:[%s5646_s24 + $0x60] sm:$0xff]  }
  0x66   : > { %5215 = vmatprep.subr.bf16.mxu1 %v5385_v35 }
  0x67   : > { %1429 = vperm.xlu1 %5340, %v5834_v36   ;;  %1426 = vperm.xlu0 %5339, %v5837_v37  }
  0x6b   : > { %1435 = vperm.xlu1 %5340, %v5844_v42   ;;  %1432 = vperm.xlu0 %5339, %v5848_v44  }
  0x6c   : > { %5168 = vmatpush3.bf16.xpose.msra.mxu0 %v5386_v43  ;;  %v5401_v43 = vld [vmem:[%s5646_s24 + $0x68] sm:$0xff]  }
  0x6d   : > { %5216 = vmatpush3.bf16.xpose.msra.mxu1 %v5387_v45 }
  0x6f   : > { %1441 = vperm.xlu1 %5340, %v5854_v48   ;;  %1438 = vperm.xlu0 %5339, %v5857_v49  }
  0x73   : > { %5342 = vset.pattern.permute.xlu1 %v5515_v51  ;;  %5341 = vset.pattern.permute.xlu0 %v5515_v51 }
  0x74   : > { %5170 = vmatmul.mubr.bf16.vlgmr.msra.gmra.mrb[0].mxu0 %v5388_v34  ;;  %5218 = vmatmul.mubr.bf16.vlgmr.msra.gmra.mrb[0].mxu1 %v5388_v34 }
  0x75   : > { %1755 = vperm.xlu1 %5342, %v5690_v15   ;;  %1752 = vperm.xlu0 %5341, %v5676_v7  }
  0x76   : > { %5171 = vmatprep.mubr.bf16.mxu0 %v5389_v50  ;;  %5219 = vmatprep.mubr.bf16.mxu1 %v5389_v50 }
  0x79   : > { %1758 = vperm.xlu1 %5342, %v5673_v6   ;;  %1761 = vperm.xlu0 %5341, %v5687_v14  }
  0x7c   : > { %5172 = vmatmul.mubr.bf16.gmra.mrb[4].mxu0 %v5389_v50  ;;  %5220 = vmatmul.mubr.bf16.gmra.mrb[4].mxu1 %v5389_v50 }
  0x7d   : > { %1764 = vperm.xlu1 %5342, %v5699_v18   ;;  %1767 = vperm.xlu0 %5341, %v5695_v16  }
  0x7e   : > { %5173 = vmatprep.mubr.bf16.mxu0 %v5390_v3  ;;  %5221 = vmatprep.mubr.bf16.mxu1 %v5390_v3 }
  0x81   : > { %1770 = vperm.xlu1 %5342, %v5714_v27   ;;  %1773 = vperm.xlu0 %5341, %v5711_v26  }
  0x84   : > { %5174 = vmatmul.mubr.bf16.gmra.mrb[8].mxu0 %v5390_v3  ;;  %5222 = vmatmul.mubr.bf16.gmra.mrb[8].mxu1 %v5390_v3 }
  0x85   : > { %1776 = vperm.xlu1 %5342, %v5724_v31   ;;  %1779 = vperm.xlu0 %5341, %v5721_v30  }
  0x86   : > { %5175 = vmatprep.mubr.bf16.mxu0 %v5391_v54  ;;  %5223 = vmatprep.mubr.bf16.mxu1 %v5391_v54 }
  0x89   : > { %1782 = vperm.xlu1 %5342, %v5738_v39   ;;  %1785 = vperm.xlu0 %5341, %v5735_v38  }
  0x8c   : > { %5176 = vmatmul.mubr.bf16.gmra.mrb[12].mxu0 %v5391_v54  ;;  %5224 = vmatmul.mubr.bf16.gmra.mrb[12].mxu1 %v5391_v54  ;;  %v5402_v54 = vld [vmem:[%s5646_s24 + $0x70] sm:$0xff]  }
  0x8d   : > { %1788 = vperm.xlu1 %5342, %v5752_v47   ;;  %1791 = vperm.xlu0 %5341, %v5749_v46  }
  0x8e   : > { %5177 = vmatprep.mubr.bf16.mxu0 %v5392_v56  ;;  %5225 = vmatprep.mubr.bf16.mxu1 %v5392_v56 }
  0x91   : > { %1794 = vperm.xlu1 %5342, %v5764_v53   ;;  %1797 = vperm.xlu0 %5341, %v5761_v52  }
  0x94   : > { %5178 = vmatmul.mubr.bf16.gmra.mrb[16].mxu0 %v5392_v56  ;;  %5226 = vmatmul.mubr.bf16.gmra.mrb[16].mxu1 %v5392_v56 }
  0x95   : > { %1800 = vperm.xlu1 %5342, %v5774_v57   ;;  %1803 = vperm.xlu0 %5341, %v5768_v55  }
  0x96   : > { %5179 = vmatprep.mubr.bf16.mxu0 %v5393_v58  ;;  %5227 = vmatprep.mubr.bf16.mxu1 %v5393_v58 }
  0x99   : > { %1806 = vperm.xlu1 %5342, %v5788_v1   ;;  %1809 = vperm.xlu0 %5341, %v5785_v0  }
  0x9c   : > { %5180 = vmatmul.mubr.bf16.gmra.mrb[20].mxu0 %v5393_v58  ;;  %5228 = vmatmul.mubr.bf16.gmra.mrb[20].mxu1 %v5393_v58 }
  0x9d   : > { %1812 = vperm.xlu1 %5342, %v5798_v8   ;;  %1815 = vperm.xlu0 %5341, %v5795_v5  }
  0x9e   : > { %5181 = vmatprep.mubr.bf16.mxu0 %v5394_v59  ;;  %5229 = vmatprep.mubr.bf16.mxu1 %v5394_v59 }
  0xa1   : > { %1818 = vperm.xlu1 %5342, %v5812_v20   ;;  %1821 = vperm.xlu0 %5341, %v5806_v17  }
  0xa4   : > { %5182 = vmatmul.mubr.bf16.gmra.mrb[24].mxu0 %v5394_v59  ;;  %5230 = vmatmul.mubr.bf16.gmra.mrb[24].mxu1 %v5394_v59 }
  0xa5   : > { %1824 = vperm.xlu1 %5342, %v5823_v25   ;;  %1827 = vperm.xlu0 %5341, %v5817_v23  }
  0xa6   : > { %5183 = vmatprep.mubr.bf16.mxu0 %v5395_v60  ;;  %5231 = vmatprep.mubr.bf16.mxu1 %v5395_v60 }
  0xa9   : > { %1830 = vperm.xlu1 %5342, %v5837_v37   ;;  %1833 = vperm.xlu0 %5341, %v5834_v36  }
  0xac   : > { %5184 = vmatmul.mubr.bf16.gmra.mrb[28].mxu0 %v5395_v60  ;;  %5232 = vmatmul.mubr.bf16.gmra.mrb[28].mxu1 %v5395_v60 }
  0xad   : > { %1836 = vperm.xlu1 %5342, %v5848_v44   ;;  %1839 = vperm.xlu0 %5341, %v5844_v42  }
  0xae   : > { %5185 = vmatprep.mubr.bf16.mxu0 %v5396_v61  ;;  %5233 = vmatprep.mubr.bf16.mxu1 %v5396_v61 }
  0xb1   : > { %1842 = vperm.xlu1 %5342, %v5857_v49   ;;  %1845 = vperm.xlu0 %5341, %v5854_v48  }
  0xb2   : > { %v5901_v62 = vpop.permute.xlu1 %1354  ;;  %v5903_v63 = vpop.permute.xlu0 %1348 }
  0xb3   : > { %vm1443_vm0 = vcmp.eq.s32.totalorder %v5903_v63, 1  ;;  %vm1445_vm6 = vcmp.eq.s32.totalorder %v5901_v62, 1 }
  0xb4   : > { %5186 = vmatmul.mubr.bf16.gmra.mrb[32].mxu0 %v5396_v61  ;;  %5234 = vmatmul.mubr.bf16.gmra.mrb[32].mxu1 %v5396_v61  ;;  %v5403_v61 = vld [vmem:[%s5646_s24 + $0x78] sm:$0xff]  }
  0xb5   : > { %5343 = vset.pattern.permute.xlu1 %v5516_v4  ;;  %5344 = vset.pattern.permute.xlu0 %v5516_v4 }
  0xb6   : > { %2156 = vperm.xlu1 %5343, %v5676_v7   ;;  %2159 = vperm.xlu0 %5344, %v5690_v15   ;;  %v5908_v9 = vpop.permute.xlu1 %1357  ;;  %v5910_v10 = vpop.permute.xlu0 %1351 }
  0xb7   : > { %5187 = vmatprep.mubr.bf16.mxu0 %v5397_v2  ;;  %5235 = vmatprep.mubr.bf16.mxu1 %v5397_v2  ;;  %vm1444_vm1 = vcmp.eq.s32.totalorder %v5910_v10, 1  ;;  %vm1446_vm8 = vcmp.eq.s32.totalorder %v5908_v9, 1 }
  0xba   : > { %2162 = vperm.xlu1 %5343, %v5673_v6   ;;  %2168 = vperm.xlu0 %5344, %v5699_v18   ;;  %v5915_v12 = vpop.permute.xlu1 %1363  ;;  %v5917_v13 = vpop.permute.xlu0 %1360 }
  0xbb   : > { %vm1447_vm12 = vcmp.eq.s32.totalorder %v5917_v13, 1  ;;  %vm1448_vm14 = vcmp.eq.s32.totalorder %v5915_v12, 1 }
  0xbc   : > { %5188 = vmatmul.mubr.bf16.gmra.mrb[36].mxu0 %v5397_v2  ;;  %5236 = vmatmul.mubr.bf16.gmra.mrb[36].mxu1 %v5397_v2 }
  0xbd   : > { %5189 = vmatprep.mubr.bf16.mxu0 %v5398_v11  ;;  %5237 = vmatprep.mubr.bf16.mxu1 %v5398_v11 }
  0xbe   : > { %2165 = vperm.xlu1 %5343, %v5687_v14   ;;  %2174 = vperm.xlu0 %5344, %v5714_v27   ;;  %v5921_v19 = vpop.permute.xlu1 %1369  ;;  %v5923_v21 = vpop.permute.xlu0 %1366 }
  0xc2   : > { %2171 = vperm.xlu1 %5343, %v5695_v16   ;;  %2180 = vperm.xlu0 %5344, %v5724_v31   ;;  %v5928_v24 = vpop.permute.xlu1 %1375  ;;  %v5930_v28 = vpop.permute.xlu0 %1372 }
  0xc3   : > { %12073 = vst [vmem:[#allocation45_spill] sm:$0xff] %v5928_v24  ;;  %12074 = vst [vmem:[#allocation46_spill] sm:$0xff] %v5930_v28 }
  0xc4   : > { %5190 = vmatmul.mubr.bf16.gmra.mrb[40].mxu0 %v5398_v11  ;;  %5238 = vmatmul.mubr.bf16.gmra.mrb[40].mxu1 %v5398_v11 }
  0xc5   : > { %5191 = vmatprep.mubr.bf16.mxu0 %v5399_v22  ;;  %5239 = vmatprep.mubr.bf16.mxu1 %v5399_v22 }
  0xc6   : > { %2177 = vperm.xlu1 %5343, %v5711_v26   ;;  %2186 = vperm.xlu0 %5344, %v5738_v39   ;;  %v5934_v29 = vpop.permute.xlu1 %1381  ;;  %v5936_v32 = vpop.permute.xlu0 %1378 }
  0xc7   : > { %12075 = vst [vmem:[#allocation47_spill] sm:$0xff] %v5934_v29  ;;  %12076 = vst [vmem:[#allocation48_spill] sm:$0xff] %v5936_v32 }
  0xca   : > { %2183 = vperm.xlu1 %5343, %v5721_v30   ;;  %2192 = vperm.xlu0 %5344, %v5752_v47   ;;  %v5941_v34 = vpop.permute.xlu1 %1387  ;;  %v5943_v35 = vpop.permute.xlu0 %1384 }
  0xcb   : > { %12077 = vst [vmem:[#allocation49_spill] sm:$0xff] %v5941_v34  ;;  %12078 = vst [vmem:[#allocation50_spill] sm:$0xff] %v5943_v35 }
  0xcc   : > { %5192 = vmatmul.mubr.bf16.gmra.mrb[44].mxu0 %v5399_v22  ;;  %5240 = vmatmul.mubr.bf16.gmra.mrb[44].mxu1 %v5399_v22 }
  0xcd   : > { %5193 = vmatprep.mubr.bf16.mxu0 %v5400_v33  ;;  %5241 = vmatprep.mubr.bf16.mxu1 %v5400_v33 }
  0xce   : > { %2189 = vperm.xlu1 %5343, %v5735_v38   ;;  %2198 = vperm.xlu0 %5344, %v5764_v53   ;;  %v5947_v40 = vpop.permute.xlu1 %1393  ;;  %v5949_v41 = vpop.permute.xlu0 %1390 }
  0xcf   : > { %12079 = vst [vmem:[#allocation51_spill] sm:$0xff] %v5947_v40  ;;  %12080 = vst [vmem:[#allocation52_spill] sm:$0xff] %v5949_v41 }
  0xd2   : > { %2195 = vperm.xlu1 %5343, %v5749_v46   ;;  %2204 = vperm.xlu0 %5344, %v5774_v57   ;;  %v5954_v45 = vpop.permute.xlu1 %1399  ;;  %v5956_v50 = vpop.permute.xlu0 %1396 }
  0xd3   : > { %12081 = vst [vmem:[#allocation53_spill] sm:$0xff] %v5954_v45  ;;  %12082 = vst [vmem:[#allocation54_spill] sm:$0xff] %v5956_v50 }
  0xd4   : > { %5194 = vmatmul.mubr.bf16.gmra.mrb[48].mxu0 %v5400_v33  ;;  %5242 = vmatmul.mubr.bf16.gmra.mrb[48].mxu1 %v5400_v33 }
  0xd5   : > { %5195 = vmatprep.mubr.bf16.mxu0 %v5401_v43  ;;  %5243 = vmatprep.mubr.bf16.mxu1 %v5401_v43 }
  0xd6   : > { %2201 = vperm.xlu1 %5343, %v5761_v52   ;;  %2210 = vperm.xlu0 %5344, %v5788_v1   ;;  %v5960_v51 = vpop.permute.xlu1 %1405  ;;  %v5962_v3 = vpop.permute.xlu0 %1402 }
  0xd7   : > { %12083 = vst [vmem:[#allocation55_spill] sm:$0xff] %v5960_v51  ;;  %12084 = vst [vmem:[#allocation56_spill] sm:$0xff] %v5962_v3 }
  0xda   : > { %2207 = vperm.xlu1 %5343, %v5768_v55   ;;  %2216 = vperm.xlu0 %5344, %v5798_v8   ;;  %v5967_v56 = vpop.permute.xlu1 %1411  ;;  %v5969_v58 = vpop.permute.xlu0 %1408 }
  0xdb   : > { %12085 = vst [vmem:[#allocation57_spill] sm:$0xff] %v5967_v56  ;;  %12086 = vst [vmem:[#allocation58_spill] sm:$0xff] %v5969_v58 }
  0xdc   : > { %5196 = vmatmul.mubr.bf16.gmra.mrb[52].mxu0 %v5401_v43  ;;  %5244 = vmatmul.mubr.bf16.gmra.mrb[52].mxu1 %v5401_v43 }
  0xdd   : > { %5197 = vmatprep.mubr.bf16.mxu0 %v5402_v54  ;;  %5245 = vmatprep.mubr.bf16.mxu1 %v5402_v54 }
  0xde   : > { %2213 = vperm.xlu1 %5343, %v5785_v0   ;;  %2222 = vperm.xlu0 %5344, %v5812_v20   ;;  %v5973_v59 = vpop.permute.xlu1 %1417  ;;  %v5975_v60 = vpop.permute.xlu0 %1414 }
  0xdf   : > { %12087 = vst [vmem:[#allocation59_spill] sm:$0xff] %v5973_v59  ;;  %12088 = vst [vmem:[#allocation60_spill] sm:$0xff] %v5975_v60 }
  0xe2   : > { %2219 = vperm.xlu1 %5343, %v5795_v5   ;;  %2228 = vperm.xlu0 %5344, %v5823_v25   ;;  %v5980_v2 = vpop.permute.xlu1 %1423  ;;  %v5982_v4 = vpop.permute.xlu0 %1420 }
  0xe3   : > { %12089 = vst [vmem:[#allocation61_spill] sm:$0xff] %v5980_v2  ;;  %12090 = vst [vmem:[#allocation62_spill] sm:$0xff] %v5982_v4 }
  0xe4   : > { %5198 = vmatmul.mubr.bf16.gmra.mrb[56].mxu0 %v5402_v54  ;;  %5246 = vmatmul.mubr.bf16.gmra.mrb[56].mxu1 %v5402_v54 }
  0xe5   : > { %5199 = vmatprep.mubr.bf16.mxu0 %v5403_v61  ;;  %5247 = vmatprep.mubr.bf16.mxu1 %v5403_v61 }
  0xe6   : > { %2225 = vperm.xlu1 %5343, %v5806_v17   ;;  %2234 = vperm.xlu0 %5344, %v5837_v37   ;;  %v5986_v11 = vpop.permute.xlu1 %1429  ;;  %v5988_v22 = vpop.permute.xlu0 %1426 }
  0xe7   : > { %12091 = vst [vmem:[#allocation63_spill] sm:$0xff] %v5986_v11  ;;  %12092 = vst [vmem:[#allocation64_spill] sm:$0xff] %v5988_v22  ;;  %v5517_v11 = vmov 3  }
  0xea   : > { %2231 = vperm.xlu1 %5343, %v5817_v23   ;;  %2240 = vperm.xlu0 %5344, %v5848_v44   ;;  %v5992_v33 = vpop.permute.xlu1 %1435  ;;  %v5994_v43 = vpop.permute.xlu0 %1432 }
  0xeb   : > { %12093 = vst [vmem:[#allocation65_spill] sm:$0xff] %v5992_v33  ;;  %12094 = vst [vmem:[#allocation66_spill] sm:$0xff] %v5994_v43 }
  0xec   : > { %5200 = vmatmul.mubr.bf16.gmra.mrb[60].mxu0 %v5403_v61  ;;  %5248 = vmatmul.mubr.bf16.gmra.mrb[60].mxu1 %v5403_v61 }
  0xee   : > { %2237 = vperm.xlu1 %5343, %v5834_v36   ;;  %2246 = vperm.xlu0 %5344, %v5857_v49   ;;  %v5998_v54 = vpop.permute.xlu1 %1441  ;;  %v6000_v2 = vpop.permute.xlu0 %1438 }
  0xef   : > { %12095 = vst [vmem:[#allocation67_spill] sm:$0xff] %v5998_v54  ;;  %12096 = vst [vmem:[#allocation68_spill] sm:$0xff] %v6000_v2 }
  0xf2   : > { %2243 = vperm.xlu1 %5343, %v5844_v42   ;;  %5345 = vset.pattern.permute.xlu0 %v5517_v11 }
  0xf3   : > { %2560 = vperm.xlu0 %5345, %v5676_v7  }
  0xf4   : > { %v6004_v22 = vpop.permute.xlu1 %1755  ;;  %v6006_v33 = vpop.permute.xlu0 %1752 }
  0xf5   : > { %vm1848_vm2 = vcmp.eq.s32.totalorder %v6004_v22, 1  ;;  %vm1847_vm3 = vcmp.eq.s32.totalorder %v6006_v33, 1 }
  0xf6   : > { %2249 = vperm.xlu1 %5343, %v5854_v48  }
  0xf7   : > { %2569 = vperm.xlu0 %5345, %v5687_v14  }
  0xf8   : > { %v6010_v61 = vpop.permute.xlu1 %1758  ;;  %v6012_v43 = vpop.permute.xlu0 %1761 }
  0xf9   : > { %vm1849_vm7 = vcmp.eq.s32.totalorder %v6010_v61, 1  ;;  %vm1850_vm9 = vcmp.eq.s32.totalorder %v6012_v43, 1 }
  0xfa   : > { %5346 = vset.pattern.permute.xlu1 %v5517_v11 }
  0xfb   : > { %2563 = vperm.xlu1 %5346, %v5690_v15   ;;  %2575 = vperm.xlu0 %5345, %v5695_v16  }
  0xfc   : > { %v6016_v54 = vpop.permute.xlu1 %1764  ;;  %v6018_v2 = vpop.permute.xlu0 %1767 }
  0xfd   : > { %vm1851_vm13 = vcmp.eq.s32.totalorder %v6016_v54, 1 }
  0xff   : > { %2566 = vperm.xlu1 %5346, %v5673_v6   ;;  %2581 = vperm.xlu0 %5345, %v5711_v26  }
 0x100   : > { %v6022_v4 = vpop.permute.xlu1 %1770  ;;  %v6024_v59 = vpop.permute.xlu0 %1773 }
 0x103   : > { %2572 = vperm.xlu1 %5346, %v5699_v18   ;;  %2587 = vperm.xlu0 %5345, %v5721_v30  }
 0x104   : > { %v6028_v11 = vpop.permute.xlu1 %1776  ;;  %v6030_v60 = vpop.permute.xlu0 %1779 }
 0x105   : > { %12097 = vst [vmem:[#allocation69_spill] sm:$0xff] %v6028_v11  ;;  %12098 = vst [vmem:[#allocation70_spill] sm:$0xff] %v6030_v60 }
 0x107   : > { %2578 = vperm.xlu1 %5346, %v5714_v27   ;;  %2593 = vperm.xlu0 %5345, %v5735_v38  }
 0x108   : > { %v6034_v56 = vpop.permute.xlu1 %1782  ;;  %v6036_v58 = vpop.permute.xlu0 %1785 }
 0x109   : > { %12099 = vst [vmem:[#allocation71_spill] sm:$0xff] %v6034_v56  ;;  %12100 = vst [vmem:[#allocation72_spill] sm:$0xff] %v6036_v58 }
 0x10b   : > { %2584 = vperm.xlu1 %5346, %v5724_v31   ;;  %2599 = vperm.xlu0 %5345, %v5749_v46  }
 0x10c   : > { %v6040_v51 = vpop.permute.xlu1 %1788  ;;  %v6042_v3 = vpop.permute.xlu0 %1791 }
 0x10d   : > { %12101 = vst [vmem:[#allocation73_spill] sm:$0xff] %v6040_v51  ;;  %12102 = vst [vmem:[#allocation74_spill] sm:$0xff] %v6042_v3 }
 0x10f   : > { %2590 = vperm.xlu1 %5346, %v5738_v39   ;;  %2605 = vperm.xlu0 %5345, %v5761_v52  }
 0x110   : > { %v6046_v45 = vpop.permute.xlu1 %1794  ;;  %v6048_v50 = vpop.permute.xlu0 %1797 }
 0x111   : > { %12103 = vst [vmem:[#allocation75_spill] sm:$0xff] %v6046_v45  ;;  %12104 = vst [vmem:[#allocation76_spill] sm:$0xff] %v6048_v50  ;;  %v5518_v45 = vmov 4  }
 0x113   : > { %2596 = vperm.xlu1 %5346, %v5752_v47   ;;  %2611 = vperm.xlu0 %5345, %v5768_v55  }
 0x114   : > { %v6052_v40 = vpop.permute.xlu0 %1803  ;;  %v6054_v41 = vpop.permute.xlu1 %1800 }
 0x115   : > { %12105 = vst [vmem:[#allocation77_spill] sm:$0xff] %v6052_v40  ;;  %12106 = vst [vmem:[#allocation78_spill] sm:$0xff] %v6054_v41 }
 0x117   : > { %2602 = vperm.xlu1 %5346, %v5764_v53   ;;  %2617 = vperm.xlu0 %5345, %v5785_v0  }
 0x118   : > { %v6058_v3 = vpop.permute.xlu0 %1809  ;;  %v6060_v34 = vpop.permute.xlu1 %1806 }
 0x119   : > { %12107 = vst [vmem:[#allocation79_spill] sm:$0xff] %v6058_v3  ;;  %12108 = vst [vmem:[#allocation80_spill] sm:$0xff] %v6060_v34 }
 0x11b   : > { %2608 = vperm.xlu1 %5346, %v5774_v57   ;;  %2623 = vperm.xlu0 %5345, %v5795_v5  }
 0x11c   : > { %v6064_v50 = vpop.permute.xlu0 %1815  ;;  %v6070_v41 = vpop.permute.xlu1 %1812 }
 0x11d   : > { %12109 = vst [vmem:[#allocation81_spill] sm:$0xff] %v6064_v50  ;;  %12111 = vst [vmem:[#allocation83_spill] sm:$0xff] %v6070_v41 }
 0x11f   : > { %2614 = vperm.xlu1 %5346, %v5788_v1   ;;  %2629 = vperm.xlu0 %5345, %v5806_v17  }
 0x120   : > { %v6068_v40 = vpop.permute.xlu0 %1821  ;;  %v6076_v34 = vpop.permute.xlu1 %1818 }
 0x121   : > { %12110 = vst [vmem:[#allocation82_spill] sm:$0xff] %v6068_v40  ;;  %12113 = vst [vmem:[#allocation85_spill] sm:$0xff] %v6076_v34 }
 0x123   : > { %2620 = vperm.xlu1 %5346, %v5798_v8   ;;  %2635 = vperm.xlu0 %5345, %v5817_v23  }
 0x124   : > { %v6074_v3 = vpop.permute.xlu0 %1827  ;;  %v6084_v40 = vpop.permute.xlu1 %1824 }
 0x125   : > { %12112 = vst [vmem:[#allocation84_spill] sm:$0xff] %v6074_v3  ;;  %12115 = vst [vmem:[#allocation87_spill] sm:$0xff] %v6084_v40 }
 0x127   : > { %2626 = vperm.xlu1 %5346, %v5812_v20   ;;  %2641 = vperm.xlu0 %5345, %v5834_v36  }
 0x128   : > { %v6080_v50 = vpop.permute.xlu0 %1833  ;;  %v6090_v3 = vpop.permute.xlu1 %1830 }
 0x129   : > { %12114 = vst [vmem:[#allocation86_spill] sm:$0xff] %v6080_v50  ;;  %12117 = vst [vmem:[#allocation89_spill] sm:$0xff] %v6090_v3 }
 0x12b   : > { %2632 = vperm.xlu1 %5346, %v5823_v25   ;;  %2647 = vperm.xlu0 %5345, %v5844_v42  }
 0x12c   : > { %v6086_v41 = vpop.permute.xlu0 %1839  ;;  %v6098_v50 = vpop.permute.xlu1 %1836 }
 0x12d   : > { %12116 = vst [vmem:[#allocation88_spill] sm:$0xff] %v6086_v41  ;;  %12119 = vst [vmem:[#allocation91_spill] sm:$0xff] %v6098_v50 }
 0x12f   : > { %2638 = vperm.xlu1 %5346, %v5837_v37   ;;  %2653 = vperm.xlu0 %5345, %v5854_v48  }
 0x130   : > { %v6092_v34 = vpop.permute.xlu0 %1845 }
 0x131   : > { %12118 = vst [vmem:[#allocation90_spill] sm:$0xff] %v6092_v34  ;;  %v6104_v34 = vpop.permute.xlu1 %1842 }
 0x132   : > { %12120 = vst [vmem:[#allocation92_spill] sm:$0xff] %v6104_v34 }
 0x133   : > { %2644 = vperm.xlu1 %5346, %v5848_v44   ;;  %5348 = vset.pattern.permute.xlu0 %v5518_v45 }
 0x134   : > { %2967 = vperm.xlu0 %5348, %v5690_v15  }
 0x135   : > { %v6100_v41 = vpop.permute.xlu0 %2159  ;;  %v2157_v50 = vpop.permute.xlu1 %2156 }
 0x136   : > { %vm2251_vm4 = vcmp.eq.s32.totalorder %v2157_v50, 1  ;;  %vm2252_vm5 = vcmp.eq.s32.totalorder %v6100_v41, 1 }
 0x137   : > { %2650 = vperm.xlu1 %5346, %v5857_v49  }
 0x138   : > { %2976 = vperm.xlu0 %5348, %v5699_v18  }
 0x139   : > { %v6106_v3 = vpop.permute.xlu0 %2168 }
 0x13a   : > { %vm2255_vm15 = vcmp.eq.s32.totalorder %v6106_v3, 1 }
 0x13b   : > { %5347 = vset.pattern.permute.xlu1 %v5518_v45 }
 0x13c   : > { %2964 = vperm.xlu1 %5347, %v5676_v7   ;;  %2982 = vperm.xlu0 %5348, %v5714_v27  }
 0x13d   : > { %v6112_v40 = vpop.permute.xlu0 %2174 }
 0x13e   : > { %12121 = vst [vmem:[#allocation93_spill] sm:$0xff] %v6112_v40 }
 0x140   : > { %2970 = vperm.xlu1 %5347, %v5673_v6   ;;  %2988 = vperm.xlu0 %5348, %v5724_v31  }
 0x144   : > { %2973 = vperm.xlu1 %5347, %v5687_v14   ;;  %2994 = vperm.xlu0 %5348, %v5738_v39  }
 0x147   : > { %v803_v45 = vpop.f32.mrb[0].mxu0  ;;  %v996_v51 = vpop.f32.mrb[0].mxu1 }
 0x148   : > { %v6115_v35 = vmul.f32 0.088388346, %v803_v45  ;;  %v6117_v34 = vmul.f32 0.088388346, %v996_v51  ;;  %2979 = vperm.xlu1 %5347, %v5695_v16   ;;  %3000 = vperm.xlu0 %5348, %v5752_v47   ;;  %v805_v58 = vpop.f32.mrb[1].mxu0  ;;  %v998_v29 = vpop.f32.mrb[1].mxu1 }
 0x149   : > { %v6123_v39 = vmul.f32 0.088388346, %v805_v58  ;;  %v6125_v31 = vmul.f32 0.088388346, %v998_v29  ;;  %v6134_v45 = vpop.permute.xlu1 %2162  ;;  %v6136_v47 = vpop.permute.xlu0 %2180 }
 0x14a   : > { %12122 = vst [vmem:[#allocation94_spill] sm:$0xff] %v6115_v35  ;;  %12123 = vst [vmem:[#allocation95_spill] sm:$0xff] %v6117_v34  ;;  %v6132_v51 = vsel %vm1443_vm0, %v6115_v35, -1e+09  ;;  %v6141_v58 = vsel %vm1847_vm3, %v6115_v35, -1e+09 }
 0x14b   : > { %12124 = vst [vmem:[#allocation96_spill] sm:$0xff] %v6123_v39  ;;  %12125 = vst [vmem:[#allocation97_spill] sm:$0xff] %v6125_v31  ;;  %v6145_v29 = vsel %vm2251_vm4, %v6115_v35, -1e+09  ;;  %v6150_v56 = vsel %vm1443_vm0, %v6117_v34, -1e+09 }
 0x14c   : > { %12126 = vst [vmem:[#allocation98_spill] sm:$0xff] %v6136_v47  ;;  %v6155_v32 = vsel %vm1847_vm3, %v6117_v34, -1e+09  ;;  %v6159_v27 = vsel %vm2251_vm4, %v6117_v34, -1e+09  ;;  %2985 = vperm.xlu1 %5347, %v5711_v26   ;;  %3006 = vperm.xlu0 %5348, %v5764_v53   ;;  %v807_v24 = vpop.f32.mrb[2].mxu0 }
 0x14d   : > { %v6164_v60 = vsel %vm1443_vm0, %v6123_v39, -1e+09  ;;  %v6171_v35 = vsel %vm1847_vm3, %v6123_v39, -1e+09  ;;  %v6175_v18 = vsel %vm2251_vm4, %v6123_v39, -1e+09 }
 0x14e   : > { %v6180_v34 = vsel %vm1443_vm0, %v6125_v31, -1e+09  ;;  %v6185_v47 = vsel %vm1847_vm3, %v6125_v31, -1e+09  ;;  %v6189_v53 = vsel %vm2251_vm4, %v6125_v31, -1e+09 }
 0x14f   : > { %v1000_v6 = vpop.f32.mrb[2].mxu1  ;;  %v6191_v15 = vmul.f32 0.088388346, %v807_v24  ;;  %v809_v11 = vpop.f32.mrb[3].mxu0  ;;  %vm2253_vm10 = vcmp.eq.s32.totalorder %v6134_v45, 1  ;;  %vm1852_vm0 = vcmp.eq.s32.totalorder %v6018_v2, 1 }
 0x150   : > { %v6193_v39 = vmul.f32 0.088388346, %v1000_v6  ;;  %v1002_v28 = vpop.f32.mrb[3].mxu1  ;;  %v6197_v63 = vmul.f32 0.088388346, %v809_v11  ;;  %v813_v26 = vpop.f32.mrb[4].mxu0  ;;  %2991 = vperm.xlu1 %5347, %v5721_v30   ;;  %3012 = vperm.xlu0 %5348, %v5774_v57  }
 0x151   : > { %12127 = vst [vmem:[#allocation99_spill] sm:$0xff] %v6191_v15  ;;  %v6199_v33 = vmul.f32 0.088388346, %v1002_v28  ;;  %v1006_v50 = vpop.f32.mrb[4].mxu1  ;;  %v6203_v24 = vpop.permute.xlu1 %2165  ;;  %v1479_v31 = vsel %vm1444_vm1, %v6191_v15, -1e+09 }
 0x152   : > { %12128 = vst [vmem:[#allocation100_spill] sm:$0xff] %v6193_v39  ;;  %12129 = vst [vmem:[#allocation101_spill] sm:$0xff] %v6197_v63  ;;  %v6205_v6 = vpop.permute.xlu0 %2186  ;;  %v1883_v11 = vsel %vm1848_vm2, %v6191_v15, -1e+09  ;;  %v2287_v28 = vsel %vm2252_vm5, %v6191_v15, -1e+09  ;;  %v1603_v30 = vmax.f32 %v6132_v51, %v1479_v31 }
 0x153   : > { %12130 = vst [vmem:[#allocation102_spill] sm:$0xff] %v6199_v33  ;;  %12131 = vst [vmem:[#allocation103_spill] sm:$0xff] %v6205_v6  ;;  %v2007_v57 = vmax.f32 %v6141_v58, %v1883_v11  ;;  %v2411_v48 = vmax.f32 %v6145_v29, %v2287_v28  ;;  %v1481_v6 = vsel %vm1444_vm1, %v6193_v39, -1e+09  ;;  %v815_v16 = vpop.f32.mrb[5].mxu0  ;;  %v1008_v42 = vpop.f32.mrb[5].mxu1 }
 0x154   : > { %v1677_v40 = vmax.f32 %v6150_v56, %v1481_v6  ;;  %v1885_v14 = vsel %vm1848_vm2, %v6193_v39, -1e+09  ;;  %v2289_v31 = vsel %vm2252_vm5, %v6193_v39, -1e+09  ;;  %v1480_v51 = vsel %vm1444_vm1, %v6197_v63, -1e+09  ;;  %2997 = vperm.xlu1 %5347, %v5735_v38   ;;  %3018 = vperm.xlu0 %5348, %v5788_v1  }
 0x155   : > { %v2081_v58 = vmax.f32 %v6155_v32, %v1885_v14  ;;  %v2485_v29 = vmax.f32 %v6159_v27, %v2289_v31  ;;  %v1640_v11 = vmax.f32 %v6164_v60, %v1480_v51  ;;  %v1884_v56 = vsel %vm1848_vm2, %v6197_v63, -1e+09  ;;  %v817_v6 = vpop.f32.mrb[6].mxu0  ;;  %v6238_v28 = vpop.f32.mrb[6].mxu1 }
 0x156   : > { %v2044_v39 = vmax.f32 %v6171_v35, %v1884_v56  ;;  %v2288_v14 = vsel %vm2252_vm5, %v6197_v63, -1e+09  ;;  %v1482_v27 = vsel %vm1444_vm1, %v6199_v33, -1e+09  ;;  %v1886_v32 = vsel %vm1848_vm2, %v6199_v33, -1e+09  ;;  %v6260_v63 = vpop.permute.xlu1 %2171  ;;  %v6262_v22 = vpop.permute.xlu0 %2192 }
 0x157   : > { %v2448_v60 = vmax.f32 %v6175_v18, %v2288_v14  ;;  %v1714_v35 = vmax.f32 %v6180_v34, %v1482_v27  ;;  %v2118_v31 = vmax.f32 %v6185_v47, %v1886_v32  ;;  %v2290_v51 = vsel %vm2252_vm5, %v6199_v33, -1e+09  ;;  %v819_v10 = vpop.f32.mrb[7].mxu0  ;;  %v1012_v56 = vpop.f32.mrb[7].mxu1 }
 0x158   : > { %v2522_v15 = vmax.f32 %v6189_v53, %v2290_v51  ;;  %v6265_v1 = vmul.f32 0.088388346, %v813_v26  ;;  %v6267_v38 = vmul.f32 0.088388346, %v1006_v50  ;;  %v6269_v18 = vmul.f32 0.088388346, %v815_v16  ;;  %3003 = vperm.xlu1 %5347, %v5749_v46   ;;  %3024 = vperm.xlu0 %5348, %v5798_v8  }
 0x159   : > { %vm2254_vm11 = vcmp.eq.s32.totalorder %v6203_v24, 1  ;;  %v6273_v47 = vmul.f32 0.088388346, %v1008_v42  ;;  %v6275_v34 = vmul.f32 0.088388346, %v817_v6  ;;  %v6297_v14 = vpop.f32.mrb[8].mxu0 }
 0x15a   : > { %12132 = vst [vmem:[#allocation104_spill] sm:$0xff] %v6265_v1  ;;  %12133 = vst [vmem:[#allocation105_spill] sm:$0xff] %v6267_v38  ;;  %v1483_v26 = vsel %vm1445_vm6, %v6265_v1, -1e+09  ;;  %v1887_v16 = vsel %vm1849_vm7, %v6265_v1, -1e+09 }
 0x15b   : > { %12134 = vst [vmem:[#allocation106_spill] sm:$0xff] %v6269_v18  ;;  %12135 = vst [vmem:[#allocation107_spill] sm:$0xff] %v6273_v47  ;;  %v2291_v53 = vsel %vm2253_vm10, %v6265_v1, -1e+09  ;;  %v6288_v42 = vmax.f32 %v1603_v30, %v1483_v26  ;;  %v6290_v41 = vmax.f32 %v2007_v57, %v1887_v16  ;;  %v1485_v6 = vsel %vm1445_vm6, %v6267_v38, -1e+09  ;;  %v6325_v1 = vpop.permute.xlu0 %2198 }
 0x15c   : > { %12136 = vst [vmem:[#allocation108_spill] sm:$0xff] %v6275_v34  ;;  %v6292_v50 = vmax.f32 %v2411_v48, %v2291_v53  ;;  %v6299_v27 = vpop.f32.mrb[8].mxu1  ;;  %v6301_v32 = vmax.f32 %v1677_v40, %v1485_v6  ;;  %v1889_v51 = vsel %vm1849_vm7, %v6267_v38, -1e+09  ;;  %v2293_v30 = vsel %vm2253_vm10, %v6267_v38, -1e+09  ;;  %3009 = vperm.xlu1 %5347, %v5761_v52   ;;  %3030 = vperm.xlu0 %5348, %v5812_v20   ;;  %v6323_v38 = vpop.permute.xlu1 %2177 }
 0x15d   : > { %v1484_v57 = vsel %vm1445_vm6, %v6269_v18, -1e+09  ;;  %v6312_v48 = vmax.f32 %v2081_v58, %v1889_v51  ;;  %v6314_v26 = vmax.f32 %v2485_v29, %v2293_v30  ;;  %v1888_v40 = vsel %vm1849_vm7, %v6269_v18, -1e+09  ;;  %v825_v53 = vpop.f32.mrb[9].mxu0  ;;  %v1018_v6 = vpop.f32.mrb[9].mxu1 }
 0x15e   : > { %v6316_v16 = vmax.f32 %v1640_v11, %v1484_v57  ;;  %12137 = vst [vmem:[#allocation109_spill] sm:$0xff] %v6325_v1  ;;  %v6327_v58 = vmax.f32 %v2044_v39, %v1888_v40  ;;  %v2292_v29 = vsel %vm2253_vm10, %v6269_v18, -1e+09  ;;  %v1486_v11 = vsel %vm1445_vm6, %v6273_v47, -1e+09  ;;  %v6347_v40 = vpop.f32.mrb[10].mxu0 }
 0x15f   : > { %v1890_v51 = vsel %vm1849_vm7, %v6273_v47, -1e+09  ;;  %v6338_v30 = vmax.f32 %v2448_v60, %v2292_v29  ;;  %v6340_v57 = vmax.f32 %v1714_v35, %v1486_v11  ;;  %v2294_v39 = vsel %vm2253_vm10, %v6273_v47, -1e+09  ;;  %v6349_v18 = vpop.f32.mrb[10].mxu1  ;;  %v6369_v11 = vpop.f32.mrb[11].mxu0 }
 0x160   : > { %v6342_v33 = vmax.f32 %v2118_v31, %v1890_v51  ;;  %v6352_v62 = vmax.f32 %v2522_v15, %v2294_v39  ;;  %v1487_v61 = vsel %vm1446_vm8, %v6275_v34, -1e+09  ;;  %v1891_v60 = vsel %vm1850_vm9, %v6275_v34, -1e+09  ;;  %v6371_v51 = vpop.f32.mrb[11].mxu1  ;;  %3015 = vperm.xlu1 %5347, %v5768_v55   ;;  %3036 = vperm.xlu0 %5348, %v5823_v25   ;;  %v6399_v1 = vpop.permute.xlu1 %2183 }
 0x161   : > { %v2295_v45 = vsel %vm2254_vm11, %v6275_v34, -1e+09  ;;  %v1605_v35 = vmax.f32 %v6288_v42, %v1487_v61  ;;  %v2009_v31 = vmax.f32 %v6290_v41, %v1891_v60  ;;  %v6367_v15 = vmul.f32 0.088388346, %v6238_v28  ;;  %v6397_v47 = vpop.f32.mrb[12].mxu1  ;;  %v6401_v25 = vpop.permute.xlu0 %2204 }
 0x162   : > { %v2413_v29 = vmax.f32 %v6292_v50, %v2295_v45  ;;  %v6376_v39 = vmul.f32 0.088388346, %v819_v10  ;;  %v6378_v42 = vmul.f32 0.088388346, %v1012_v56  ;;  %v6395_v45 = vpop.f32.mrb[12].mxu0  ;;  %12141 = vst [vmem:[#allocation113_spill] sm:$0xff] %v6401_v25 }
 0x163   : > { %12138 = vst [vmem:[#allocation110_spill] sm:$0xff] %v6367_v15  ;;  %v1489_v41 = vsel %vm1446_vm8, %v6367_v15, -1e+09  ;;  %v1893_v28 = vsel %vm1850_vm9, %v6367_v15, -1e+09  ;;  %v6423_v25 = vpop.f32.mrb[13].mxu1 }
 0x164   : > { %12139 = vst [vmem:[#allocation111_spill] sm:$0xff] %v6376_v39  ;;  %12140 = vst [vmem:[#allocation112_spill] sm:$0xff] %v6378_v42  ;;  %v2297_v50 = vsel %vm2254_vm11, %v6367_v15, -1e+09  ;;  %v1679_v61 = vmax.f32 %v6301_v32, %v1489_v41  ;;  %v2083_v60 = vmax.f32 %v6312_v48, %v1893_v28  ;;  %v1488_v56 = vsel %vm1446_vm8, %v6376_v39, -1e+09  ;;  %3021 = vperm.xlu1 %5347, %v5785_v0  }
 0x165   : > { %v2487_v10 = vmax.f32 %v6314_v26, %v2297_v50  ;;  %v1642_v20 = vmax.f32 %v6316_v16, %v1488_v56  ;;  %v1892_v32 = vsel %vm1850_vm9, %v6376_v39, -1e+09  ;;  %v2296_v48 = vsel %vm2254_vm11, %v6376_v39, -1e+09  ;;  %3042 = vperm.xlu0 %5348, %v5837_v37   ;;  %v6421_v56 = vpop.f32.mrb[13].mxu0 }
 0x166   : > { %v1490_v26 = vsel %vm1446_vm8, %v6378_v42, -1e+09  ;;  %v2046_v41 = vmax.f32 %v6327_v58, %v1892_v32  ;;  %v2450_v16 = vmax.f32 %v6338_v30, %v2296_v48  ;;  %v1894_v50 = vsel %vm1850_vm9, %v6378_v42, -1e+09  ;;  %v6464_v48 = vpop.f32.mrb[14].mxu1 }
 0x167   : > { %v1716_v28 = vmax.f32 %v6340_v57, %v1490_v26  ;;  %v2120_v9 = vmax.f32 %v6342_v33, %v1894_v50  ;;  %v2298_v37 = vsel %vm2254_vm11, %v6378_v42, -1e+09  ;;  %v6430_v58 = vmul.f32 0.088388346, %v6297_v14  ;;  %v6442_v33 = vpop.f32.mrb[14].mxu0  ;;  %v6468_v50 = vpop.permute.xlu1 %2189 }
 0x168   : > { %v6433_v30 = vmul.f32 0.088388346, %v6299_v27  ;;  %v2524_v43 = vmax.f32 %v6352_v62, %v2298_v37  ;;  %v6438_v57 = vmul.f32 0.088388346, %v825_v53  ;;  %v6440_v32 = vmul.f32 0.088388346, %v1018_v6  ;;  %3027 = vperm.xlu1 %5347, %v5795_v5  }
 0x169   : > { %12142 = vst [vmem:[#allocation114_spill] sm:$0xff] %v6430_v58  ;;  %v1491_v24 = vsel %vm1447_vm12, %v6430_v58, -1e+09  ;;  %v1895_v14 = vsel %vm1851_vm13, %v6430_v58, -1e+09  ;;  %3048 = vperm.xlu0 %5348, %v5848_v44   ;;  %v6466_v26 = vpop.f32.mrb[15].mxu0 }
 0x16a   : > { %12143 = vst [vmem:[#allocation115_spill] sm:$0xff] %v6433_v30  ;;  %12144 = vst [vmem:[#allocation116_spill] sm:$0xff] %v6438_v57  ;;  %v2299_v27 = vsel %vm2255_vm15, %v6430_v58, -1e+09  ;;  %v6455_v37 = vmax.f32 %v1605_v35, %v1491_v24  ;;  %v6457_v53 = vmax.f32 %v2009_v31, %v1895_v14  ;;  %v1493_v62 = vsel %vm1447_vm12, %v6433_v30, -1e+09  ;;  %v6470_v58 = vpop.permute.xlu0 %2210 }
 0x16b   : > { %12145 = vst [vmem:[#allocation117_spill] sm:$0xff] %v6440_v32  ;;  %v6459_v6 = vmax.f32 %v2413_v29, %v2299_v27  ;;  %12146 = vst [vmem:[#allocation118_spill] sm:$0xff] %v6470_v58  ;;  %v6472_v8 = vmax.f32 %v1679_v61, %v1493_v62  ;;  %v1897_v35 = vsel %vm1851_vm13, %v6433_v30, -1e+09  ;;  %v2301_v31 = vsel %vm2255_vm15, %v6433_v30, -1e+09 }
 0x16c   : > { %v1492_v29 = vsel %vm1447_vm12, %v6438_v57, -1e+09  ;;  %v6483_v24 = vmax.f32 %v2083_v60, %v1897_v35  ;;  %v6485_v14 = vmax.f32 %v2487_v10, %v2301_v31  ;;  %v1896_v61 = vsel %vm1851_vm13, %v6438_v57, -1e+09  ;;  %v6492_v62 = vpop.f32.mrb[15].mxu1  ;;  %v6494_v58 = vpop.f32.mrb[16].mxu0  ;;  %3033 = vperm.xlu1 %5347, %v5806_v17  }
 0x16d   : > { %v6487_v27 = vmax.f32 %v1642_v20, %v1492_v29  ;;  %v6496_v44 = vmax.f32 %v2046_v41, %v1896_v61  ;;  %v2300_v30 = vsel %vm2255_vm15, %v6438_v57, -1e+09  ;;  %v1494_v60 = vsel %vm1447_vm12, %v6440_v32, -1e+09  ;;  %3054 = vperm.xlu0 %5348, %v5857_v49   ;;  %v6518_v13 = vpop.f32.mrb[16].mxu1  ;;  %v6520_v29 = vpop.f32.mrb[17].mxu0 }
 0x16e   : > { %v1898_v20 = vsel %vm1851_vm13, %v6440_v32, -1e+09  ;;  %v6509_v10 = vmax.f32 %v2450_v16, %v2300_v30  ;;  %v6511_v41 = vmax.f32 %v1716_v28, %v1494_v60  ;;  %v2302_v31 = vsel %vm2255_vm15, %v6440_v32, -1e+09  ;;  %v6531_v28 = vpop.f32.mrb[17].mxu1  ;;  %v6542_v30 = vpop.permute.xlu1 %2195 }
 0x16f   : > { %v6513_v35 = vmax.f32 %v2120_v9, %v1898_v20  ;;  %v6523_v54 = vmax.f32 %v2524_v43, %v2302_v31  ;;  %v6526_v61 = vmul.f32 0.088388346, %v6347_v40  ;;  %v6529_v16 = vmul.f32 0.088388346, %v6349_v18  ;;  %v6544_v40 = vpop.permute.xlu0 %2216  ;;  %v6563_v32 = vpop.f32.mrb[18].mxu0 }
 0x170   : > { %vm1449_vm1 = vcmp.eq.s32.totalorder %v5923_v21, 1  ;;  %vm1853_vm2 = vcmp.eq.s32.totalorder %v6022_v4, 1  ;;  %vm2256_vm3 = vcmp.eq.s32.totalorder %v6260_v63, 1  ;;  %v6537_v3 = vmul.f32 0.088388346, %v6369_v11  ;;  %12151 = vst [vmem:[#allocation123_spill] sm:$0xff] %v6544_v40  ;;  %3039 = vperm.xlu1 %5347, %v5817_v23  }
 0x171   : > { %12147 = vst [vmem:[#allocation119_spill] sm:$0xff] %v6526_v61  ;;  %12148 = vst [vmem:[#allocation120_spill] sm:$0xff] %v6529_v16  ;;  %v6540_v9 = vmul.f32 0.088388346, %v6371_v51  ;;  %v1495_v18 = vsel %vm1448_vm14, %v6526_v61, -1e+09 }
 0x172   : > { %12149 = vst [vmem:[#allocation121_spill] sm:$0xff] %v6537_v3  ;;  %v1899_v43 = vsel %vm1852_vm0, %v6526_v61, -1e+09  ;;  %v2303_v11 = vsel %vm2256_vm3, %v6526_v61, -1e+09  ;;  %v11698_v51 = vmov 5   ;;  %v1607_v60 = vmax.f32 %v6455_v37, %v1495_v18 }
 0x173   : > { %12150 = vst [vmem:[#allocation122_spill] sm:$0xff] %v6540_v9  ;;  %5349 = vset.pattern.permute.xlu0 %v11698_v51  ;;  %v2011_v20 = vmax.f32 %v6457_v53, %v1899_v43  ;;  %v2415_v31 = vmax.f32 %v6459_v6, %v2303_v11  ;;  %v1497_v40 = vsel %vm1448_vm14, %v6529_v16, -1e+09  ;;  %v6565_v57 = vpop.f32.mrb[18].mxu1  ;;  %v1901_v37 = vsel %vm1852_vm0, %v6529_v16, -1e+09  ;;  %v6615_v61 = vpop.permute.xlu0 %2222 }
 0x174   : > { %3368 = vperm.xlu0 %5349, %v5676_v7   ;;  %v1681_v49 = vmax.f32 %v6472_v8, %v1497_v40  ;;  %v2305_v53 = vsel %vm2256_vm3, %v6529_v16, -1e+09  ;;  %v1496_v6 = vsel %vm1448_vm14, %v6537_v3, -1e+09  ;;  %v2085_v18 = vmax.f32 %v6483_v24, %v1901_v37  ;;  %v6584_v40 = vpop.f32.mrb[19].mxu0  ;;  %v6586_v51 = vpop.f32.mrb[19].mxu1  ;;  %3045 = vperm.xlu1 %5347, %v5834_v36  }
 0x175   : > { %v2489_v43 = vmax.f32 %v6485_v14, %v2305_v53  ;;  %v1644_v11 = vmax.f32 %v6487_v27, %v1496_v6  ;;  %v1900_v8 = vsel %vm1852_vm0, %v6537_v3, -1e+09  ;;  %v2304_v16 = vsel %vm2256_vm3, %v6537_v3, -1e+09  ;;  %v6607_v53 = vpop.f32.mrb[20].mxu0  ;;  %v6609_v2 = vpop.f32.mrb[20].mxu1 }
 0x176   : > { %v2048_v7 = vmax.f32 %v6496_v44, %v1900_v8  ;;  %v1498_v24 = vsel %vm1448_vm14, %v6540_v9, -1e+09  ;;  %v1902_v14 = vsel %vm1852_vm0, %v6540_v9, -1e+09  ;;  %vm1450_vm4 = vcmp.eq.s32.totalorder %v5921_v19, 1  ;;  %v12152_v6 = vld [vmem:[#allocation15_spill] sm:$0xff]  ;;  %v6612_v8 = vpop.permute.xlu1 %2201 }
 0x177   : > { %vm1854_vm5 = vcmp.eq.s32.totalorder %v6024_v59, 1  ;;  %v2452_v44 = vmax.f32 %v6509_v10, %v2304_v16  ;;  %v1718_v27 = vmax.f32 %v6511_v41, %v1498_v24  ;;  %v2122_v37 = vmax.f32 %v6513_v35, %v1902_v14  ;;  %12153 = vst [vmem:[#allocation124_spill] sm:$0xff] %v6612_v8  ;;  %12154 = vst [vmem:[#allocation125_spill] sm:$0xff] %v6615_v61  ;;  %v12158_v35 = vld [vmem:[#allocation93_spill] sm:$0xff]  ;;  %v6655_v61 = vpop.f32.mrb[21].mxu1  ;;  %v12166_v4 = vld [vmem:[#allocation19_spill] sm:$0xff] }
 0x178   : > { %v2306_v12 = vsel %vm2256_vm3, %v6540_v9, -1e+09  ;;  %3377 = vperm.xlu0 %5349, %v12152_v6   ;;  %v6618_v10 = vmul.f32 0.088388346, %v6395_v45  ;;  %v6621_v41 = vmul.f32 0.088388346, %v6397_v47 }
 0x179   : > { %v2526_v3 = vmax.f32 %v6523_v54, %v2306_v12  ;;  %v6624_v63 = vmul.f32 0.088388346, %v6421_v56  ;;  %vm2257_vm6 = vcmp.eq.s32.totalorder %v12158_v35, 1  ;;  %vm2258_vm7 = vcmp.eq.s32.totalorder %v6323_v38, 1  ;;  %v12161_v24 = vld [vmem:[#allocation41_spill] sm:$0xff]  ;;  %v6653_v6 = vpop.f32.mrb[21].mxu0 }
 0x17a   : > { %12155 = vst [vmem:[#allocation126_spill] sm:$0xff] %v6618_v10  ;;  %12156 = vst [vmem:[#allocation127_spill] sm:$0xff] %v6621_v41  ;;  %v6629_v16 = vmul.f32 0.088388346, %v6423_v25  ;;  %v6632_v54 = vmul.f32 0.088388346, %v6442_v33  ;;  %3051 = vperm.xlu1 %5347, %v12161_v24  }
 0x17b   : > { %12157 = vst [vmem:[#allocation128_spill] sm:$0xff] %v6624_v63  ;;  %v1499_v45 = vsel %vm1449_vm1, %v6618_v10, -1e+09  ;;  %v1903_v47 = vsel %vm1853_vm2, %v6618_v10, -1e+09  ;;  %v12162_v8 = vld [vmem:[#allocation17_spill] sm:$0xff] }
 0x17c   : > { %12159 = vst [vmem:[#allocation93_spill] sm:$0xff] %v6629_v16  ;;  %12160 = vst [vmem:[#allocation129_spill] sm:$0xff] %v6632_v54  ;;  %v2307_v56 = vsel %vm2257_vm6, %v6618_v10, -1e+09  ;;  %v6644_v14 = vmax.f32 %v1607_v60, %v1499_v45  ;;  %v6646_v25 = vmax.f32 %v2011_v20, %v1903_v47  ;;  %v1501_v12 = vsel %vm1449_vm1, %v6621_v41, -1e+09  ;;  %3383 = vperm.xlu0 %5349, %v12162_v8   ;;  %v6682_v10 = vpop.permute.xlu1 %2207 }
 0x17d   : > { %v6648_v33 = vmax.f32 %v2415_v31, %v2307_v56  ;;  %v6658_v9 = vmax.f32 %v1681_v49, %v1501_v12  ;;  %v1905_v60 = vsel %vm1853_vm2, %v6621_v41, -1e+09  ;;  %v2309_v20 = vsel %vm2257_vm6, %v6621_v41, -1e+09  ;;  %v6678_v12 = vpop.f32.mrb[22].mxu0  ;;  %v6680_v8 = vpop.f32.mrb[22].mxu1 }
 0x17e   : > { %v1500_v31 = vsel %vm1449_vm1, %v6624_v63, -1e+09  ;;  %v6669_v45 = vmax.f32 %v2085_v18, %v1905_v60  ;;  %v6671_v47 = vmax.f32 %v2489_v43, %v2309_v20  ;;  %v1904_v49 = vsel %vm1853_vm2, %v6624_v63, -1e+09  ;;  %12163 = vst [vmem:[#allocation130_spill] sm:$0xff] %v6682_v10  ;;  %v6695_v60 = vpop.permute.xlu0 %2228  ;;  %v12165_v20 = vld [vmem:[#allocation43_spill] sm:$0xff] }
 0x17f   : > { %v6673_v56 = vmax.f32 %v1644_v11, %v1500_v31  ;;  %v6684_v41 = vmax.f32 %v2048_v7, %v1904_v49  ;;  %v2308_v18 = vsel %vm2257_vm6, %v6624_v63, -1e+09  ;;  %v1502_v43 = vsel %vm1449_vm1, %v6629_v16, -1e+09  ;;  %12164 = vst [vmem:[#allocation131_spill] sm:$0xff] %v6695_v60  ;;  %3057 = vperm.xlu1 %5347, %v12165_v20   ;;  %v6707_v21 = vpop.f32.mrb[23].mxu0 }
 0x180   : > { %v1906_v11 = vsel %vm1853_vm2, %v6629_v16, -1e+09  ;;  %v6698_v31 = vmax.f32 %v2452_v44, %v2308_v18  ;;  %v6700_v7 = vmax.f32 %v1718_v27, %v1502_v43  ;;  %v2310_v10 = vsel %vm2257_vm6, %v6629_v16, -1e+09  ;;  %v6709_v63 = vpop.f32.mrb[23].mxu1  ;;  %3389 = vperm.xlu0 %5349, %v12166_v4   ;;  %v12170_v4 = vld [vmem:[#allocation46_spill] sm:$0xff] }
 0x181   : > { %v6702_v49 = vmax.f32 %v2122_v37, %v1906_v11  ;;  %v6712_v24 = vmax.f32 %v2526_v3, %v2310_v10  ;;  %v1503_v44 = vsel %vm1450_vm4, %v6632_v54, -1e+09  ;;  %v1907_v27 = vsel %vm1854_vm5, %v6632_v54, -1e+09  ;;  %v6729_v10 = vpop.f32.mrb[24].mxu0  ;;  %v6731_v11 = vpop.f32.mrb[24].mxu1 }
 0x182   : > { %v2311_v37 = vsel %vm2258_vm7, %v6632_v54, -1e+09  ;;  %v1609_v35 = vmax.f32 %v6644_v14, %v1503_v44  ;;  %v2013_v18 = vmax.f32 %v6646_v25, %v1907_v27  ;;  %v6727_v3 = vmul.f32 0.088388346, %v6464_v48  ;;  %12168 = vst [vmem:[#allocation133_spill] sm:$0xff] %v6729_v10  ;;  %12169 = vst [vmem:[#allocation134_spill] sm:$0xff] %v6731_v11  ;;  %v6763_v10 = vpop.permute.xlu1 %2213 }
 0x183   : > { %v2417_v43 = vmax.f32 %v6648_v33, %v2311_v37  ;;  %vm1451_vm8 = vcmp.eq.s32.totalorder %v12170_v4, 1  ;;  %v12171_v60 = vld [vmem:[#allocation69_spill] sm:$0xff]  ;;  %v6736_v16 = vmul.f32 0.088388346, %v6466_v26  ;;  %v6739_v14 = vmul.f32 0.088388346, %v6492_v62 }
 0x184   : > { %12167 = vst [vmem:[#allocation132_spill] sm:$0xff] %v6727_v3  ;;  %vm1855_vm9 = vcmp.eq.s32.totalorder %v12171_v60, 1  ;;  %v12174_v25 = vmov 5   ;;  %v1505_v48 = vsel %vm1450_vm4, %v6727_v3, -1e+09  ;;  %v12175_v27 = vld [vmem:[#allocation16_spill] sm:$0xff] }
 0x185   : > { %12172 = vst [vmem:[#allocation46_spill] sm:$0xff] %v6736_v16  ;;  %12173 = vst [vmem:[#allocation69_spill] sm:$0xff] %v6739_v14  ;;  %5350 = vset.pattern.permute.xlu1 %v12174_v25  ;;  %v1909_v33 = vsel %vm1854_vm5, %v6727_v3, -1e+09  ;;  %v2313_v44 = vsel %vm2258_vm7, %v6727_v3, -1e+09  ;;  %v1683_v62 = vmax.f32 %v6658_v9, %v1505_v48  ;;  %v6775_v48 = vpop.permute.xlu0 %2234 }
 0x186   : > { %3371 = vperm.xlu1 %5350, %v12175_v27   ;;  %v12176_v26 = vld [vmem:[#allocation21_spill] sm:$0xff]  ;;  %v2087_v37 = vmax.f32 %v6669_v45, %v1909_v33  ;;  %v2491_v25 = vmax.f32 %v6671_v47, %v2313_v44  ;;  %v1504_v54 = vsel %vm1450_vm4, %v6736_v16, -1e+09  ;;  %v6759_v20 = vpop.f32.mrb[25].mxu0  ;;  %v6761_v11 = vpop.f32.mrb[25].mxu1  ;;  %12177 = vst [vmem:[#allocation135_spill] sm:$0xff] %v6763_v10 }
 0x187   : > { %3395 = vperm.xlu0 %5349, %v12176_v26   ;;  %v1646_v27 = vmax.f32 %v6673_v56, %v1504_v54  ;;  %v1908_v9 = vsel %vm1854_vm5, %v6736_v16, -1e+09  ;;  %v2312_v45 = vsel %vm2258_vm7, %v6736_v16, -1e+09  ;;  %v1506_v47 = vsel %vm1450_vm4, %v6739_v14, -1e+09 }
 0x188   : > { %12178 = vst [vmem:[#allocation136_spill] sm:$0xff] %v6775_v48  ;;  %v2050_v33 = vmax.f32 %v6684_v41, %v1908_v9  ;;  %v2454_v44 = vmax.f32 %v6698_v31, %v2312_v45  ;;  %v1720_v54 = vmax.f32 %v6700_v7, %v1506_v47  ;;  %v1910_v56 = vsel %vm1854_vm5, %v6739_v14, -1e+09  ;;  %v6783_v26 = vpop.f32.mrb[26].mxu0  ;;  %v6785_v10 = vpop.f32.mrb[26].mxu1  ;;  %v12181_v7 = vld [vmem:[#allocation13_spill] sm:$0xff] }
 0x189   : > { %v2124_v3 = vmax.f32 %v6702_v49, %v1910_v56  ;;  %v2314_v19 = vsel %vm2258_vm7, %v6739_v14, -1e+09  ;;  %v6792_v41 = vmul.f32 0.088388346, %v6494_v58  ;;  %v6795_v31 = vmul.f32 0.088388346, %v6518_v13  ;;  %v6832_v14 = vpop.permute.xlu1 %2219 }
 0x18a   : > { %3374 = vperm.xlu1 %5350, %v12181_v7   ;;  %v12182_v59 = vld [vmem:[#allocation23_spill] sm:$0xff]  ;;  %v12183_v9 = vld [vmem:[#allocation45_spill] sm:$0xff]  ;;  %v12184_v45 = vld [vmem:[#allocation98_spill] sm:$0xff]  ;;  %v2528_v49 = vmax.f32 %v6712_v24, %v2314_v19  ;;  %v6803_v47 = vmul.f32 0.088388346, %v6520_v29  ;;  %v6808_v58 = vpop.f32.mrb[27].mxu0 }
 0x18b   : > { %12179 = vst [vmem:[#allocation137_spill] sm:$0xff] %v6792_v41  ;;  %12180 = vst [vmem:[#allocation138_spill] sm:$0xff] %v6795_v31  ;;  %3401 = vperm.xlu0 %5349, %v12182_v59   ;;  %vm1452_vm10 = vcmp.eq.s32.totalorder %v12183_v9, 1  ;;  %vm2259_vm11 = vcmp.eq.s32.totalorder %v12184_v45, 1  ;;  %v6806_v38 = vmul.f32 0.088388346, %v6531_v28 }
 0x18c   : > { %12185 = vst [vmem:[#allocation45_spill] sm:$0xff] %v6803_v47  ;;  %v1507_v13 = vsel %vm1451_vm8, %v6792_v41, -1e+09  ;;  %v1911_v56 = vsel %vm1855_vm9, %v6792_v41, -1e+09  ;;  %v6828_v7 = vpop.f32.mrb[27].mxu1 }
 0x18d   : > { %12186 = vst [vmem:[#allocation98_spill] sm:$0xff] %v6806_v38  ;;  %v2315_v24 = vsel %vm2259_vm11, %v6792_v41, -1e+09  ;;  %v6819_v19 = vmax.f32 %v1609_v35, %v1507_v13  ;;  %v6821_v29 = vmax.f32 %v2013_v18, %v1911_v56  ;;  %v1509_v59 = vsel %vm1451_vm8, %v6795_v31, -1e+09  ;;  %v6830_v48 = vpop.f32.mrb[28].mxu0  ;;  %v6845_v13 = vpop.permute.xlu0 %2240 }
 0x18e   : > { %v6823_v28 = vmax.f32 %v2417_v43, %v2315_v24  ;;  %12187 = vst [vmem:[#allocation139_spill] sm:$0xff] %v6830_v48  ;;  %12188 = vst [vmem:[#allocation140_spill] sm:$0xff] %v6832_v14  ;;  %v6834_v16 = vmax.f32 %v1683_v62, %v1509_v59  ;;  %v1913_v35 = vsel %vm1855_vm9, %v6795_v31, -1e+09  ;;  %v2317_v18 = vsel %vm2259_vm11, %v6795_v31, -1e+09 }
 0x18f   : > { %v1508_v43 = vsel %vm1451_vm8, %v6803_v47, -1e+09  ;;  %12189 = vst [vmem:[#allocation141_spill] sm:$0xff] %v6845_v13  ;;  %v12190_v56 = vld [vmem:[#allocation18_spill] sm:$0xff]  ;;  %3407 = vperm.xlu0 %5349, %v5749_v46   ;;  %v6849_v62 = vmax.f32 %v2087_v37, %v1913_v35  ;;  %v6851_v59 = vmax.f32 %v2491_v25, %v2317_v18  ;;  %v1912_v14 = vsel %vm1855_vm9, %v6803_v47, -1e+09 }
 0x190   : > { %3380 = vperm.xlu1 %5350, %v12190_v56   ;;  %v6853_v24 = vmax.f32 %v1646_v27, %v1508_v43  ;;  %v6858_v31 = vpop.f32.mrb[28].mxu1  ;;  %v6860_v41 = vpop.f32.mrb[29].mxu0  ;;  %v6862_v48 = vmax.f32 %v2050_v33, %v1912_v14  ;;  %v2316_v46 = vsel %vm2259_vm11, %v6803_v47, -1e+09  ;;  %v1510_v37 = vsel %vm1451_vm8, %v6806_v38, -1e+09 }
 0x191   : > { %v1914_v27 = vsel %vm1855_vm9, %v6806_v38, -1e+09  ;;  %v6873_v25 = vmax.f32 %v2454_v44, %v2316_v46  ;;  %v6875_v35 = vmax.f32 %v1720_v54, %v1510_v37  ;;  %v2318_v14 = vsel %vm2259_vm11, %v6806_v38, -1e+09  ;;  %v6882_v33 = vpop.f32.mrb[29].mxu1  ;;  %v6884_v43 = vpop.f32.mrb[30].mxu0 }
 0x192   : > { %v6877_v18 = vmax.f32 %v2124_v3, %v1914_v27  ;;  %v12191_v4 = vld [vmem:[#allocation70_spill] sm:$0xff]  ;;  %v6887_v13 = vmax.f32 %v2528_v49, %v2318_v14  ;;  %v6890_v60 = vmul.f32 0.088388346, %v6563_v32  ;;  %v6893_v46 = vmul.f32 0.088388346, %v6565_v57  ;;  %v6895_v3 = vpop.f32.mrb[30].mxu1  ;;  %v6909_v49 = vpop.permute.xlu1 %2225 }
 0x193   : > { %vm1856_vm12 = vcmp.eq.s32.totalorder %v12191_v4, 1  ;;  %12194 = vst [vmem:[#allocation143_spill] sm:$0xff] %v6895_v3  ;;  %v12195_v44 = vld [vmem:[#allocation20_spill] sm:$0xff]  ;;  %3413 = vperm.xlu0 %5349, %v5761_v52   ;;  %v12197_v45 = vld [vmem:[#allocation71_spill] sm:$0xff]  ;;  %vm2260_vm0 = vcmp.eq.s32.totalorder %v6399_v1, 1  ;;  %v6928_v38 = vpop.f32.mrb[31].mxu0 }
 0x194   : > { %12192 = vst [vmem:[#allocation70_spill] sm:$0xff] %v6890_v60  ;;  %12193 = vst [vmem:[#allocation142_spill] sm:$0xff] %v6893_v46  ;;  %3386 = vperm.xlu1 %5350, %v12195_v44   ;;  %v12196_v54 = vld [vmem:[#allocation48_spill] sm:$0xff]  ;;  %vm1857_vm14 = vcmp.eq.s32.totalorder %v12197_v45, 1  ;;  %v12198_v37 = vld [vmem:[#allocation103_spill] sm:$0xff]  ;;  %v6920_v44 = vpop.permute.xlu0 %2246  ;;  %v6930_v47 = vpop.f32.mrb[31].mxu1 }
 0x195   : > { %vm1453_vm13 = vcmp.eq.s32.totalorder %v12196_v54, 1  ;;  %vm2261_vm15 = vcmp.eq.s32.totalorder %v12198_v37, 1  ;;  %v6904_v32 = vmul.f32 0.088388346, %v6584_v40  ;;  %v6907_v57 = vmul.f32 0.088388346, %v6586_v51 }
 0x196   : > { %12201 = vst [vmem:[#allocation103_spill] sm:$0xff] %v6909_v49  ;;  %v1511_v27 = vsel %vm1452_vm10, %v6890_v60, -1e+09  ;;  %v1915_v14 = vsel %vm1856_vm12, %v6890_v60, -1e+09  ;;  %12202 = vst [vmem:[#allocation144_spill] sm:$0xff] %v6920_v44  ;;  %v6976_v4 = vpop.permute.xlu1 %2231 }
 0x197   : > { %12199 = vst [vmem:[#allocation48_spill] sm:$0xff] %v6904_v32  ;;  %12200 = vst [vmem:[#allocation71_spill] sm:$0xff] %v6907_v57  ;;  %v2319_v52 = vsel %vm2260_vm0, %v6890_v60, -1e+09  ;;  %v1611_v40 = vmax.f32 %v6819_v19, %v1511_v27  ;;  %v2015_v51 = vmax.f32 %v6821_v29, %v1915_v14  ;;  %v1513_v49 = vsel %vm1452_vm10, %v6893_v46, -1e+09  ;;  %3419 = vperm.xlu0 %5349, %v5768_v55  }
 0x198   : > { %v2419_v56 = vmax.f32 %v6823_v28, %v2319_v52  ;;  %v1685_v3 = vmax.f32 %v6834_v16, %v1513_v49  ;;  %v1917_v44 = vsel %vm1856_vm12, %v6893_v46, -1e+09  ;;  %v2321_v19 = vsel %vm2260_vm0, %v6893_v46, -1e+09  ;;  %v12203_v29 = vld [vmem:[#allocation22_spill] sm:$0xff]  ;;  %v6950_v14 = vpop.f32.mrb[32].mxu0 }
 0x199   : > { %v1512_v52 = vsel %vm1452_vm10, %v6904_v32, -1e+09  ;;  %3392 = vperm.xlu1 %5350, %v12203_v29   ;;  %v2089_v28 = vmax.f32 %v6849_v62, %v1917_v44  ;;  %v2493_v16 = vmax.f32 %v6851_v59, %v2321_v19  ;;  %v1916_v27 = vsel %vm1856_vm12, %v6904_v32, -1e+09  ;;  %12204 = vst [vmem:[#allocation145_spill] sm:$0xff] %v6950_v14  ;;  %v6952_v46 = vpop.f32.mrb[32].mxu1 }
 0x19a   : > { %v1648_v49 = vmax.f32 %v6853_v24, %v1512_v52  ;;  %12205 = vst [vmem:[#allocation146_spill] sm:$0xff] %v6952_v46  ;;  %v2052_v60 = vmax.f32 %v6862_v48, %v1916_v27  ;;  %v2320_v55 = vsel %vm2260_vm0, %v6904_v32, -1e+09  ;;  %v1514_v62 = vsel %vm1452_vm10, %v6907_v57, -1e+09  ;;  %v12206_v24 = vld [vmem:[#allocation47_spill] sm:$0xff] }
 0x19b   : > { %v1918_v59 = vsel %vm1856_vm12, %v6907_v57, -1e+09  ;;  %vm1454_vm1 = vcmp.eq.s32.totalorder %v12206_v24, 1  ;;  %v12207_v44 = vld [vmem:[#allocation72_spill] sm:$0xff]  ;;  %v2456_v19 = vmax.f32 %v6873_v25, %v2320_v55  ;;  %v1722_v48 = vmax.f32 %v6875_v35, %v1514_v62  ;;  %v6972_v9 = vpop.f32.mrb[33].mxu0  ;;  %v6974_v29 = vpop.f32.mrb[33].mxu1  ;;  %3425 = vperm.xlu0 %5349, %v5785_v0  }
 0x19c   : > { %vm1858_vm2 = vcmp.eq.s32.totalorder %v12207_v44, 1  ;;  %v2126_v52 = vmax.f32 %v6877_v18, %v1918_v59  ;;  %v2322_v27 = vsel %vm2260_vm0, %v6907_v57, -1e+09  ;;  %12208 = vst [vmem:[#allocation47_spill] sm:$0xff] %v6974_v29  ;;  %12209 = vst [vmem:[#allocation72_spill] sm:$0xff] %v6976_v4  ;;  %v6988_v35 = vpop.permute.xlu0 %2560  ;;  %v12213_v1 = vld [vmem:[#allocation24_spill] sm:$0xff] }
 0x19d   : > { %v2530_v46 = vmax.f32 %v6887_v13, %v2322_v27  ;;  %v6980_v14 = vmul.f32 0.088388346, %v6607_v53  ;;  %v6983_v55 = vmul.f32 0.088388346, %v6609_v2  ;;  %v6986_v25 = vmul.f32 0.088388346, %v6653_v6  ;;  %3398 = vperm.xlu1 %5350, %v12213_v1  }
 0x19e   : > { %vm2262_vm3 = vcmp.eq.s32.totalorder %v6468_v50, 1  ;;  %v6994_v18 = vmul.f32 0.088388346, %v6655_v61  ;;  %v6997_v53 = vmul.f32 0.088388346, %v6678_v12  ;;  %vm2655_vm4 = vcmp.eq.s32.totalorder %v6988_v35, 1 }
 0x19f   : > { %12210 = vst [vmem:[#allocation147_spill] sm:$0xff] %v6980_v14  ;;  %12211 = vst [vmem:[#allocation148_spill] sm:$0xff] %v6983_v55  ;;  %v1515_v2 = vsel %vm1453_vm13, %v6980_v14, -1e+09  ;;  %v1919_v6 = vsel %vm1857_vm14, %v6980_v14, -1e+09  ;;  %3431 = vperm.xlu0 %5349, %v5795_v5  }
 0x1a0   : > { %12212 = vst [vmem:[#allocation149_spill] sm:$0xff] %v6986_v25  ;;  %12214 = vst [vmem:[#allocation150_spill] sm:$0xff] %v6994_v18  ;;  %v2323_v13 = vsel %vm2261_vm15, %v6980_v14, -1e+09  ;;  %v7009_v62 = vmax.f32 %v1611_v40, %v1515_v2  ;;  %v7011_v61 = vmax.f32 %v2015_v51, %v1919_v6  ;;  %v1517_v59 = vsel %vm1453_vm13, %v6983_v55, -1e+09  ;;  %v7048_v14 = vpop.permute.xlu1 %2237 }
 0x1a1   : > { %12215 = vst [vmem:[#allocation151_spill] sm:$0xff] %v6997_v53  ;;  %v7013_v12 = vmax.f32 %v2419_v56, %v2323_v13  ;;  %v7018_v27 = vpop.f32.mrb[34].mxu0  ;;  %v7020_v0 = vpop.f32.mrb[34].mxu1  ;;  %v7022_v1 = vmax.f32 %v1685_v3, %v1517_v59  ;;  %v1921_v4 = vsel %vm1857_vm14, %v6983_v55, -1e+09  ;;  %v12218_v51 = vld [vmem:[#allocation26_spill] sm:$0xff] }
 0x1a2   : > { %12216 = vst [vmem:[#allocation152_spill] sm:$0xff] %v7018_v27  ;;  %12217 = vst [vmem:[#allocation153_spill] sm:$0xff] %v7020_v0  ;;  %v2325_v40 = vsel %vm2261_vm15, %v6983_v55, -1e+09  ;;  %v1516_v56 = vsel %vm1453_vm13, %v6986_v25, -1e+09  ;;  %3404 = vperm.xlu1 %5350, %v12218_v51   ;;  %v7035_v2 = vmax.f32 %v2089_v28, %v1921_v4 }
 0x1a3   : > { %v7037_v3 = vmax.f32 %v2493_v16, %v2325_v40  ;;  %v7039_v6 = vmax.f32 %v1648_v49, %v1516_v56  ;;  %v1920_v13 = vsel %vm1857_vm14, %v6986_v25, -1e+09  ;;  %v7044_v59 = vpop.f32.mrb[35].mxu0  ;;  %v7046_v55 = vpop.f32.mrb[35].mxu1  ;;  %12221 = vst [vmem:[#allocation156_spill] sm:$0xff] %v7048_v14  ;;  %3437 = vperm.xlu0 %5349, %v5806_v17   ;;  %v12228_v51 = vld [vmem:[#allocation94_spill] sm:$0xff] }
 0x1a4   : > { %12219 = vst [vmem:[#allocation154_spill] sm:$0xff] %v7044_v59  ;;  %12220 = vst [vmem:[#allocation155_spill] sm:$0xff] %v7046_v55  ;;  %v7050_v0 = vmax.f32 %v2052_v60, %v1920_v13  ;;  %v2324_v28 = vsel %vm2261_vm15, %v6986_v25, -1e+09  ;;  %v1518_v16 = vsel %vm1453_vm13, %v6994_v18, -1e+09  ;;  %v2570_v14 = vpop.permute.xlu0 %2569 }
 0x1a5   : > { %v1922_v49 = vsel %vm1857_vm14, %v6994_v18, -1e+09  ;;  %v7061_v4 = vmax.f32 %v2456_v19, %v2324_v28  ;;  %v7063_v40 = vmax.f32 %v1722_v48, %v1518_v16  ;;  %v2326_v60 = vsel %vm2261_vm15, %v6994_v18, -1e+09  ;;  %v7070_v13 = vpop.f32.mrb[36].mxu0  ;;  %v7072_v5 = vpop.f32.mrb[36].mxu1 }
 0x1a6   : > { %v7065_v56 = vmax.f32 %v2126_v52, %v1922_v49  ;;  %12222 = vst [vmem:[#allocation157_spill] sm:$0xff] %v7070_v13  ;;  %12223 = vst [vmem:[#allocation158_spill] sm:$0xff] %v7072_v5  ;;  %v7074_v54 = vmax.f32 %v2530_v46, %v2326_v60  ;;  %v7079_v45 = vsel %vm1454_vm1, %v6997_v53, -1e+09  ;;  %v7084_v19 = vsel %vm1858_vm2, %v6997_v53, -1e+09 }
 0x1a7   : > { %v7089_v37 = vsel %vm2262_vm3, %v6997_v53, -1e+09  ;;  %v12224_v48 = vld [vmem:[#allocation28_spill] sm:$0xff]  ;;  %v7100_v16 = vmul.f32 0.088388346, %v6680_v8  ;;  %v7102_v49 = vpop.f32.mrb[37].mxu0  ;;  %3443 = vperm.xlu0 %5349, %v5817_v23  }
 0x1a8   : > { %3410 = vperm.xlu1 %5350, %v12224_v48   ;;  %12226 = vst [vmem:[#allocation160_spill] sm:$0xff] %v7102_v49  ;;  %v7104_v60 = vpop.f32.mrb[37].mxu1  ;;  %v7109_v17 = vsel %vm2655_vm4, %v12228_v51, -1e+09  ;;  %v12229_v48 = vld [vmem:[#allocation96_spill] sm:$0xff]  ;;  %v12230_v52 = vld [vmem:[#allocation95_spill] sm:$0xff] }
 0x1a9   : > { %12225 = vst [vmem:[#allocation159_spill] sm:$0xff] %v7100_v16  ;;  %12227 = vst [vmem:[#allocation161_spill] sm:$0xff] %v7104_v60  ;;  %v7114_v46 = vsel %vm2655_vm4, %v12229_v48, -1e+09  ;;  %v7119_v28 = vsel %vm2655_vm4, %v12230_v52, -1e+09 }
 0x1aa   : > { %v7124_v8 = vsel %vm1454_vm1, %v7100_v16, -1e+09  ;;  %v7129_v51 = vsel %vm1858_vm2, %v7100_v16, -1e+09  ;;  %v7134_v48 = vsel %vm2262_vm3, %v7100_v16, -1e+09 }
 0x1ab   : > { %v12231_v60 = vld [vmem:[#allocation50_spill] sm:$0xff]  ;;  %v12232_v52 = vld [vmem:[#allocation73_spill] sm:$0xff]  ;;  %v1687_v49 = vmax.f32 %v7022_v1, %v7124_v8  ;;  %v7149_v55 = vpop.f32.mrb[38].mxu0  ;;  %v7151_v59 = vpop.f32.mrb[38].mxu1  ;;  %vm2263_vm7 = vcmp.eq.s32.totalorder %v6262_v22, 1  ;;  %vm2658_vm8 = vcmp.eq.s32.totalorder %v2570_v14, 1  ;;  %3449 = vperm.xlu0 %5349, %v5834_v36  }
 0x1ac   : > { %vm1455_vm5 = vcmp.eq.s32.totalorder %v12231_v60, 1  ;;  %vm1859_vm6 = vcmp.eq.s32.totalorder %v12232_v52, 1  ;;  %v12233_v25 = vld [vmem:[#allocation97_spill] sm:$0xff]  ;;  %12234 = vst [vmem:[#allocation50_spill] sm:$0xff] %v7149_v55  ;;  %12235 = vst [vmem:[#allocation73_spill] sm:$0xff] %v7151_v59  ;;  %v12236_v27 = vld [vmem:[#allocation30_spill] sm:$0xff]  ;;  %v7156_v1 = vpop.permute.xlu1 %2243 }
 0x1ad   : > { %v7147_v13 = vsel %vm2655_vm4, %v12233_v25, -1e+09  ;;  %3416 = vperm.xlu1 %5350, %v12236_v27   ;;  %12237 = vst [vmem:[#allocation162_spill] sm:$0xff] %v7156_v1  ;;  %v7159_v8 = vmul.f32 0.088388346, %v6707_v21  ;;  %v7193_v59 = vpop.f32.mrb[39].mxu0 }
 0x1ae   : > { %v7162_v18 = vmul.f32 0.088388346, %v6709_v63  ;;  %v7166_v35 = vsel %vm2658_vm8, %v6275_v34, -1e+09  ;;  %v7170_v5 = vsel %vm2658_vm8, %v6376_v39, -1e+09 }
 0x1af   : > { %12238 = vst [vmem:[#allocation163_spill] sm:$0xff] %v7159_v8  ;;  %v7174_v23 = vsel %vm2658_vm8, %v6367_v15, -1e+09  ;;  %v1520_v21 = vsel %vm1454_vm1, %v7159_v8, -1e+09  ;;  %12240 = vst [vmem:[#allocation165_spill] sm:$0xff] %v7193_v59 }
 0x1b0   : > { %12239 = vst [vmem:[#allocation164_spill] sm:$0xff] %v7162_v18  ;;  %v1924_v63 = vsel %vm1858_vm2, %v7159_v8, -1e+09  ;;  %v2328_v34 = vsel %vm2262_vm3, %v7159_v8, -1e+09  ;;  %v1650_v25 = vmax.f32 %v7039_v6, %v1520_v21  ;;  %v7195_v55 = vpop.f32.mrb[39].mxu1 }
 0x1b1   : > { %v2054_v15 = vmax.f32 %v7050_v0, %v1924_v63  ;;  %v2458_v27 = vmax.f32 %v7061_v4, %v2328_v34  ;;  %v1522_v1 = vsel %vm1454_vm1, %v7162_v18, -1e+09  ;;  %12241 = vst [vmem:[#allocation166_spill] sm:$0xff] %v7195_v55  ;;  %v12242_v29 = vld [vmem:[#allocation32_spill] sm:$0xff]  ;;  %v1926_v0 = vsel %vm1858_vm2, %v7162_v18, -1e+09 }
 0x1b2   : > { %3422 = vperm.xlu1 %5350, %v12242_v29   ;;  %v1724_v39 = vmax.f32 %v7063_v40, %v1522_v1  ;;  %v2330_v34 = vsel %vm2262_vm3, %v7162_v18, -1e+09  ;;  %v7208_v6 = vpop.f32.mrb[40].mxu0  ;;  %v7210_v4 = vpop.f32.mrb[40].mxu1  ;;  %v12245_v21 = vld [vmem:[#allocation49_spill] sm:$0xff]  ;;  %v12246_v63 = vld [vmem:[#allocation74_spill] sm:$0xff]  ;;  %v2128_v44 = vmax.f32 %v7065_v56, %v1926_v0 }
 0x1b3   : > { %12243 = vst [vmem:[#allocation167_spill] sm:$0xff] %v7208_v6  ;;  %12244 = vst [vmem:[#allocation168_spill] sm:$0xff] %v7210_v4  ;;  %vm1456_vm9 = vcmp.eq.s32.totalorder %v12245_v21, 1  ;;  %vm1860_vm10 = vcmp.eq.s32.totalorder %v12246_v63, 1  ;;  %vm2264_vm11 = vcmp.eq.s32.totalorder %v6542_v30, 1  ;;  %v2532_v40 = vmax.f32 %v7074_v54, %v2330_v34  ;;  %v7223_v24 = vpop.f32.mrb[41].mxu0  ;;  %v7227_v29 = vpop.permute.xlu1 %2249 }
 0x1b4   : > { %v7221_v1 = vsel %vm2658_vm8, %v6378_v42, -1e+09  ;;  %12247 = vst [vmem:[#allocation49_spill] sm:$0xff] %v7223_v24  ;;  %v7225_v36 = vpop.f32.mrb[41].mxu1  ;;  %12249 = vst [vmem:[#allocation169_spill] sm:$0xff] %v7227_v29  ;;  %v12250_v6 = vld [vmem:[#allocation133_spill] sm:$0xff] }
 0x1b5   : > { %12248 = vst [vmem:[#allocation74_spill] sm:$0xff] %v7225_v36  ;;  %v7232_v56 = vmul.f32 0.088388346, %v12250_v6  ;;  %v12252_v54 = vld [vmem:[#allocation134_spill] sm:$0xff]  ;;  %v7238_v34 = vmul.f32 0.088388346, %v6759_v20 }
 0x1b6   : > { %v7235_v0 = vmul.f32 0.088388346, %v12252_v54  ;;  %v7241_v14 = vmul.f32 0.088388346, %v6761_v11  ;;  %v7244_v50 = vmul.f32 0.088388346, %v6783_v26  ;;  %v12261_v54 = vmax.f32 %v7011_v61, %v7084_v19 }
 0x1b7   : > { %12251 = vst [vmem:[#allocation133_spill] sm:$0xff] %v7232_v56  ;;  %12254 = vst [vmem:[#allocation170_spill] sm:$0xff] %v7238_v34  ;;  %v7247_v42 = vmul.f32 0.088388346, %v6785_v10  ;;  %v12258_v29 = vld [vmem:[#allocation34_spill] sm:$0xff]  ;;  %v12259_v4 = vld [vmem:[#allocation41_spill] sm:$0xff]  ;;  %v12260_v10 = vmax.f32 %v7009_v62, %v7079_v45  ;;  %v12265_v45 = vmax.f32 %v7035_v2, %v7129_v51 }
 0x1b8   : > { %12253 = vst [vmem:[#allocation134_spill] sm:$0xff] %v7235_v0  ;;  %12255 = vst [vmem:[#allocation171_spill] sm:$0xff] %v7241_v14  ;;  %3428 = vperm.xlu1 %5350, %v12258_v29   ;;  %3455 = vperm.xlu0 %5349, %v12259_v4   ;;  %v1523_v6 = vsel %vm1455_vm5, %v7232_v56, -1e+09  ;;  %v1927_v20 = vsel %vm1859_vm6, %v7232_v56, -1e+09  ;;  %v12262_v29 = vmax.f32 %v7013_v12, %v7089_v37 }
 0x1b9   : > { %12256 = vst [vmem:[#allocation172_spill] sm:$0xff] %v7244_v50  ;;  %12257 = vst [vmem:[#allocation173_spill] sm:$0xff] %v7247_v42  ;;  %v2331_v11 = vsel %vm2263_vm7, %v7232_v56, -1e+09  ;;  %v7263_v26 = vmax.f32 %v12260_v10, %v1523_v6  ;;  %v7268_v4 = vmax.f32 %v12261_v54, %v1927_v20  ;;  %v1525_v24 = vsel %vm1455_vm5, %v7235_v0, -1e+09  ;;  %v2564_v54 = vpop.permute.xlu1 %2563 }
 0x1ba   : > { %v7273_v36 = vmax.f32 %v12262_v29, %v2331_v11  ;;  %v7278_v55 = vpop.f32.mrb[42].mxu0  ;;  %v7280_v59 = vpop.f32.mrb[42].mxu1  ;;  %v7282_v62 = vmax.f32 %v1687_v49, %v1525_v24  ;;  %v1929_v61 = vsel %vm1859_vm6, %v7235_v0, -1e+09  ;;  %v2333_v12 = vsel %vm2263_vm7, %v7235_v0, -1e+09 }
 0x1bb   : > { %12263 = vst [vmem:[#allocation174_spill] sm:$0xff] %v7278_v55  ;;  %12264 = vst [vmem:[#allocation175_spill] sm:$0xff] %v7280_v59  ;;  %v1524_v29 = vsel %vm1455_vm5, %v7238_v34, -1e+09  ;;  %v7296_v19 = vmax.f32 %v12265_v45, %v1929_v61  ;;  %v12266_v37 = vmax.f32 %v7037_v3, %v7134_v48  ;;  %v1928_v6 = vsel %vm1859_vm6, %v7238_v34, -1e+09 }
 0x1bc   : > { %v7303_v24 = vmax.f32 %v1650_v25, %v1524_v29  ;;  %v7308_v20 = vpop.f32.mrb[43].mxu0  ;;  %v7310_v11 = vpop.f32.mrb[43].mxu1  ;;  %v12269_v10 = vld [vmem:[#allocation36_spill] sm:$0xff]  ;;  %v12270_v51 = vld [vmem:[#allocation43_spill] sm:$0xff]  ;;  %v7314_v2 = vmax.f32 %v2054_v15, %v1928_v6  ;;  %v2332_v3 = vsel %vm2263_vm7, %v7238_v34, -1e+09 }
 0x1bd   : > { %v7301_v49 = vmax.f32 %v12266_v37, %v2333_v12  ;;  %12267 = vst [vmem:[#allocation176_spill] sm:$0xff] %v7308_v20  ;;  %12268 = vst [vmem:[#allocation177_spill] sm:$0xff] %v7310_v11  ;;  %3434 = vperm.xlu1 %5350, %v12269_v10   ;;  %3461 = vperm.xlu0 %5349, %v12270_v51   ;;  %v1526_v25 = vsel %vm1455_vm5, %v7241_v14, -1e+09  ;;  %v1930_v48 = vsel %vm1859_vm6, %v7241_v14, -1e+09 }
 0x1be   : > { %v7325_v61 = vmax.f32 %v2458_v27, %v2332_v3  ;;  %v7327_v12 = vmax.f32 %v1724_v39, %v1526_v25  ;;  %v7329_v29 = vmax.f32 %v2128_v44, %v1930_v48  ;;  %v2334_v15 = vsel %vm2263_vm7, %v7241_v14, -1e+09  ;;  %v7334_v45 = vpop.f32.mrb[44].mxu0  ;;  %v7336_v37 = vpop.f32.mrb[44].mxu1  ;;  %v12275_v48 = vld [vmem:[#allocation38_spill] sm:$0xff]  ;;  %v12277_v10 = vld [vmem:[#allocation99_spill] sm:$0xff] }
 0x1bf   : > { %12271 = vst [vmem:[#allocation178_spill] sm:$0xff] %v7334_v45  ;;  %12272 = vst [vmem:[#allocation179_spill] sm:$0xff] %v7336_v37  ;;  %v7338_v60 = vmax.f32 %v2532_v40, %v2334_v15  ;;  %v7343_v52 = vsel %vm1456_vm9, %v7244_v50, -1e+09  ;;  %v7348_v39 = vsel %vm1860_vm10, %v7244_v50, -1e+09  ;;  %v2576_v27 = vpop.permute.xlu0 %2575 }
 0x1c0   : > { %v7353_v22 = vsel %vm2264_vm11, %v7244_v50, -1e+09  ;;  %v7364_v6 = vsel %vm1456_vm9, %v7247_v42, -1e+09  ;;  %v7366_v3 = vpop.f32.mrb[45].mxu0  ;;  %v7368_v25 = vpop.f32.mrb[45].mxu1 }
 0x1c1   : > { %12273 = vst [vmem:[#allocation180_spill] sm:$0xff] %v7366_v3  ;;  %12274 = vst [vmem:[#allocation181_spill] sm:$0xff] %v7368_v25  ;;  %3440 = vperm.xlu1 %5350, %v12275_v48   ;;  %v7376_v44 = vsel %vm1860_vm10, %v7247_v42, -1e+09  ;;  %v7381_v40 = vsel %vm2264_vm11, %v7247_v42, -1e+09 }
 0x1c2   : > { %vm2656_vm12 = vcmp.eq.s32.totalorder %v2564_v54, 1  ;;  %v7383_v51 = vpop.f32.mrb[46].mxu0  ;;  %v12278_v3 = vld [vmem:[#allocation101_spill] sm:$0xff]  ;;  %v7391_v45 = vpop.f32.mrb[46].mxu1  ;;  %v12281_v54 = vmax.f32 %v7109_v17, %v7166_v35  ;;  %v12283_v48 = vld [vmem:[#allocation100_spill] sm:$0xff]  ;;  %v12284_v14 = vld [vmem:[#allocation102_spill] sm:$0xff]  ;;  %v12288_v17 = vmax.f32 %v7147_v13, %v7221_v1 }
 0x1c3   : > { %12276 = vst [vmem:[#allocation182_spill] sm:$0xff] %v7383_v51  ;;  %v2691_v25 = vsel %vm2656_vm12, %v12277_v10, -1e+09  ;;  %v2692_v37 = vsel %vm2656_vm12, %v12278_v3, -1e+09  ;;  %12279 = vst [vmem:[#allocation183_spill] sm:$0xff] %v7391_v45  ;;  %v12282_v51 = vmax.f32 %v7114_v46, %v7170_v5  ;;  %v12287_v3 = vmax.f32 %v7119_v28, %v7174_v23  ;;  %v2567_v23 = vpop.permute.xlu1 %2566 }
 0x1c4   : > { %v7393_v11 = vpop.f32.mrb[47].mxu0  ;;  %v2816_v20 = vmax.f32 %v12281_v54, %v2691_v25  ;;  %v2693_v55 = vsel %vm2656_vm12, %v12283_v48, -1e+09  ;;  %v2694_v15 = vsel %vm2656_vm12, %v12284_v14, -1e+09  ;;  %v7403_v0 = vpop.f32.mrb[47].mxu1 }
 0x1c5   : > { %12280 = vst [vmem:[#allocation184_spill] sm:$0xff] %v7393_v11  ;;  %v2853_v59 = vmax.f32 %v12282_v51, %v2692_v37  ;;  %12285 = vst [vmem:[#allocation185_spill] sm:$0xff] %v7403_v0  ;;  %v7405_v10 = vpop.f32.mrb[48].mxu0  ;;  %v2890_v11 = vmax.f32 %v12287_v3, %v2693_v55  ;;  %v2927_v35 = vmax.f32 %v12288_v17, %v2694_v15  ;;  %vm2660_vm13 = vcmp.eq.s32.totalorder %v2576_v27, 1  ;;  %v7416_v46 = vpop.f32.mrb[48].mxu1  ;;  %v12291_v51 = vld [vmem:[#allocation40_spill] sm:$0xff] }
 0x1c6   : > { %12286 = vst [vmem:[#allocation186_spill] sm:$0xff] %v7405_v10  ;;  %v7414_v5 = vmul.f32 0.088388346, %v6808_v58  ;;  %12290 = vst [vmem:[#allocation188_spill] sm:$0xff] %v7416_v46  ;;  %3446 = vperm.xlu1 %5350, %v12291_v51   ;;  %v12292_v37 = vld [vmem:[#allocation119_spill] sm:$0xff]  ;;  %v12293_v54 = vld [vmem:[#allocation121_spill] sm:$0xff] }
 0x1c7   : > { %v2707_v25 = vsel %vm2660_vm13, %v12292_v37, -1e+09  ;;  %v2708_v14 = vsel %vm2660_vm13, %v12293_v54, -1e+09  ;;  %v12294_v48 = vld [vmem:[#allocation120_spill] sm:$0xff]  ;;  %v12296_v27 = vld [vmem:[#allocation122_spill] sm:$0xff] }
 0x1c8   : > { %12289 = vst [vmem:[#allocation187_spill] sm:$0xff] %v7414_v5  ;;  %v2709_v10 = vsel %vm2660_vm13, %v12294_v48, -1e+09  ;;  %v12295_v55 = vld [vmem:[#allocation52_spill] sm:$0xff]  ;;  %v2817_v28 = vmax.f32 %v2816_v20, %v2707_v25  ;;  %v2854_v13 = vmax.f32 %v2853_v59, %v2708_v14  ;;  %v2710_v3 = vsel %vm2660_vm13, %v12296_v27, -1e+09  ;;  %v2582_v20 = vpop.permute.xlu0 %2581 }
 0x1c9   : > { %vm1457_vm14 = vcmp.eq.s32.totalorder %v12295_v55, 1  ;;  %v2891_v1 = vmax.f32 %v2890_v11, %v2709_v10  ;;  %v7424_v58 = vpop.f32.mrb[49].mxu0  ;;  %v7426_v15 = vpop.f32.mrb[49].mxu1  ;;  %v12299_v17 = vld [vmem:[#allocation75_spill] sm:$0xff]  ;;  %v12300_v51 = vld [vmem:[#allocation109_spill] sm:$0xff]  ;;  %v2928_v37 = vmax.f32 %v2927_v35, %v2710_v3  ;;  %v12304_v54 = vld [vmem:[#allocation42_spill] sm:$0xff] }
 0x1ca   : > { %12297 = vst [vmem:[#allocation52_spill] sm:$0xff] %v7424_v58  ;;  %12298 = vst [vmem:[#allocation189_spill] sm:$0xff] %v7426_v15  ;;  %vm1861_vm15 = vcmp.eq.s32.totalorder %v12299_v17, 1  ;;  %vm2265_vm0 = vcmp.eq.s32.totalorder %v12300_v51, 1  ;;  %v7433_v48 = vsel %vm1456_vm9, %v7414_v5, -1e+09  ;;  %3452 = vperm.xlu1 %5350, %v12304_v54  }
 0x1cb   : > { %v7438_v59 = vsel %vm1860_vm10, %v7414_v5, -1e+09  ;;  %v7443_v14 = vsel %vm2264_vm11, %v7414_v5, -1e+09  ;;  %v1652_v11 = vmax.f32 %v7303_v24, %v7433_v48  ;;  %v7452_v25 = vmul.f32 0.088388346, %v6828_v7 }
 0x1cc   : > { %v2056_v10 = vmax.f32 %v7314_v2, %v7438_v59  ;;  %v2460_v35 = vmax.f32 %v7325_v61, %v7443_v14  ;;  %v7454_v3 = vpop.f32.mrb[50].mxu0  ;;  %v7456_v27 = vpop.f32.mrb[50].mxu1  ;;  %vm2657_vm1 = vcmp.eq.s32.totalorder %v2567_v23, 1  ;;  %vm2662_vm2 = vcmp.eq.s32.totalorder %v2582_v20, 1  ;;  %v12305_v15 = vld [vmem:[#allocation139_spill] sm:$0xff]  ;;  %v12309_v21 = vld [vmem:[#allocation106_spill] sm:$0xff] }
 0x1cd   : > { %12301 = vst [vmem:[#allocation75_spill] sm:$0xff] %v7452_v25  ;;  %12302 = vst [vmem:[#allocation109_spill] sm:$0xff] %v7454_v3  ;;  %v7460_v58 = vmul.f32 0.088388346, %v12305_v15  ;;  %v7463_v24 = vmul.f32 0.088388346, %v6858_v31 }
 0x1ce   : > { %12303 = vst [vmem:[#allocation190_spill] sm:$0xff] %v7456_v27  ;;  %v1530_v2 = vsel %vm1456_vm9, %v7452_v25, -1e+09  ;;  %v1934_v7 = vsel %vm1860_vm10, %v7452_v25, -1e+09  ;;  %v12308_v31 = vld [vmem:[#allocation104_spill] sm:$0xff] }
 0x1cf   : > { %12306 = vst [vmem:[#allocation139_spill] sm:$0xff] %v7460_v58  ;;  %12307 = vst [vmem:[#allocation191_spill] sm:$0xff] %v7463_v24  ;;  %v2338_v61 = vsel %vm2264_vm11, %v7452_v25, -1e+09  ;;  %v1726_v48 = vmax.f32 %v7327_v12, %v1530_v2  ;;  %v2130_v23 = vmax.f32 %v7329_v29, %v1934_v7  ;;  %v2695_v59 = vsel %vm2657_vm1, %v12308_v31, -1e+09 }
 0x1d0   : > { %v2534_v15 = vmax.f32 %v7338_v60, %v2338_v61  ;;  %v7478_v14 = vmax.f32 %v2817_v28, %v2695_v59  ;;  %v2696_v54 = vsel %vm2657_vm1, %v12309_v21, -1e+09  ;;  %v12310_v27 = vld [vmem:[#allocation105_spill] sm:$0xff]  ;;  %v12311_v63 = vld [vmem:[#allocation107_spill] sm:$0xff]  ;;  %v12312_v0 = vld [vmem:[#allocation44_spill] sm:$0xff] }
 0x1d1   : > { %v2697_v3 = vsel %vm2657_vm1, %v12310_v27, -1e+09  ;;  %v2698_v46 = vsel %vm2657_vm1, %v12311_v63, -1e+09  ;;  %3458 = vperm.xlu1 %5350, %v12312_v0   ;;  %v12313_v30 = vld [vmem:[#allocation51_spill] sm:$0xff]  ;;  %v7485_v45 = vmax.f32 %v2854_v13, %v2696_v54  ;;  %v12314_v60 = vld [vmem:[#allocation129_spill] sm:$0xff] }
 0x1d2   : > { %vm1458_vm3 = vcmp.eq.s32.totalorder %v12313_v30, 1  ;;  %v7487_v12 = vmax.f32 %v2891_v1, %v2697_v3  ;;  %v7489_v29 = vmax.f32 %v2928_v37, %v2698_v46  ;;  %v2715_v28 = vsel %vm2662_vm2, %v12314_v60, -1e+09  ;;  %v12315_v2 = vld [vmem:[#allocation76_spill] sm:$0xff]  ;;  %v12316_v61 = vld [vmem:[#allocation46_spill] sm:$0xff]  ;;  %v12318_v27 = vld [vmem:[#allocation69_spill] sm:$0xff] }
 0x1d3   : > { %vm1862_vm4 = vcmp.eq.s32.totalorder %v12315_v2, 1  ;;  %v2819_v7 = vmax.f32 %v7478_v14, %v2715_v28  ;;  %v2716_v59 = vsel %vm2662_vm2, %v12316_v61, -1e+09  ;;  %v12317_v63 = vld [vmem:[#allocation132_spill] sm:$0xff]  ;;  %v2718_v54 = vsel %vm2662_vm2, %v12318_v27, -1e+09 }
 0x1d4   : > { %v2717_v0 = vsel %vm2662_vm2, %v12317_v63, -1e+09  ;;  %v12319_v13 = vld [vmem:[#allocation124_spill] sm:$0xff]  ;;  %v2856_v46 = vmax.f32 %v7485_v45, %v2716_v59  ;;  %v2930_v1 = vmax.f32 %v7489_v29, %v2718_v54  ;;  %v1531_v3 = vsel %vm1457_vm14, %v7460_v58, -1e+09  ;;  %v12337_v51 = vld [vmem:[#allocation115_spill] sm:$0xff] }
 0x1d5   : > { %vm2266_vm5 = vcmp.eq.s32.totalorder %v12319_v13, 1  ;;  %v2893_v37 = vmax.f32 %v7487_v12, %v2717_v0  ;;  %v12320_v14 = vmax.f32 %v7263_v26, %v7343_v52  ;;  %v1935_v20 = vsel %vm1861_vm15, %v7460_v58, -1e+09  ;;  %v2573_v12 = vpop.permute.xlu1 %2572  ;;  %v12338_v21 = vld [vmem:[#allocation117_spill] sm:$0xff]  ;;  %v12353_v2 = vld [vmem:[#allocation127_spill] sm:$0xff] }
 0x1d6   : > { %v2339_v45 = vsel %vm2265_vm0, %v7460_v58, -1e+09  ;;  %v1533_v0 = vsel %vm1457_vm14, %v7463_v24, -1e+09  ;;  %v12321_v29 = vmax.f32 %v7268_v4, %v7348_v39  ;;  %v12322_v26 = vmax.f32 %v7273_v36, %v7353_v22 }
 0x1d7   : > { %v7511_v28 = vmax.f32 %v12320_v14, %v1531_v3  ;;  %v12323_v54 = vmax.f32 %v7282_v62, %v7364_v6  ;;  %v1937_v14 = vsel %vm1861_vm15, %v7463_v24, -1e+09  ;;  %v12324_v27 = vmax.f32 %v7296_v19, %v7376_v44  ;;  %v12329_v19 = vld [vmem:[#allocation143_spill] sm:$0xff] }
 0x1d8   : > { %v7525_v59 = vmax.f32 %v12321_v29, %v1935_v20  ;;  %v7530_v52 = vmax.f32 %v12322_v26, %v2339_v45  ;;  %v2341_v36 = vsel %vm2265_vm0, %v7463_v24, -1e+09  ;;  %v7549_v39 = vmul.f32 0.088388346, %v6860_v41  ;;  %v7585_v29 = vpop.f32.mrb[51].mxu1 }
 0x1d9   : > { %v7535_v3 = vmax.f32 %v12323_v54, %v1533_v0  ;;  %v7543_v4 = vmax.f32 %v12324_v27, %v1937_v14  ;;  %v7552_v62 = vmul.f32 0.088388346, %v6882_v33  ;;  %v12327_v22 = vmax.f32 %v7301_v49, %v7381_v40  ;;  %v7565_v27 = vpop.f32.mrb[51].mxu0  ;;  %12332 = vst [vmem:[#allocation193_spill] sm:$0xff] %v7585_v29 }
 0x1da   : > { %12325 = vst [vmem:[#allocation51_spill] sm:$0xff] %v7549_v39  ;;  %v7560_v20 = vmul.f32 0.088388346, %v6884_v43  ;;  %v7563_v44 = vmul.f32 0.088388346, %v12329_v19  ;;  %vm2659_vm6 = vcmp.eq.s32.totalorder %v2573_v12, 1 }
 0x1db   : > { %12326 = vst [vmem:[#allocation76_spill] sm:$0xff] %v7552_v62  ;;  %v7557_v6 = vmax.f32 %v12327_v22, %v2341_v36  ;;  %12331 = vst [vmem:[#allocation192_spill] sm:$0xff] %v7565_v27  ;;  %v1532_v41 = vsel %vm1457_vm14, %v7549_v39, -1e+09  ;;  %v1936_v33 = vsel %vm1861_vm15, %v7549_v39, -1e+09 }
 0x1dc   : > { %12328 = vst [vmem:[#allocation124_spill] sm:$0xff] %v7560_v20  ;;  %12330 = vst [vmem:[#allocation143_spill] sm:$0xff] %v7563_v44  ;;  %v2340_v49 = vsel %vm2265_vm0, %v7549_v39, -1e+09  ;;  %v7576_v43 = vmax.f32 %v1652_v11, %v1532_v41  ;;  %v7578_v40 = vmax.f32 %v2056_v10, %v1936_v33  ;;  %v1534_v0 = vsel %vm1457_vm14, %v7552_v62, -1e+09 }
 0x1dd   : > { %v7580_v45 = vmax.f32 %v2460_v35, %v2340_v49  ;;  %v7587_v26 = vmax.f32 %v1726_v48, %v1534_v0  ;;  %v1938_v54 = vsel %vm1861_vm15, %v7552_v62, -1e+09  ;;  %v2342_v11 = vsel %vm2265_vm0, %v7552_v62, -1e+09  ;;  %v7639_v33 = vpop.f32.mrb[52].mxu0  ;;  %v7641_v49 = vpop.f32.mrb[52].mxu1 }
 0x1de   : > { %v7598_v10 = vsel %vm1458_vm3, %v7560_v20, -1e+09  ;;  %v7600_v35 = vmax.f32 %v2130_v23, %v1938_v54  ;;  %v7602_v55 = vmax.f32 %v2534_v15, %v2342_v11  ;;  %v7609_v17 = vsel %vm1862_vm4, %v7560_v20, -1e+09  ;;  %12333 = vst [vmem:[#allocation194_spill] sm:$0xff] %v7639_v33  ;;  %12334 = vst [vmem:[#allocation195_spill] sm:$0xff] %v7641_v49  ;;  %v2588_v48 = vpop.permute.xlu0 %2587 }
 0x1df   : > { %v7616_v14 = vsel %vm2266_vm5, %v7560_v20, -1e+09  ;;  %v7621_v23 = vsel %vm1458_vm3, %v7563_v44, -1e+09  ;;  %v7626_v15 = vsel %vm1862_vm4, %v7563_v44, -1e+09 }
 0x1e0   : > { %v7637_v41 = vsel %vm2266_vm5, %v7563_v44, -1e+09  ;;  %v12335_v54 = vld [vmem:[#allocation114_spill] sm:$0xff]  ;;  %v12336_v36 = vld [vmem:[#allocation116_spill] sm:$0xff]  ;;  %v2705_v19 = vsel %vm2659_vm6, %v12337_v51, -1e+09 }
 0x1e1   : > { %v2703_v11 = vsel %vm2659_vm6, %v12335_v54, -1e+09  ;;  %v2704_v22 = vsel %vm2659_vm6, %v12336_v36, -1e+09  ;;  %v2894_v60 = vmax.f32 %v2893_v37, %v2705_v19  ;;  %v2706_v31 = vsel %vm2659_vm6, %v12338_v21, -1e+09 }
 0x1e2   : > { %v2820_v63 = vmax.f32 %v2819_v7, %v2703_v11  ;;  %v2857_v61 = vmax.f32 %v2856_v46, %v2704_v22  ;;  %v7653_v49 = vpop.f32.mrb[53].mxu0  ;;  %v7655_v33 = vpop.f32.mrb[53].mxu1  ;;  %v2931_v0 = vmax.f32 %v2930_v1, %v2706_v31  ;;  %vm2664_vm7 = vcmp.eq.s32.totalorder %v2588_v48, 1  ;;  %v12343_v51 = vld [vmem:[#allocation70_spill] sm:$0xff]  ;;  %v12347_v19 = vld [vmem:[#allocation113_spill] sm:$0xff] }
 0x1e3   : > { %12339 = vst [vmem:[#allocation196_spill] sm:$0xff] %v7653_v49  ;;  %12340 = vst [vmem:[#allocation197_spill] sm:$0xff] %v7655_v33  ;;  %v7658_v54 = vmul.f32 0.088388346, %v6928_v38  ;;  %v7661_v36 = vmul.f32 0.088388346, %v6930_v47  ;;  %v2579_v11 = vpop.permute.xlu1 %2578 }
 0x1e4   : > { %v2723_v29 = vsel %vm2664_vm7, %v12343_v51, -1e+09  ;;  %v2724_v7 = vsel %vm2664_vm7, %v6904_v32, -1e+09  ;;  %v12344_v46 = vld [vmem:[#allocation142_spill] sm:$0xff]  ;;  %vm2267_vm10 = vcmp.eq.s32.totalorder %v12347_v19, 1 }
 0x1e5   : > { %12341 = vst [vmem:[#allocation198_spill] sm:$0xff] %v7658_v54  ;;  %12342 = vst [vmem:[#allocation199_spill] sm:$0xff] %v7661_v36  ;;  %v2725_v37 = vsel %vm2664_vm7, %v12344_v46, -1e+09  ;;  %v12345_v12 = vld [vmem:[#allocation54_spill] sm:$0xff]  ;;  %v2821_v31 = vmax.f32 %v2820_v63, %v2723_v29  ;;  %v2858_v1 = vmax.f32 %v2857_v61, %v2724_v7  ;;  %v7670_v47 = vpop.f32.mrb[54].mxu0 }
 0x1e6   : > { %vm1459_vm8 = vcmp.eq.s32.totalorder %v12345_v12, 1  ;;  %v12346_v22 = vld [vmem:[#allocation78_spill] sm:$0xff]  ;;  %v2895_v48 = vmax.f32 %v2894_v60, %v2725_v37  ;;  %v2726_v38 = vsel %vm2664_vm7, %v6907_v57, -1e+09  ;;  %12348 = vst [vmem:[#allocation54_spill] sm:$0xff] %v7670_v47  ;;  %v7687_v7 = vpop.f32.mrb[54].mxu1  ;;  %v2594_v47 = vpop.permute.xlu0 %2593 }
 0x1e7   : > { %vm1863_vm9 = vcmp.eq.s32.totalorder %v12346_v22, 1  ;;  %v2932_v21 = vmax.f32 %v2931_v0, %v2726_v38  ;;  %v1536_v32 = vsel %vm1458_vm3, %v7658_v54, -1e+09  ;;  %v1940_v46 = vsel %vm1862_vm4, %v7658_v54, -1e+09  ;;  %12349 = vst [vmem:[#allocation78_spill] sm:$0xff] %v7687_v7 }
 0x1e8   : > { %v2344_v63 = vsel %vm2266_vm5, %v7658_v54, -1e+09  ;;  %v1654_v60 = vmax.f32 %v7576_v43, %v1536_v32  ;;  %v2058_v61 = vmax.f32 %v7578_v40, %v1940_v46  ;;  %v1538_v0 = vsel %vm1458_vm3, %v7661_v36, -1e+09  ;;  %v12351_v46 = vld [vmem:[#allocation128_spill] sm:$0xff]  ;;  %v7700_v57 = vpop.f32.mrb[55].mxu0 }
 0x1e9   : > { %v2462_v29 = vmax.f32 %v7580_v45, %v2344_v63  ;;  %v1728_v37 = vmax.f32 %v7587_v26, %v1538_v0  ;;  %v1942_v38 = vsel %vm1862_vm4, %v7661_v36, -1e+09  ;;  %v2346_v32 = vsel %vm2266_vm5, %v7661_v36, -1e+09  ;;  %v12350_v45 = vld [vmem:[#allocation126_spill] sm:$0xff]  ;;  %12352 = vst [vmem:[#allocation113_spill] sm:$0xff] %v7700_v57 }
 0x1ea   : > { %vm2661_vm11 = vcmp.eq.s32.totalorder %v2579_v11, 1  ;;  %v2132_v43 = vmax.f32 %v7600_v35, %v1942_v38  ;;  %v2536_v40 = vmax.f32 %v7602_v55, %v2346_v32  ;;  %v12354_v7 = vld [vmem:[#allocation93_spill] sm:$0xff]  ;;  %v7708_v11 = vpop.f32.mrb[55].mxu1  ;;  %vm2666_vm12 = vcmp.eq.s32.totalorder %v2594_v47, 1  ;;  %v12385_v33 = vld [vmem:[#allocation56_spill] sm:$0xff]  ;;  %v12390_v49 = vld [vmem:[#allocation155_spill] sm:$0xff] }
 0x1eb   : > { %v2711_v30 = vsel %vm2661_vm11, %v12350_v45, -1e+09  ;;  %v2712_v63 = vsel %vm2661_vm11, %v12351_v46, -1e+09  ;;  %v2713_v51 = vsel %vm2661_vm11, %v12353_v2, -1e+09 }
 0x1ec   : > { %v7702_v26 = vmax.f32 %v2821_v31, %v2711_v30  ;;  %v7704_v0 = vmax.f32 %v2858_v1, %v2712_v63  ;;  %v2714_v13 = vsel %vm2661_vm11, %v12354_v7, -1e+09  ;;  %12355 = vst [vmem:[#allocation200_spill] sm:$0xff] %v7708_v11  ;;  %v7710_v35 = vmax.f32 %v2895_v48, %v2713_v51  ;;  %v12356_v38 = vld [vmem:[#allocation145_spill] sm:$0xff]  ;;  %v12360_v7 = vld [vmem:[#allocation130_spill] sm:$0xff]  ;;  %v12367_v2 = vld [vmem:[#allocation47_spill] sm:$0xff] }
 0x1ed   : > { %v7712_v55 = vmax.f32 %v2932_v21, %v2714_v13  ;;  %v7715_v32 = vmul.f32 0.088388346, %v12356_v38  ;;  %v12358_v46 = vld [vmem:[#allocation53_spill] sm:$0xff]  ;;  %v2731_v1 = vsel %vm2666_vm12, %v6997_v53, -1e+09  ;;  %vm2268_vm15 = vcmp.eq.s32.totalorder %v12360_v7, 1 }
 0x1ee   : > { %vm1460_vm13 = vcmp.eq.s32.totalorder %v12358_v46, 1  ;;  %v12359_v31 = vld [vmem:[#allocation77_spill] sm:$0xff]  ;;  %v2732_v30 = vsel %vm2666_vm12, %v7159_v8, -1e+09  ;;  %v7722_v63 = vsel %vm2666_vm12, %v7100_v16, -1e+09  ;;  %v2823_v21 = vmax.f32 %v7702_v26, %v2731_v1 }
 0x1ef   : > { %12357 = vst [vmem:[#allocation145_spill] sm:$0xff] %v7715_v32  ;;  %vm1864_vm14 = vcmp.eq.s32.totalorder %v12359_v31, 1  ;;  %v2860_v51 = vmax.f32 %v7704_v0, %v2732_v30  ;;  %v2897_v48 = vmax.f32 %v7710_v35, %v7722_v63  ;;  %v7730_v47 = vsel %vm2666_vm12, %v7162_v18, -1e+09  ;;  %v12364_v18 = vld [vmem:[#allocation146_spill] sm:$0xff] }
 0x1f0   : > { %v1539_v38 = vsel %vm1459_vm8, %v7715_v32, -1e+09  ;;  %v1943_v16 = vsel %vm1863_vm9, %v7715_v32, -1e+09  ;;  %v2347_v26 = vsel %vm2267_vm10, %v7715_v32, -1e+09  ;;  %v12361_v0 = vmax.f32 %v7511_v28, %v7598_v10 }
 0x1f1   : > { %v12362_v1 = vmax.f32 %v7525_v59, %v7609_v17  ;;  %v12363_v63 = vmax.f32 %v7530_v52, %v7616_v14  ;;  %v7759_v8 = vmul.f32 0.088388346, %v12364_v18  ;;  %v7762_v53 = vmul.f32 0.088388346, %v6972_v9  ;;  %v12369_v10 = vld [vmem:[#allocation152_spill] sm:$0xff] }
 0x1f2   : > { %v7746_v35 = vmax.f32 %v12361_v0, %v1539_v38  ;;  %v7765_v28 = vmul.f32 0.088388346, %v12367_v2  ;;  %v7768_v38 = vmul.f32 0.088388346, %v12369_v10  ;;  %v12371_v9 = vmax.f32 %v7535_v3, %v7621_v23  ;;  %v2585_v23 = vpop.permute.xlu1 %2584  ;;  %v2600_v10 = vpop.permute.xlu0 %2599 }
 0x1f3   : > { %v7751_v30 = vmax.f32 %v12362_v1, %v1943_v16  ;;  %v7756_v13 = vmax.f32 %v12363_v63, %v2347_v26  ;;  %12365 = vst [vmem:[#allocation53_spill] sm:$0xff] %v7759_v8  ;;  %12366 = vst [vmem:[#allocation77_spill] sm:$0xff] %v7762_v53  ;;  %v1541_v16 = vsel %vm1459_vm8, %v7759_v8, -1e+09  ;;  %v1945_v59 = vsel %vm1863_vm9, %v7759_v8, -1e+09 }
 0x1f4   : > { %12368 = vst [vmem:[#allocation130_spill] sm:$0xff] %v7765_v28  ;;  %12370 = vst [vmem:[#allocation146_spill] sm:$0xff] %v7768_v38  ;;  %v2349_v18 = vsel %vm2267_vm10, %v7759_v8, -1e+09  ;;  %v7782_v52 = vmax.f32 %v12371_v9, %v1541_v16  ;;  %v12372_v17 = vmax.f32 %v7543_v4, %v7626_v15  ;;  %v12373_v2 = vmax.f32 %v7557_v6, %v7637_v41  ;;  %v7817_v16 = vpop.f32.mrb[56].mxu0 }
 0x1f5   : > { %v1540_v0 = vsel %vm1459_vm8, %v7762_v53, -1e+09  ;;  %v1944_v3 = vsel %vm1863_vm9, %v7762_v53, -1e+09  ;;  %v2348_v4 = vsel %vm2267_vm10, %v7762_v53, -1e+09  ;;  %v12386_v45 = vmax.f32 %v7712_v55, %v7730_v47 }
 0x1f6   : > { %v7787_v14 = vmax.f32 %v12372_v17, %v1945_v59  ;;  %v7792_v26 = vmax.f32 %v12373_v2, %v2349_v18  ;;  %v7797_v1 = vmax.f32 %v1654_v60, %v1540_v0  ;;  %v1542_v6 = vsel %vm1459_vm8, %v7765_v28, -1e+09  ;;  %12374 = vst [vmem:[#allocation47_spill] sm:$0xff] %v7817_v16  ;;  %v7845_v18 = vpop.f32.mrb[56].mxu1  ;;  %v7847_v9 = vpop.f32.mrb[57].mxu0  ;;  %v12384_v16 = vld [vmem:[#allocation98_spill] sm:$0xff] }
 0x1f7   : > { %v7808_v15 = vmax.f32 %v2058_v61, %v1944_v3  ;;  %v7810_v41 = vmax.f32 %v2462_v29, %v2348_v4  ;;  %v7812_v63 = vmax.f32 %v1728_v37, %v1542_v6  ;;  %v1946_v60 = vsel %vm1863_vm9, %v7765_v28, -1e+09  ;;  %12375 = vst [vmem:[#allocation152_spill] sm:$0xff] %v7845_v18  ;;  %12376 = vst [vmem:[#allocation201_spill] sm:$0xff] %v7847_v9  ;;  %v7854_v0 = vpop.f32.mrb[57].mxu1  ;;  %v12380_v3 = vld [vmem:[#allocation137_spill] sm:$0xff] }
 0x1f8   : > { %v7819_v59 = vmax.f32 %v2132_v43, %v1946_v60  ;;  %v2350_v12 = vsel %vm2267_vm10, %v7765_v28, -1e+09  ;;  %v7827_v61 = vsel %vm1460_vm13, %v7768_v38, -1e+09  ;;  %v7832_v29 = vsel %vm1864_vm14, %v7768_v38, -1e+09 }
 0x1f9   : > { %v7834_v22 = vmax.f32 %v2536_v40, %v2350_v12  ;;  %v7843_v19 = vsel %vm2268_vm15, %v7768_v38, -1e+09  ;;  %v12377_v40 = vld [vmem:[#allocation153_spill] sm:$0xff]  ;;  %vm2663_vm0 = vcmp.eq.s32.totalorder %v2585_v23, 1  ;;  %vm2668_vm1 = vcmp.eq.s32.totalorder %v2600_v10, 1  ;;  %12379 = vst [vmem:[#allocation202_spill] sm:$0xff] %v7854_v0 }
 0x1fa   : > { %v7852_v2 = vmul.f32 0.088388346, %v12377_v40  ;;  %v2719_v4 = vsel %vm2663_vm0, %v12380_v3, -1e+09  ;;  %v12381_v6 = vld [vmem:[#allocation45_spill] sm:$0xff]  ;;  %v12382_v12 = vld [vmem:[#allocation138_spill] sm:$0xff] }
 0x1fb   : > { %v2720_v60 = vsel %vm2663_vm0, %v12381_v6, -1e+09  ;;  %v2721_v43 = vsel %vm2663_vm0, %v12382_v12, -1e+09  ;;  %v2824_v3 = vmax.f32 %v2823_v21, %v2719_v4  ;;  %v7883_v9 = vpop.f32.mrb[58].mxu0  ;;  %v2591_v4 = vpop.permute.xlu1 %2590  ;;  %vm1461_vm2 = vcmp.eq.s32.totalorder %v12385_v33, 1 }
 0x1fc   : > { %12378 = vst [vmem:[#allocation153_spill] sm:$0xff] %v7852_v2  ;;  %v7865_v17 = vsel %vm1460_vm13, %v7852_v2, -1e+09  ;;  %v7870_v40 = vsel %vm1864_vm14, %v7852_v2, -1e+09  ;;  %v2861_v0 = vmax.f32 %v2860_v51, %v2720_v60  ;;  %12383 = vst [vmem:[#allocation203_spill] sm:$0xff] %v7883_v9  ;;  %v2898_v18 = vmax.f32 %v2897_v48, %v2721_v43  ;;  %v2606_v6 = vpop.permute.xlu0 %2605 }
 0x1fd   : > { %v7875_v37 = vsel %vm2268_vm15, %v7852_v2, -1e+09  ;;  %v2722_v11 = vsel %vm2663_vm0, %v12384_v16, -1e+09  ;;  %v2739_v57 = vsel %vm2668_vm1, %v7244_v50, -1e+09 }
 0x1fe   : > { %v2740_v21 = vsel %vm2668_vm1, %v7414_v5, -1e+09  ;;  %v2935_v51 = vmax.f32 %v12386_v45, %v2722_v11  ;;  %v2825_v60 = vmax.f32 %v2824_v3, %v2739_v57  ;;  %v2741_v48 = vsel %vm2668_vm1, %v7247_v42, -1e+09  ;;  %v7897_v23 = vpop.f32.mrb[58].mxu1  ;;  %v12387_v43 = vld [vmem:[#allocation80_spill] sm:$0xff] }
 0x1ff   : > { %v2862_v12 = vmax.f32 %v2861_v0, %v2740_v21  ;;  %vm1865_vm3 = vcmp.eq.s32.totalorder %v12387_v43, 1  ;;  %v2899_v50 = vmax.f32 %v2898_v18, %v2741_v48  ;;  %v2742_v5 = vsel %vm2668_vm1, %v7452_v25, -1e+09  ;;  %v12388_v16 = vld [vmem:[#allocation154_spill] sm:$0xff]  ;;  %v12393_v11 = vld [vmem:[#allocation157_spill] sm:$0xff]  ;;  %v7927_v3 = vpop.f32.mrb[59].mxu0  ;;  %v2597_v43 = vpop.permute.xlu1 %2596 }
 0x200   : > { %v7903_v9 = vmul.f32 0.088388346, %v12388_v16  ;;  %v7906_v27 = vmul.f32 0.088388346, %v12390_v49  ;;  %v12392_v45 = vld [vmem:[#allocation118_spill] sm:$0xff]  ;;  %v2936_v57 = vmax.f32 %v2935_v51, %v2742_v5  ;;  %vm2665_vm5 = vcmp.eq.s32.totalorder %v2591_v4, 1 }
 0x201   : > { %vm2269_vm4 = vcmp.eq.s32.totalorder %v12392_v45, 1  ;;  %vm2670_vm6 = vcmp.eq.s32.totalorder %v2606_v6, 1  ;;  %v7910_v55 = vmul.f32 0.088388346, %v12393_v11  ;;  %v12395_v48 = vld [vmem:[#allocation147_spill] sm:$0xff]  ;;  %v12403_v6 = vmax.f32 %v7751_v30, %v7832_v29  ;;  %v12411_v30 = vld [vmem:[#allocation50_spill] sm:$0xff] }
 0x202   : > { %12389 = vst [vmem:[#allocation56_spill] sm:$0xff] %v7903_v9  ;;  %12391 = vst [vmem:[#allocation80_spill] sm:$0xff] %v7906_v27  ;;  %v1544_v47 = vsel %vm1460_vm13, %v7903_v9, -1e+09  ;;  %v1948_v10 = vsel %vm1864_vm14, %v7903_v9, -1e+09 }
 0x203   : > { %12394 = vst [vmem:[#allocation154_spill] sm:$0xff] %v7910_v55  ;;  %v2352_v49 = vsel %vm2268_vm15, %v7903_v9, -1e+09  ;;  %v1656_v16 = vmax.f32 %v7797_v1, %v1544_v47  ;;  %v2060_v5 = vmax.f32 %v7808_v15, %v1948_v10  ;;  %v1546_v0 = vsel %vm1460_vm13, %v7906_v27, -1e+09  ;;  %v12396_v47 = vld [vmem:[#allocation149_spill] sm:$0xff] }
 0x204   : > { %v2464_v18 = vmax.f32 %v7810_v41, %v2352_v49  ;;  %v1730_v21 = vmax.f32 %v7812_v63, %v1546_v0  ;;  %v1950_v51 = vsel %vm1864_vm14, %v7906_v27, -1e+09  ;;  %v2354_v1 = vsel %vm2268_vm15, %v7906_v27, -1e+09  ;;  %v7944_v10 = vpop.f32.mrb[59].mxu1  ;;  %v12397_v49 = vld [vmem:[#allocation148_spill] sm:$0xff] }
 0x205   : > { %v2727_v15 = vsel %vm2665_vm5, %v12395_v48, -1e+09  ;;  %v2134_v41 = vmax.f32 %v7819_v59, %v1950_v51  ;;  %v2538_v46 = vmax.f32 %v7834_v22, %v2354_v1  ;;  %v2728_v63 = vsel %vm2665_vm5, %v12396_v47, -1e+09  ;;  %v12398_v0 = vld [vmem:[#allocation150_spill] sm:$0xff]  ;;  %v12399_v22 = vld [vmem:[#allocation55_spill] sm:$0xff] }
 0x206   : > { %v7940_v11 = vmax.f32 %v2825_v60, %v2727_v15  ;;  %v7946_v31 = vmax.f32 %v2862_v12, %v2728_v63  ;;  %v2729_v7 = vsel %vm2665_vm5, %v12397_v49, -1e+09  ;;  %v2730_v25 = vsel %vm2665_vm5, %v12398_v0, -1e+09  ;;  %v12400_v60 = vld [vmem:[#allocation79_spill] sm:$0xff] }
 0x207   : > { %v7954_v59 = vsel %vm2670_vm6, %v7560_v20, -1e+09  ;;  %vm1462_vm7 = vcmp.eq.s32.totalorder %v12399_v22, 1  ;;  %vm1866_vm8 = vcmp.eq.s32.totalorder %v12400_v60, 1  ;;  %v7958_v51 = vmax.f32 %v2899_v50, %v2729_v7  ;;  %v12401_v4 = vld [vmem:[#allocation135_spill] sm:$0xff] }
 0x208   : > { %v7960_v1 = vmax.f32 %v2936_v57, %v2730_v25  ;;  %v2827_v12 = vmax.f32 %v7940_v11, %v7954_v59  ;;  %v2748_v15 = vsel %vm2670_vm6, %v7658_v54, -1e+09  ;;  %vm2270_vm9 = vcmp.eq.s32.totalorder %v12401_v4, 1 }
 0x209   : > { %v2864_v63 = vmax.f32 %v7946_v31, %v2748_v15  ;;  %v2749_v20 = vsel %vm2670_vm6, %v7563_v44, -1e+09  ;;  %v2750_v42 = vsel %vm2670_vm6, %v7661_v36, -1e+09  ;;  %v1547_v50 = vsel %vm1461_vm2, %v7910_v55, -1e+09 }
 0x20a   : > { %v2901_v25 = vmax.f32 %v7958_v51, %v2749_v20  ;;  %v2938_v57 = vmax.f32 %v7960_v1, %v2750_v42  ;;  %v12402_v11 = vmax.f32 %v7746_v35, %v7827_v61  ;;  %v1951_v31 = vsel %vm1865_vm3, %v7910_v55, -1e+09  ;;  %v12404_v51 = vld [vmem:[#allocation158_spill] sm:$0xff]  ;;  %v12406_v1 = vld [vmem:[#allocation160_spill] sm:$0xff] }
 0x20b   : > { %v7988_v59 = vmax.f32 %v12403_v6, %v1951_v31  ;;  %v2355_v20 = vsel %vm2269_vm4, %v7910_v55, -1e+09  ;;  %v7994_v42 = vmul.f32 0.088388346, %v12404_v51  ;;  %v7997_v35 = vmul.f32 0.088388346, %v12406_v1 }
 0x20c   : > { %v7980_v7 = vmax.f32 %v12402_v11, %v1547_v50  ;;  %v12408_v61 = vmax.f32 %v7756_v13, %v7843_v19  ;;  %v12409_v50 = vld [vmem:[#allocation161_spill] sm:$0xff]  ;;  %v8008_v29 = vmul.f32 0.088388346, %v12411_v30  ;;  %v12415_v19 = vmax.f32 %v7782_v52, %v7865_v17 }
 0x20d   : > { %12405 = vst [vmem:[#allocation155_spill] sm:$0xff] %v7994_v42  ;;  %12407 = vst [vmem:[#allocation118_spill] sm:$0xff] %v7997_v35  ;;  %v8005_v11 = vmul.f32 0.088388346, %v12409_v50  ;;  %v12413_v31 = vld [vmem:[#allocation73_spill] sm:$0xff]  ;;  %v12417_v30 = vmax.f32 %v7792_v26, %v7875_v37  ;;  %vm2667_vm10 = vcmp.eq.s32.totalorder %v2597_v43, 1 }
 0x20e   : > { %v8002_v15 = vmax.f32 %v12408_v61, %v2355_v20  ;;  %12412 = vst [vmem:[#allocation55_spill] sm:$0xff] %v8008_v29  ;;  %v8011_v6 = vmul.f32 0.088388346, %v12413_v31  ;;  %v1549_v51 = vsel %vm1461_vm2, %v7994_v42, -1e+09  ;;  %v12416_v61 = vmax.f32 %v7787_v14, %v7870_v40 }
 0x20f   : > { %12410 = vst [vmem:[#allocation157_spill] sm:$0xff] %v8005_v11  ;;  %v1953_v1 = vsel %vm1865_vm3, %v7994_v42, -1e+09  ;;  %v2357_v13 = vsel %vm2269_vm4, %v7994_v42, -1e+09  ;;  %v8025_v20 = vmax.f32 %v12415_v19, %v1549_v51 }
 0x210   : > { %12414 = vst [vmem:[#allocation79_spill] sm:$0xff] %v8011_v6  ;;  %v8030_v50 = vmax.f32 %v12416_v61, %v1953_v1  ;;  %v8035_v31 = vmax.f32 %v12417_v30, %v2357_v13  ;;  %v1548_v36 = vsel %vm1461_vm2, %v7997_v35, -1e+09  ;;  %v1952_v52 = vsel %vm1865_vm3, %v7997_v35, -1e+09  ;;  %v8088_v13 = vpop.f32.mrb[60].mxu1 }
 0x211   : > { %v8040_v44 = vmax.f32 %v1656_v16, %v1548_v36  ;;  %v2356_v14 = vsel %vm2269_vm4, %v7997_v35, -1e+09  ;;  %v1550_v26 = vsel %vm1461_vm2, %v8005_v11, -1e+09  ;;  %v8051_v37 = vmax.f32 %v2060_v5, %v1952_v52  ;;  %v8060_v16 = vpop.f32.mrb[60].mxu0  ;;  %12419 = vst [vmem:[#allocation158_spill] sm:$0xff] %v8088_v13 }
 0x212   : > { %v8053_v17 = vmax.f32 %v2464_v18, %v2356_v14  ;;  %v8055_v40 = vmax.f32 %v1730_v21, %v1550_v26  ;;  %v1954_v36 = vsel %vm1865_vm3, %v8005_v11, -1e+09  ;;  %12418 = vst [vmem:[#allocation135_spill] sm:$0xff] %v8060_v16  ;;  %v2358_v1 = vsel %vm2269_vm4, %v8005_v11, -1e+09  ;;  %v12421_v21 = vld [vmem:[#allocation134_spill] sm:$0xff] }
 0x213   : > { %v8062_v51 = vmax.f32 %v2134_v41, %v1954_v36  ;;  %v8070_v33 = vsel %vm1462_vm7, %v8008_v29, -1e+09  ;;  %v8075_v5 = vsel %vm1866_vm8, %v8008_v29, -1e+09  ;;  %v8077_v18 = vmax.f32 %v2538_v46, %v2358_v1  ;;  %v2612_v36 = vpop.permute.xlu0 %2611  ;;  %v8113_v1 = vpop.f32.mrb[61].mxu0  ;;  %v12422_v52 = vld [vmem:[#allocation171_spill] sm:$0xff] }
 0x214   : > { %v8086_v41 = vsel %vm2270_vm9, %v8008_v29, -1e+09  ;;  %v8095_v46 = vsel %vm1462_vm7, %v8011_v6, -1e+09  ;;  %v8100_v61 = vsel %vm1866_vm8, %v8011_v6, -1e+09 }
 0x215   : > { %v8105_v30 = vsel %vm2270_vm9, %v8011_v6, -1e+09  ;;  %12420 = vst [vmem:[#allocation160_spill] sm:$0xff] %v8113_v1  ;;  %v2735_v19 = vsel %vm2667_vm10, %v7232_v56, -1e+09  ;;  %v8119_v13 = vpop.f32.mrb[61].mxu1 }
 0x216   : > { %v2736_v45 = vsel %vm2667_vm10, %v7238_v34, -1e+09  ;;  %v2737_v54 = vsel %vm2667_vm10, %v12421_v21, -1e+09  ;;  %v2828_v0 = vmax.f32 %v2827_v12, %v2735_v19  ;;  %v2738_v48 = vsel %vm2667_vm10, %v12422_v52, -1e+09 }
 0x217   : > { %v2865_v49 = vmax.f32 %v2864_v63, %v2736_v45  ;;  %v2902_v47 = vmax.f32 %v2901_v25, %v2737_v54  ;;  %v2939_v14 = vmax.f32 %v2938_v57, %v2738_v48  ;;  %vm2672_vm11 = vcmp.eq.s32.totalorder %v2612_v36, 1  ;;  %v12423_v26 = vld [vmem:[#allocation165_spill] sm:$0xff]  ;;  %v12425_v16 = vld [vmem:[#allocation166_spill] sm:$0xff]  ;;  %v12428_v54 = vld [vmem:[#allocation83_spill] sm:$0xff] }
 0x218   : > { %v8122_v43 = vmul.f32 0.088388346, %v12423_v26  ;;  %v8125_v1 = vmul.f32 0.088388346, %v12425_v16  ;;  %v2755_v56 = vsel %vm2672_vm11, %v7768_v38, -1e+09  ;;  %v2603_v26 = vpop.permute.xlu1 %2602 }
 0x219   : > { %v2756_v34 = vsel %vm2672_vm11, %v7903_v9, -1e+09  ;;  %v2757_v12 = vsel %vm2672_vm11, %v7852_v2, -1e+09  ;;  %v12427_v63 = vld [vmem:[#allocation58_spill] sm:$0xff]  ;;  %vm1867_vm13 = vcmp.eq.s32.totalorder %v12428_v54, 1  ;;  %v2829_v48 = vmax.f32 %v2828_v0, %v2755_v56 }
 0x21a   : > { %12424 = vst [vmem:[#allocation161_spill] sm:$0xff] %v8122_v43  ;;  %12426 = vst [vmem:[#allocation50_spill] sm:$0xff] %v8125_v1  ;;  %vm1463_vm12 = vcmp.eq.s32.totalorder %v12427_v63, 1  ;;  %v12429_v25 = vld [vmem:[#allocation123_spill] sm:$0xff]  ;;  %v2866_v57 = vmax.f32 %v2865_v49, %v2756_v34  ;;  %v2903_v45 = vmax.f32 %v2902_v47, %v2757_v12  ;;  %v2758_v19 = vsel %vm2672_vm11, %v7906_v27, -1e+09 }
 0x21b   : > { %vm2271_vm14 = vcmp.eq.s32.totalorder %v12429_v25, 1  ;;  %v8134_v16 = vpop.f32.mrb[62].mxu0  ;;  %v2940_v36 = vmax.f32 %v2939_v14, %v2758_v19  ;;  %v1552_v9 = vsel %vm1462_vm7, %v8122_v43, -1e+09  ;;  %v1956_v2 = vsel %vm1866_vm8, %v8122_v43, -1e+09 }
 0x21c   : > { %v2360_v56 = vsel %vm2270_vm9, %v8122_v43, -1e+09  ;;  %v1658_v34 = vmax.f32 %v8040_v44, %v1552_v9  ;;  %v2062_v47 = vmax.f32 %v8051_v37, %v1956_v2  ;;  %v1554_v0 = vsel %vm1462_vm7, %v8125_v1, -1e+09  ;;  %v8151_v14 = vpop.f32.mrb[62].mxu1  ;;  %v2618_v9 = vpop.permute.xlu0 %2617  ;;  %v12434_v38 = vld [vmem:[#allocation140_spill] sm:$0xff] }
 0x21d   : > { %v2466_v49 = vmax.f32 %v8053_v17, %v2360_v56  ;;  %v1732_v12 = vmax.f32 %v8055_v40, %v1554_v0  ;;  %v1958_v19 = vsel %vm1866_vm8, %v8125_v1, -1e+09  ;;  %v2362_v44 = vsel %vm2270_vm9, %v8125_v1, -1e+09  ;;  %v8164_v56 = vpop.f32.mrb[63].mxu0 }
 0x21e   : > { %vm2669_vm15 = vcmp.eq.s32.totalorder %v2603_v26, 1  ;;  %v2136_v2 = vmax.f32 %v8062_v51, %v1958_v19  ;;  %v2540_v37 = vmax.f32 %v8077_v18, %v2362_v44  ;;  %v8172_v26 = vpop.f32.mrb[63].mxu1  ;;  %vm2674_vm0 = vcmp.eq.s32.totalorder %v2618_v9, 1  ;;  %v12430_v18 = vld [vmem:[#allocation167_spill] sm:$0xff]  ;;  %v12432_v44 = vld [vmem:[#allocation57_spill] sm:$0xff] }
 0x21f   : > { %v2743_v22 = vsel %vm2669_vm15, %v7460_v58, -1e+09  ;;  %v2744_v17 = vsel %vm2669_vm15, %v7549_v39, -1e+09  ;;  %v2745_v0 = vsel %vm2669_vm15, %v7463_v24, -1e+09 }
 0x220   : > { %v8166_v40 = vmax.f32 %v2829_v48, %v2743_v22  ;;  %v8168_v60 = vmax.f32 %v2866_v57, %v2744_v17  ;;  %v2746_v4 = vsel %vm2669_vm15, %v7552_v62, -1e+09  ;;  %v8174_v27 = vmax.f32 %v2903_v45, %v2745_v0  ;;  %v12433_v48 = vld [vmem:[#allocation81_spill] sm:$0xff]  ;;  %v12442_v62 = vld [vmem:[#allocation74_spill] sm:$0xff]  ;;  %v12563_v24 = vld [vmem:[#allocation24_spill] sm:$0xff] }
 0x221   : > { %v8176_v51 = vmax.f32 %v2940_v36, %v2746_v4  ;;  %v8179_v19 = vmul.f32 0.088388346, %v12430_v18  ;;  %vm1464_vm1 = vcmp.eq.s32.totalorder %v12432_v44, 1  ;;  %vm1868_vm2 = vcmp.eq.s32.totalorder %v12433_v48, 1  ;;  %v12564_v39 = vld [vmem:[#allocation19_spill] sm:$0xff] }
 0x222   : > { %v2763_v57 = vsel %vm2674_vm0, %v8008_v29, -1e+09  ;;  %v2764_v22 = vsel %vm2674_vm0, %v8122_v43, -1e+09  ;;  %v2765_v17 = vsel %vm2674_vm0, %v8011_v6, -1e+09 }
 0x223   : > { %12431 = vst [vmem:[#allocation73_spill] sm:$0xff] %v8179_v19  ;;  %vm2272_vm3 = vcmp.eq.s32.totalorder %v12434_v38, 1  ;;  %v2831_v45 = vmax.f32 %v8166_v40, %v2763_v57  ;;  %v2868_v36 = vmax.f32 %v8168_v60, %v2764_v22  ;;  %v2905_v9 = vmax.f32 %v8174_v27, %v2765_v17  ;;  %v12440_v43 = vld [vmem:[#allocation49_spill] sm:$0xff] }
 0x224   : > { %v2766_v0 = vsel %vm2674_vm0, %v8125_v1, -1e+09  ;;  %v1555_v18 = vsel %vm1463_vm12, %v8179_v19, -1e+09  ;;  %v1959_v6 = vsel %vm1867_vm13, %v8179_v19, -1e+09  ;;  %v12435_v60 = vmax.f32 %v7980_v7, %v8070_v33 }
 0x225   : > { %v2942_v4 = vmax.f32 %v8176_v51, %v2766_v0  ;;  %v2363_v40 = vsel %vm2271_vm14, %v8179_v19, -1e+09  ;;  %v12436_v51 = vmax.f32 %v7988_v59, %v8075_v5  ;;  %v12437_v22 = vmax.f32 %v8002_v15, %v8086_v41  ;;  %v12438_v0 = vld [vmem:[#allocation168_spill] sm:$0xff]  ;;  %v12444_v33 = vld [vmem:[#allocation174_spill] sm:$0xff] }
 0x226   : > { %v8204_v27 = vmax.f32 %v12435_v60, %v1555_v18  ;;  %v8217_v1 = vmul.f32 0.088388346, %v12438_v0  ;;  %v8220_v29 = vmul.f32 0.088388346, %v12440_v43  ;;  %v8223_v7 = vmul.f32 0.088388346, %v12442_v62  ;;  %v2609_v0 = vpop.permute.xlu1 %2608 }
 0x227   : > { %v8209_v57 = vmax.f32 %v12436_v51, %v1959_v6  ;;  %v8214_v17 = vmax.f32 %v12437_v22, %v2363_v40  ;;  %v8226_v18 = vmul.f32 0.088388346, %v12444_v33  ;;  %v12446_v5 = vmax.f32 %v8025_v20, %v8095_v46  ;;  %v8275_v33 = vpop.permute.xlu0 %2623 }
 0x228   : > { %12439 = vst [vmem:[#allocation165_spill] sm:$0xff] %v8217_v1  ;;  %12441 = vst [vmem:[#allocation166_spill] sm:$0xff] %v8220_v29  ;;  %v1557_v59 = vsel %vm1463_vm12, %v8217_v1, -1e+09  ;;  %v1961_v15 = vsel %vm1867_vm13, %v8217_v1, -1e+09  ;;  %v12447_v41 = vmax.f32 %v8030_v50, %v8100_v61  ;;  %v12448_v40 = vmax.f32 %v8035_v31, %v8105_v30 }
 0x229   : > { %12443 = vst [vmem:[#allocation58_spill] sm:$0xff] %v8223_v7  ;;  %12445 = vst [vmem:[#allocation83_spill] sm:$0xff] %v8226_v18  ;;  %v2365_v6 = vsel %vm2271_vm14, %v8217_v1, -1e+09  ;;  %v8240_v62 = vmax.f32 %v12446_v5, %v1557_v59  ;;  %v1556_v51 = vsel %vm1463_vm12, %v8220_v29, -1e+09 }
 0x22a   : > { %v8245_v43 = vmax.f32 %v12447_v41, %v1961_v15  ;;  %v8250_v60 = vmax.f32 %v12448_v40, %v2365_v6  ;;  %v8255_v22 = vmax.f32 %v1658_v34, %v1556_v51  ;;  %v1960_v20 = vsel %vm1867_vm13, %v8220_v29, -1e+09  ;;  %v12449_v6 = vld [vmem:[#allocation175_spill] sm:$0xff]  ;;  %v12451_v41 = vld [vmem:[#allocation60_spill] sm:$0xff] }
 0x22b   : > { %v2364_v50 = vsel %vm2271_vm14, %v8220_v29, -1e+09  ;;  %v1558_v31 = vsel %vm1463_vm12, %v8223_v7, -1e+09  ;;  %v8266_v46 = vmax.f32 %v2062_v47, %v1960_v20  ;;  %v1962_v34 = vsel %vm1867_vm13, %v8223_v7, -1e+09 }
 0x22c   : > { %v8268_v61 = vmax.f32 %v2466_v49, %v2364_v50  ;;  %v8270_v30 = vmax.f32 %v1732_v12, %v1558_v31  ;;  %v8277_v59 = vmax.f32 %v2136_v2, %v1962_v34  ;;  %v2366_v63 = vsel %vm2271_vm14, %v8223_v7, -1e+09  ;;  %v12452_v50 = vld [vmem:[#allocation85_spill] sm:$0xff] }
 0x22d   : > { %v1559_v47 = vsel %vm1464_vm1, %v8226_v18, -1e+09  ;;  %v1963_v49 = vsel %vm1868_vm2, %v8226_v18, -1e+09  ;;  %v8288_v12 = vmax.f32 %v2540_v37, %v2366_v63  ;;  %v2367_v2 = vsel %vm2272_vm3, %v8226_v18, -1e+09 }
 0x22e   : > { %v1623_v54 = vmax.f32 %v8204_v27, %v1559_v47  ;;  %v2027_v15 = vmax.f32 %v8209_v57, %v1963_v49  ;;  %v2431_v25 = vmax.f32 %v8214_v17, %v2367_v2  ;;  %v8297_v5 = vmul.f32 0.088388346, %v12449_v6  ;;  %v2615_v49 = vpop.permute.xlu1 %2614 }
 0x22f   : > { %vm2671_vm4 = vcmp.eq.s32.totalorder %v2609_v0, 1  ;;  %vm2676_vm5 = vcmp.eq.s32.totalorder %v8275_v33, 1  ;;  %vm1465_vm6 = vcmp.eq.s32.totalorder %v12451_v41, 1  ;;  %vm1869_vm7 = vcmp.eq.s32.totalorder %v12452_v50, 1 }
 0x230   : > { %12450 = vst [vmem:[#allocation123_spill] sm:$0xff] %v8297_v5  ;;  %v2751_v37 = vsel %vm2671_vm4, %v7715_v32, -1e+09  ;;  %v2752_v27 = vsel %vm2671_vm4, %v7762_v53, -1e+09  ;;  %vm2673_vm9 = vcmp.eq.s32.totalorder %v2615_v49, 1 }
 0x231   : > { %v2753_v57 = vsel %vm2671_vm4, %v7759_v8, -1e+09  ;;  %v1561_v17 = vsel %vm1464_vm1, %v8297_v5, -1e+09  ;;  %v1965_v40 = vsel %vm1868_vm2, %v8297_v5, -1e+09  ;;  %v2832_v20 = vmax.f32 %v2831_v45, %v2751_v37 }
 0x232   : > { %v2369_v51 = vsel %vm2272_vm3, %v8297_v5, -1e+09  ;;  %v1697_v31 = vmax.f32 %v8240_v62, %v1561_v17  ;;  %v2101_v34 = vmax.f32 %v8245_v43, %v1965_v40  ;;  %v8320_v47 = vmax.f32 %v2868_v36, %v2752_v27  ;;  %v12453_v37 = vld [vmem:[#allocation176_spill] sm:$0xff]  ;;  %v12455_v36 = vld [vmem:[#allocation177_spill] sm:$0xff]  ;;  %v12473_v53 = vld [vmem:[#allocation62_spill] sm:$0xff] }
 0x233   : > { %v2505_v63 = vmax.f32 %v8250_v60, %v2369_v51  ;;  %v2906_v2 = vmax.f32 %v2905_v9, %v2753_v57  ;;  %v2754_v6 = vsel %vm2671_vm4, %v7765_v28, -1e+09  ;;  %v2771_v8 = vsel %vm2676_vm5, %v8226_v18, -1e+09  ;;  %v12457_v9 = vld [vmem:[#allocation125_spill] sm:$0xff]  ;;  %v12458_v57 = vld [vmem:[#allocation178_spill] sm:$0xff] }
 0x234   : > { %v2773_v45 = vsel %vm2676_vm5, %v8297_v5, -1e+09  ;;  %v8330_v62 = vmax.f32 %v2942_v4, %v2754_v6  ;;  %v2833_v43 = vmax.f32 %v2832_v20, %v2771_v8  ;;  %v8333_v60 = vmul.f32 0.088388346, %v12453_v37 }
 0x235   : > { %v8336_v27 = vmul.f32 0.088388346, %v12455_v36  ;;  %vm2273_vm8 = vcmp.eq.s32.totalorder %v12457_v9, 1  ;;  %v2907_v0 = vmax.f32 %v2906_v2, %v2773_v45  ;;  %v8340_v17 = vmul.f32 0.088388346, %v12458_v57 }
 0x236   : > { %12454 = vst [vmem:[#allocation167_spill] sm:$0xff] %v8333_v60  ;;  %v1560_v40 = vsel %vm1464_vm1, %v8333_v60, -1e+09  ;;  %v1964_v8 = vsel %vm1868_vm2, %v8333_v60, -1e+09  ;;  %vm1467_vm14 = vcmp.eq.s32.totalorder %v12473_v53, 1 }
 0x237   : > { %12456 = vst [vmem:[#allocation57_spill] sm:$0xff] %v8336_v27  ;;  %12459 = vst [vmem:[#allocation81_spill] sm:$0xff] %v8340_v17  ;;  %v2368_v4 = vsel %vm2272_vm3, %v8333_v60, -1e+09  ;;  %v1660_v51 = vmax.f32 %v8255_v22, %v1560_v40  ;;  %v2064_v20 = vmax.f32 %v8266_v46, %v1964_v8  ;;  %v1562_v6 = vsel %vm1464_vm1, %v8336_v27, -1e+09 }
 0x238   : > { %v2468_v2 = vmax.f32 %v8268_v61, %v2368_v4  ;;  %v1734_v45 = vmax.f32 %v8270_v30, %v1562_v6  ;;  %v1966_v37 = vsel %vm1868_vm2, %v8336_v27, -1e+09  ;;  %v2370_v36 = vsel %vm2272_vm3, %v8336_v27, -1e+09  ;;  %v12460_v46 = vld [vmem:[#allocation59_spill] sm:$0xff]  ;;  %v12461_v61 = vld [vmem:[#allocation82_spill] sm:$0xff] }
 0x239   : > { %v2759_v22 = vsel %vm2673_vm9, %v7910_v55, -1e+09  ;;  %vm1466_vm10 = vcmp.eq.s32.totalorder %v12460_v46, 1  ;;  %vm1870_vm11 = vcmp.eq.s32.totalorder %v12461_v61, 1  ;;  %v2138_v44 = vmax.f32 %v8277_v59, %v1966_v37  ;;  %v12462_v40 = vld [vmem:[#allocation103_spill] sm:$0xff]  ;;  %v12481_v61 = vld [vmem:[#allocation84_spill] sm:$0xff] }
 0x23a   : > { %v2542_v57 = vmax.f32 %v8288_v12, %v2370_v36  ;;  %v8370_v30 = vmax.f32 %v2833_v43, %v2759_v22  ;;  %v2760_v48 = vsel %vm2673_vm9, %v7997_v35, -1e+09  ;;  %vm2274_vm12 = vcmp.eq.s32.totalorder %v12462_v40, 1  ;;  %v12463_v36 = vld [vmem:[#allocation179_spill] sm:$0xff] }
 0x23b   : > { %v2870_v38 = vmax.f32 %v8320_v47, %v2760_v48  ;;  %v2761_v8 = vsel %vm2673_vm9, %v7994_v42, -1e+09  ;;  %v2762_v4 = vsel %vm2673_vm9, %v8005_v11, -1e+09  ;;  %v1563_v59 = vsel %vm1465_vm6, %v8340_v17, -1e+09 }
 0x23c   : > { %v8383_v12 = vmax.f32 %v2907_v0, %v2761_v8  ;;  %v2944_v43 = vmax.f32 %v8330_v62, %v2762_v4  ;;  %v8386_v6 = vmax.f32 %v1623_v54, %v1563_v59  ;;  %v1967_v47 = vsel %vm1869_vm7, %v8340_v17, -1e+09  ;;  %v12465_v48 = vld [vmem:[#allocation180_spill] sm:$0xff]  ;;  %v12467_v54 = vld [vmem:[#allocation181_spill] sm:$0xff]  ;;  %v12469_v4 = vld [vmem:[#allocation182_spill] sm:$0xff] }
 0x23d   : > { %v8391_v37 = vmax.f32 %v2027_v15, %v1967_v47  ;;  %v2371_v49 = vsel %vm2273_vm8, %v8340_v17, -1e+09  ;;  %v8397_v22 = vmul.f32 0.088388346, %v12463_v36  ;;  %v8400_v0 = vmul.f32 0.088388346, %v12465_v48 }
 0x23e   : > { %v8402_v8 = vmax.f32 %v2431_v25, %v2371_v49  ;;  %v8405_v62 = vmul.f32 0.088388346, %v12467_v54  ;;  %v8408_v59 = vmul.f32 0.088388346, %v12469_v4  ;;  %v12471_v15 = vld [vmem:[#allocation183_spill] sm:$0xff]  ;;  %vm1872_vm3 = vcmp.eq.s32.totalorder %v12481_v61, 1 }
 0x23f   : > { %12464 = vst [vmem:[#allocation140_spill] sm:$0xff] %v8397_v22  ;;  %12466 = vst [vmem:[#allocation168_spill] sm:$0xff] %v8400_v0  ;;  %v8411_v47 = vmul.f32 0.088388346, %v12471_v15  ;;  %v1565_v5 = vsel %vm1465_vm6, %v8397_v22, -1e+09 }
 0x240   : > { %12468 = vst [vmem:[#allocation49_spill] sm:$0xff] %v8405_v62  ;;  %12470 = vst [vmem:[#allocation74_spill] sm:$0xff] %v8408_v59  ;;  %v1969_v36 = vsel %vm1869_vm7, %v8397_v22, -1e+09  ;;  %v2373_v25 = vsel %vm2273_vm8, %v8397_v22, -1e+09  ;;  %v8422_v49 = vmax.f32 %v1697_v31, %v1565_v5  ;;  %v2621_v31 = vpop.permute.xlu1 %2620 }
 0x241   : > { %12472 = vst [vmem:[#allocation174_spill] sm:$0xff] %v8411_v47  ;;  %v8424_v48 = vmax.f32 %v2101_v34, %v1969_v36  ;;  %v8426_v54 = vmax.f32 %v2505_v63, %v2373_v25  ;;  %v1564_v4 = vsel %vm1465_vm6, %v8400_v0, -1e+09  ;;  %v1968_v18 = vsel %vm1869_vm7, %v8400_v0, -1e+09 }
 0x242   : > { %v8431_v15 = vmax.f32 %v1660_v51, %v1564_v4  ;;  %v2372_v11 = vsel %vm2273_vm8, %v8400_v0, -1e+09  ;;  %v1566_v5 = vsel %vm1465_vm6, %v8405_v62, -1e+09  ;;  %v8442_v34 = vmax.f32 %v2064_v20, %v1968_v18 }
 0x243   : > { %v8444_v63 = vmax.f32 %v2468_v2, %v2372_v11  ;;  %v8446_v36 = vmax.f32 %v1734_v45, %v1566_v5  ;;  %v1970_v51 = vsel %vm1869_vm7, %v8405_v62, -1e+09  ;;  %v2374_v4 = vsel %vm2273_vm8, %v8405_v62, -1e+09 }
 0x244   : > { %v8451_v25 = vmax.f32 %v2138_v44, %v1970_v51  ;;  %v8459_v41 = vsel %vm1466_vm10, %v8408_v59, -1e+09  ;;  %v8464_v11 = vsel %vm1870_vm11, %v8408_v59, -1e+09  ;;  %v8466_v18 = vmax.f32 %v2542_v57, %v2374_v4  ;;  %v2627_v42 = vpop.permute.xlu1 %2626  ;;  %v12474_v51 = vld [vmem:[#allocation87_spill] sm:$0xff] }
 0x245   : > { %v8475_v9 = vsel %vm2274_vm12, %v8408_v59, -1e+09  ;;  %v8482_v45 = vsel %vm1466_vm10, %v8411_v47, -1e+09  ;;  %v8487_v44 = vsel %vm1870_vm11, %v8411_v47, -1e+09 }
 0x246   : > { %v8492_v57 = vsel %vm2274_vm12, %v8411_v47, -1e+09  ;;  %vm2675_vm13 = vcmp.eq.s32.totalorder %v2621_v31, 1  ;;  %vm1871_vm15 = vcmp.eq.s32.totalorder %v12474_v51, 1  ;;  %v12475_v31 = vld [vmem:[#allocation184_spill] sm:$0xff]  ;;  %vm2677_vm1 = vcmp.eq.s32.totalorder %v2627_v42, 1 }
 0x247   : > { %v2767_v2 = vsel %vm2675_vm13, %v8179_v19, -1e+09  ;;  %v2768_v20 = vsel %vm2675_vm13, %v8220_v29, -1e+09  ;;  %v2769_v50 = vsel %vm2675_vm13, %v8217_v1, -1e+09 }
 0x248   : > { %v2835_v35 = vmax.f32 %v8370_v30, %v2767_v2  ;;  %v2871_v55 = vmax.f32 %v2870_v38, %v2768_v20  ;;  %v2909_v28 = vmax.f32 %v8383_v12, %v2769_v50  ;;  %v2770_v5 = vsel %vm2675_vm13, %v8223_v7, -1e+09  ;;  %v12477_v19 = vld [vmem:[#allocation185_spill] sm:$0xff]  ;;  %v12479_v1 = vld [vmem:[#allocation131_spill] sm:$0xff]  ;;  %v8521_v12 = vpop.permute.xlu0 %2629 }
 0x249   : > { %v2945_v4 = vmax.f32 %v2944_v43, %v2770_v5  ;;  %v8509_v32 = vmul.f32 0.088388346, %v12475_v31  ;;  %v8512_v29 = vmul.f32 0.088388346, %v12477_v19  ;;  %vm2275_vm0 = vcmp.eq.s32.totalorder %v12479_v1, 1 }
 0x24a   : > { %v2772_v30 = vsel %vm2676_vm5, %v8333_v60, -1e+09  ;;  %v2774_v38 = vsel %vm2676_vm5, %v8336_v27, -1e+09  ;;  %v2775_v46 = vsel %vm2677_vm1, %v8340_v17, -1e+09 }
 0x24b   : > { %12476 = vst [vmem:[#allocation175_spill] sm:$0xff] %v8509_v32  ;;  %12478 = vst [vmem:[#allocation60_spill] sm:$0xff] %v8512_v29  ;;  %v1568_v43 = vsel %vm1466_vm10, %v8509_v32, -1e+09  ;;  %v1972_v19 = vsel %vm1870_vm11, %v8509_v32, -1e+09  ;;  %v2872_v20 = vmax.f32 %v2871_v55, %v2772_v30  ;;  %v2946_v30 = vmax.f32 %v2945_v4, %v2774_v38 }
 0x24c   : > { %v2376_v50 = vsel %vm2274_vm12, %v8509_v32, -1e+09  ;;  %v1662_v2 = vmax.f32 %v8431_v15, %v1568_v43  ;;  %v2066_v33 = vmax.f32 %v8442_v34, %v1972_v19  ;;  %v1570_v31 = vsel %vm1466_vm10, %v8512_v29, -1e+09  ;;  %v8545_v15 = vpop.permute.xlu1 %2632  ;;  %v12480_v43 = vld [vmem:[#allocation61_spill] sm:$0xff]  ;;  %v12482_v19 = vld [vmem:[#allocation72_spill] sm:$0xff] }
 0x24d   : > { %v2470_v5 = vmax.f32 %v8444_v63, %v2376_v50  ;;  %v1736_v27 = vmax.f32 %v8446_v36, %v1570_v31  ;;  %v1974_v60 = vsel %vm1870_vm11, %v8512_v29, -1e+09  ;;  %v2378_v55 = vsel %vm2274_vm12, %v8512_v29, -1e+09  ;;  %v12483_v50 = vld [vmem:[#allocation186_spill] sm:$0xff] }
 0x24e   : > { %v2140_v34 = vmax.f32 %v8451_v25, %v1974_v60  ;;  %v2544_v63 = vmax.f32 %v8466_v18, %v2378_v55  ;;  %v2776_v36 = vsel %vm2677_vm1, %v8400_v0, -1e+09  ;;  %vm1468_vm2 = vcmp.eq.s32.totalorder %v12480_v43, 1  ;;  %v12485_v55 = vld [vmem:[#allocation188_spill] sm:$0xff] }
 0x24f   : > { %vm2276_vm4 = vcmp.eq.s32.totalorder %v12482_v19, 1  ;;  %v8556_v40 = vmax.f32 %v2835_v35, %v2775_v46  ;;  %v8558_v4 = vmax.f32 %v2872_v20, %v2776_v36  ;;  %v2777_v60 = vsel %vm2677_vm1, %v8397_v22, -1e+09  ;;  %v8575_v35 = vpop.permute.xlu0 %2635  ;;  %v12487_v20 = vld [vmem:[#allocation52_spill] sm:$0xff]  ;;  %v12489_v36 = vld [vmem:[#allocation189_spill] sm:$0xff] }
 0x250   : > { %v2778_v25 = vsel %vm2677_vm1, %v8405_v62, -1e+09  ;;  %v8564_v18 = vmax.f32 %v2909_v28, %v2777_v60  ;;  %v8569_v31 = vmul.f32 0.088388346, %v12483_v50  ;;  %v8572_v0 = vmul.f32 0.088388346, %v12485_v55  ;;  %v8613_v7 = vpop.permute.xlu1 %2638 }
 0x251   : > { %v8566_v38 = vmax.f32 %v2946_v30, %v2778_v25  ;;  %vm2678_vm5 = vcmp.eq.s32.totalorder %v8521_v12, 1  ;;  %v8578_v46 = vmul.f32 0.088388346, %v12487_v20  ;;  %v8581_v42 = vmul.f32 0.088388346, %v12489_v36  ;;  %v12491_v28 = vld [vmem:[#allocation109_spill] sm:$0xff] }
 0x252   : > { %12484 = vst [vmem:[#allocation85_spill] sm:$0xff] %v8569_v31  ;;  %12486 = vst [vmem:[#allocation176_spill] sm:$0xff] %v8572_v0  ;;  %v8584_v60 = vmul.f32 0.088388346, %v12491_v28  ;;  %v1571_v30 = vsel %vm1467_vm14, %v8569_v31, -1e+09  ;;  %v12493_v55 = vmax.f32 %v8386_v6, %v8459_v41  ;;  %v12494_v36 = vmax.f32 %v8391_v37, %v8464_v11 }
 0x253   : > { %12488 = vst [vmem:[#allocation177_spill] sm:$0xff] %v8578_v46  ;;  %12490 = vst [vmem:[#allocation125_spill] sm:$0xff] %v8581_v42  ;;  %v1975_v25 = vsel %vm1871_vm15, %v8569_v31, -1e+09  ;;  %v2379_v50 = vsel %vm2275_vm0, %v8569_v31, -1e+09  ;;  %v12495_v62 = vmax.f32 %v8402_v8, %v8475_v9  ;;  %v12496_v6 = vmax.f32 %v8422_v49, %v8482_v45 }
 0x254   : > { %12492 = vst [vmem:[#allocation178_spill] sm:$0xff] %v8584_v60  ;;  %v8598_v20 = vmax.f32 %v12493_v55, %v1571_v30  ;;  %v8603_v28 = vmax.f32 %v12494_v36, %v1975_v25  ;;  %v1573_v17 = vsel %vm1467_vm14, %v8572_v0, -1e+09  ;;  %v1977_v37 = vsel %vm1871_vm15, %v8572_v0, -1e+09 }
 0x255   : > { %v8608_v22 = vmax.f32 %v12495_v62, %v2379_v50  ;;  %v8618_v41 = vmax.f32 %v12496_v6, %v1573_v17  ;;  %v2381_v8 = vsel %vm2275_vm0, %v8572_v0, -1e+09  ;;  %v1572_v62 = vsel %vm1467_vm14, %v8578_v46, -1e+09 }
 0x256   : > { %v12497_v11 = vmax.f32 %v8424_v48, %v8487_v44  ;;  %v12498_v17 = vmax.f32 %v8426_v54, %v8492_v57  ;;  %v8639_v45 = vmax.f32 %v1662_v2, %v1572_v62  ;;  %v1976_v30 = vsel %vm1871_vm15, %v8578_v46, -1e+09  ;;  %v8655_v44 = vpop.permute.xlu0 %2641 }
 0x257   : > { %v8644_v25 = vmax.f32 %v2066_v33, %v1976_v30  ;;  %v2380_v50 = vsel %vm2275_vm0, %v8578_v46, -1e+09  ;;  %v1574_v48 = vsel %vm1467_vm14, %v8581_v42, -1e+09  ;;  %v1978_v54 = vsel %vm1871_vm15, %v8581_v42, -1e+09 }
 0x258   : > { %v8632_v9 = vmax.f32 %v12497_v11, %v1977_v37  ;;  %v8637_v49 = vmax.f32 %v12498_v17, %v2381_v8  ;;  %v8657_v57 = vmax.f32 %v2470_v5, %v2380_v50  ;;  %v8659_v2 = vmax.f32 %v1736_v27, %v1574_v48  ;;  %v8692_v37 = vpop.permute.xlu1 %2644  ;;  %v12502_v48 = vld [vmem:[#allocation89_spill] sm:$0xff] }
 0x259   : > { %v8661_v33 = vmax.f32 %v2140_v34, %v1978_v54  ;;  %v2382_v55 = vsel %vm2275_vm0, %v8581_v42, -1e+09  ;;  %v8671_v53 = vsel %vm1468_vm2, %v8584_v60, -1e+09  ;;  %v8676_v51 = vsel %vm1872_vm3, %v8584_v60, -1e+09 }
 0x25a   : > { %v8666_v36 = vmax.f32 %v2544_v63, %v2382_v55  ;;  %v8681_v27 = vsel %vm2276_vm4, %v8584_v60, -1e+09  ;;  %v12499_v63 = vld [vmem:[#allocation190_spill] sm:$0xff]  ;;  %vm2680_vm6 = vcmp.eq.s32.totalorder %v8575_v35, 1  ;;  %vm2679_vm7 = vcmp.eq.s32.totalorder %v8545_v15, 1  ;;  %v12501_v54 = vld [vmem:[#allocation64_spill] sm:$0xff] }
 0x25b   : > { %v8690_v6 = vmul.f32 0.088388346, %v12499_v63  ;;  %v2779_v8 = vsel %vm2678_vm5, %v8408_v59, -1e+09  ;;  %v2780_v62 = vsel %vm2678_vm5, %v8509_v32, -1e+09  ;;  %v12517_v35 = vmax.f32 %v8598_v20, %v8671_v53 }
 0x25c   : > { %v2837_v50 = vmax.f32 %v8556_v40, %v2779_v8  ;;  %v2874_v63 = vmax.f32 %v8558_v4, %v2780_v62  ;;  %v2781_v34 = vsel %vm2678_vm5, %v8411_v47, -1e+09  ;;  %v2782_v5 = vsel %vm2678_vm5, %v8512_v29, -1e+09  ;;  %v8734_v8 = vpop.permute.xlu0 %2647  ;;  %v12506_v15 = vld [vmem:[#allocation193_spill] sm:$0xff] }
 0x25d   : > { %12500 = vst [vmem:[#allocation59_spill] sm:$0xff] %v8690_v6  ;;  %v8705_v11 = vsel %vm1468_vm2, %v8690_v6, -1e+09  ;;  %v8710_v17 = vsel %vm1872_vm3, %v8690_v6, -1e+09  ;;  %vm1469_vm8 = vcmp.eq.s32.totalorder %v12501_v54, 1  ;;  %v2911_v4 = vmax.f32 %v8564_v18, %v2781_v34 }
 0x25e   : > { %v8715_v30 = vsel %vm2276_vm4, %v8690_v6, -1e+09  ;;  %v2783_v40 = vsel %vm2679_vm7, %v8569_v31, -1e+09  ;;  %vm1873_vm9 = vcmp.eq.s32.totalorder %v12502_v48, 1  ;;  %v2948_v62 = vmax.f32 %v8566_v38, %v2782_v5  ;;  %v8754_v38 = vpop.permute.xlu1 %2650 }
 0x25f   : > { %v2838_v55 = vmax.f32 %v2837_v50, %v2783_v40  ;;  %v2784_v12 = vsel %vm2679_vm7, %v8578_v46, -1e+09  ;;  %v2785_v29 = vsel %vm2679_vm7, %v8572_v0, -1e+09  ;;  %v2786_v47 = vsel %vm2679_vm7, %v8581_v42, -1e+09 }
 0x260   : > { %v8743_v1 = vmax.f32 %v2874_v63, %v2784_v12  ;;  %v2787_v18 = vsel %vm2680_vm6, %v8584_v60, -1e+09  ;;  %v2912_v5 = vmax.f32 %v2911_v4, %v2785_v29  ;;  %v8756_v34 = vmax.f32 %v2948_v62, %v2786_v47  ;;  %v12503_v40 = vld [vmem:[#allocation136_spill] sm:$0xff]  ;;  %v12508_v42 = vld [vmem:[#allocation194_spill] sm:$0xff]  ;;  %v12510_v47 = vld [vmem:[#allocation195_spill] sm:$0xff] }
 0x261   : > { %v2839_v50 = vmax.f32 %v2838_v55, %v2787_v18  ;;  %v2789_v63 = vsel %vm2680_vm6, %v8690_v6, -1e+09  ;;  %vm2277_vm10 = vcmp.eq.s32.totalorder %v12503_v40, 1  ;;  %v12504_v12 = vld [vmem:[#allocation192_spill] sm:$0xff]  ;;  %v8766_v59 = vmul.f32 0.088388346, %v12506_v15 }
 0x262   : > { %v8763_v32 = vmul.f32 0.088388346, %v12504_v12  ;;  %vm2681_vm11 = vcmp.eq.s32.totalorder %v8613_v7, 1  ;;  %v2913_v60 = vmax.f32 %v2912_v5, %v2789_v63  ;;  %v8770_v29 = vmul.f32 0.088388346, %v12508_v42  ;;  %v12512_v4 = vld [vmem:[#allocation196_spill] sm:$0xff]  ;;  %v8787_v42 = vpop.permute.xlu0 %2653 }
 0x263   : > { %12507 = vst [vmem:[#allocation103_spill] sm:$0xff] %v8766_v59  ;;  %v8773_v55 = vmul.f32 0.088388346, %v12510_v47  ;;  %v8776_v62 = vmul.f32 0.088388346, %v12512_v4  ;;  %12514 = vst [vmem:[#allocation182_spill] sm:$0xff] %v8787_v42 }
 0x264   : > { %12505 = vst [vmem:[#allocation82_spill] sm:$0xff] %v8763_v32  ;;  %12509 = vst [vmem:[#allocation179_spill] sm:$0xff] %v8770_v29  ;;  %v1576_v18 = vsel %vm1468_vm2, %v8763_v32, -1e+09  ;;  %v1980_v12 = vsel %vm1872_vm3, %v8763_v32, -1e+09 }
 0x265   : > { %12511 = vst [vmem:[#allocation180_spill] sm:$0xff] %v8773_v55  ;;  %12513 = vst [vmem:[#allocation181_spill] sm:$0xff] %v8776_v62  ;;  %v2384_v5 = vsel %vm2276_vm4, %v8763_v32, -1e+09  ;;  %v1664_v63 = vmax.f32 %v8639_v45, %v1576_v18  ;;  %v2068_v15 = vmax.f32 %v8644_v25, %v1980_v12  ;;  %v2788_v4 = vsel %vm2680_vm6, %v8763_v32, -1e+09  ;;  %v8805_v25 = vpop.permute.xlu1 %2964 }
 0x266   : > { %v2472_v47 = vmax.f32 %v8657_v57, %v2384_v5  ;;  %v2876_v6 = vmax.f32 %v8743_v1, %v2788_v4  ;;  %v1578_v0 = vsel %vm1468_vm2, %v8766_v59, -1e+09  ;;  %v1982_v42 = vsel %vm1872_vm3, %v8766_v59, -1e+09  ;;  %v8854_v53 = vpop.permute.xlu0 %2967  ;;  %v12538_v32 = vld [vmem:[#allocation20_spill] sm:$0xff] }
 0x267   : > { %v2386_v45 = vsel %vm2276_vm4, %v8766_v59, -1e+09  ;;  %v1738_v57 = vmax.f32 %v8659_v2, %v1578_v0  ;;  %v2142_v18 = vmax.f32 %v8661_v33, %v1982_v42  ;;  %v2790_v43 = vsel %vm2680_vm6, %v8766_v59, -1e+09  ;;  %v12515_v2 = vld [vmem:[#allocation63_spill] sm:$0xff]  ;;  %v12516_v33 = vld [vmem:[#allocation86_spill] sm:$0xff] }
 0x268   : > { %v2546_v1 = vmax.f32 %v8666_v36, %v2386_v45  ;;  %v2950_v12 = vmax.f32 %v8756_v34, %v2790_v43  ;;  %v1579_v61 = vsel %vm1469_vm8, %v8770_v29, -1e+09  ;;  %v1983_v19 = vsel %vm1873_vm9, %v8770_v29, -1e+09 }
 0x269   : > { %v2387_v0 = vsel %vm2277_vm10, %v8770_v29, -1e+09  ;;  %vm1470_vm12 = vcmp.eq.s32.totalorder %v12515_v2, 1  ;;  %vm1874_vm13 = vcmp.eq.s32.totalorder %v12516_v33, 1  ;;  %v8828_v36 = vmax.f32 %v12517_v35, %v1579_v61  ;;  %v12544_v33 = vld [vmem:[#allocation99_spill] sm:$0xff] }
 0x26a   : > { %v12518_v34 = vmax.f32 %v8603_v28, %v8676_v51  ;;  %v12519_v42 = vmax.f32 %v8608_v22, %v8681_v27  ;;  %v2791_v45 = vsel %vm2681_vm11, %v8770_v29, -1e+09  ;;  %v1581_v20 = vsel %vm1469_vm8, %v8773_v55, -1e+09 }
 0x26b   : > { %v8843_v43 = vmax.f32 %v2839_v50, %v2791_v45  ;;  %v1985_v28 = vsel %vm1873_vm9, %v8773_v55, -1e+09  ;;  %v2389_v22 = vsel %vm2277_vm10, %v8773_v55, -1e+09  ;;  %v12520_v51 = vmax.f32 %v8618_v41, %v8705_v11  ;;  %v8885_v11 = vpop.permute.xlu1 %2970 }
 0x26c   : > { %v8833_v5 = vmax.f32 %v12518_v34, %v1983_v19  ;;  %v8838_v4 = vmax.f32 %v12519_v42, %v2387_v0  ;;  %v12521_v50 = vmax.f32 %v8632_v9, %v8710_v17  ;;  %v12522_v19 = vmax.f32 %v8637_v49, %v8715_v30 }
 0x26d   : > { %v8859_v27 = vmax.f32 %v12520_v51, %v1581_v20  ;;  %v2793_v35 = vsel %vm2681_vm11, %v8773_v55, -1e+09  ;;  %v1580_v41 = vsel %vm1469_vm8, %v8776_v62, -1e+09  ;;  %v1984_v9 = vsel %vm1873_vm9, %v8776_v62, -1e+09 }
 0x26e   : > { %v8864_v61 = vmax.f32 %v12521_v50, %v1985_v28  ;;  %v8869_v0 = vmax.f32 %v12522_v19, %v2389_v22  ;;  %v8874_v34 = vmax.f32 %v2913_v60, %v2793_v35  ;;  %v2388_v49 = vsel %vm2277_vm10, %v8776_v62, -1e+09  ;;  %v12523_v20 = vld [vmem:[#allocation197_spill] sm:$0xff]  ;;  %v12525_v22 = vld [vmem:[#allocation54_spill] sm:$0xff]  ;;  %v12527_v50 = vld [vmem:[#allocation156_spill] sm:$0xff] }
 0x26f   : > { %v8887_v17 = vmax.f32 %v1664_v63, %v1580_v41  ;;  %v8889_v30 = vmax.f32 %v2068_v15, %v1984_v9  ;;  %v8891_v60 = vmax.f32 %v2472_v47, %v2388_v49  ;;  %v2792_v42 = vsel %vm2681_vm11, %v8776_v62, -1e+09  ;;  %v12528_v15 = vld [vmem:[#allocation78_spill] sm:$0xff]  ;;  %v12530_v19 = vld [vmem:[#allocation113_spill] sm:$0xff]  ;;  %v12532_v49 = vld [vmem:[#allocation16_spill] sm:$0xff] }
 0x270   : > { %v8896_v45 = vmax.f32 %v2876_v6, %v2792_v42  ;;  %v8899_v28 = vmul.f32 0.088388346, %v12523_v20  ;;  %v8902_v51 = vmul.f32 0.088388346, %v12525_v22  ;;  %vm2278_vm14 = vcmp.eq.s32.totalorder %v12527_v50, 1  ;;  %v8924_v42 = vpop.permute.xlu0 %2976  ;;  %v12533_v20 = vld [vmem:[#allocation14_spill] sm:$0xff] }
 0x271   : > { %vm2682_vm15 = vcmp.eq.s32.totalorder %v8655_v44, 1  ;;  %v11894_v63 = vmov 6   ;;  %v8908_v47 = vmul.f32 0.088388346, %v12528_v15  ;;  %v8911_v35 = vmul.f32 0.088388346, %v12530_v19 }
 0x272   : > { %12524 = vst [vmem:[#allocation183_spill] sm:$0xff] %v8899_v28  ;;  %12526 = vst [vmem:[#allocation62_spill] sm:$0xff] %v8902_v51  ;;  %5352 = vset.pattern.permute.xlu0 %v11894_v63  ;;  %5351 = vset.pattern.permute.xlu1 %v11894_v63  ;;  %v1582_v6 = vsel %vm1469_vm8, %v8899_v28, -1e+09  ;;  %v1986_v41 = vsel %vm1873_vm9, %v8899_v28, -1e+09 }
 0x273   : > { %12529 = vst [vmem:[#allocation87_spill] sm:$0xff] %v8908_v47  ;;  %12531 = vst [vmem:[#allocation184_spill] sm:$0xff] %v8911_v35  ;;  %v2390_v9 = vsel %vm2277_vm10, %v8899_v28, -1e+09  ;;  %3775 = vperm.xlu0 %5352, %v12532_v49   ;;  %3772 = vperm.xlu1 %5351, %v12533_v20   ;;  %v8927_v22 = vmax.f32 %v1738_v57, %v1582_v6  ;;  %v8929_v15 = vmax.f32 %v2142_v18, %v1986_v41  ;;  %v12545_v50 = vld [vmem:[#allocation101_spill] sm:$0xff] }
 0x274   : > { %v8931_v54 = vmax.f32 %v2546_v1, %v2390_v9  ;;  %v2794_v48 = vsel %vm2681_vm11, %v8899_v28, -1e+09  ;;  %v8941_v40 = vsel %vm1470_vm12, %v8902_v51, -1e+09  ;;  %v8946_v57 = vsel %vm1874_vm13, %v8902_v51, -1e+09  ;;  %v8953_v1 = vpop.permute.xlu1 %2973 }
 0x275   : > { %v8936_v19 = vmax.f32 %v2950_v12, %v2794_v48  ;;  %v8951_v18 = vsel %vm2278_vm14, %v8902_v51, -1e+09  ;;  %v1629_v7 = vmax.f32 %v8828_v36, %v8941_v40  ;;  %v2033_v12 = vmax.f32 %v8833_v5, %v8946_v57  ;;  %v12535_v40 = vld [vmem:[#allocation13_spill] sm:$0xff] }
 0x276   : > { %v2437_v6 = vmax.f32 %v8838_v4, %v8951_v18  ;;  %v8964_v41 = vsel %vm2682_vm15, %v8902_v51, -1e+09  ;;  %v8971_v48 = vsel %vm1470_vm12, %v8908_v47, -1e+09  ;;  %v8976_v36 = vsel %vm1874_vm13, %v8908_v47, -1e+09 }
 0x277   : > { %v8981_v5 = vsel %vm2278_vm14, %v8908_v47, -1e+09  ;;  %v12534_v4 = vld [vmem:[#allocation18_spill] sm:$0xff]  ;;  %3778 = vperm.xlu1 %5351, %v12535_v40   ;;  %v1703_v57 = vmax.f32 %v8859_v27, %v8971_v48  ;;  %v2107_v18 = vmax.f32 %v8864_v61, %v8976_v36  ;;  %v8994_v9 = vsel %vm2682_vm15, %v8908_v47, -1e+09  ;;  %v12536_v47 = vld [vmem:[#allocation200_spill] sm:$0xff] }
 0x278   : > { %3784 = vperm.xlu0 %5352, %v12534_v4   ;;  %v2511_v63 = vmax.f32 %v8869_v0, %v8981_v5  ;;  %v2915_v51 = vmax.f32 %v8874_v34, %v8994_v9  ;;  %v9001_v59 = vsel %vm1470_vm12, %v8911_v35, -1e+09  ;;  %v9006_v27 = vsel %vm1874_vm13, %v8911_v35, -1e+09  ;;  %v9013_v0 = vpop.permute.xlu0 %2982  ;;  %v12547_v44 = vld [vmem:[#allocation17_spill] sm:$0xff] }
 0x279   : > { %v9011_v61 = vsel %vm2278_vm14, %v8911_v35, -1e+09  ;;  %v1666_v34 = vmax.f32 %v8887_v17, %v9001_v59  ;;  %v2070_v9 = vmax.f32 %v8889_v30, %v9006_v27  ;;  %v9024_v36 = vsel %vm2682_vm15, %v8911_v35, -1e+09  ;;  %v9032_v59 = vpop.permute.xlu1 %2979  ;;  %v12540_v17 = vld [vmem:[#allocation15_spill] sm:$0xff]  ;;  %v12541_v30 = vld [vmem:[#allocation66_spill] sm:$0xff] }
 0x27a   : > { %v2474_v48 = vmax.f32 %v8891_v60, %v9011_v61  ;;  %v9029_v4 = vmul.f32 0.088388346, %v12536_v47  ;;  %12539 = vst [vmem:[#allocation131_spill] sm:$0xff] %v9032_v59  ;;  %vm1471_vm0 = vcmp.eq.s32.totalorder %v12541_v30, 1  ;;  %v12542_v60 = vld [vmem:[#allocation91_spill] sm:$0xff]  ;;  %v12543_v27 = vld [vmem:[#allocation141_spill] sm:$0xff]  ;;  %v12565_v58 = vmax.f32 %v8843_v43, %v8964_v41 }
 0x27b   : > { %3781 = vperm.xlu1 %5351, %v12540_v17   ;;  %vm1875_vm1 = vcmp.eq.s32.totalorder %v12542_v60, 1  ;;  %vm2279_vm2 = vcmp.eq.s32.totalorder %v12543_v27, 1  ;;  %vm3060_vm3 = vcmp.eq.s32.totalorder %v8854_v53, 1  ;;  %vm2683_vm4 = vcmp.eq.s32.totalorder %v8692_v37, 1  ;;  %v12556_v55 = vld [vmem:[#allocation201_spill] sm:$0xff] }
 0x27c   : > { %12537 = vst [vmem:[#allocation185_spill] sm:$0xff] %v9029_v4  ;;  %3790 = vperm.xlu0 %5352, %v12538_v32   ;;  %v1586_v61 = vsel %vm1470_vm12, %v9029_v4, -1e+09  ;;  %v1990_v47 = vsel %vm1874_vm13, %v9029_v4, -1e+09  ;;  %vm2684_vm8 = vcmp.eq.s32.totalorder %v8734_v8, 1 }
 0x27d   : > { %v2394_v5 = vsel %vm2278_vm14, %v9029_v4, -1e+09  ;;  %v1740_v35 = vmax.f32 %v8927_v22, %v1586_v61  ;;  %v2144_v32 = vmax.f32 %v8929_v15, %v1990_v47  ;;  %v2798_v17 = vsel %vm2682_vm15, %v9029_v4, -1e+09  ;;  %v12546_v15 = vld [vmem:[#allocation22_spill] sm:$0xff]  ;;  %v12551_v47 = vld [vmem:[#allocation152_spill] sm:$0xff] }
 0x27e   : > { %v2548_v40 = vmax.f32 %v8931_v54, %v2394_v5  ;;  %v2952_v2 = vmax.f32 %v8936_v19, %v2798_v17  ;;  %v9059_v28 = vsel %vm3060_vm3, %v12544_v33, -1e+09  ;;  %v9064_v22 = vsel %vm3060_vm3, %v12545_v50, -1e+09  ;;  %v9067_v54 = vpop.permute.xlu0 %2988  ;;  %v12548_v5 = vld [vmem:[#allocation100_spill] sm:$0xff]  ;;  %v12549_v17 = vld [vmem:[#allocation47_spill] sm:$0xff] }
 0x27f   : > { %3787 = vperm.xlu1 %5351, %v12547_v44   ;;  %v9073_v19 = vsel %vm3060_vm3, %v12548_v5, -1e+09  ;;  %v9076_v61 = vmul.f32 0.088388346, %v12549_v17  ;;  %v9079_v33 = vmul.f32 0.088388346, %v12551_v47  ;;  %v9093_v17 = vpop.permute.xlu1 %2985 }
 0x280   : > { %3796 = vperm.xlu0 %5352, %v12546_v15   ;;  %v12553_v4 = vld [vmem:[#allocation65_spill] sm:$0xff]  ;;  %v12554_v50 = vld [vmem:[#allocation88_spill] sm:$0xff]  ;;  %v12555_v15 = vld [vmem:[#allocation162_spill] sm:$0xff]  ;;  %v9085_v62 = vmul.f32 0.088388346, %v12556_v55  ;;  %12562 = vst [vmem:[#allocation52_spill] sm:$0xff] %v9093_v17 }
 0x281   : > { %12550 = vst [vmem:[#allocation61_spill] sm:$0xff] %v9076_v61  ;;  %12552 = vst [vmem:[#allocation84_spill] sm:$0xff] %v9079_v33  ;;  %vm1472_vm5 = vcmp.eq.s32.totalorder %v12553_v4, 1  ;;  %vm1876_vm6 = vcmp.eq.s32.totalorder %v12554_v50, 1  ;;  %vm2280_vm7 = vcmp.eq.s32.totalorder %v12555_v15, 1  ;;  %v12558_v44 = vld [vmem:[#allocation202_spill] sm:$0xff] }
 0x282   : > { %12557 = vst [vmem:[#allocation72_spill] sm:$0xff] %v9085_v62  ;;  %v9088_v29 = vmul.f32 0.088388346, %v12558_v44  ;;  %v12560_v5 = vld [vmem:[#allocation203_spill] sm:$0xff]  ;;  %vm3063_vm9 = vcmp.eq.s32.totalorder %v8924_v42, 1  ;;  %vm3059_vm10 = vcmp.eq.s32.totalorder %v8805_v25, 1 }
 0x283   : > { %v9091_v49 = vmul.f32 0.088388346, %v12560_v5  ;;  %v1587_v47 = vsel %vm1471_vm0, %v9076_v61, -1e+09  ;;  %v1991_v55 = vsel %vm1875_vm1, %v9076_v61, -1e+09  ;;  %3793 = vperm.xlu1 %5351, %v12564_v39   ;;  %v12570_v39 = vmax.f32 %v8896_v45, %v9024_v36 }
 0x284   : > { %12559 = vst [vmem:[#allocation186_spill] sm:$0xff] %v9088_v29  ;;  %v2395_v44 = vsel %vm2279_vm2, %v9076_v61, -1e+09  ;;  %v9106_v5 = vmax.f32 %v1629_v7, %v1587_v47  ;;  %v9108_v20 = vmax.f32 %v2033_v12, %v1991_v55  ;;  %v2799_v31 = vsel %vm2683_vm4, %v9076_v61, -1e+09  ;;  %3802 = vperm.xlu0 %5352, %v12563_v24   ;;  %v12569_v24 = vld [vmem:[#allocation21_spill] sm:$0xff] }
 0x285   : > { %12561 = vst [vmem:[#allocation188_spill] sm:$0xff] %v9091_v49  ;;  %v9110_v46 = vmax.f32 %v2437_v6, %v2395_v44  ;;  %v9120_v52 = vmax.f32 %v12565_v58, %v2799_v31  ;;  %v1589_v7 = vsel %vm1471_vm0, %v9079_v33, -1e+09  ;;  %v1993_v12 = vsel %vm1875_vm1, %v9079_v33, -1e+09  ;;  %v9140_v31 = vpop.permute.xlu0 %2994  ;;  %v12585_v61 = vld [vmem:[#allocation92_spill] sm:$0xff] }
 0x286   : > { %v2397_v6 = vsel %vm2279_vm2, %v9079_v33, -1e+09  ;;  %v9131_v47 = vmax.f32 %v1703_v57, %v1589_v7  ;;  %v9133_v55 = vmax.f32 %v2107_v18, %v1993_v12  ;;  %v2801_v58 = vsel %vm2683_vm4, %v9079_v33, -1e+09  ;;  %12566 = vst [vmem:[#allocation189_spill] sm:$0xff] %v9140_v31  ;;  %v12594_v31 = vld [vmem:[#allocation116_spill] sm:$0xff] }
 0x287   : > { %v9135_v44 = vmax.f32 %v2511_v63, %v2397_v6  ;;  %v9142_v43 = vmax.f32 %v2915_v51, %v2801_v58  ;;  %v1588_v41 = vsel %vm1471_vm0, %v9085_v62, -1e+09  ;;  %v1992_v57 = vsel %vm1875_vm1, %v9085_v62, -1e+09  ;;  %v12567_v6 = vld [vmem:[#allocation26_spill] sm:$0xff]  ;;  %v9163_v58 = vpop.permute.xlu1 %2991  ;;  %3799 = vperm.xlu1 %5351, %v12569_v24   ;;  %v12598_v25 = vld [vmem:[#allocation117_spill] sm:$0xff] }
 0x288   : > { %v2396_v63 = vsel %vm2279_vm2, %v9085_v62, -1e+09  ;;  %v9153_v18 = vmax.f32 %v1666_v34, %v1588_v41  ;;  %v9155_v7 = vmax.f32 %v2070_v9, %v1992_v57  ;;  %v2800_v51 = vsel %vm2683_vm4, %v9085_v62, -1e+09  ;;  %3808 = vperm.xlu0 %5352, %v12567_v6   ;;  %12568 = vst [vmem:[#allocation109_spill] sm:$0xff] %v9163_v58  ;;  %v12586_v62 = vld [vmem:[#allocation144_spill] sm:$0xff] }
 0x289   : > { %v9157_v12 = vmax.f32 %v2474_v48, %v2396_v63  ;;  %v9169_v33 = vmax.f32 %v12570_v39, %v2800_v51  ;;  %v1590_v34 = vsel %vm1471_vm0, %v9088_v29, -1e+09  ;;  %v1994_v9 = vsel %vm1875_vm1, %v9088_v29, -1e+09  ;;  %v9217_v27 = vpop.permute.xlu0 %3000  ;;  %v12573_v51 = vld [vmem:[#allocation23_spill] sm:$0xff]  ;;  %v12587_v58 = vld [vmem:[#allocation32_spill] sm:$0xff] }
 0x28a   : > { %v2398_v48 = vsel %vm2279_vm2, %v9088_v29, -1e+09  ;;  %v9180_v41 = vmax.f32 %v1740_v35, %v1590_v34  ;;  %v9182_v57 = vmax.f32 %v2144_v32, %v1994_v9  ;;  %v2802_v39 = vsel %vm2683_vm4, %v9088_v29, -1e+09  ;;  %12571 = vst [vmem:[#allocation190_spill] sm:$0xff] %v9217_v27  ;;  %v12574_v34 = vld [vmem:[#allocation102_spill] sm:$0xff] }
 0x28b   : > { %v9184_v63 = vmax.f32 %v2548_v40, %v2398_v48  ;;  %v9189_v45 = vmax.f32 %v2952_v2, %v2802_v39  ;;  %v9194_v36 = vsel %vm1472_vm5, %v9091_v49, -1e+09  ;;  %v9199_v35 = vsel %vm1876_vm6, %v9091_v49, -1e+09  ;;  %v12572_v2 = vld [vmem:[#allocation28_spill] sm:$0xff]  ;;  %3805 = vperm.xlu1 %5351, %v12573_v51   ;;  %v12577_v40 = vld [vmem:[#allocation114_spill] sm:$0xff]  ;;  %v9244_v53 = vpop.permute.xlu1 %2997 }
 0x28c   : > { %v9204_v32 = vsel %vm2280_vm7, %v9091_v49, -1e+09  ;;  %v9215_v60 = vsel %vm2684_vm8, %v9091_v49, -1e+09  ;;  %3814 = vperm.xlu0 %5352, %v12572_v2   ;;  %v9224_v9 = vsel %vm3060_vm3, %v12574_v34, -1e+09 }
 0x28d   : > { %v9229_v39 = vmul.f32 0.088388346, %v7897_v23  ;;  %v9232_v30 = vmul.f32 0.088388346, %v7927_v3  ;;  %v9237_v37 = vsel %vm3063_vm9, %v12577_v40, -1e+09  ;;  %v9302_v29 = vpop.permute.xlu0 %3006 }
 0x28e   : > { %12578 = vst [vmem:[#allocation136_spill] sm:$0xff] %v9237_v37  ;;  %v9240_v2 = vmul.f32 0.088388346, %v7944_v10  ;;  %vm3061_vm11 = vcmp.eq.s32.totalorder %v8885_v11, 1  ;;  %12580 = vst [vmem:[#allocation193_spill] sm:$0xff] %v9244_v53  ;;  %v12581_v51 = vld [vmem:[#allocation30_spill] sm:$0xff] }
 0x28f   : > { %12575 = vst [vmem:[#allocation64_spill] sm:$0xff] %v9229_v39  ;;  %12576 = vst [vmem:[#allocation89_spill] sm:$0xff] %v9232_v30  ;;  %v9249_v23 = vsel %vm1472_vm5, %v9229_v39, -1e+09  ;;  %v9254_v3 = vsel %vm1876_vm6, %v9229_v39, -1e+09  ;;  %v9336_v21 = vpop.permute.xlu1 %3003 }
 0x290   : > { %12579 = vst [vmem:[#allocation192_spill] sm:$0xff] %v9240_v2  ;;  %v9259_v10 = vsel %vm2280_vm7, %v9229_v39, -1e+09  ;;  %v9270_v6 = vsel %vm2684_vm8, %v9229_v39, -1e+09  ;;  %3820 = vperm.xlu0 %5352, %v12581_v51   ;;  %v12582_v49 = vld [vmem:[#allocation25_spill] sm:$0xff] }
 0x291   : > { %3811 = vperm.xlu1 %5351, %v12582_v49   ;;  %v9279_v48 = vsel %vm1472_vm5, %v9232_v30, -1e+09  ;;  %v9284_v34 = vsel %vm1876_vm6, %v9232_v30, -1e+09  ;;  %v9289_v40 = vsel %vm2280_vm7, %v9232_v30, -1e+09 }
 0x292   : > { %v9300_v39 = vsel %vm2684_vm8, %v9232_v30, -1e+09  ;;  %12583 = vst [vmem:[#allocation194_spill] sm:$0xff] %v9302_v29  ;;  %v9309_v51 = vsel %vm1472_vm5, %v9240_v2, -1e+09  ;;  %v12584_v30 = vld [vmem:[#allocation68_spill] sm:$0xff] }
 0x293   : > { %v9314_v24 = vsel %vm1876_vm6, %v9240_v2, -1e+09  ;;  %v9319_v49 = vsel %vm2280_vm7, %v9240_v2, -1e+09  ;;  %vm1473_vm12 = vcmp.eq.s32.totalorder %v12584_v30, 1  ;;  %vm1877_vm13 = vcmp.eq.s32.totalorder %v12585_v61, 1  ;;  %v9408_v11 = vpop.permute.xlu1 %3009 }
 0x294   : > { %vm2281_vm14 = vcmp.eq.s32.totalorder %v12586_v62, 1  ;;  %v9333_v15 = vsel %vm2684_vm8, %v9240_v2, -1e+09  ;;  %3826 = vperm.xlu0 %5352, %v12587_v58   ;;  %12588 = vst [vmem:[#allocation195_spill] sm:$0xff] %v9336_v21  ;;  %v12589_v29 = vld [vmem:[#allocation27_spill] sm:$0xff]  ;;  %vm2685_vm15 = vcmp.eq.s32.totalorder %v8754_v38, 1  ;;  %v12648_v30 = vmax.f32 %v9184_v63, %v9319_v49 }
 0x295   : > { %3817 = vperm.xlu1 %5351, %v12589_v29   ;;  %v12590_v53 = vld [vmem:[#allocation94_spill] sm:$0xff]  ;;  %v12591_v27 = vld [vmem:[#allocation96_spill] sm:$0xff]  ;;  %v12592_v2 = vld [vmem:[#allocation95_spill] sm:$0xff]  ;;  %vm3065_vm0 = vcmp.eq.s32.totalorder %v9013_v0, 1  ;;  %12612 = vst [vmem:[#allocation113_spill] sm:$0xff] %v9408_v11  ;;  %vm3067_vm1 = vcmp.eq.s32.totalorder %v9067_v54, 1 }
 0x296   : > { %v3091_v50 = vsel %vm3059_vm10, %v12590_v53, -1e+09  ;;  %v3092_v8 = vsel %vm3059_vm10, %v12591_v27, -1e+09  ;;  %v3093_v58 = vsel %vm3059_vm10, %v12592_v2, -1e+09 }
 0x297   : > { %v12593_v21 = vld [vmem:[#allocation97_spill] sm:$0xff]  ;;  %v3219_v17 = vmax.f32 %v3091_v50, %v9059_v28  ;;  %v3256_v4 = vmax.f32 %v3092_v8, %v9064_v22  ;;  %v3293_v37 = vmax.f32 %v3093_v58, %v9073_v19  ;;  %v9360_v53 = vsel %vm3063_vm9, %v12594_v31, -1e+09  ;;  %v12596_v27 = vld [vmem:[#allocation115_spill] sm:$0xff]  ;;  %v12600_v22 = vld [vmem:[#allocation104_spill] sm:$0xff]  ;;  %v9380_v8 = vpop.permute.xlu0 %3012 }
 0x298   : > { %v3094_v29 = vsel %vm3059_vm10, %v12593_v21, -1e+09  ;;  %12595 = vst [vmem:[#allocation196_spill] sm:$0xff] %v9360_v53  ;;  %v9365_v59 = vsel %vm3063_vm9, %v12596_v27, -1e+09  ;;  %v12601_v58 = vld [vmem:[#allocation106_spill] sm:$0xff]  ;;  %v12631_v53 = vmax.f32 %v9120_v52, %v9215_v60  ;;  %v12634_v52 = vmax.f32 %v9133_v55, %v9254_v3 }
 0x299   : > { %12597 = vst [vmem:[#allocation63_spill] sm:$0xff] %v9365_v59  ;;  %v3330_v2 = vmax.f32 %v3094_v29, %v9224_v9  ;;  %v9372_v28 = vsel %vm3063_vm9, %v12598_v25, -1e+09  ;;  %v3099_v19 = vsel %vm3061_vm11, %v12600_v22, -1e+09  ;;  %12602 = vst [vmem:[#allocation197_spill] sm:$0xff] %v9380_v8  ;;  %v12635_v60 = vmax.f32 %v9135_v44, %v9259_v10 }
 0x29a   : > { %12599 = vst [vmem:[#allocation86_spill] sm:$0xff] %v9372_v28  ;;  %v3100_v50 = vsel %vm3061_vm11, %v12601_v58, -1e+09  ;;  %v12603_v27 = vld [vmem:[#allocation34_spill] sm:$0xff]  ;;  %v12604_v29 = vld [vmem:[#allocation29_spill] sm:$0xff]  ;;  %v12606_v25 = vld [vmem:[#allocation107_spill] sm:$0xff]  ;;  %v9390_v21 = vmax.f32 %v3219_v17, %v3099_v19  ;;  %v12640_v10 = vmax.f32 %v9153_v18, %v9279_v48 }
 0x29b   : > { %3832 = vperm.xlu0 %5352, %v12603_v27   ;;  %3823 = vperm.xlu1 %5351, %v12604_v29   ;;  %v12605_v9 = vld [vmem:[#allocation105_spill] sm:$0xff]  ;;  %v3102_v31 = vsel %vm3061_vm11, %v12606_v25, -1e+09  ;;  %v9392_v22 = vmax.f32 %v3256_v4, %v3100_v50  ;;  %v12607_v28 = vld [vmem:[#allocation126_spill] sm:$0xff]  ;;  %v12609_v27 = vld [vmem:[#allocation128_spill] sm:$0xff]  ;;  %v9458_v59 = vpop.permute.xlu0 %3018  ;;  %vm3062_vm5 = vcmp.eq.s32.totalorder %v8953_v1, 1 }
 0x29c   : > { %v3101_v42 = vsel %vm3061_vm11, %v12605_v9, -1e+09  ;;  %v9397_v58 = vsel %vm3065_vm0, %v12607_v28, -1e+09  ;;  %v9402_v29 = vsel %vm3065_vm0, %v12609_v27, -1e+09  ;;  %v9406_v9 = vmax.f32 %v3330_v2, %v3102_v31 }
 0x29d   : > { %12608 = vst [vmem:[#allocation54_spill] sm:$0xff] %v9397_v58  ;;  %12610 = vst [vmem:[#allocation156_spill] sm:$0xff] %v9402_v29  ;;  %v9404_v8 = vmax.f32 %v3293_v37, %v3101_v42  ;;  %v12613_v17 = vld [vmem:[#allocation127_spill] sm:$0xff]  ;;  %v12615_v19 = vld [vmem:[#allocation93_spill] sm:$0xff]  ;;  %v9431_v25 = vmul.f32 0.088388346, %v8119_v13 }
 0x29e   : > { %12611 = vst [vmem:[#allocation78_spill] sm:$0xff] %v9406_v9  ;;  %v9413_v4 = vsel %vm3065_vm0, %v12613_v17, -1e+09  ;;  %v9418_v50 = vsel %vm3065_vm0, %v12615_v19, -1e+09  ;;  %v12617_v27 = vld [vmem:[#allocation135_spill] sm:$0xff]  ;;  %v12628_v19 = vmax.f32 %v9106_v5, %v9194_v36  ;;  %v12633_v36 = vmax.f32 %v9131_v47, %v9249_v23 }
 0x29f   : > { %12614 = vst [vmem:[#allocation200_spill] sm:$0xff] %v9413_v4  ;;  %12616 = vst [vmem:[#allocation66_spill] sm:$0xff] %v9418_v50  ;;  %v9422_v28 = vmul.f32 0.088388346, %v12617_v27  ;;  %v12619_v37 = vld [vmem:[#allocation158_spill] sm:$0xff]  ;;  %v12621_v2 = vld [vmem:[#allocation160_spill] sm:$0xff]  ;;  %v12630_v4 = vmax.f32 %v9110_v46, %v9204_v32  ;;  %v12638_v47 = vmax.f32 %v9142_v43, %v9270_v6  ;;  %v12641_v43 = vmax.f32 %v9155_v7, %v9284_v34 }
 0x2a0   : > { %v9425_v31 = vmul.f32 0.088388346, %v12619_v37  ;;  %v9428_v42 = vmul.f32 0.088388346, %v12621_v2  ;;  %12623 = vst [vmem:[#allocation152_spill] sm:$0xff] %v9431_v25  ;;  %v12624_v17 = vld [vmem:[#allocation36_spill] sm:$0xff] }
 0x2a1   : > { %12618 = vst [vmem:[#allocation91_spill] sm:$0xff] %v9422_v28  ;;  %3838 = vperm.xlu0 %5352, %v12624_v17   ;;  %v12625_v11 = vld [vmem:[#allocation31_spill] sm:$0xff]  ;;  %v1595_v0 = vsel %vm1473_vm12, %v9422_v28, -1e+09  ;;  %v1999_v27 = vsel %vm1877_vm13, %v9422_v28, -1e+09 }
 0x2a2   : > { %12620 = vst [vmem:[#allocation141_spill] sm:$0xff] %v9425_v31  ;;  %12622 = vst [vmem:[#allocation47_spill] sm:$0xff] %v9428_v42  ;;  %3829 = vperm.xlu1 %5351, %v12625_v11   ;;  %v2403_v37 = vsel %vm2281_vm14, %v9422_v28, -1e+09  ;;  %v12626_v2 = vld [vmem:[#allocation67_spill] sm:$0xff]  ;;  %v12627_v13 = vld [vmem:[#allocation90_spill] sm:$0xff]  ;;  %v1632_v17 = vmax.f32 %v12628_v19, %v1595_v0  ;;  %v12629_v11 = vmax.f32 %v9108_v20, %v9199_v35 }
 0x2a3   : > { %vm1474_vm2 = vcmp.eq.s32.totalorder %v12626_v2, 1  ;;  %vm1878_vm3 = vcmp.eq.s32.totalorder %v12627_v13, 1  ;;  %v2440_v29 = vmax.f32 %v12630_v4, %v2403_v37  ;;  %v2807_v58 = vsel %vm2685_vm15, %v9422_v28, -1e+09  ;;  %v9487_v4 = vpop.permute.xlu1 %3015  ;;  %v12637_v19 = vld [vmem:[#allocation33_spill] sm:$0xff]  ;;  %v12650_v62 = vld [vmem:[#allocation40_spill] sm:$0xff] }
 0x2a4   : > { %v2036_v50 = vmax.f32 %v12629_v11, %v1999_v27  ;;  %v9463_v9 = vmax.f32 %v12631_v53, %v2807_v58  ;;  %v1597_v20 = vsel %vm1473_vm12, %v9425_v31, -1e+09  ;;  %v2001_v46 = vsel %vm1877_vm13, %v9425_v31, -1e+09  ;;  %v12636_v11 = vld [vmem:[#allocation38_spill] sm:$0xff]  ;;  %v12657_v63 = vld [vmem:[#allocation169_spill] sm:$0xff] }
 0x2a5   : > { %v2405_v5 = vsel %vm2281_vm14, %v9425_v31, -1e+09  ;;  %v1706_v35 = vmax.f32 %v12633_v36, %v1597_v20  ;;  %v2110_v32 = vmax.f32 %v12634_v52, %v2001_v46  ;;  %v2809_v58 = vsel %vm2685_vm15, %v9425_v31, -1e+09  ;;  %3844 = vperm.xlu0 %5352, %v12636_v11   ;;  %v9546_v36 = vpop.permute.xlu0 %3024  ;;  %v12651_v52 = vld [vmem:[#allocation35_spill] sm:$0xff]  ;;  %v12673_v13 = vld [vmem:[#allocation110_spill] sm:$0xff] }
 0x2a6   : > { %12632 = vst [vmem:[#allocation65_spill] sm:$0xff] %v9463_v9  ;;  %v2514_v53 = vmax.f32 %v12635_v60, %v2405_v5  ;;  %3835 = vperm.xlu1 %5351, %v12637_v19   ;;  %v9493_v23 = vmax.f32 %v12638_v47, %v2809_v58  ;;  %v1596_v55 = vsel %vm1473_vm12, %v9428_v42, -1e+09  ;;  %v2000_v44 = vsel %vm1877_vm13, %v9428_v42, -1e+09  ;;  %v12672_v2 = vld [vmem:[#allocation111_spill] sm:$0xff] }
 0x2a7   : > { %v2404_v3 = vsel %vm2281_vm14, %v9428_v42, -1e+09  ;;  %v1669_v0 = vmax.f32 %v12640_v10, %v1596_v55  ;;  %v2073_v6 = vmax.f32 %v12641_v43, %v2000_v44  ;;  %v12642_v27 = vmax.f32 %v9157_v12, %v9289_v40  ;;  %v12662_v44 = vld [vmem:[#allocation37_spill] sm:$0xff]  ;;  %v12687_v11 = vld [vmem:[#allocation86_spill] sm:$0xff]  ;;  %v12689_v19 = vld [vmem:[#allocation147_spill] sm:$0xff] }
 0x2a8   : > { %12639 = vst [vmem:[#allocation88_spill] sm:$0xff] %v9493_v23  ;;  %v2808_v20 = vsel %vm2685_vm15, %v9428_v42, -1e+09  ;;  %v12644_v46 = vmax.f32 %v9169_v33, %v9300_v39  ;;  %v1598_v18 = vsel %vm1473_vm12, %v9431_v25, -1e+09  ;;  %v12646_v40 = vmax.f32 %v9180_v41, %v9309_v51  ;;  %v12658_v51 = vld [vmem:[#allocation137_spill] sm:$0xff] }
 0x2a9   : > { %v9513_v37 = vmax.f32 %v12642_v27, %v2404_v3  ;;  %v2002_v7 = vsel %vm1877_vm13, %v9431_v25, -1e+09  ;;  %v2406_v12 = vsel %vm2281_vm14, %v9431_v25, -1e+09  ;;  %v12647_v33 = vmax.f32 %v9182_v57, %v9314_v24  ;;  %3850 = vperm.xlu0 %5352, %v12650_v62   ;;  %v12686_v62 = vld [vmem:[#allocation63_spill] sm:$0xff] }
 0x2aa   : > { %v9521_v5 = vmax.f32 %v12644_v46, %v2808_v20  ;;  %v1743_v34 = vmax.f32 %v12646_v40, %v1598_v18  ;;  %v9541_v39 = vmax.f32 %v12648_v30, %v2406_v12  ;;  %v2810_v61 = vsel %vm2685_vm15, %v9431_v25, -1e+09  ;;  %3841 = vperm.xlu1 %5351, %v12651_v52   ;;  %v9615_v20 = vpop.permute.xlu0 %3030  ;;  %v12665_v46 = vld [vmem:[#allocation45_spill] sm:$0xff]  ;;  %v12669_v40 = vld [vmem:[#allocation108_spill] sm:$0xff]  ;;  %v12670_v30 = vld [vmem:[#allocation131_spill] sm:$0xff] }
 0x2ab   : > { %12643 = vst [vmem:[#allocation162_spill] sm:$0xff] %v9513_v37  ;;  %v2147_v48 = vmax.f32 %v12647_v33, %v2002_v7  ;;  %v12652_v41 = vmax.f32 %v9189_v45, %v9333_v15  ;;  %v9556_v57 = vmul.f32 0.088388346, %v8134_v16  ;;  %v9559_v49 = vmul.f32 0.088388346, %v8151_v14  ;;  %v9574_v16 = vpop.permute.xlu1 %3021  ;;  %v12710_v37 = vld [vmem:[#allocation142_spill] sm:$0xff] }
 0x2ac   : > { %12645 = vst [vmem:[#allocation201_spill] sm:$0xff] %v9521_v5  ;;  %12649 = vst [vmem:[#allocation202_spill] sm:$0xff] %v9541_v39  ;;  %v9562_v38 = vmul.f32 0.088388346, %v8164_v56  ;;  %vm2282_vm4 = vcmp.eq.s32.totalorder %v12657_v63, 1  ;;  %vm3064_vm6 = vcmp.eq.s32.totalorder %v12670_v30, 1 }
 0x2ad   : > { %v9553_v24 = vmax.f32 %v12652_v41, %v2810_v61  ;;  %12654 = vst [vmem:[#allocation68_spill] sm:$0xff] %v9556_v57  ;;  %12655 = vst [vmem:[#allocation92_spill] sm:$0xff] %v9559_v49  ;;  %v9568_v60 = vsel %vm3067_vm1, %v12658_v51, -1e+09  ;;  %v9571_v45 = vmul.f32 0.088388346, %v8172_v26 }
 0x2ae   : > { %12656 = vst [vmem:[#allocation144_spill] sm:$0xff] %v9562_v38  ;;  %v1599_v14 = vsel %vm1474_vm2, %v9556_v57, -1e+09  ;;  %v2003_v56 = vsel %vm1878_vm3, %v9556_v57, -1e+09  ;;  %3847 = vperm.xlu1 %5351, %v12662_v44   ;;  %v12671_v61 = vld [vmem:[#allocation39_spill] sm:$0xff] }
 0x2af   : > { %12653 = vst [vmem:[#allocation203_spill] sm:$0xff] %v9553_v24  ;;  %12659 = vst [vmem:[#allocation135_spill] sm:$0xff] %v9571_v45  ;;  %v2407_v15 = vsel %vm2282_vm4, %v9556_v57, -1e+09  ;;  %v9585_v58 = vmax.f32 %v1632_v17, %v1599_v14  ;;  %v9587_v26 = vmax.f32 %v2036_v50, %v2003_v56  ;;  %v1601_v55 = vsel %vm1474_vm2, %v9559_v49, -1e+09 }
 0x2b0   : > { %v9589_v47 = vmax.f32 %v2440_v29, %v2407_v15  ;;  %v9595_v3 = vmax.f32 %v1706_v35, %v1601_v55  ;;  %v2005_v10 = vsel %vm1878_vm3, %v9559_v49, -1e+09  ;;  %v2409_v17 = vsel %vm2282_vm4, %v9559_v49, -1e+09  ;;  %v12675_v15 = vld [vmem:[#allocation138_spill] sm:$0xff]  ;;  %v12690_v24 = vld [vmem:[#allocation52_spill] sm:$0xff] }
 0x2b1   : > { %12660 = vst [vmem:[#allocation158_spill] sm:$0xff] %v9587_v26  ;;  %v1600_v29 = vsel %vm1474_vm2, %v9562_v38, -1e+09  ;;  %v9606_v50 = vmax.f32 %v2110_v32, %v2005_v10  ;;  %v9608_v43 = vmax.f32 %v2514_v53, %v2409_v17  ;;  %v2004_v35 = vsel %vm1878_vm3, %v9562_v38, -1e+09  ;;  %v12685_v51 = vld [vmem:[#allocation122_spill] sm:$0xff] }
 0x2b2   : > { %12661 = vst [vmem:[#allocation160_spill] sm:$0xff] %v9589_v47  ;;  %v9610_v27 = vmax.f32 %v1669_v0, %v1600_v29  ;;  %v9620_v18 = vsel %vm3067_vm1, %v12665_v46, -1e+09  ;;  %v9622_v7 = vmax.f32 %v2073_v6, %v2004_v35  ;;  %v1602_v32 = vsel %vm1474_vm2, %v9571_v45, -1e+09  ;;  %v9638_v6 = vpop.permute.xlu1 %3027  ;;  %3853 = vperm.xlu1 %5351, %v12671_v61   ;;  %v12676_v29 = vld [vmem:[#allocation78_spill] sm:$0xff] }
 0x2b3   : > { %12663 = vst [vmem:[#allocation67_spill] sm:$0xff] %v9606_v50  ;;  %12664 = vst [vmem:[#allocation90_spill] sm:$0xff] %v9608_v43  ;;  %v2006_v53 = vsel %vm1878_vm3, %v9571_v45, -1e+09  ;;  %v9630_v0 = vmax.f32 %v1743_v34, %v1602_v32  ;;  %v3103_v33 = vsel %vm3062_vm5, %v12669_v40, -1e+09 }
 0x2b4   : > { %12666 = vst [vmem:[#allocation169_spill] sm:$0xff] %v9622_v7  ;;  %v9632_v12 = vmax.f32 %v2147_v48, %v2006_v53  ;;  %v3104_v41 = vsel %vm3062_vm5, %v12672_v2, -1e+09  ;;  %v3105_v34 = vsel %vm3062_vm5, %v12673_v13, -1e+09  ;;  %v12674_v48 = vld [vmem:[#allocation112_spill] sm:$0xff]  ;;  %v3221_v56 = vmax.f32 %v9390_v21, %v3103_v33 }
 0x2b5   : > { %12667 = vst [vmem:[#allocation204_spill] sm:$0xff] %v9630_v0  ;;  %v3106_v14 = vsel %vm3062_vm5, %v12674_v48, -1e+09  ;;  %v3125_v55 = vsel %vm3067_vm1, %v12675_v15, -1e+09  ;;  %v3258_v10 = vmax.f32 %v9392_v22, %v3104_v41  ;;  %v3295_v17 = vmax.f32 %v9404_v8, %v3105_v34  ;;  %v12677_v32 = vld [vmem:[#allocation98_spill] sm:$0xff] }
 0x2b6   : > { %12668 = vst [vmem:[#allocation205_spill] sm:$0xff] %v9632_v12  ;;  %v3332_v35 = vmax.f32 %v12676_v29, %v3106_v14  ;;  %v3126_v53 = vsel %vm3067_vm1, %v12677_v32, -1e+09  ;;  %v9663_v1 = vsel %vm2282_vm4, %v9562_v38, -1e+09  ;;  %v12679_v21 = vld [vmem:[#allocation189_spill] sm:$0xff]  ;;  %v9677_v32 = vpop.permute.xlu0 %3036  ;;  %v9693_v23 = vpop.permute.xlu1 %3033 }
 0x2b7   : > { %12678 = vst [vmem:[#allocation131_spill] sm:$0xff] %v9663_v1  ;;  %vm3069_vm7 = vcmp.eq.s32.totalorder %v12679_v21, 1  ;;  %v12680_v33 = vld [vmem:[#allocation136_spill] sm:$0xff]  ;;  %v12681_v15 = vld [vmem:[#allocation119_spill] sm:$0xff]  ;;  %v12682_v8 = vld [vmem:[#allocation121_spill] sm:$0xff]  ;;  %v3296_v61 = vmax.f32 %v3295_v17, %v12686_v62  ;;  %vm3066_vm8 = vcmp.eq.s32.totalorder %v12690_v24, 1 }
 0x2b8   : > { %v3222_v46 = vmax.f32 %v3221_v56, %v12680_v33  ;;  %v3111_v22 = vsel %vm3064_vm6, %v12681_v15, -1e+09  ;;  %v3112_v41 = vsel %vm3064_vm6, %v12682_v8, -1e+09  ;;  %v12683_v34 = vld [vmem:[#allocation120_spill] sm:$0xff]  ;;  %v3333_v44 = vmax.f32 %v3332_v35, %v12687_v11  ;;  %v12691_v30 = vld [vmem:[#allocation149_spill] sm:$0xff] }
 0x2b9   : > { %v3113_v54 = vsel %vm3064_vm6, %v12683_v34, -1e+09  ;;  %v12684_v14 = vld [vmem:[#allocation196_spill] sm:$0xff]  ;;  %v3114_v56 = vsel %vm3064_vm6, %v12685_v51, -1e+09  ;;  %v12693_v35 = vld [vmem:[#allocation150_spill] sm:$0xff] }
 0x2ba   : > { %v3259_v29 = vmax.f32 %v3258_v10, %v12684_v14  ;;  %v3223_v33 = vmax.f32 %v3222_v46, %v3111_v22  ;;  %v9687_v52 = vsel %vm2282_vm4, %v9571_v45, -1e+09  ;;  %v3131_v10 = vsel %vm3069_vm7, %v12689_v19, -1e+09  ;;  %v12692_v46 = vld [vmem:[#allocation148_spill] sm:$0xff]  ;;  %v12694_v19 = vld [vmem:[#allocation190_spill] sm:$0xff] }
 0x2bb   : > { %12688 = vst [vmem:[#allocation78_spill] sm:$0xff] %v9687_v52  ;;  %v3132_v62 = vsel %vm3069_vm7, %v12691_v30, -1e+09  ;;  %v3133_v11 = vsel %vm3069_vm7, %v12692_v46, -1e+09  ;;  %v3297_v63 = vmax.f32 %v3296_v61, %v3113_v54  ;;  %v3334_v17 = vmax.f32 %v3333_v44, %v3114_v56  ;;  %v12697_v5 = vld [vmem:[#allocation46_spill] sm:$0xff]  ;;  %v9714_v52 = vpop.permute.xlu0 %3042 }
 0x2bc   : > { %v3260_v14 = vmax.f32 %v3259_v29, %v3112_v41  ;;  %v3134_v22 = vsel %vm3069_vm7, %v12693_v35, -1e+09  ;;  %vm3071_vm9 = vcmp.eq.s32.totalorder %v12694_v19, 1  ;;  %v12695_v41 = vld [vmem:[#allocation129_spill] sm:$0xff]  ;;  %v12696_v29 = vld [vmem:[#allocation54_spill] sm:$0xff]  ;;  %v12698_v49 = vld [vmem:[#allocation132_spill] sm:$0xff] }
 0x2bd   : > { %v3119_v24 = vsel %vm3066_vm8, %v12695_v41, -1e+09  ;;  %v3224_v45 = vmax.f32 %v3223_v33, %v12696_v29  ;;  %v3120_v9 = vsel %vm3066_vm8, %v12697_v5, -1e+09  ;;  %v3121_v30 = vsel %vm3066_vm8, %v12698_v49, -1e+09 }
 0x2be   : > { %v12699_v38 = vld [vmem:[#allocation69_spill] sm:$0xff]  ;;  %v12700_v39 = vld [vmem:[#allocation156_spill] sm:$0xff]  ;;  %v12702_v56 = vld [vmem:[#allocation66_spill] sm:$0xff]  ;;  %vm3077_vm14 = vcmp.eq.s32.totalorder %v9458_v59, 1  ;;  %vm3079_vm1 = vcmp.eq.s32.totalorder %v9546_v36, 1  ;;  %vm3081_vm2 = vcmp.eq.s32.totalorder %v9615_v20, 1 }
 0x2bf   : > { %v3122_v57 = vsel %vm3066_vm8, %v12699_v38, -1e+09  ;;  %v3261_v46 = vmax.f32 %v3260_v14, %v12700_v39  ;;  %v3225_v61 = vmax.f32 %v3224_v45, %v3119_v24  ;;  %v12701_v44 = vld [vmem:[#allocation200_spill] sm:$0xff]  ;;  %v3335_v21 = vmax.f32 %v3334_v17, %v12702_v56  ;;  %v12703_v35 = vld [vmem:[#allocation194_spill] sm:$0xff]  ;;  %v12704_v41 = vld [vmem:[#allocation133_spill] sm:$0xff] }
 0x2c0   : > { %v3298_v54 = vmax.f32 %v3297_v63, %v12701_v44  ;;  %vm3073_vm10 = vcmp.eq.s32.totalorder %v12703_v35, 1  ;;  %v3139_v33 = vsel %vm3071_vm9, %v12704_v41, -1e+09  ;;  %v12705_v29 = vld [vmem:[#allocation170_spill] sm:$0xff]  ;;  %v12707_v17 = vld [vmem:[#allocation109_spill] sm:$0xff]  ;;  %v9727_v44 = vpop.permute.xlu1 %3039  ;;  %v12709_v41 = vld [vmem:[#allocation48_spill] sm:$0xff] }
 0x2c1   : > { %v3140_v49 = vsel %vm3071_vm9, %v12705_v29, -1e+09  ;;  %v12706_v38 = vld [vmem:[#allocation134_spill] sm:$0xff]  ;;  %v3262_v45 = vmax.f32 %v3261_v46, %v3120_v9  ;;  %v3336_v63 = vmax.f32 %v3335_v21, %v3122_v57  ;;  %vm3068_vm11 = vcmp.eq.s32.totalorder %v12707_v17, 1  ;;  %v12711_v47 = vld [vmem:[#allocation71_spill] sm:$0xff]  ;;  %v12714_v21 = vld [vmem:[#allocation193_spill] sm:$0xff] }
 0x2c2   : > { %v3141_v39 = vsel %vm3071_vm9, %v12706_v38, -1e+09  ;;  %v3299_v14 = vmax.f32 %v3298_v54, %v3121_v30  ;;  %v3226_v24 = vmax.f32 %v3225_v61, %v9568_v60  ;;  %v12708_v56 = vld [vmem:[#allocation70_spill] sm:$0xff]  ;;  %v3128_v43 = vsel %vm3068_vm11, %v12709_v41, -1e+09  ;;  %v12712_v57 = vld [vmem:[#allocation171_spill] sm:$0xff] }
 0x2c3   : > { %v3127_v5 = vsel %vm3068_vm11, %v12708_v56, -1e+09  ;;  %v3129_v1 = vsel %vm3068_vm11, %v12710_v37, -1e+09  ;;  %v3263_v29 = vmax.f32 %v3262_v45, %v9620_v18  ;;  %v3130_v12 = vsel %vm3068_vm11, %v12711_v47, -1e+09 }
 0x2c4   : > { %v3227_v38 = vmax.f32 %v3226_v24, %v3127_v5  ;;  %v3300_v9 = vmax.f32 %v3299_v14, %v3125_v55  ;;  %v3337_v30 = vmax.f32 %v3336_v63, %v3126_v53  ;;  %v3142_v46 = vsel %vm3071_vm9, %v12712_v57, -1e+09  ;;  %v12713_v60 = vld [vmem:[#allocation139_spill] sm:$0xff]  ;;  %v9747_v14 = vpop.permute.xlu0 %3048  ;;  %v12717_v19 = vld [vmem:[#allocation76_spill] sm:$0xff]  ;;  %v12718_v24 = vld [vmem:[#allocation197_spill] sm:$0xff] }
 0x2c5   : > { %v3147_v61 = vsel %vm3073_vm10, %v12713_v60, -1e+09  ;;  %v3264_v54 = vmax.f32 %v3263_v29, %v3128_v43  ;;  %vm3070_vm12 = vcmp.eq.s32.totalorder %v12714_v21, 1  ;;  %v12715_v17 = vld [vmem:[#allocation51_spill] sm:$0xff]  ;;  %v3150_v63 = vsel %vm3073_vm10, %v12717_v19, -1e+09 }
 0x2c6   : > { %v3148_v18 = vsel %vm3073_vm10, %v12715_v17, -1e+09  ;;  %v12716_v45 = vld [vmem:[#allocation191_spill] sm:$0xff]  ;;  %v3301_v55 = vmax.f32 %v3300_v9, %v3129_v1  ;;  %v3338_v53 = vmax.f32 %v3337_v30, %v3130_v12  ;;  %vm3075_vm13 = vcmp.eq.s32.totalorder %v12718_v24, 1  ;;  %v12722_v37 = vld [vmem:[#allocation164_spill] sm:$0xff]  ;;  %v9757_v1 = vpop.permute.xlu1 %3045  ;;  %v12723_v35 = vld [vmem:[#allocation145_spill] sm:$0xff] }
 0x2c7   : > { %v3149_v5 = vsel %vm3073_vm10, %v12716_v45, -1e+09  ;;  %v12719_v43 = vld [vmem:[#allocation151_spill] sm:$0xff]  ;;  %v3228_v21 = vmax.f32 %v3227_v38, %v3131_v10  ;;  %v3138_v41 = vsel %vm3070_vm12, %v12722_v37, -1e+09  ;;  %v3265_v45 = vmax.f32 %v3264_v54, %v3132_v62  ;;  %v12725_v10 = vld [vmem:[#allocation53_spill] sm:$0xff] }
 0x2c8   : > { %v3135_v29 = vsel %vm3070_vm12, %v12719_v43, -1e+09  ;;  %v12720_v60 = vld [vmem:[#allocation163_spill] sm:$0xff]  ;;  %v3302_v9 = vmax.f32 %v3301_v55, %v3133_v11  ;;  %v3339_v30 = vmax.f32 %v3338_v53, %v3134_v22  ;;  %v3155_v19 = vsel %vm3075_vm13, %v12723_v35, -1e+09  ;;  %v12724_v43 = vld [vmem:[#allocation77_spill] sm:$0xff]  ;;  %v9773_v50 = vpop.permute.xlu0 %3054 }
 0x2c9   : > { %v3136_v57 = vsel %vm3070_vm12, %v12720_v60, -1e+09  ;;  %v12721_v17 = vld [vmem:[#allocation159_spill] sm:$0xff]  ;;  %v3229_v12 = vmax.f32 %v3228_v21, %v3135_v29  ;;  %v3156_v38 = vsel %vm3075_vm13, %v12724_v43, -1e+09  ;;  %v12727_v22 = vld [vmem:[#allocation172_spill] sm:$0xff] }
 0x2ca   : > { %v3137_v47 = vsel %vm3070_vm12, %v12721_v17, -1e+09  ;;  %v3157_v37 = vsel %vm3075_vm13, %v12725_v10, -1e+09  ;;  %v3266_v62 = vmax.f32 %v3265_v45, %v3136_v57  ;;  %v3340_v17 = vmax.f32 %v3339_v30, %v3138_v41  ;;  %v12726_v29 = vld [vmem:[#allocation195_spill] sm:$0xff]  ;;  %v12729_v60 = vld [vmem:[#allocation173_spill] sm:$0xff] }
 0x2cb   : > { %v3303_v54 = vmax.f32 %v3302_v9, %v3137_v47  ;;  %vm3072_vm15 = vcmp.eq.s32.totalorder %v12726_v29, 1  ;;  %v3230_v11 = vmax.f32 %v3229_v12, %v3139_v33  ;;  %v12728_v53 = vld [vmem:[#allocation187_spill] sm:$0xff]  ;;  %v12731_v57 = vld [vmem:[#allocation130_spill] sm:$0xff]  ;;  %v12733_v12 = vld [vmem:[#allocation113_spill] sm:$0xff]  ;;  %v9783_v9 = vpop.permute.xlu1 %3051  ;;  %vm3076_vm3 = vcmp.eq.s32.totalorder %v9487_v4, 1 }
 0x2cc   : > { %v3143_v55 = vsel %vm3072_vm15, %v12727_v22, -1e+09  ;;  %v3144_v21 = vsel %vm3072_vm15, %v12728_v53, -1e+09  ;;  %v3145_v35 = vsel %vm3072_vm15, %v12729_v60, -1e+09  ;;  %v3267_v56 = vmax.f32 %v3266_v62, %v3140_v49 }
 0x2cd   : > { %v12730_v43 = vld [vmem:[#allocation75_spill] sm:$0xff]  ;;  %v3231_v26 = vmax.f32 %v3230_v11, %v3143_v55  ;;  %v3304_v0 = vmax.f32 %v3303_v54, %v3141_v39  ;;  %v3341_v10 = vmax.f32 %v3340_v17, %v3142_v46  ;;  %v3158_v47 = vsel %vm3075_vm13, %v12731_v57, -1e+09  ;;  %v12732_v41 = vld [vmem:[#allocation154_spill] sm:$0xff]  ;;  %v12736_v24 = vld [vmem:[#allocation157_spill] sm:$0xff] }
 0x2ce   : > { %v3146_v7 = vsel %vm3072_vm15, %v12730_v43, -1e+09  ;;  %v3163_v33 = vsel %vm3077_vm14, %v12732_v41, -1e+09  ;;  %v3268_v45 = vmax.f32 %v3267_v56, %v3144_v21  ;;  %vm3074_vm0 = vcmp.eq.s32.totalorder %v12733_v12, 1  ;;  %v12734_v49 = vld [vmem:[#allocation118_spill] sm:$0xff] }
 0x2cf   : > { %v3164_v30 = vsel %vm3077_vm14, %v12734_v49, -1e+09  ;;  %v12735_v62 = vld [vmem:[#allocation155_spill] sm:$0xff]  ;;  %v3305_v46 = vmax.f32 %v3304_v0, %v3145_v35  ;;  %v3342_v17 = vmax.f32 %v3341_v10, %v3146_v7  ;;  %v3166_v54 = vsel %vm3077_vm14, %v12736_v24, -1e+09  ;;  %v12737_v56 = vld [vmem:[#allocation124_spill] sm:$0xff]  ;;  %v9800_v7 = vpop.permute.xlu0 %3368 }
 0x2d0   : > { %v3165_v39 = vsel %vm3077_vm14, %v12735_v62, -1e+09  ;;  %v3151_v29 = vsel %vm3074_vm0, %v12737_v56, -1e+09  ;;  %v3232_v11 = vmax.f32 %v3231_v26, %v3147_v61  ;;  %v12738_v55 = vld [vmem:[#allocation198_spill] sm:$0xff]  ;;  %v12739_v12 = vld [vmem:[#allocation143_spill] sm:$0xff]  ;;  %v3269_v43 = vmax.f32 %v3268_v45, %v3148_v18 }
 0x2d1   : > { %v3152_v21 = vsel %vm3074_vm0, %v12738_v55, -1e+09  ;;  %v3153_v41 = vsel %vm3074_vm0, %v12739_v12, -1e+09  ;;  %v12740_v49 = vld [vmem:[#allocation199_spill] sm:$0xff]  ;;  %v3306_v62 = vmax.f32 %v3305_v46, %v3149_v5  ;;  %v3343_v0 = vmax.f32 %v3342_v17, %v3150_v63  ;;  %v12741_v59 = vld [vmem:[#allocation73_spill] sm:$0xff]  ;;  %v9812_v46 = vpop.permute.xlu1 %3057 }
 0x2d2   : > { %v3154_v57 = vsel %vm3074_vm0, %v12740_v49, -1e+09  ;;  %v3233_v60 = vmax.f32 %v3232_v11, %v3151_v29  ;;  %v3171_v35 = vsel %vm3079_vm1, %v12741_v59, -1e+09  ;;  %v12742_v10 = vld [vmem:[#allocation166_spill] sm:$0xff]  ;;  %v12743_v61 = vld [vmem:[#allocation165_spill] sm:$0xff]  ;;  %v3270_v18 = vmax.f32 %v3269_v43, %v3152_v21 }
 0x2d3   : > { %v3172_v26 = vsel %vm3079_vm1, %v12742_v10, -1e+09  ;;  %v3173_v24 = vsel %vm3079_vm1, %v12743_v61, -1e+09  ;;  %v3307_v45 = vmax.f32 %v3306_v62, %v3153_v41  ;;  %v3344_v5 = vmax.f32 %v3343_v0, %v3154_v57  ;;  %v12744_v17 = vld [vmem:[#allocation146_spill] sm:$0xff]  ;;  %v12745_v11 = vld [vmem:[#allocation56_spill] sm:$0xff]  ;;  %v9831_v0 = vpop.permute.xlu0 %3377 }
 0x2d4   : > { %v3234_v63 = vmax.f32 %v3233_v60, %v3155_v19  ;;  %v3159_v29 = vsel %vm3076_vm3, %v12744_v17, -1e+09  ;;  %v3160_v59 = vsel %vm3076_vm3, %v12745_v11, -1e+09  ;;  %v12746_v49 = vld [vmem:[#allocation153_spill] sm:$0xff]  ;;  %v3271_v55 = vmax.f32 %v3270_v18, %v3156_v38  ;;  %v12747_v10 = vld [vmem:[#allocation80_spill] sm:$0xff] }
 0x2d5   : > { %v3161_v12 = vsel %vm3076_vm3, %v12746_v49, -1e+09  ;;  %v3162_v56 = vsel %vm3076_vm3, %v12747_v10, -1e+09  ;;  %v3308_v22 = vmax.f32 %v3307_v45, %v3157_v37  ;;  %v3345_v61 = vmax.f32 %v3344_v5, %v3158_v47  ;;  %v12748_v43 = vld [vmem:[#allocation58_spill] sm:$0xff]  ;;  %v12749_v4 = vld [vmem:[#allocation81_spill] sm:$0xff] }
 0x2d6   : > { %v3235_v53 = vmax.f32 %v3234_v63, %v3159_v29  ;;  %v3174_v57 = vsel %vm3079_vm1, %v12748_v43, -1e+09  ;;  %v3179_v60 = vsel %vm3081_vm2, %v12749_v4, -1e+09  ;;  %v3272_v19 = vmax.f32 %v3271_v55, %v3160_v59  ;;  %v12750_v41 = vld [vmem:[#allocation168_spill] sm:$0xff]  ;;  %v12752_v36 = vld [vmem:[#allocation49_spill] sm:$0xff] }
 0x2d7   : > { %vm3078_vm4 = vcmp.eq.s32.totalorder %v9574_v16, 1  ;;  %v3180_v38 = vsel %vm3081_vm2, %v12750_v41, -1e+09  ;;  %v12751_v62 = vld [vmem:[#allocation140_spill] sm:$0xff]  ;;  %v3309_v47 = vmax.f32 %v3308_v22, %v3161_v12  ;;  %v3346_v21 = vmax.f32 %v3345_v61, %v3162_v56  ;;  %v12753_v55 = vld [vmem:[#allocation55_spill] sm:$0xff]  ;;  %v12754_v45 = vld [vmem:[#allocation161_spill] sm:$0xff]  ;;  %v9841_v22 = vpop.permute.xlu1 %3371 }
 0x2d8   : > { %v3181_v37 = vsel %vm3081_vm2, %v12751_v62, -1e+09  ;;  %v3182_v18 = vsel %vm3081_vm2, %v12752_v36, -1e+09  ;;  %vm3083_vm5 = vcmp.eq.s32.totalorder %v9677_v32, 1  ;;  %v3236_v59 = vmax.f32 %v3235_v53, %v3163_v33  ;;  %v12755_v63 = vld [vmem:[#allocation79_spill] sm:$0xff] }
 0x2d9   : > { %v3167_v16 = vsel %vm3078_vm4, %v12753_v55, -1e+09  ;;  %v3168_v5 = vsel %vm3078_vm4, %v12754_v45, -1e+09  ;;  %v3169_v29 = vsel %vm3078_vm4, %v12755_v63, -1e+09  ;;  %v3273_v62 = vmax.f32 %v3272_v19, %v3164_v30  ;;  %v9857_v55 = vpop.permute.xlu0 %3383 }
 0x2da   : > { %v12756_v41 = vld [vmem:[#allocation50_spill] sm:$0xff]  ;;  %v3237_v56 = vmax.f32 %v3236_v59, %v3167_v16  ;;  %v3310_v12 = vmax.f32 %v3309_v47, %v3165_v39  ;;  %v3347_v61 = vmax.f32 %v3346_v21, %v3166_v54  ;;  %vm3085_vm6 = vcmp.eq.s32.totalorder %v9714_v52, 1  ;;  %v12757_v20 = vld [vmem:[#allocation85_spill] sm:$0xff]  ;;  %v12759_v33 = vld [vmem:[#allocation176_spill] sm:$0xff] }
 0x2db   : > { %v3170_v4 = vsel %vm3078_vm4, %v12756_v41, -1e+09  ;;  %v3187_v36 = vsel %vm3083_vm5, %v12757_v20, -1e+09  ;;  %v12758_v43 = vld [vmem:[#allocation177_spill] sm:$0xff]  ;;  %v3274_v30 = vmax.f32 %v3273_v62, %v3168_v5  ;;  %vm3080_vm7 = vcmp.eq.s32.totalorder %v9638_v6, 1 }
 0x2dc   : > { %v3188_v53 = vsel %vm3083_vm5, %v12758_v43, -1e+09  ;;  %v3189_v41 = vsel %vm3083_vm5, %v12759_v33, -1e+09  ;;  %v3311_v19 = vmax.f32 %v3310_v12, %v3169_v29  ;;  %v3348_v63 = vmax.f32 %v3347_v61, %v3170_v4  ;;  %v12760_v54 = vld [vmem:[#allocation83_spill] sm:$0xff]  ;;  %v12763_v43 = vld [vmem:[#allocation57_spill] sm:$0xff] }
 0x2dd   : > { %v5521_v39 = vmov 7   ;;  %v3175_v47 = vsel %vm3080_vm7, %v12760_v54, -1e+09  ;;  %v12761_v21 = vld [vmem:[#allocation167_spill] sm:$0xff]  ;;  %v3238_v45 = vmax.f32 %v3237_v56, %v3171_v35  ;;  %v3178_v10 = vsel %vm3080_vm7, %v12763_v43, -1e+09 }
 0x2de   : > { %5353 = vset.pattern.permute.xlu0 %v5521_v39  ;;  %v3176_v16 = vsel %vm3080_vm7, %v12761_v21, -1e+09  ;;  %v12762_v59 = vld [vmem:[#allocation123_spill] sm:$0xff]  ;;  %5354 = vset.pattern.permute.xlu1 %v5521_v39  ;;  %v3275_v33 = vmax.f32 %v3274_v30, %v3172_v26  ;;  %v3312_v62 = vmax.f32 %v3311_v19, %v3173_v24  ;;  %v3349_v5 = vmax.f32 %v3348_v63, %v3174_v57  ;;  %v12764_v4 = vld [vmem:[#allocation14_spill] sm:$0xff]  ;;  %v12765_v6 = vld [vmem:[#allocation16_spill] sm:$0xff]  ;;  %v9869_v39 = vpop.permute.xlu1 %3374 }
 0x2df   : > { %v3177_v20 = vsel %vm3080_vm7, %v12762_v59, -1e+09  ;;  %4176 = vperm.xlu0 %5353, %v12764_v4   ;;  %4179 = vperm.xlu1 %5354, %v12765_v6   ;;  %v12766_v29 = vld [vmem:[#allocation125_spill] sm:$0xff]  ;;  %v12767_v61 = vld [vmem:[#allocation179_spill] sm:$0xff]  ;;  %v3239_v56 = vmax.f32 %v3238_v45, %v3175_v47  ;;  %vm3082_vm8 = vcmp.eq.s32.totalorder %v9693_v23, 1  ;;  %v12769_v19 = vld [vmem:[#allocation180_spill] sm:$0xff] }
 0x2e0   : > { %v3190_v12 = vsel %vm3083_vm5, %v12766_v29, -1e+09  ;;  %v3195_v35 = vsel %vm3085_vm6, %v12767_v61, -1e+09  ;;  %v12768_v26 = vld [vmem:[#allocation181_spill] sm:$0xff]  ;;  %v3276_v57 = vmax.f32 %v3275_v33, %v3176_v16  ;;  %v3313_v63 = vmax.f32 %v3312_v62, %v3177_v20  ;;  %v12770_v4 = vld [vmem:[#allocation183_spill] sm:$0xff] }
 0x2e1   : > { %v3196_v24 = vsel %vm3085_vm6, %v12768_v26, -1e+09  ;;  %v3350_v30 = vmax.f32 %v3349_v5, %v3178_v10  ;;  %v3197_v32 = vsel %vm3085_vm6, %v12769_v19, -1e+09  ;;  %v3198_v6 = vsel %vm3085_vm6, %v12770_v4, -1e+09  ;;  %v9895_v26 = vpop.permute.xlu0 %3389 }
 0x2e2   : > { %vm3087_vm9 = vcmp.eq.s32.totalorder %v9747_v14, 1  ;;  %v3240_v45 = vmax.f32 %v3239_v56, %v3179_v60  ;;  %v12771_v47 = vld [vmem:[#allocation74_spill] sm:$0xff]  ;;  %v12772_v29 = vld [vmem:[#allocation175_spill] sm:$0xff]  ;;  %v3277_v16 = vmax.f32 %v3276_v57, %v3180_v38  ;;  %v12775_v52 = vld [vmem:[#allocation13_spill] sm:$0xff]  ;;  %v3314_v4 = vmax.f32 %v3313_v63, %v3181_v37 }
 0x2e3   : > { %v3183_v61 = vsel %vm3082_vm8, %v12771_v47, -1e+09  ;;  %v3184_v20 = vsel %vm3082_vm8, %v12772_v29, -1e+09  ;;  %v12773_v10 = vld [vmem:[#allocation174_spill] sm:$0xff]  ;;  %v12774_v62 = vld [vmem:[#allocation15_spill] sm:$0xff]  ;;  %4182 = vperm.xlu1 %5354, %v12775_v52   ;;  %v3351_v19 = vmax.f32 %v3350_v30, %v3182_v18  ;;  %v9916_v30 = vpop.permute.xlu1 %3380 }
 0x2e4   : > { %v3185_v33 = vsel %vm3082_vm8, %v12773_v10, -1e+09  ;;  %4185 = vperm.xlu0 %5353, %v12774_v62   ;;  %v12776_v5 = vld [vmem:[#allocation60_spill] sm:$0xff]  ;;  %v3241_v56 = vmax.f32 %v3240_v45, %v3183_v61  ;;  %v12777_v47 = vld [vmem:[#allocation61_spill] sm:$0xff]  ;;  %v3278_v23 = vmax.f32 %v3277_v16, %v3184_v20  ;;  %v12780_v61 = vld [vmem:[#allocation186_spill] sm:$0xff]  ;;  %vm3084_vm10 = vcmp.eq.s32.totalorder %v9727_v44, 1 }
 0x2e5   : > { %v3186_v60 = vsel %vm3082_vm8, %v12776_v5, -1e+09  ;;  %v3203_v29 = vsel %vm3087_vm9, %v12777_v47, -1e+09  ;;  %v12778_v43 = vld [vmem:[#allocation72_spill] sm:$0xff]  ;;  %v3315_v18 = vmax.f32 %v3314_v4, %v3185_v33  ;;  %12781 = vst [vmem:[#allocation189_spill] sm:$0xff] %v9916_v30 }
 0x2e6   : > { %v9903_v38 = vsel %vm3087_vm9, %v12778_v43, -1e+09  ;;  %v12779_v57 = vld [vmem:[#allocation84_spill] sm:$0xff]  ;;  %v9913_v37 = vsel %vm3087_vm9, %v12780_v61, -1e+09  ;;  %v3352_v63 = vmax.f32 %v3351_v19, %v3186_v60  ;;  %v12782_v45 = vld [vmem:[#allocation178_spill] sm:$0xff]  ;;  %v3279_v19 = vmax.f32 %v3278_v23, %v3188_v53 }
 0x2e7   : > { %v9908_v62 = vsel %vm3087_vm9, %v12779_v57, -1e+09  ;;  %v3191_v52 = vsel %vm3084_vm10, %v12782_v45, -1e+09  ;;  %v12783_v43 = vld [vmem:[#allocation82_spill] sm:$0xff]  ;;  %v12784_v5 = vld [vmem:[#allocation59_spill] sm:$0xff]  ;;  %v3242_v57 = vmax.f32 %v3241_v56, %v3187_v36  ;;  %v3316_v33 = vmax.f32 %v3315_v18, %v3189_v41 }
 0x2e8   : > { %v3192_v47 = vsel %vm3084_vm10, %v12783_v43, -1e+09  ;;  %v3193_v10 = vsel %vm3084_vm10, %v12784_v5, -1e+09  ;;  %v12785_v59 = vld [vmem:[#allocation17_spill] sm:$0xff]  ;;  %v12786_v20 = vld [vmem:[#allocation18_spill] sm:$0xff]  ;;  %v3353_v44 = vmax.f32 %v3352_v63, %v3190_v12 }
 0x2e9   : > { %4191 = vperm.xlu0 %5353, %v12785_v59   ;;  %4188 = vperm.xlu1 %5354, %v12786_v20   ;;  %vm3089_vm11 = vcmp.eq.s32.totalorder %v9773_v50, 1  ;;  %v12787_v14 = vld [vmem:[#allocation103_spill] sm:$0xff]  ;;  %v3243_v16 = vmax.f32 %v3242_v57, %v3191_v52  ;;  %vm3463_vm12 = vcmp.eq.s32.totalorder %v9800_v7, 1  ;;  %vm3086_vm13 = vcmp.eq.s32.totalorder %v9757_v1, 1  ;;  %v12788_v59 = vld [vmem:[#allocation94_spill] sm:$0xff]  ;;  %v9929_v20 = vpop.permute.xlu0 %3395  ;;  %v12789_v5 = vld [vmem:[#allocation96_spill] sm:$0xff] }
 0x2ea   : > { %v3194_v4 = vsel %vm3084_vm10, %v12787_v14, -1e+09  ;;  %vm3466_vm14 = vcmp.eq.s32.totalorder %v9831_v0, 1  ;;  %v3280_v60 = vmax.f32 %v3279_v19, %v3192_v47  ;;  %v3317_v36 = vmax.f32 %v3316_v33, %v3193_v10  ;;  %v12790_v14 = vld [vmem:[#allocation95_spill] sm:$0xff]  ;;  %v12791_v41 = vld [vmem:[#allocation97_spill] sm:$0xff]  ;;  %v12793_v7 = vld [vmem:[#allocation20_spill] sm:$0xff]  ;;  %v9945_v33 = vpop.permute.xlu1 %3386 }
 0x2eb   : > { %v3354_v56 = vmax.f32 %v3353_v44, %v3194_v4  ;;  %v3495_v61 = vsel %vm3463_vm12, %v12788_v59, -1e+09  ;;  %v3496_v43 = vsel %vm3463_vm12, %v12789_v5, -1e+09  ;;  %v3497_v53 = vsel %vm3463_vm12, %v12790_v14, -1e+09 }
 0x2ec   : > { %v3498_v12 = vsel %vm3463_vm12, %v12791_v41, -1e+09  ;;  %v3244_v57 = vmax.f32 %v3243_v16, %v3195_v35  ;;  %v12792_v23 = vld [vmem:[#allocation19_spill] sm:$0xff]  ;;  %v12794_v18 = vld [vmem:[#allocation62_spill] sm:$0xff]  ;;  %v12795_v10 = vld [vmem:[#allocation184_spill] sm:$0xff]  ;;  %v3281_v19 = vmax.f32 %v3280_v60, %v3196_v24  ;;  %12797 = vst [vmem:[#allocation136_spill] sm:$0xff] %v9945_v33 }
 0x2ed   : > { %4197 = vperm.xlu0 %5353, %v12792_v23   ;;  %4194 = vperm.xlu1 %5354, %v12793_v7   ;;  %v3199_v47 = vsel %vm3086_vm13, %v12794_v18, -1e+09  ;;  %v3200_v63 = vsel %vm3086_vm13, %v12795_v10, -1e+09  ;;  %v12796_v52 = vld [vmem:[#allocation87_spill] sm:$0xff]  ;;  %v12798_v35 = vld [vmem:[#allocation185_spill] sm:$0xff]  ;;  %v3318_v23 = vmax.f32 %v3317_v36, %v3197_v32  ;;  %v3355_v7 = vmax.f32 %v3354_v56, %v3198_v6  ;;  %v9966_v56 = vpop.permute.xlu0 %3401 }
 0x2ee   : > { %v3201_v4 = vsel %vm3086_vm13, %v12796_v52, -1e+09  ;;  %v3202_v44 = vsel %vm3086_vm13, %v12798_v35, -1e+09  ;;  %v3245_v16 = vmax.f32 %v3244_v57, %v3199_v47  ;;  %v3282_v41 = vmax.f32 %v3281_v19, %v3200_v63  ;;  %v12799_v57 = vld [vmem:[#allocation21_spill] sm:$0xff]  ;;  %v12800_v47 = vld [vmem:[#allocation22_spill] sm:$0xff] }
 0x2ef   : > { %v3507_v14 = vsel %vm3466_vm14, %v12669_v40, -1e+09  ;;  %v3508_v5 = vsel %vm3466_vm14, %v12672_v2, -1e+09  ;;  %v3509_v24 = vsel %vm3466_vm14, %v12673_v13, -1e+09  ;;  %v3319_v60 = vmax.f32 %v3318_v23, %v3201_v4 }
 0x2f0   : > { %v3356_v59 = vmax.f32 %v3355_v7, %v3202_v44  ;;  %v3623_v1 = vmax.f32 %v3495_v61, %v3507_v14  ;;  %v3660_v35 = vmax.f32 %v3496_v43, %v3508_v5  ;;  %v3697_v32 = vmax.f32 %v3497_v53, %v3509_v24  ;;  %v12801_v4 = vld [vmem:[#allocation188_spill] sm:$0xff]  ;;  %v12802_v43 = vld [vmem:[#allocation89_spill] sm:$0xff]  ;;  %v9989_v44 = vpop.permute.xlu1 %3392  ;;  %v12840_v49 = vld [vmem:[#allocation135_spill] sm:$0xff] }
 0x2f1   : > { %4203 = vperm.xlu0 %5353, %v12799_v57   ;;  %v3510_v6 = vsel %vm3466_vm14, %v12674_v48, -1e+09  ;;  %vm3088_vm15 = vcmp.eq.s32.totalorder %v9783_v9, 1  ;;  %v9964_v36 = vmax.f32 %v3245_v16, %v3203_v29  ;;  %4200 = vperm.xlu1 %5354, %v12800_v47   ;;  %v12803_v61 = vld [vmem:[#allocation64_spill] sm:$0xff]  ;;  %v9984_v29 = vmax.f32 %v3282_v41, %v9903_v38  ;;  %12805 = vst [vmem:[#allocation196_spill] sm:$0xff] %v9989_v44  ;;  %v12806_v38 = vld [vmem:[#allocation23_spill] sm:$0xff] }
 0x2f2   : > { %v3734_v63 = vmax.f32 %v3498_v12, %v3510_v6  ;;  %v9970_v19 = vsel %vm3088_vm15, %v12801_v4, -1e+09  ;;  %v9973_v5 = vsel %vm3088_vm15, %v12802_v43, -1e+09  ;;  %v9976_v14 = vsel %vm3088_vm15, %v12803_v61, -1e+09 }
 0x2f3   : > { %v12804_v0 = vld [vmem:[#allocation192_spill] sm:$0xff]  ;;  %v9987_v12 = vmax.f32 %v3319_v60, %v9908_v62  ;;  %v9994_v16 = vsel %vm3089_vm11, %v9422_v28, -1e+09  ;;  %v9999_v23 = vsel %vm3089_vm11, %v9428_v42, -1e+09  ;;  %v10002_v7 = vmax.f32 %v3356_v59, %v9913_v37  ;;  %v12809_v62 = vld [vmem:[#allocation25_spill] sm:$0xff] }
 0x2f4   : > { %v9979_v53 = vsel %vm3088_vm15, %v12804_v0, -1e+09  ;;  %vm3468_vm0 = vcmp.eq.s32.totalorder %v9857_v55, 1  ;;  %v12807_v57 = vld [vmem:[#allocation24_spill] sm:$0xff]  ;;  %v10023_v47 = vsel %vm3089_vm11, %v9425_v31, -1e+09  ;;  %v10045_v48 = vpop.permute.xlu1 %3398 }
 0x2f5   : > { %4209 = vperm.xlu0 %5353, %v12806_v38   ;;  %v3515_v24 = vsel %vm3468_vm0, %v12681_v15, -1e+09  ;;  %v3516_v60 = vsel %vm3468_vm0, %v12682_v8, -1e+09  ;;  %4206 = vperm.xlu1 %5354, %v12807_v57   ;;  %v3517_v6 = vsel %vm3468_vm0, %v12683_v34, -1e+09 }
 0x2f6   : > { %v10015_v59 = vmax.f32 %v3623_v1, %v3515_v24  ;;  %v10017_v55 = vmax.f32 %v3660_v35, %v3516_v60  ;;  %v10028_v38 = vsel %vm3089_vm11, %v9431_v25, -1e+09  ;;  %v10030_v57 = vmax.f32 %v3697_v32, %v3517_v6  ;;  %v10033_v1 = vpop.permute.xlu0 %3407  ;;  %v12810_v9 = vld [vmem:[#allocation204_spill] sm:$0xff]  ;;  %v12811_v34 = vld [vmem:[#allocation158_spill] sm:$0xff]  ;;  %v12812_v32 = vld [vmem:[#allocation169_spill] sm:$0xff]  ;;  %12814 = vst [vmem:[#allocation86_spill] sm:$0xff] %v10045_v48 }
 0x2f7   : > { %v3518_v37 = vsel %vm3468_vm0, %v12685_v51, -1e+09  ;;  %12808 = vst [vmem:[#allocation63_spill] sm:$0xff] %v10033_v1  ;;  %v1634_v24 = vrot.slane %v9585_v58, 4  ;;  %v1671_v60 = vrot.slane %v9610_v27, 4  ;;  %v1708_v41 = vrot.slane %v9595_v3, 4 }
 0x2f8   : > { %v10035_v35 = vmax.f32 %v3734_v63, %v3518_v37  ;;  %v1745_v50 = vrot.slane %v12810_v9, 4  ;;  %v2038_v8 = vrot.slane %v12811_v34, 4  ;;  %v2075_v6 = vrot.slane %v12812_v32, 4  ;;  %v12813_v15 = vld [vmem:[#allocation67_spill] sm:$0xff]  ;;  %v12815_v63 = vld [vmem:[#allocation26_spill] sm:$0xff]  ;;  %v12816_v40 = vld [vmem:[#allocation205_spill] sm:$0xff]  ;;  %v10062_v10 = vpop.permute.xlu1 %3404 }
 0x2f9   : > { %4215 = vperm.xlu0 %5353, %v12809_v62   ;;  %v2112_v51 = vrot.slane %v12813_v15, 4  ;;  %4212 = vperm.xlu1 %5354, %v12815_v63   ;;  %v1635_v37 = vmax.f32 %v9585_v58, %v1634_v24  ;;  %v1672_v13 = vmax.f32 %v9610_v27, %v1671_v60  ;;  %v1709_v2 = vmax.f32 %v9595_v3, %v1708_v41  ;;  %v12817_v0 = vld [vmem:[#allocation182_spill] sm:$0xff]  ;;  %v12818_v27 = vld [vmem:[#allocation27_spill] sm:$0xff]  ;;  %v12822_v45 = vld [vmem:[#allocation29_spill] sm:$0xff] }
 0x2fa   : > { %v2149_v62 = vrot.slane %v12816_v40, 4  ;;  %v1746_v25 = vmax.f32 %v12810_v9, %v1745_v50  ;;  %v2039_v31 = vmax.f32 %v12811_v34, %v2038_v8  ;;  %v2076_v42 = vmax.f32 %v12812_v32, %v2075_v6  ;;  %v10059_v9 = vpop.permute.xlu0 %3413  ;;  %v12820_v8 = vld [vmem:[#allocation28_spill] sm:$0xff]  ;;  %12821 = vst [vmem:[#allocation190_spill] sm:$0xff] %v10062_v10  ;;  %v12845_v1 = vld [vmem:[#allocation35_spill] sm:$0xff] }
 0x2fb   : > { %v2113_v28 = vmax.f32 %v12813_v15, %v2112_v51  ;;  %vm2686_vm1 = vcmp.eq.s32.totalorder %v12817_v0, 1  ;;  %v1636_v61 = vrot.slane %v1635_v37, 2  ;;  %v1673_v63 = vrot.slane %v1672_v13, 2  ;;  %12819 = vst [vmem:[#allocation52_spill] sm:$0xff] %v10059_v9 }
 0x2fc   : > { %v1710_v43 = vrot.slane %v1709_v2, 2  ;;  %v2150_v58 = vmax.f32 %v12816_v40, %v2149_v62  ;;  %v1747_v3 = vrot.slane %v1746_v25, 2  ;;  %v2040_v41 = vrot.slane %v2039_v31, 2 }
 0x2fd   : > { %4221 = vperm.xlu0 %5353, %v12818_v27   ;;  %v2077_v24 = vrot.slane %v2076_v42, 2  ;;  %v2114_v60 = vrot.slane %v2113_v28, 2  ;;  %4218 = vperm.xlu1 %5354, %v12820_v8   ;;  %v1637_v34 = vmax.f32 %v1635_v37, %v1636_v61  ;;  %v1674_v50 = vmax.f32 %v1672_v13, %v1673_v63  ;;  %v12823_v61 = vld [vmem:[#allocation30_spill] sm:$0xff] }
 0x2fe   : > { %v1711_v51 = vmax.f32 %v1709_v2, %v1710_v43  ;;  %v2151_v15 = vrot.slane %v2150_v58, 2  ;;  %v1748_v32 = vmax.f32 %v1746_v25, %v1747_v3  ;;  %v2041_v6 = vmax.f32 %v2039_v31, %v2040_v41  ;;  %v10080_v37 = vpop.permute.xlu0 %3419  ;;  %v12826_v41 = vld [vmem:[#allocation131_spill] sm:$0xff] }
 0x2ff   : > { %v2078_v4 = vmax.f32 %v2076_v42, %v2077_v24  ;;  %v2115_v52 = vmax.f32 %v2113_v28, %v2114_v60  ;;  %v1638_v40 = vrot.slane %v1637_v34, 1  ;;  %v1675_v62 = vrot.slane %v1674_v50, 1  ;;  %12824 = vst [vmem:[#allocation54_spill] sm:$0xff] %v10080_v37  ;;  %v12827_v24 = vld [vmem:[#allocation162_spill] sm:$0xff] }
 0x300   : > { %v1712_v27 = vrot.slane %v1711_v51, 1  ;;  %v2152_v18 = vmax.f32 %v2150_v58, %v2151_v15  ;;  %v1749_v21 = vrot.slane %v1748_v32, 1  ;;  %v2042_v54 = vrot.slane %v2041_v6, 1  ;;  %v12825_v58 = vld [vmem:[#allocation160_spill] sm:$0xff] }
 0x301   : > { %4227 = vperm.xlu0 %5353, %v12822_v45   ;;  %v2079_v48 = vrot.slane %v2078_v4, 1  ;;  %v2116_v8 = vrot.slane %v2115_v52, 1  ;;  %4224 = vperm.xlu1 %5354, %v12823_v61   ;;  %v10066_v2 = vmax.f32 %v1637_v34, %v1638_v40  ;;  %v10068_v25 = vmax.f32 %v1674_v50, %v1675_v62  ;;  %v12828_v34 = vld [vmem:[#allocation90_spill] sm:$0xff]  ;;  %v10100_v40 = vpop.permute.xlu1 %3410  ;;  %v12836_v62 = vld [vmem:[#allocation32_spill] sm:$0xff] }
 0x302   : > { %v10070_v31 = vmax.f32 %v1711_v51, %v1712_v27  ;;  %v2153_v28 = vrot.slane %v2152_v18, 1  ;;  %v10072_v42 = vmax.f32 %v1748_v32, %v1749_v21  ;;  %v10074_v13 = vmax.f32 %v2041_v6, %v2042_v54  ;;  %v12829_v51 = vld [vmem:[#allocation31_spill] sm:$0xff]  ;;  %v12830_v21 = vld [vmem:[#allocation78_spill] sm:$0xff]  ;;  %v12834_v32 = vld [vmem:[#allocation92_spill] sm:$0xff]  ;;  %12835 = vst [vmem:[#allocation156_spill] sm:$0xff] %v10100_v40 }
 0x303   : > { %v10076_v43 = vmax.f32 %v2078_v4, %v2079_v48  ;;  %v10078_v45 = vmax.f32 %v2115_v52, %v2116_v8  ;;  %v2442_v3 = vrot.slane %v12825_v58, 4  ;;  %v2478_v60 = vmax.f32 %v12827_v24, %v12826_v41  ;;  %v12831_v54 = vld [vmem:[#allocation202_spill] sm:$0xff]  ;;  %v12832_v48 = vld [vmem:[#allocation68_spill] sm:$0xff] }
 0x304   : > { %v10082_v63 = vmax.f32 %v2152_v18, %v2153_v28  ;;  %v2516_v50 = vrot.slane %v12828_v34, 4  ;;  %v2552_v15 = vmax.f32 %v12831_v54, %v12830_v21  ;;  %v2811_v52 = vsel %vm2686_vm1, %v12832_v48, -1e+09  ;;  %v12833_v4 = vld [vmem:[#allocation144_spill] sm:$0xff]  ;;  %v12837_v28 = vld [vmem:[#allocation65_spill] sm:$0xff] }
 0x305   : > { %4233 = vperm.xlu0 %5353, %v12829_v51   ;;  %v2812_v18 = vsel %vm2686_vm1, %v12833_v4, -1e+09  ;;  %v2813_v6 = vsel %vm2686_vm1, %v12834_v32, -1e+09  ;;  %4230 = vperm.xlu1 %5354, %v12836_v62   ;;  %v2443_v27 = vmax.f32 %v12825_v58, %v2442_v3  ;;  %v2479_v8 = vrot.slane %v2478_v60, 4  ;;  %v12838_v51 = vld [vmem:[#allocation201_spill] sm:$0xff] }
 0x306   : > { %v2517_v61 = vmax.f32 %v12828_v34, %v2516_v50  ;;  %v2845_v41 = vmax.f32 %v12837_v28, %v2811_v52  ;;  %v2553_v24 = vrot.slane %v2552_v15, 4  ;;  %v2882_v21 = vmax.f32 %v12838_v51, %v2812_v18  ;;  %v12839_v54 = vld [vmem:[#allocation88_spill] sm:$0xff]  ;;  %v12841_v62 = vld [vmem:[#allocation203_spill] sm:$0xff]  ;;  %v12842_v58 = vld [vmem:[#allocation33_spill] sm:$0xff]  ;;  %v10113_v28 = vpop.permute.xlu0 %3425 }
 0x307   : > { %v2919_v10 = vmax.f32 %v12839_v54, %v2813_v6  ;;  %v2814_v11 = vsel %vm2686_vm1, %v12840_v49, -1e+09  ;;  %v2444_v17 = vrot.slane %v2443_v27, 2  ;;  %v2480_v40 = vmax.f32 %v2478_v60, %v2479_v8  ;;  %12843 = vst [vmem:[#allocation200_spill] sm:$0xff] %v10113_v28  ;;  %v12844_v18 = vld [vmem:[#allocation34_spill] sm:$0xff] }
 0x308   : > { %v2518_v37 = vrot.slane %v2517_v61, 2  ;;  %v2956_v44 = vmax.f32 %v12841_v62, %v2814_v11  ;;  %v2554_v3 = vmax.f32 %v2552_v15, %v2553_v24  ;;  %v2846_v34 = vrot.slane %v2845_v41, 4  ;;  %v10116_v11 = vpop.permute.xlu1 %3416 }
 0x309   : > { %4239 = vperm.xlu0 %5353, %v12842_v58   ;;  %v2883_v50 = vrot.slane %v2882_v21, 4  ;;  %v2920_v52 = vrot.slane %v2919_v10, 4  ;;  %4236 = vperm.xlu1 %5354, %v12844_v18   ;;  %vm4579_vm2 = vcmask 1040384   ;;  %v2445_v6 = vmax.f32 %v2443_v27, %v2444_v17  ;;  %v12846_v27 = vld [vmem:[#allocation36_spill] sm:$0xff] }
 0x30a   : > { %v2481_v51 = vrot.slane %v2480_v40, 2  ;;  %v2519_v0 = vmax.f32 %v2517_v61, %v2518_v37  ;;  %v2957_v54 = vrot.slane %v2956_v44, 4  ;;  %v2555_v9 = vrot.slane %v2554_v3, 2 }
 0x30b   : > { %v2847_v60 = vmax.f32 %v2845_v41, %v2846_v34  ;;  %v2884_v8 = vmax.f32 %v2882_v21, %v2883_v50  ;;  %v2921_v33 = vmax.f32 %v2919_v10, %v2920_v52  ;;  %vm4584_vm3 = vcmask 1041408  }
 0x30c   : > { %v2446_v15 = vrot.slane %v2445_v6, 1  ;;  %v2482_v24 = vmax.f32 %v2480_v40, %v2481_v51  ;;  %v2520_v62 = vrot.slane %v2519_v0, 1  ;;  %v2958_v58 = vmax.f32 %v2956_v44, %v2957_v54  ;;  %v10120_v40 = vpop.permute.xlu0 %3431 }
 0x30d   : > { %4245 = vperm.xlu0 %5353, %v12845_v1   ;;  %v2556_v28 = vmax.f32 %v2554_v3, %v2555_v9  ;;  %v2848_v18 = vrot.slane %v2847_v60, 2  ;;  %v2885_v30 = vrot.slane %v2884_v8, 2  ;;  %v2922_v17 = vrot.slane %v2921_v33, 2  ;;  %4242 = vperm.xlu1 %5354, %v12846_v27   ;;  %v12848_v3 = vld [vmem:[#allocation37_spill] sm:$0xff] }
 0x30e   : > { %vm4589_vm4 = vcmask 1042432   ;;  %v2447_v37 = vmax.f32 %v2445_v6, %v2446_v15  ;;  %v2483_v61 = vrot.slane %v2482_v24, 1  ;;  %v2521_v41 = vmax.f32 %v2519_v0, %v2520_v62 }
 0x30f   : > { %v2959_v10 = vrot.slane %v2958_v58, 2  ;;  %v2557_v21 = vrot.slane %v2556_v28, 1  ;;  %v2849_v34 = vmax.f32 %v2847_v60, %v2848_v18  ;;  %v2886_v50 = vmax.f32 %v2884_v8, %v2885_v30  ;;  %v10128_v60 = vpop.permute.xlu1 %3422  ;;  %v12849_v30 = vld [vmem:[#allocation38_spill] sm:$0xff] }
 0x310   : > { %v2923_v52 = vmax.f32 %v2921_v33, %v2922_v17  ;;  %v2484_v44 = vmax.f32 %v2482_v24, %v2483_v61  ;;  %vm3090_vm5 = vcmp.eq.s32.totalorder %v9812_v46, 1  ;;  %v12847_v1 = vmax.f32 %v9964_v36, %v9970_v19 }
 0x311   : > { %v2960_v51 = vmax.f32 %v2958_v58, %v2959_v10  ;;  %4251 = vperm.xlu0 %5353, %v12848_v3   ;;  %v2558_v6 = vmax.f32 %v2556_v28, %v2557_v21  ;;  %v2850_v0 = vrot.slane %v2849_v34, 1  ;;  %v2887_v54 = vrot.slane %v2886_v50, 1  ;;  %4248 = vperm.xlu1 %5354, %v12849_v30   ;;  %v12851_v10 = vld [vmem:[#allocation39_spill] sm:$0xff] }
 0x312   : > { %v3248_v9 = vmax.f32 %v12847_v1, %v9994_v16  ;;  %v2924_v15 = vrot.slane %v2923_v52, 1  ;;  %v3215_v8 = vsel %vm3090_vm5, %v12832_v48, -1e+09  ;;  %v3216_v36 = vsel %vm3090_vm5, %v12833_v4, -1e+09 }
 0x313   : > { %v2961_v33 = vrot.slane %v2960_v51, 1  ;;  %v12850_v19 = vmax.f32 %v9984_v29, %v9973_v5  ;;  %v2851_v28 = vmax.f32 %v2849_v34, %v2850_v0  ;;  %v2888_v24 = vmax.f32 %v2886_v50, %v2887_v54  ;;  %v10162_v50 = vpop.permute.xlu0 %3437 }
 0x314   : > { %v2925_v62 = vmax.f32 %v2923_v52, %v2924_v15  ;;  %v3217_v58 = vsel %vm3090_vm5, %v12834_v32, -1e+09  ;;  %v3218_v17 = vsel %vm3090_vm5, %v12840_v49, -1e+09  ;;  %v3249_v27 = vmax.f32 %v3248_v9, %v3215_v8  ;;  %v12854_v52 = vld [vmem:[#allocation40_spill] sm:$0xff] }
 0x315   : > { %v3285_v16 = vmax.f32 %v12850_v19, %v9999_v23  ;;  %v2962_v18 = vmax.f32 %v2960_v51, %v2961_v33  ;;  %4257 = vperm.xlu0 %5353, %v12851_v10   ;;  %v12852_v5 = vmax.f32 %v9987_v12, %v9976_v14  ;;  %v12853_v23 = vmax.f32 %v10002_v7, %v9979_v53 }
 0x316   : > { %v4580_v34 = vsel %vm4579_vm2, %v10066_v2, %v10074_v13  ;;  %v4581_v46 = vsel %vm4579_vm2, %v10068_v25, %v10076_v43  ;;  %4254 = vperm.xlu1 %5354, %v12854_v52   ;;  %v3250_v51 = vrot.slane %v3249_v27, 4  ;;  %v4582_v12 = vsel %vm4579_vm2, %v10070_v31, %v10078_v45  ;;  %v10173_v25 = vpop.permute.xlu1 %3428  ;;  %v12855_v31 = vld [vmem:[#allocation42_spill] sm:$0xff] }
 0x317   : > { %v3286_v61 = vmax.f32 %v3285_v16, %v3216_v36  ;;  %v3322_v29 = vmax.f32 %v12852_v5, %v10023_v47  ;;  %v3359_v21 = vmax.f32 %v12853_v23, %v10028_v38  ;;  %v4583_v53 = vsel %vm4579_vm2, %v10072_v42, %v10082_v63  ;;  %v10186_v30 = vpop.permute.xlu0 %3443  ;;  %v12857_v36 = vld [vmem:[#allocation129_spill] sm:$0xff]  ;;  %v12858_v16 = vld [vmem:[#allocation46_spill] sm:$0xff]  ;;  %v12860_v5 = vld [vmem:[#allocation132_spill] sm:$0xff] }
 0x318   : > { %vm4594_vm6 = vcmask 1043456   ;;  %v4585_v38 = vsel %vm4584_vm3, %v4580_v34, %v2447_v37  ;;  %v4586_v2 = vsel %vm4584_vm3, %v4581_v46, %v2484_v44  ;;  %v3251_v13 = vmax.f32 %v3249_v27, %v3250_v51  ;;  %v12861_v23 = vld [vmem:[#allocation69_spill] sm:$0xff] }
 0x319   : > { %v3287_v14 = vrot.slane %v3286_v61, 4  ;;  %v3323_v7 = vmax.f32 %v3322_v29, %v3217_v58  ;;  %v3360_v47 = vmax.f32 %v3359_v21, %v3218_v17  ;;  %v4587_v1 = vsel %vm4584_vm3, %v4582_v12, %v2521_v41  ;;  %4260 = vperm.xlu0 %5353, %v12855_v31  }
 0x31a   : > { %v4588_v9 = vsel %vm4584_vm3, %v4583_v53, %v2558_v6  ;;  %v4590_v42 = vsel %vm4589_vm4, %v4585_v38, %v2851_v28  ;;  %v4591_v63 = vsel %vm4589_vm4, %v4586_v2, %v2888_v24  ;;  %v12856_v0 = vmov 6   ;;  %v12859_v24 = vld [vmem:[#allocation41_spill] sm:$0xff]  ;;  %v10197_v27 = vpop.permute.xlu1 %3434 }
 0x31b   : > { %v3288_v43 = vmax.f32 %v3286_v61, %v3287_v14  ;;  %v3324_v45 = vrot.slane %v3323_v7, 4  ;;  %v3361_v3 = vrot.slane %v3360_v47, 4  ;;  %5355 = vset.pattern.permute.xlu1 %v12856_v0  ;;  %v3252_v37 = vrot.slane %v3251_v13, 2  ;;  %v12862_v14 = vld [vmem:[#allocation99_spill] sm:$0xff]  ;;  %v12863_v53 = vld [vmem:[#allocation101_spill] sm:$0xff] }
 0x31c   : > { %v4592_v54 = vsel %vm4589_vm4, %v4587_v1, %v2925_v62  ;;  %v4593_v15 = vsel %vm4589_vm4, %v4588_v9, %v2962_v18  ;;  %3856 = vperm.xlu1 %5355, %v12855_v31   ;;  %vm3470_vm7 = vcmp.eq.s32.totalorder %v9895_v26, 1  ;;  %vm3464_vm8 = vcmp.eq.s32.totalorder %v9841_v22, 1  ;;  %v12864_v26 = vld [vmem:[#allocation44_spill] sm:$0xff]  ;;  %v12868_v31 = vld [vmem:[#allocation102_spill] sm:$0xff] }
 0x31d   : > { %v3289_v44 = vrot.slane %v3288_v43, 2  ;;  %v3325_v41 = vmax.f32 %v3323_v7, %v3324_v45  ;;  %v3362_v6 = vmax.f32 %v3360_v47, %v3361_v3  ;;  %v3253_v33 = vmax.f32 %v3251_v13, %v3252_v37  ;;  %4263 = vperm.xlu0 %5353, %v12859_v24   ;;  %v12867_v1 = vld [vmem:[#allocation100_spill] sm:$0xff] }
 0x31e   : > { %v3523_v19 = vsel %vm3470_vm7, %v12857_v36, -1e+09  ;;  %v3524_v28 = vsel %vm3470_vm7, %v12858_v16, -1e+09  ;;  %v3525_v29 = vsel %vm3470_vm7, %v12860_v5, -1e+09 }
 0x31f   : > { %v3290_v8 = vmax.f32 %v3288_v43, %v3289_v44  ;;  %v3326_v62 = vrot.slane %v3325_v41, 2  ;;  %v3363_v58 = vrot.slane %v3362_v6, 2  ;;  %v3625_v18 = vmax.f32 %v10015_v59, %v3523_v19  ;;  %v10215_v43 = vpop.permute.xlu0 %3449  ;;  %v12874_v19 = vld [vmem:[#allocation48_spill] sm:$0xff]  ;;  %v12922_v5 = vld [vmem:[#allocation161_spill] sm:$0xff]  ;;  %v12923_v36 = vld [vmem:[#allocation79_spill] sm:$0xff] }
 0x320   : > { %v3662_v17 = vmax.f32 %v10017_v55, %v3524_v28  ;;  %v3254_v61 = vrot.slane %v3253_v33, 1  ;;  %v3526_v21 = vsel %vm3470_vm7, %v12861_v23, -1e+09  ;;  %3859 = vperm.xlu1 %5355, %v12859_v24   ;;  %v3699_v59 = vmax.f32 %v10030_v57, %v3525_v29  ;;  %v12877_v29 = vld [vmem:[#allocation104_spill] sm:$0xff]  ;;  %v12918_v23 = vld [vmem:[#allocation149_spill] sm:$0xff] }
 0x321   : > { %v3291_v10 = vrot.slane %v3290_v8, 1  ;;  %v3327_v34 = vmax.f32 %v3325_v41, %v3326_v62  ;;  %v3364_v46 = vmax.f32 %v3362_v6, %v3363_v58  ;;  %v3736_v55 = vmax.f32 %v10035_v35, %v3526_v21  ;;  %4266 = vperm.xlu0 %5353, %v12864_v26   ;;  %v10230_v41 = vpop.permute.xlu1 %3440  ;;  %v12875_v62 = vld [vmem:[#allocation142_spill] sm:$0xff] }
 0x322   : > { %v3255_v52 = vmax.f32 %v3253_v33, %v3254_v61  ;;  %v3499_v12 = vsel %vm3464_vm8, %v12862_v14, -1e+09  ;;  %v3500_v7 = vsel %vm3464_vm8, %v12863_v53, -1e+09  ;;  %v3501_v9 = vsel %vm3464_vm8, %v12867_v1, -1e+09 }
 0x323   : > { %v3292_v51 = vmax.f32 %v3290_v8, %v3291_v10  ;;  %v3328_v47 = vrot.slane %v3327_v34, 1  ;;  %v3365_v38 = vrot.slane %v3364_v46, 1  ;;  %v3626_v2 = vmax.f32 %v3625_v18, %v3499_v12  ;;  %v12873_v33 = vld [vmem:[#allocation70_spill] sm:$0xff]  ;;  %v12876_v18 = vld [vmem:[#allocation71_spill] sm:$0xff] }
 0x324   : > { %v3663_v13 = vmax.f32 %v3662_v17, %v3500_v7  ;;  %v10218_v57 = vsel %vm4594_vm6, %v4590_v42, %v3255_v52  ;;  %v3502_v45 = vsel %vm3464_vm8, %v12868_v31, -1e+09  ;;  %3862 = vperm.xlu1 %5355, %v12864_v26   ;;  %v3700_v37 = vmax.f32 %v3699_v59, %v3501_v9  ;;  %v12869_v42 = vld [vmem:[#allocation189_spill] sm:$0xff] }
 0x325   : > { %12865 = vst [vmem:[#allocation66_spill] sm:$0xff] %v10218_v57  ;;  %v10221_v35 = vsel %vm4594_vm6, %v4591_v63, %v3292_v51  ;;  %v3329_v3 = vmax.f32 %v3327_v34, %v3328_v47  ;;  %v3366_v0 = vmax.f32 %v3364_v46, %v3365_v38  ;;  %v3737_v44 = vmax.f32 %v3736_v55, %v3502_v45  ;;  %v12870_v63 = vld [vmem:[#allocation43_spill] sm:$0xff]  ;;  %v10254_v34 = vpop.permute.xlu0 %3455  ;;  %v12879_v55 = vld [vmem:[#allocation105_spill] sm:$0xff]  ;;  %v10268_v9 = vpop.permute.xlu1 %3446 }
 0x326   : > { %12866 = vst [vmem:[#allocation194_spill] sm:$0xff] %v10221_v35  ;;  %vm3472_vm9 = vcmp.eq.s32.totalorder %v9929_v20, 1  ;;  %vm3465_vm10 = vcmp.eq.s32.totalorder %v9869_v39, 1  ;;  %vm3474_vm11 = vcmp.eq.s32.totalorder %v9966_v56, 1  ;;  %vm3467_vm12 = vcmp.eq.s32.totalorder %v12869_v42, 1  ;;  %4269 = vperm.xlu0 %5353, %v12870_v63   ;;  %v12880_v51 = vld [vmem:[#allocation107_spill] sm:$0xff] }
 0x327   : > { %v10238_v22 = vsel %vm4594_vm6, %v4592_v54, %v3329_v3  ;;  %v10241_v6 = vsel %vm4594_vm6, %v4593_v15, %v3366_v0  ;;  %v3531_v8 = vsel %vm3472_vm9, %v12873_v33, -1e+09  ;;  %v3532_v28 = vsel %vm3472_vm9, %v12874_v19, -1e+09  ;;  %v12878_v15 = vld [vmem:[#allocation106_spill] sm:$0xff]  ;;  %v12881_v47 = vld [vmem:[#allocation151_spill] sm:$0xff] }
 0x328   : > { %12871 = vst [vmem:[#allocation109_spill] sm:$0xff] %v10238_v22  ;;  %12872 = vst [vmem:[#allocation193_spill] sm:$0xff] %v10241_v6  ;;  %v3627_v24 = vmax.f32 %v3626_v2, %v3531_v8  ;;  %v3664_v20 = vmax.f32 %v3663_v13, %v3532_v28  ;;  %v3533_v58 = vsel %vm3472_vm9, %v12875_v62, -1e+09  ;;  %v3534_v17 = vsel %vm3472_vm9, %v12876_v18, -1e+09  ;;  %3865 = vperm.xlu1 %5355, %v12870_v63  }
 0x329   : > { %v3701_v61 = vmax.f32 %v3700_v37, %v3533_v58  ;;  %v3738_v10 = vmax.f32 %v3737_v44, %v3534_v17  ;;  %v3503_v54 = vsel %vm3465_vm10, %v12877_v29, -1e+09  ;;  %v3504_v21 = vsel %vm3465_vm10, %v12878_v15, -1e+09  ;;  %v12882_v2 = vld [vmem:[#allocation163_spill] sm:$0xff]  ;;  %v12884_v39 = vld [vmem:[#allocation164_spill] sm:$0xff]  ;;  %v10296_v22 = vpop.permute.xlu1 %3452 }
 0x32a   : > { %v3628_v46 = vmax.f32 %v3627_v24, %v3503_v54  ;;  %v3665_v59 = vmax.f32 %v3664_v20, %v3504_v21  ;;  %v3505_v52 = vsel %vm3465_vm10, %v12879_v55, -1e+09  ;;  %v3506_v12 = vsel %vm3465_vm10, %v12880_v51, -1e+09  ;;  %v12883_v0 = vld [vmem:[#allocation159_spill] sm:$0xff]  ;;  %v12885_v28 = vld [vmem:[#allocation114_spill] sm:$0xff] }
 0x32b   : > { %v3702_v7 = vmax.f32 %v3701_v61, %v3505_v52  ;;  %v3739_v26 = vmax.f32 %v3738_v10, %v3506_v12  ;;  %v3539_v38 = vsel %vm3474_vm11, %v12881_v47, -1e+09  ;;  %v3540_v13 = vsel %vm3474_vm11, %v12882_v2, -1e+09  ;;  %v12886_v20 = vld [vmem:[#allocation116_spill] sm:$0xff]  ;;  %v12887_v10 = vld [vmem:[#allocation115_spill] sm:$0xff] }
 0x32c   : > { %v3629_v45 = vmax.f32 %v3628_v46, %v3539_v38  ;;  %v3666_v3 = vmax.f32 %v3665_v59, %v3540_v13  ;;  %v3541_v37 = vsel %vm3474_vm11, %v12883_v0, -1e+09  ;;  %v3542_v44 = vsel %vm3474_vm11, %v12884_v39, -1e+09  ;;  %v12888_v21 = vld [vmem:[#allocation117_spill] sm:$0xff]  ;;  %v12889_v52 = vld [vmem:[#allocation63_spill] sm:$0xff] }
 0x32d   : > { %v3703_v63 = vmax.f32 %v3702_v7, %v3541_v37  ;;  %v3740_v8 = vmax.f32 %v3739_v26, %v3542_v44  ;;  %v3511_v24 = vsel %vm3467_vm12, %v12885_v28, -1e+09  ;;  %v3512_v58 = vsel %vm3467_vm12, %v12886_v20, -1e+09  ;;  %v12890_v12 = vld [vmem:[#allocation136_spill] sm:$0xff]  ;;  %v10290_v7 = vpop.permute.xlu0 %3461  ;;  %v12892_v13 = vld [vmem:[#allocation187_spill] sm:$0xff] }
 0x32e   : > { %v3630_v17 = vmax.f32 %v3629_v45, %v3511_v24  ;;  %v3667_v61 = vmax.f32 %v3666_v3, %v3512_v58  ;;  %v3513_v54 = vsel %vm3467_vm12, %v12887_v10, -1e+09  ;;  %v3514_v56 = vsel %vm3467_vm12, %v12888_v21, -1e+09  ;;  %v12891_v26 = vld [vmem:[#allocation172_spill] sm:$0xff]  ;;  %v12893_v3 = vld [vmem:[#allocation173_spill] sm:$0xff] }
 0x32f   : > { %v3704_v46 = vmax.f32 %v3703_v63, %v3513_v54  ;;  %v3741_v59 = vmax.f32 %v3740_v8, %v3514_v56  ;;  %vm3476_vm13 = vcmp.eq.s32.totalorder %v12889_v52, 1  ;;  %vm3469_vm14 = vcmp.eq.s32.totalorder %v12890_v12, 1  ;;  %v12894_v6 = vld [vmem:[#allocation75_spill] sm:$0xff]  ;;  %v12895_v8 = vld [vmem:[#allocation126_spill] sm:$0xff]  ;;  %v12896_v56 = vld [vmem:[#allocation128_spill] sm:$0xff] }
 0x330   : > { %v3547_v38 = vsel %vm3476_vm13, %v12891_v26, -1e+09  ;;  %v3548_v45 = vsel %vm3476_vm13, %v12892_v13, -1e+09  ;;  %v3549_v37 = vsel %vm3476_vm13, %v12893_v3, -1e+09 }
 0x331   : > { %v3631_v44 = vmax.f32 %v3630_v17, %v3547_v38  ;;  %v3668_v24 = vmax.f32 %v3667_v61, %v3548_v45  ;;  %v3705_v58 = vmax.f32 %v3704_v46, %v3549_v37  ;;  %v3550_v42 = vsel %vm3476_vm13, %v12894_v6, -1e+09  ;;  %v12897_v35 = vld [vmem:[#allocation127_spill] sm:$0xff]  ;;  %v12898_v38 = vld [vmem:[#allocation93_spill] sm:$0xff]  ;;  %v12899_v37 = vld [vmem:[#allocation52_spill] sm:$0xff] }
 0x332   : > { %v3742_v63 = vmax.f32 %v3741_v59, %v3550_v42  ;;  %v3519_v54 = vsel %vm3469_vm14, %v12895_v8, -1e+09  ;;  %v3520_v52 = vsel %vm3469_vm14, %v12896_v56, -1e+09  ;;  %v3521_v57 = vsel %vm3469_vm14, %v12897_v35, -1e+09 }
 0x333   : > { %v3632_v17 = vmax.f32 %v3631_v44, %v3519_v54  ;;  %v3669_v61 = vmax.f32 %v3668_v24, %v3520_v52  ;;  %v3706_v46 = vmax.f32 %v3705_v58, %v3521_v57  ;;  %v3522_v45 = vsel %vm3469_vm14, %v12898_v38, -1e+09  ;;  %v12900_v42 = vld [vmem:[#allocation196_spill] sm:$0xff]  ;;  %v12901_v6 = vld [vmem:[#allocation54_spill] sm:$0xff]  ;;  %v12904_v0 = vld [vmem:[#allocation143_spill] sm:$0xff]  ;;  %v10316_v44 = vpop.permute.xlu0 %3775 }
 0x334   : > { %v3743_v59 = vmax.f32 %v3742_v63, %v3522_v45  ;;  %vm3478_vm15 = vcmp.eq.s32.totalorder %v12899_v37, 1  ;;  %vm3471_vm0 = vcmp.eq.s32.totalorder %v12900_v42, 1  ;;  %vm3480_vm1 = vcmp.eq.s32.totalorder %v12901_v6, 1  ;;  %v12902_v3 = vld [vmem:[#allocation124_spill] sm:$0xff]  ;;  %v12903_v26 = vld [vmem:[#allocation198_spill] sm:$0xff]  ;;  %v12905_v12 = vld [vmem:[#allocation199_spill] sm:$0xff] }
 0x335   : > { %v3555_v13 = vsel %vm3478_vm15, %v12902_v3, -1e+09  ;;  %v3556_v39 = vsel %vm3478_vm15, %v12903_v26, -1e+09  ;;  %v3557_v2 = vsel %vm3478_vm15, %v12904_v0, -1e+09  ;;  %v10328_v26 = vpop.permute.xlu1 %3458 }
 0x336   : > { %v3633_v57 = vmax.f32 %v3632_v17, %v3555_v13  ;;  %v3670_v24 = vmax.f32 %v3669_v61, %v3556_v39  ;;  %v3707_v58 = vmax.f32 %v3706_v46, %v3557_v2  ;;  %v3558_v54 = vsel %vm3478_vm15, %v12905_v12, -1e+09  ;;  %v12906_v52 = vld [vmem:[#allocation137_spill] sm:$0xff]  ;;  %v12908_v47 = vld [vmem:[#allocation138_spill] sm:$0xff]  ;;  %v12911_v12 = vld [vmem:[#allocation56_spill] sm:$0xff] }
 0x337   : > { %v3744_v63 = vmax.f32 %v3743_v59, %v3558_v54  ;;  %v3527_v45 = vsel %vm3471_vm0, %v12906_v52, -1e+09  ;;  %v12907_v37 = vld [vmem:[#allocation45_spill] sm:$0xff]  ;;  %v3529_v0 = vsel %vm3471_vm0, %v12908_v47, -1e+09  ;;  %v12909_v17 = vld [vmem:[#allocation98_spill] sm:$0xff] }
 0x338   : > { %v3528_v3 = vsel %vm3471_vm0, %v12907_v37, -1e+09  ;;  %v3634_v13 = vmax.f32 %v3633_v57, %v3527_v45  ;;  %v3708_v2 = vmax.f32 %v3707_v58, %v3529_v0  ;;  %v3530_v61 = vsel %vm3471_vm0, %v12909_v17, -1e+09  ;;  %v12910_v59 = vld [vmem:[#allocation146_spill] sm:$0xff]  ;;  %v12912_v62 = vld [vmem:[#allocation153_spill] sm:$0xff] }
 0x339   : > { %v3671_v39 = vmax.f32 %v3670_v24, %v3528_v3  ;;  %v3745_v46 = vmax.f32 %v3744_v63, %v3530_v61  ;;  %v3563_v54 = vsel %vm3480_vm1, %v12910_v59, -1e+09  ;;  %v3564_v18 = vsel %vm3480_vm1, %v12911_v12, -1e+09  ;;  %v12913_v24 = vld [vmem:[#allocation80_spill] sm:$0xff]  ;;  %v12914_v63 = vld [vmem:[#allocation86_spill] sm:$0xff]  ;;  %v10348_v59 = vpop.permute.xlu0 %3784 }
 0x33a   : > { %v3565_v19 = vsel %vm3480_vm1, %v12912_v62, -1e+09  ;;  %v3635_v57 = vmax.f32 %v3634_v13, %v3563_v54  ;;  %v3566_v42 = vsel %vm3480_vm1, %v12913_v24, -1e+09  ;;  %vm3473_vm2 = vcmp.eq.s32.totalorder %v12914_v63, 1  ;;  %v12915_v45 = vld [vmem:[#allocation200_spill] sm:$0xff] }
 0x33b   : > { %v3672_v3 = vmax.f32 %v3671_v39, %v3564_v18  ;;  %v3709_v0 = vmax.f32 %v3708_v2, %v3565_v19  ;;  %v3746_v58 = vmax.f32 %v3745_v46, %v3566_v42  ;;  %vm3482_vm3 = vcmp.eq.s32.totalorder %v12915_v45, 1  ;;  %v12916_v61 = vld [vmem:[#allocation190_spill] sm:$0xff]  ;;  %v12917_v12 = vld [vmem:[#allocation147_spill] sm:$0xff]  ;;  %v12919_v13 = vld [vmem:[#allocation148_spill] sm:$0xff]  ;;  %v10354_v46 = vpop.permute.xlu1 %3772 }
 0x33c   : > { %vm3475_vm4 = vcmp.eq.s32.totalorder %v12916_v61, 1  ;;  %v3535_v33 = vsel %vm3473_vm2, %v12917_v12, -1e+09  ;;  %v3536_v62 = vsel %vm3473_vm2, %v12918_v23, -1e+09  ;;  %v12920_v6 = vld [vmem:[#allocation150_spill] sm:$0xff] }
 0x33d   : > { %v3537_v18 = vsel %vm3473_vm2, %v12919_v13, -1e+09  ;;  %v3636_v19 = vmax.f32 %v3635_v57, %v3535_v33  ;;  %v3673_v39 = vmax.f32 %v3672_v3, %v3536_v62  ;;  %v3538_v54 = vsel %vm3473_vm2, %v12920_v6, -1e+09  ;;  %v12921_v63 = vld [vmem:[#allocation55_spill] sm:$0xff]  ;;  %v12924_v3 = vld [vmem:[#allocation50_spill] sm:$0xff] }
 0x33e   : > { %v3710_v2 = vmax.f32 %v3709_v0, %v3537_v18  ;;  %v3747_v42 = vmax.f32 %v3746_v58, %v3538_v54  ;;  %v3571_v24 = vsel %vm3482_vm3, %v12921_v63, -1e+09  ;;  %v3572_v16 = vsel %vm3482_vm3, %v12922_v5, -1e+09  ;;  %v12925_v18 = vld [vmem:[#allocation133_spill] sm:$0xff]  ;;  %v12926_v63 = vld [vmem:[#allocation170_spill] sm:$0xff] }
 0x33f   : > { %v3573_v51 = vsel %vm3482_vm3, %v12923_v36, -1e+09  ;;  %v3637_v33 = vmax.f32 %v3636_v19, %v3571_v24  ;;  %v3674_v62 = vmax.f32 %v3673_v39, %v3572_v16  ;;  %v3574_v0 = vsel %vm3482_vm3, %v12924_v3, -1e+09  ;;  %v12927_v55 = vld [vmem:[#allocation134_spill] sm:$0xff]  ;;  %v12928_v19 = vld [vmem:[#allocation171_spill] sm:$0xff]  ;;  %v10380_v39 = vpop.permute.xlu0 %3790 }
 0x340   : > { %v3711_v57 = vmax.f32 %v3710_v2, %v3573_v51  ;;  %v3748_v58 = vmax.f32 %v3747_v42, %v3574_v0  ;;  %v3543_v54 = vsel %vm3475_vm4, %v12925_v18, -1e+09  ;;  %v3544_v5 = vsel %vm3475_vm4, %v12926_v63, -1e+09  ;;  %v12929_v42 = vld [vmem:[#allocation156_spill] sm:$0xff]  ;;  %v12930_v0 = vld [vmem:[#allocation83_spill] sm:$0xff] }
 0x341   : > { %v3545_v36 = vsel %vm3475_vm4, %v12927_v55, -1e+09  ;;  %v3638_v24 = vmax.f32 %v3637_v33, %v3543_v54  ;;  %v3675_v16 = vmax.f32 %v3674_v62, %v3544_v5  ;;  %v3546_v45 = vsel %vm3475_vm4, %v12928_v19, -1e+09  ;;  %v12931_v63 = vld [vmem:[#allocation167_spill] sm:$0xff]  ;;  %v12933_v54 = vld [vmem:[#allocation57_spill] sm:$0xff] }
 0x342   : > { %v3712_v51 = vmax.f32 %v3711_v57, %v3545_v36  ;;  %v3749_v2 = vmax.f32 %v3748_v58, %v3546_v45  ;;  %vm3484_vm5 = vcmp.eq.s32.totalorder %v10120_v40, 1  ;;  %vm3477_vm6 = vcmp.eq.s32.totalorder %v12929_v42, 1  ;;  %v12932_v33 = vld [vmem:[#allocation123_spill] sm:$0xff]  ;;  %v10388_v36 = vpop.permute.xlu1 %3778  ;;  %v12941_v42 = vld [vmem:[#allocation60_spill] sm:$0xff] }
 0x343   : > { %vm3486_vm7 = vcmp.eq.s32.totalorder %v10162_v50, 1  ;;  %v3579_v3 = vsel %vm3484_vm5, %v12930_v0, -1e+09  ;;  %v3580_v55 = vsel %vm3484_vm5, %v12931_v63, -1e+09  ;;  %v12934_v45 = vld [vmem:[#allocation139_spill] sm:$0xff] }
 0x344   : > { %v3581_v5 = vsel %vm3484_vm5, %v12932_v33, -1e+09  ;;  %v3639_v62 = vmax.f32 %v3638_v24, %v3579_v3  ;;  %v3676_v61 = vmax.f32 %v3675_v16, %v3580_v55  ;;  %v3582_v19 = vsel %vm3484_vm5, %v12933_v54, -1e+09  ;;  %v12935_v18 = vld [vmem:[#allocation51_spill] sm:$0xff]  ;;  %v12937_v55 = vld [vmem:[#allocation76_spill] sm:$0xff] }
 0x345   : > { %v3713_v57 = vmax.f32 %v3712_v51, %v3581_v5  ;;  %v3750_v58 = vmax.f32 %v3749_v2, %v3582_v19  ;;  %v3551_v40 = vsel %vm3477_vm6, %v12934_v45, -1e+09  ;;  %v3552_v0 = vsel %vm3477_vm6, %v12935_v18, -1e+09  ;;  %v12936_v15 = vld [vmem:[#allocation191_spill] sm:$0xff]  ;;  %v12938_v51 = vld [vmem:[#allocation74_spill] sm:$0xff] }
 0x346   : > { %v3553_v33 = vsel %vm3477_vm6, %v12936_v15, -1e+09  ;;  %v3640_v63 = vmax.f32 %v3639_v62, %v3551_v40  ;;  %v3677_v29 = vmax.f32 %v3676_v61, %v3552_v0  ;;  %v3554_v24 = vsel %vm3477_vm6, %v12937_v55, -1e+09  ;;  %v12939_v2 = vld [vmem:[#allocation175_spill] sm:$0xff]  ;;  %v12940_v54 = vld [vmem:[#allocation174_spill] sm:$0xff]  ;;  %v10412_v62 = vpop.permute.xlu0 %3796  ;;  %v10420_v40 = vpop.permute.xlu1 %3781 }
 0x347   : > { %v3714_v3 = vmax.f32 %v3713_v57, %v3553_v33  ;;  %v3751_v16 = vmax.f32 %v3750_v58, %v3554_v24  ;;  %v3587_v19 = vsel %vm3486_vm7, %v12938_v51, -1e+09  ;;  %v3588_v5 = vsel %vm3486_vm7, %v12939_v2, -1e+09  ;;  %v12942_v24 = vld [vmem:[#allocation145_spill] sm:$0xff]  ;;  %v12945_v50 = vld [vmem:[#allocation130_spill] sm:$0xff] }
 0x348   : > { %v3589_v15 = vsel %vm3486_vm7, %v12940_v54, -1e+09  ;;  %v3641_v0 = vmax.f32 %v3640_v63, %v3587_v19  ;;  %v3678_v33 = vmax.f32 %v3677_v29, %v3588_v5  ;;  %v3590_v57 = vsel %vm3486_vm7, %v12941_v42, -1e+09  ;;  %v12943_v2 = vld [vmem:[#allocation77_spill] sm:$0xff]  ;;  %v12947_v42 = vld [vmem:[#allocation82_spill] sm:$0xff] }
 0x349   : > { %v3715_v61 = vmax.f32 %v3714_v3, %v3589_v15  ;;  %v3752_v58 = vmax.f32 %v3751_v16, %v3590_v57  ;;  %vm3479_vm8 = vcmp.eq.s32.totalorder %v10116_v11, 1  ;;  %vm3488_vm9 = vcmp.eq.s32.totalorder %v10186_v30, 1  ;;  %v12944_v63 = vld [vmem:[#allocation53_spill] sm:$0xff]  ;;  %v12946_v57 = vld [vmem:[#allocation178_spill] sm:$0xff]  ;;  %v12948_v18 = vld [vmem:[#allocation59_spill] sm:$0xff] }
 0x34a   : > { %vm3481_vm10 = vcmp.eq.s32.totalorder %v10128_v60, 1  ;;  %v3559_v54 = vsel %vm3479_vm8, %v12942_v24, -1e+09  ;;  %v3560_v51 = vsel %vm3479_vm8, %v12943_v2, -1e+09  ;;  %v12953_v30 = vld [vmem:[#allocation157_spill] sm:$0xff] }
 0x34b   : > { %v3561_v29 = vsel %vm3479_vm8, %v12944_v63, -1e+09  ;;  %v3642_v15 = vmax.f32 %v3641_v0, %v3559_v54  ;;  %v3679_v3 = vmax.f32 %v3678_v33, %v3560_v51  ;;  %v3562_v5 = vsel %vm3479_vm8, %v12945_v50, -1e+09  ;;  %v12949_v51 = vld [vmem:[#allocation103_spill] sm:$0xff]  ;;  %v10438_v33 = vpop.permute.xlu0 %3802  ;;  %v12957_v60 = vld [vmem:[#allocation185_spill] sm:$0xff] }
 0x34c   : > { %v3716_v19 = vmax.f32 %v3715_v61, %v3561_v29  ;;  %v3753_v16 = vmax.f32 %v3752_v58, %v3562_v5  ;;  %v3595_v11 = vsel %vm3488_vm9, %v12946_v57, -1e+09  ;;  %v3596_v55 = vsel %vm3488_vm9, %v12947_v42, -1e+09  ;;  %v12950_v58 = vld [vmem:[#allocation154_spill] sm:$0xff]  ;;  %v12952_v57 = vld [vmem:[#allocation155_spill] sm:$0xff] }
 0x34d   : > { %v3597_v2 = vsel %vm3488_vm9, %v12948_v18, -1e+09  ;;  %v3643_v24 = vmax.f32 %v3642_v15, %v3595_v11  ;;  %v3680_v63 = vmax.f32 %v3679_v3, %v3596_v55  ;;  %v3598_v0 = vsel %vm3488_vm9, %v12949_v51, -1e+09  ;;  %v12951_v5 = vld [vmem:[#allocation118_spill] sm:$0xff]  ;;  %v12955_v18 = vld [vmem:[#allocation184_spill] sm:$0xff] }
 0x34e   : > { %v3717_v54 = vmax.f32 %v3716_v19, %v3597_v2  ;;  %v3754_v61 = vmax.f32 %v3753_v16, %v3598_v0  ;;  %v3567_v29 = vsel %vm3481_vm10, %v12950_v58, -1e+09  ;;  %v3568_v42 = vsel %vm3481_vm10, %v12951_v5, -1e+09  ;;  %v10452_v16 = vpop.permute.xlu1 %3787  ;;  %v12954_v0 = vld [vmem:[#allocation62_spill] sm:$0xff]  ;;  %v12958_v5 = vld [vmem:[#allocation73_spill] sm:$0xff] }
 0x34f   : > { %v3569_v55 = vsel %vm3481_vm10, %v12952_v57, -1e+09  ;;  %v3644_v2 = vmax.f32 %v3643_v24, %v3567_v29  ;;  %v3681_v15 = vmax.f32 %v3680_v63, %v3568_v42  ;;  %v3570_v19 = vsel %vm3481_vm10, %v12953_v30, -1e+09  ;;  %v12956_v24 = vld [vmem:[#allocation87_spill] sm:$0xff]  ;;  %v12960_v58 = vld [vmem:[#allocation165_spill] sm:$0xff] }
 0x350   : > { %v3718_v3 = vmax.f32 %v3717_v54, %v3569_v55  ;;  %v3755_v11 = vmax.f32 %v3754_v61, %v3570_v19  ;;  %vm3490_vm11 = vcmp.eq.s32.totalorder %v10215_v43, 1  ;;  %vm3483_vm12 = vcmp.eq.s32.totalorder %v10173_v25, 1  ;;  %v12959_v61 = vld [vmem:[#allocation166_spill] sm:$0xff]  ;;  %v12965_v25 = vld [vmem:[#allocation192_spill] sm:$0xff] }
 0x351   : > { %vm3492_vm13 = vcmp.eq.s32.totalorder %v10254_v34, 1  ;;  %v3603_v51 = vsel %vm3490_vm11, %v12954_v0, -1e+09  ;;  %v3604_v57 = vsel %vm3490_vm11, %v12955_v18, -1e+09  ;;  %v10470_v0 = vpop.permute.xlu0 %3808  ;;  %vm3485_vm14 = vcmp.eq.s32.totalorder %v10197_v27, 1 }
 0x352   : > { %v3605_v42 = vsel %vm3490_vm11, %v12956_v24, -1e+09  ;;  %v3645_v63 = vmax.f32 %v3644_v2, %v3603_v51  ;;  %v3682_v54 = vmax.f32 %v3681_v15, %v3604_v57  ;;  %v3606_v55 = vsel %vm3490_vm11, %v12957_v60, -1e+09  ;;  %v12961_v15 = vld [vmem:[#allocation58_spill] sm:$0xff]  ;;  %v12963_v60 = vld [vmem:[#allocation89_spill] sm:$0xff] }
 0x353   : > { %v3719_v29 = vmax.f32 %v3718_v3, %v3605_v42  ;;  %v3756_v30 = vmax.f32 %v3755_v11, %v3606_v55  ;;  %v3575_v43 = vsel %vm3483_vm12, %v12958_v5, -1e+09  ;;  %v3576_v19 = vsel %vm3483_vm12, %v12959_v61, -1e+09  ;;  %v12962_v42 = vld [vmem:[#allocation188_spill] sm:$0xff] }
 0x354   : > { %v3577_v18 = vsel %vm3483_vm12, %v12960_v58, -1e+09  ;;  %v3646_v51 = vmax.f32 %v3645_v63, %v3575_v43  ;;  %v3683_v57 = vmax.f32 %v3682_v54, %v3576_v19  ;;  %v3578_v3 = vsel %vm3483_vm12, %v12961_v15, -1e+09  ;;  %v12964_v61 = vld [vmem:[#allocation64_spill] sm:$0xff]  ;;  %v10484_v63 = vpop.permute.xlu1 %3793  ;;  %v12966_v19 = vld [vmem:[#allocation81_spill] sm:$0xff] }
 0x355   : > { %v3720_v2 = vmax.f32 %v3719_v29, %v3577_v18  ;;  %v3757_v11 = vmax.f32 %v3756_v30, %v3578_v3  ;;  %v3611_v55 = vsel %vm3492_vm13, %v12962_v42, -1e+09  ;;  %v3612_v24 = vsel %vm3492_vm13, %v12963_v60, -1e+09  ;;  %v12967_v60 = vld [vmem:[#allocation168_spill] sm:$0xff]  ;;  %v10496_v34 = vpop.permute.xlu0 %3814 }
 0x356   : > { %v3613_v58 = vsel %vm3492_vm13, %v12964_v61, -1e+09  ;;  %v3647_v18 = vmax.f32 %v3646_v51, %v3611_v55  ;;  %v3684_v54 = vmax.f32 %v3683_v57, %v3612_v24  ;;  %v3614_v30 = vsel %vm3492_vm13, %v12965_v25, -1e+09  ;;  %v12968_v42 = vld [vmem:[#allocation140_spill] sm:$0xff]  ;;  %v12969_v57 = vld [vmem:[#allocation49_spill] sm:$0xff] }
 0x357   : > { %v3721_v29 = vmax.f32 %v3720_v2, %v3613_v58  ;;  %v3758_v43 = vmax.f32 %v3757_v11, %v3614_v30  ;;  %vm3494_vm15 = vcmp.eq.s32.totalorder %v10290_v7, 1  ;;  %vm3487_vm0 = vcmp.eq.s32.totalorder %v10230_v41, 1  ;;  %v12972_v25 = vld [vmem:[#allocation176_spill] sm:$0xff]  ;;  %v12973_v7 = vld [vmem:[#allocation125_spill] sm:$0xff] }
 0x358   : > { %v3583_v3 = vsel %vm3485_vm14, %v12966_v19, -1e+09  ;;  %v3584_v61 = vsel %vm3485_vm14, %v12967_v60, -1e+09  ;;  %v3585_v15 = vsel %vm3485_vm14, %v12968_v42, -1e+09 }
 0x359   : > { %v3648_v51 = vmax.f32 %v3647_v18, %v3583_v3  ;;  %v3685_v24 = vmax.f32 %v3684_v54, %v3584_v61  ;;  %v3722_v58 = vmax.f32 %v3721_v29, %v3585_v15  ;;  %v3586_v2 = vsel %vm3485_vm14, %v12969_v57, -1e+09  ;;  %v10510_v29 = vpop.permute.xlu1 %3799  ;;  %v12970_v3 = vld [vmem:[#allocation85_spill] sm:$0xff] }
 0x35a   : > { %v3759_v11 = vmax.f32 %v3758_v43, %v3586_v2  ;;  %v3619_v27 = vsel %vm3494_vm15, %v12832_v48, -1e+09  ;;  %v3620_v55 = vsel %vm3494_vm15, %v12833_v4, -1e+09  ;;  %v3621_v30 = vsel %vm3494_vm15, %v12834_v32, -1e+09 }
 0x35b   : > { %v3649_v18 = vmax.f32 %v3648_v51, %v3619_v27  ;;  %v3686_v61 = vmax.f32 %v3685_v24, %v3620_v55  ;;  %v3723_v15 = vmax.f32 %v3722_v58, %v3621_v30  ;;  %v3622_v54 = vsel %vm3494_vm15, %v12840_v49, -1e+09  ;;  %v12971_v48 = vld [vmem:[#allocation177_spill] sm:$0xff] }
 0x35c   : > { %v3760_v43 = vmax.f32 %v3759_v11, %v3622_v54  ;;  %v3591_v2 = vsel %vm3487_vm0, %v12970_v3, -1e+09  ;;  %v3592_v4 = vsel %vm3487_vm0, %v12971_v48, -1e+09  ;;  %v3593_v51 = vsel %vm3487_vm0, %v12972_v25, -1e+09 }
 0x35d   : > { %v3650_v24 = vmax.f32 %v3649_v18, %v3591_v2  ;;  %v3687_v58 = vmax.f32 %v3686_v61, %v3592_v4  ;;  %v3724_v27 = vmax.f32 %v3723_v15, %v3593_v51  ;;  %v3594_v55 = vsel %vm3487_vm0, %v12973_v7, -1e+09  ;;  %v10530_v18 = vpop.permute.xlu0 %3820  ;;  %v12974_v61 = vld [vmem:[#allocation179_spill] sm:$0xff]  ;;  %v12975_v15 = vld [vmem:[#allocation181_spill] sm:$0xff]  ;;  %v12976_v51 = vld [vmem:[#allocation180_spill] sm:$0xff]  ;;  %v10537_v7 = vpop.permute.xlu1 %3805 }
 0x35e   : > { %v3761_v11 = vmax.f32 %v3760_v43, %v3594_v55  ;;  %vm3868_vm1 = vcmp.eq.s32.totalorder %v10316_v44, 1  ;;  %vm3489_vm2 = vcmp.eq.s32.totalorder %v10268_v9, 1  ;;  %vm3871_vm3 = vcmp.eq.s32.totalorder %v10348_v59, 1  ;;  %v12977_v55 = vld [vmem:[#allocation183_spill] sm:$0xff] }
 0x35f   : > { %v3903_v30 = vsel %vm3868_vm1, %v12862_v14, -1e+09  ;;  %v3904_v54 = vsel %vm3868_vm1, %v12863_v53, -1e+09  ;;  %v3905_v49 = vsel %vm3868_vm1, %v12867_v1, -1e+09 }
 0x360   : > { %v3906_v4 = vsel %vm3868_vm1, %v12868_v31, -1e+09  ;;  %v3599_v41 = vsel %vm3489_vm2, %v12974_v61, -1e+09  ;;  %v3600_v43 = vsel %vm3489_vm2, %v12975_v15, -1e+09 }
 0x361   : > { %v3651_v2 = vmax.f32 %v3650_v24, %v3599_v41  ;;  %v3688_v44 = vmax.f32 %v3687_v58, %v3600_v43  ;;  %v3601_v9 = vsel %vm3489_vm2, %v12976_v51, -1e+09  ;;  %v3602_v32 = vsel %vm3489_vm2, %v12977_v55, -1e+09  ;;  %v12979_v43 = vld [vmem:[#allocation72_spill] sm:$0xff] }
 0x362   : > { %v3725_v14 = vmax.f32 %v3724_v27, %v3601_v9  ;;  %v3762_v53 = vmax.f32 %v3761_v11, %v3602_v32  ;;  %v3915_v1 = vsel %vm3871_vm3, %v12885_v28, -1e+09  ;;  %v3916_v31 = vsel %vm3871_vm3, %v12886_v20, -1e+09  ;;  %v12978_v11 = vld [vmem:[#allocation61_spill] sm:$0xff]  ;;  %v12981_v28 = vld [vmem:[#allocation186_spill] sm:$0xff] }
 0x363   : > { %v4027_v61 = vmax.f32 %v3915_v1, %v3903_v30  ;;  %v4064_v15 = vmax.f32 %v3916_v31, %v3904_v54  ;;  %v3917_v24 = vsel %vm3871_vm3, %v12887_v10, -1e+09  ;;  %v3918_v58 = vsel %vm3871_vm3, %v12888_v21, -1e+09  ;;  %v12980_v1 = vld [vmem:[#allocation84_spill] sm:$0xff]  ;;  %v10556_v30 = vpop.permute.xlu0 %3826 }
 0x364   : > { %v4101_v27 = vmax.f32 %v3917_v24, %v3905_v49  ;;  %v4138_v32 = vmax.f32 %v3918_v58, %v3906_v4  ;;  %vm3491_vm4 = vcmp.eq.s32.totalorder %v10296_v22, 1  ;;  %vm3873_vm5 = vcmp.eq.s32.totalorder %v10380_v39, 1  ;;  %v10568_v24 = vpop.permute.xlu1 %3811 }
 0x365   : > { %v3607_v41 = vsel %vm3491_vm4, %v12978_v11, -1e+09  ;;  %v3608_v9 = vsel %vm3491_vm4, %v12979_v43, -1e+09  ;;  %v3609_v31 = vsel %vm3491_vm4, %v12980_v1, -1e+09 }
 0x366   : > { %v3652_v54 = vmax.f32 %v3651_v2, %v3607_v41  ;;  %v3689_v10 = vmax.f32 %v3688_v44, %v3608_v9  ;;  %v3726_v20 = vmax.f32 %v3725_v14, %v3609_v31  ;;  %v3610_v59 = vsel %vm3491_vm4, %v12981_v28, -1e+09  ;;  %v12982_v41 = vld [vmem:[#allocation91_spill] sm:$0xff]  ;;  %v12984_v28 = vld [vmem:[#allocation141_spill] sm:$0xff] }
 0x367   : > { %v3763_v21 = vmax.f32 %v3762_v53, %v3610_v59  ;;  %v3923_v49 = vsel %vm3873_vm5, %v12895_v8, -1e+09  ;;  %v3924_v22 = vsel %vm3873_vm5, %v12896_v56, -1e+09  ;;  %v3925_v4 = vsel %vm3873_vm5, %v12897_v35, -1e+09 }
 0x368   : > { %v4028_v2 = vmax.f32 %v4027_v61, %v3923_v49  ;;  %v4065_v44 = vmax.f32 %v4064_v15, %v3924_v22  ;;  %v4102_v14 = vmax.f32 %v4101_v27, %v3925_v4  ;;  %v3926_v53 = vsel %vm3873_vm5, %v12898_v38, -1e+09  ;;  %v12983_v31 = vld [vmem:[#allocation47_spill] sm:$0xff]  ;;  %v12985_v15 = vld [vmem:[#allocation152_spill] sm:$0xff]  ;;  %v10579_v49 = vpop.permute.xlu0 %3832  ;;  %v13026_v8 = vld [vmem:[#allocation142_spill] sm:$0xff] }
 0x369   : > { %v4139_v58 = vmax.f32 %v4138_v32, %v3926_v53  ;;  %vm3493_vm6 = vcmp.eq.s32.totalorder %v10328_v26, 1  ;;  %vm3875_vm7 = vcmp.eq.s32.totalorder %v10412_v62, 1  ;;  %vm3867_vm8 = vcmp.eq.s32.totalorder %v10354_v46, 1 }
 0x36a   : > { %v3615_v9 = vsel %vm3493_vm6, %v12982_v41, -1e+09  ;;  %v3616_v59 = vsel %vm3493_vm6, %v12983_v31, -1e+09  ;;  %v3617_v1 = vsel %vm3493_vm6, %v12984_v28, -1e+09 }
 0x36b   : > { %v3653_v43 = vmax.f32 %v3652_v54, %v3615_v9  ;;  %v3690_v11 = vmax.f32 %v3689_v10, %v3616_v59  ;;  %v3727_v61 = vmax.f32 %v3726_v20, %v3617_v1  ;;  %v3618_v27 = vsel %vm3493_vm6, %v12985_v15, -1e+09  ;;  %v10591_v20 = vpop.permute.xlu1 %3817  ;;  %v12986_v15 = vld [vmem:[#allocation94_spill] sm:$0xff]  ;;  %v12988_v31 = vld [vmem:[#allocation95_spill] sm:$0xff] }
 0x36c   : > { %v3764_v39 = vmax.f32 %v3763_v21, %v3618_v27  ;;  %v3931_v26 = vsel %vm3875_vm7, %v12906_v52, -1e+09  ;;  %v3932_v32 = vsel %vm3875_vm7, %v12907_v37, -1e+09  ;;  %v3933_v22 = vsel %vm3875_vm7, %v12908_v47, -1e+09 }
 0x36d   : > { %v4029_v54 = vmax.f32 %v4028_v2, %v3931_v26  ;;  %v3654_v10 = vrot.slane %v3653_v43, 4  ;;  %v4066_v1 = vmax.f32 %v4065_v44, %v3932_v32  ;;  %v4103_v21 = vmax.f32 %v4102_v14, %v3933_v22  ;;  %v12987_v2 = vld [vmem:[#allocation96_spill] sm:$0xff]  ;;  %v10605_v32 = vpop.permute.xlu0 %3838 }
 0x36e   : > { %v3934_v4 = vsel %vm3875_vm7, %v12909_v17, -1e+09  ;;  %v3691_v53 = vrot.slane %v3690_v11, 4  ;;  %v3728_v9 = vrot.slane %v3727_v61, 4  ;;  %v3765_v59 = vrot.slane %v3764_v39, 4 }
 0x36f   : > { %v4140_v27 = vmax.f32 %v4139_v58, %v3934_v4  ;;  %v3899_v28 = vsel %vm3867_vm8, %v12986_v15, -1e+09  ;;  %v3900_v26 = vsel %vm3867_vm8, %v12987_v2, -1e+09  ;;  %v3901_v44 = vsel %vm3867_vm8, %v12988_v31, -1e+09  ;;  %v10616_v52 = vpop.permute.xlu1 %3823 }
 0x370   : > { %v4030_v14 = vmax.f32 %v4029_v54, %v3899_v28  ;;  %v10607_v62 = vmax.f32 %v3653_v43, %v3654_v10  ;;  %v4067_v22 = vmax.f32 %v4066_v1, %v3900_v26  ;;  %v4104_v41 = vmax.f32 %v4103_v21, %v3901_v44  ;;  %v12990_v58 = vld [vmem:[#allocation97_spill] sm:$0xff]  ;;  %v12995_v44 = vld [vmem:[#allocation106_spill] sm:$0xff] }
 0x371   : > { %v3902_v4 = vsel %vm3867_vm8, %v12990_v58, -1e+09  ;;  %v10612_v17 = vmax.f32 %v3690_v11, %v3691_v53  ;;  %v10614_v47 = vmax.f32 %v3727_v61, %v3728_v9  ;;  %v10618_v38 = vmax.f32 %v3764_v39, %v3765_v59  ;;  %v10629_v39 = vpop.permute.xlu0 %3844  ;;  %v12994_v9 = vld [vmem:[#allocation104_spill] sm:$0xff]  ;;  %v12998_v10 = vld [vmem:[#allocation133_spill] sm:$0xff]  ;;  %v13000_v43 = vld [vmem:[#allocation134_spill] sm:$0xff] }
 0x372   : > { %12989 = vst [vmem:[#allocation197_spill] sm:$0xff] %v10607_v62  ;;  %v4141_v37 = vmax.f32 %v4140_v27, %v3902_v4  ;;  %vm3877_vm9 = vcmp.eq.s32.totalorder %v10438_v33, 1  ;;  %vm3869_vm10 = vcmp.eq.s32.totalorder %v10388_v36, 1  ;;  %vm3879_vm11 = vcmp.eq.s32.totalorder %v10470_v0, 1 }
 0x373   : > { %12991 = vst [vmem:[#allocation195_spill] sm:$0xff] %v10612_v17  ;;  %12992 = vst [vmem:[#allocation113_spill] sm:$0xff] %v10614_v47  ;;  %v3939_v28 = vsel %vm3877_vm9, %v12917_v12, -1e+09  ;;  %v3940_v46 = vsel %vm3877_vm9, %v12918_v23, -1e+09 }
 0x374   : > { %12993 = vst [vmem:[#allocation14_spill] sm:$0xff] %v10618_v38  ;;  %v4031_v54 = vmax.f32 %v4030_v14, %v3939_v28  ;;  %v3941_v11 = vsel %vm3877_vm9, %v12919_v13, -1e+09  ;;  %v4068_v1 = vmax.f32 %v4067_v22, %v3940_v46  ;;  %v3942_v53 = vsel %vm3877_vm9, %v12920_v6, -1e+09  ;;  %v12996_v22 = vld [vmem:[#allocation105_spill] sm:$0xff]  ;;  %v10642_v28 = vpop.permute.xlu1 %3829 }
 0x375   : > { %v4105_v21 = vmax.f32 %v4104_v41, %v3941_v11  ;;  %v3907_v59 = vsel %vm3869_vm10, %v12994_v9, -1e+09  ;;  %v4142_v27 = vmax.f32 %v4141_v37, %v3942_v53  ;;  %v3908_v14 = vsel %vm3869_vm10, %v12995_v44, -1e+09  ;;  %v12997_v11 = vld [vmem:[#allocation107_spill] sm:$0xff]  ;;  %v13002_v47 = vld [vmem:[#allocation108_spill] sm:$0xff]  ;;  %v10663_v62 = vpop.permute.xlu0 %3850 }
 0x376   : > { %v4032_v26 = vmax.f32 %v4031_v54, %v3907_v59  ;;  %v3909_v4 = vsel %vm3869_vm10, %v12996_v22, -1e+09  ;;  %v4069_v46 = vmax.f32 %v4068_v1, %v3908_v14  ;;  %v3910_v33 = vsel %vm3869_vm10, %v12997_v11, -1e+09  ;;  %v12999_v59 = vld [vmem:[#allocation170_spill] sm:$0xff]  ;;  %v13001_v14 = vld [vmem:[#allocation171_spill] sm:$0xff] }
 0x377   : > { %v4106_v41 = vmax.f32 %v4105_v21, %v3909_v4  ;;  %v3947_v37 = vsel %vm3879_vm11, %v12998_v10, -1e+09  ;;  %v4143_v54 = vmax.f32 %v4142_v27, %v3910_v33  ;;  %v3948_v61 = vsel %vm3879_vm11, %v12999_v59, -1e+09  ;;  %v13003_v27 = vld [vmem:[#allocation111_spill] sm:$0xff]  ;;  %v13011_v13 = vld [vmem:[#allocation120_spill] sm:$0xff] }
 0x378   : > { %v4033_v53 = vmax.f32 %v4032_v26, %v3947_v37  ;;  %v3949_v38 = vsel %vm3879_vm11, %v13000_v43, -1e+09  ;;  %v4070_v1 = vmax.f32 %v4069_v46, %v3948_v61  ;;  %v3950_v36 = vsel %vm3879_vm11, %v13001_v14, -1e+09  ;;  %v13004_v37 = vld [vmem:[#allocation110_spill] sm:$0xff]  ;;  %v13005_v61 = vld [vmem:[#allocation112_spill] sm:$0xff] }
 0x379   : > { %v4107_v21 = vmax.f32 %v4106_v41, %v3949_v38  ;;  %vm3870_vm12 = vcmp.eq.s32.totalorder %v10420_v40, 1  ;;  %v4144_v4 = vmax.f32 %v4143_v54, %v3950_v36  ;;  %vm3881_vm13 = vcmp.eq.s32.totalorder %v10496_v34, 1  ;;  %v10669_v40 = vpop.permute.xlu1 %3835  ;;  %v13006_v41 = vld [vmem:[#allocation51_spill] sm:$0xff]  ;;  %v13015_v23 = vld [vmem:[#allocation53_spill] sm:$0xff] }
 0x37a   : > { %v3911_v33 = vsel %vm3870_vm12, %v13002_v47, -1e+09  ;;  %v3912_v26 = vsel %vm3870_vm12, %v13003_v27, -1e+09  ;;  %v3913_v17 = vsel %vm3870_vm12, %v13004_v37, -1e+09 }
 0x37b   : > { %v4034_v59 = vmax.f32 %v4033_v53, %v3911_v33  ;;  %v4071_v10 = vmax.f32 %v4070_v1, %v3912_v26  ;;  %v4108_v43 = vmax.f32 %v4107_v21, %v3913_v17  ;;  %v3914_v38 = vsel %vm3870_vm12, %v13005_v61, -1e+09  ;;  %v13007_v36 = vld [vmem:[#allocation191_spill] sm:$0xff]  ;;  %v13008_v21 = vld [vmem:[#allocation76_spill] sm:$0xff]  ;;  %v13029_v11 = vld [vmem:[#allocation165_spill] sm:$0xff] }
 0x37c   : > { %v4145_v46 = vmax.f32 %v4144_v4, %v3914_v38  ;;  %vm3872_vm14 = vcmp.eq.s32.totalorder %v10452_v16, 1  ;;  %vm3883_vm15 = vcmp.eq.s32.totalorder %v10530_v18, 1  ;;  %v3955_v0 = vsel %vm3881_vm13, %v12934_v45, -1e+09  ;;  %v13009_v26 = vld [vmem:[#allocation119_spill] sm:$0xff]  ;;  %v13010_v38 = vld [vmem:[#allocation121_spill] sm:$0xff] }
 0x37d   : > { %v3956_v54 = vsel %vm3881_vm13, %v13006_v41, -1e+09  ;;  %v3957_v14 = vsel %vm3881_vm13, %v13007_v36, -1e+09  ;;  %v4035_v53 = vmax.f32 %v4034_v59, %v3955_v0  ;;  %v3958_v33 = vsel %vm3881_vm13, %v13008_v21, -1e+09 }
 0x37e   : > { %v4072_v1 = vmax.f32 %v4071_v10, %v3956_v54  ;;  %v4109_v17 = vmax.f32 %v4108_v43, %v3957_v14  ;;  %v4146_v4 = vmax.f32 %v4145_v46, %v3958_v33  ;;  %v3919_v34 = vsel %vm3872_vm14, %v13009_v26, -1e+09  ;;  %v13012_v10 = vld [vmem:[#allocation122_spill] sm:$0xff]  ;;  %v10687_v14 = vpop.permute.xlu0 %4176  ;;  %v13013_v0 = vld [vmem:[#allocation145_spill] sm:$0xff]  ;;  %v13022_v12 = vld [vmem:[#allocation155_spill] sm:$0xff] }
 0x37f   : > { %v3920_v6 = vsel %vm3872_vm14, %v13010_v38, -1e+09  ;;  %v3921_v41 = vsel %vm3872_vm14, %v13011_v13, -1e+09  ;;  %v4036_v45 = vmax.f32 %v4035_v53, %v3919_v34  ;;  %v3922_v43 = vsel %vm3872_vm14, %v13012_v10, -1e+09 }
 0x380   : > { %v4073_v36 = vmax.f32 %v4072_v1, %v3920_v6  ;;  %v4110_v59 = vmax.f32 %v4109_v17, %v3921_v41  ;;  %v4147_v46 = vmax.f32 %v4146_v4, %v3922_v43  ;;  %v3963_v54 = vsel %vm3883_vm15, %v13013_v0, -1e+09  ;;  %v13014_v33 = vld [vmem:[#allocation77_spill] sm:$0xff]  ;;  %v10701_v17 = vpop.permute.xlu1 %3841  ;;  %v13020_v0 = vld [vmem:[#allocation154_spill] sm:$0xff]  ;;  %v13033_v44 = vld [vmem:[#allocation159_spill] sm:$0xff] }
 0x381   : > { %v3964_v21 = vsel %vm3883_vm15, %v13014_v33, -1e+09  ;;  %v3965_v6 = vsel %vm3883_vm15, %v13015_v23, -1e+09  ;;  %v4037_v41 = vmax.f32 %v4036_v45, %v3963_v54  ;;  %v3966_v16 = vsel %vm3883_vm15, %v12945_v50, -1e+09 }
 0x382   : > { %v4074_v53 = vmax.f32 %v4073_v36, %v3964_v21  ;;  %v4111_v1 = vmax.f32 %v4110_v59, %v3965_v6  ;;  %v4148_v4 = vmax.f32 %v4147_v46, %v3966_v16  ;;  %vm3874_vm0 = vcmp.eq.s32.totalorder %v10484_v63, 1  ;;  %v13016_v34 = vld [vmem:[#allocation129_spill] sm:$0xff]  ;;  %v13017_v33 = vld [vmem:[#allocation46_spill] sm:$0xff]  ;;  %v13018_v45 = vld [vmem:[#allocation132_spill] sm:$0xff]  ;;  %v10719_v56 = vpop.permute.xlu0 %4185 }
 0x383   : > { %vm3885_vm1 = vcmp.eq.s32.totalorder %v10556_v30, 1  ;;  %vm3876_vm2 = vcmp.eq.s32.totalorder %v10510_v29, 1  ;;  %v3927_v43 = vsel %vm3874_vm0, %v13016_v34, -1e+09  ;;  %v3928_v23 = vsel %vm3874_vm0, %v13017_v33, -1e+09 }
 0x384   : > { %v3929_v36 = vsel %vm3874_vm0, %v13018_v45, -1e+09  ;;  %v4038_v21 = vmax.f32 %v4037_v41, %v3927_v43  ;;  %v4075_v59 = vmax.f32 %v4074_v53, %v3928_v23  ;;  %v13019_v18 = vld [vmem:[#allocation69_spill] sm:$0xff]  ;;  %v3971_v63 = vsel %vm3885_vm1, %v13020_v0, -1e+09  ;;  %v13021_v46 = vld [vmem:[#allocation118_spill] sm:$0xff] }
 0x385   : > { %v4112_v54 = vmax.f32 %v4111_v1, %v3929_v36  ;;  %v3930_v6 = vsel %vm3874_vm0, %v13019_v18, -1e+09  ;;  %v3972_v16 = vsel %vm3885_vm1, %v13021_v46, -1e+09  ;;  %v3973_v35 = vsel %vm3885_vm1, %v13022_v12, -1e+09 }
 0x386   : > { %v4149_v50 = vmax.f32 %v4148_v4, %v3930_v6  ;;  %v4039_v41 = vmax.f32 %v4038_v21, %v3971_v63  ;;  %v4076_v23 = vmax.f32 %v4075_v59, %v3972_v16  ;;  %v13023_v1 = vld [vmem:[#allocation157_spill] sm:$0xff]  ;;  %v13024_v36 = vld [vmem:[#allocation70_spill] sm:$0xff]  ;;  %v13025_v0 = vld [vmem:[#allocation48_spill] sm:$0xff]  ;;  %v3937_v12 = vsel %vm3876_vm2, %v13026_v8, -1e+09  ;;  %v10733_v21 = vpop.permute.xlu1 %3847  ;;  %v10745_v29 = vpop.permute.xlu0 %4191 }
 0x387   : > { %v4113_v53 = vmax.f32 %v4112_v54, %v3973_v35  ;;  %v3974_v4 = vsel %vm3885_vm1, %v13023_v1, -1e+09  ;;  %v3935_v6 = vsel %vm3876_vm2, %v13024_v36, -1e+09  ;;  %v3936_v46 = vsel %vm3876_vm2, %v13025_v0, -1e+09 }
 0x388   : > { %v4150_v43 = vmax.f32 %v4149_v50, %v3974_v4  ;;  %v4040_v35 = vmax.f32 %v4039_v41, %v3935_v6  ;;  %v4077_v59 = vmax.f32 %v4076_v23, %v3936_v46  ;;  %v13027_v30 = vld [vmem:[#allocation71_spill] sm:$0xff]  ;;  %vm3887_vm3 = vcmp.eq.s32.totalorder %v10579_v49, 1  ;;  %v13028_v4 = vld [vmem:[#allocation166_spill] sm:$0xff] }
 0x389   : > { %v4114_v54 = vmax.f32 %v4113_v53, %v3937_v12  ;;  %v3938_v50 = vsel %vm3876_vm2, %v13027_v30, -1e+09  ;;  %vm3878_vm4 = vcmp.eq.s32.totalorder %v10537_v7, 1  ;;  %vm3889_vm5 = vcmp.eq.s32.totalorder %v10605_v32, 1  ;;  %v13030_v23 = vld [vmem:[#allocation58_spill] sm:$0xff]  ;;  %v13031_v6 = vld [vmem:[#allocation151_spill] sm:$0xff] }
 0x38a   : > { %v4151_v63 = vmax.f32 %v4150_v43, %v3938_v50  ;;  %v3979_v16 = vsel %vm3887_vm3, %v12958_v5, -1e+09  ;;  %v3980_v1 = vsel %vm3887_vm3, %v13028_v4, -1e+09  ;;  %v3981_v22 = vsel %vm3887_vm3, %v13029_v11, -1e+09 }
 0x38b   : > { %v4041_v41 = vmax.f32 %v4040_v35, %v3979_v16  ;;  %v4078_v46 = vmax.f32 %v4077_v59, %v3980_v1  ;;  %v4115_v12 = vmax.f32 %v4114_v54, %v3981_v22  ;;  %v3982_v53 = vsel %vm3887_vm3, %v13030_v23, -1e+09  ;;  %v13032_v50 = vld [vmem:[#allocation163_spill] sm:$0xff]  ;;  %v13034_v59 = vld [vmem:[#allocation164_spill] sm:$0xff] }
 0x38c   : > { %v4152_v43 = vmax.f32 %v4151_v63, %v3982_v53  ;;  %v3943_v49 = vsel %vm3878_vm4, %v13031_v6, -1e+09  ;;  %v3944_v5 = vsel %vm3878_vm4, %v13032_v50, -1e+09  ;;  %v3945_v11 = vsel %vm3878_vm4, %v13033_v44, -1e+09  ;;  %v10759_v63 = vpop.permute.xlu1 %3853 }
 0x38d   : > { %v4042_v35 = vmax.f32 %v4041_v41, %v3943_v49  ;;  %v4079_v1 = vmax.f32 %v4078_v46, %v3944_v5  ;;  %v4116_v22 = vmax.f32 %v4115_v12, %v3945_v11  ;;  %v3946_v54 = vsel %vm3878_vm4, %v13034_v59, -1e+09  ;;  %v13038_v32 = vld [vmem:[#allocation75_spill] sm:$0xff] }
 0x38e   : > { %v4153_v16 = vmax.f32 %v4152_v43, %v3946_v54  ;;  %v3987_v53 = vsel %vm3889_vm5, %v12966_v19, -1e+09  ;;  %v3988_v23 = vsel %vm3889_vm5, %v12967_v60, -1e+09  ;;  %v3989_v5 = vsel %vm3889_vm5, %v12968_v42, -1e+09 }
 0x38f   : > { %v4043_v11 = vmax.f32 %v4042_v35, %v3987_v53  ;;  %v4080_v41 = vmax.f32 %v4079_v1, %v3988_v23  ;;  %v4117_v46 = vmax.f32 %v4116_v22, %v3989_v5  ;;  %v3990_v7 = vsel %vm3889_vm5, %v12969_v57, -1e+09  ;;  %v13035_v43 = vld [vmem:[#allocation172_spill] sm:$0xff]  ;;  %v13036_v54 = vld [vmem:[#allocation187_spill] sm:$0xff]  ;;  %v13037_v19 = vld [vmem:[#allocation173_spill] sm:$0xff]  ;;  %v10779_v35 = vpop.permute.xlu0 %4197 }
 0x390   : > { %v4154_v12 = vmax.f32 %v4153_v16, %v3990_v7  ;;  %vm3880_vm6 = vcmp.eq.s32.totalorder %v10568_v24, 1  ;;  %vm3891_vm7 = vcmp.eq.s32.totalorder %v10629_v39, 1  ;;  %vm3882_vm8 = vcmp.eq.s32.totalorder %v10591_v20, 1  ;;  %v10791_v57 = vpop.permute.xlu1 %4179  ;;  %v13042_v4 = vld [vmem:[#allocation143_spill] sm:$0xff] }
 0x391   : > { %v3951_v49 = vsel %vm3880_vm6, %v13035_v43, -1e+09  ;;  %v3952_v60 = vsel %vm3880_vm6, %v13036_v54, -1e+09  ;;  %v3953_v42 = vsel %vm3880_vm6, %v13037_v19, -1e+09 }
 0x392   : > { %v4044_v23 = vmax.f32 %v4043_v11, %v3951_v49  ;;  %v4081_v1 = vmax.f32 %v4080_v41, %v3952_v60  ;;  %v4118_v22 = vmax.f32 %v4117_v46, %v3953_v42  ;;  %v3954_v53 = vsel %vm3880_vm6, %v13038_v32, -1e+09  ;;  %v13039_v41 = vld [vmem:[#allocation125_spill] sm:$0xff]  ;;  %v13040_v49 = vld [vmem:[#allocation124_spill] sm:$0xff] }
 0x393   : > { %v4155_v16 = vmax.f32 %v4154_v12, %v3954_v53  ;;  %v3995_v24 = vsel %vm3891_vm7, %v12970_v3, -1e+09  ;;  %v3996_v5 = vsel %vm3891_vm7, %v12971_v48, -1e+09  ;;  %v3997_v7 = vsel %vm3891_vm7, %v12972_v25, -1e+09 }
 0x394   : > { %v4045_v11 = vmax.f32 %v4044_v23, %v3995_v24  ;;  %v4082_v60 = vmax.f32 %v4081_v1, %v3996_v5  ;;  %v4119_v42 = vmax.f32 %v4118_v22, %v3997_v7  ;;  %v3998_v46 = vsel %vm3891_vm7, %v13039_v41, -1e+09  ;;  %v13041_v3 = vld [vmem:[#allocation198_spill] sm:$0xff]  ;;  %v13043_v24 = vld [vmem:[#allocation199_spill] sm:$0xff]  ;;  %v10811_v5 = vpop.permute.xlu0 %4203  ;;  %v13045_v41 = vld [vmem:[#allocation181_spill] sm:$0xff] }
 0x395   : > { %v4156_v12 = vmax.f32 %v4155_v16, %v3998_v46  ;;  %v3959_v53 = vsel %vm3882_vm8, %v13040_v49, -1e+09  ;;  %v3960_v48 = vsel %vm3882_vm8, %v13041_v3, -1e+09  ;;  %v3961_v25 = vsel %vm3882_vm8, %v13042_v4, -1e+09 }
 0x396   : > { %v4046_v23 = vmax.f32 %v4045_v11, %v3959_v53  ;;  %v4083_v1 = vmax.f32 %v4082_v60, %v3960_v48  ;;  %v4120_v22 = vmax.f32 %v4119_v42, %v3961_v25  ;;  %v3962_v39 = vsel %vm3882_vm8, %v13043_v24, -1e+09  ;;  %v13044_v7 = vld [vmem:[#allocation179_spill] sm:$0xff]  ;;  %v10817_v42 = vpop.permute.xlu1 %4182  ;;  %v13048_v24 = vld [vmem:[#allocation153_spill] sm:$0xff] }
 0x397   : > { %v4157_v16 = vmax.f32 %v4156_v12, %v3962_v39  ;;  %vm3893_vm9 = vcmp.eq.s32.totalorder %v10663_v62, 1  ;;  %vm3884_vm10 = vcmp.eq.s32.totalorder %v10616_v52, 1  ;;  %vm4271_vm11 = vcmp.eq.s32.totalorder %v10687_v14, 1  ;;  %v13046_v12 = vld [vmem:[#allocation146_spill] sm:$0xff]  ;;  %v13047_v39 = vld [vmem:[#allocation56_spill] sm:$0xff] }
 0x398   : > { %v4003_v46 = vsel %vm3893_vm9, %v13044_v7, -1e+09  ;;  %v4004_v4 = vsel %vm3893_vm9, %v13045_v41, -1e+09  ;;  %v4005_v48 = vsel %vm3893_vm9, %v12976_v51, -1e+09  ;;  %v10846_v52 = vpop.permute.xlu0 %4209 }
 0x399   : > { %v4047_v25 = vmax.f32 %v4046_v23, %v4003_v46  ;;  %v4084_v11 = vmax.f32 %v4083_v1, %v4004_v4  ;;  %v4121_v60 = vmax.f32 %v4120_v22, %v4005_v48  ;;  %v4006_v20 = vsel %vm3893_vm9, %v12977_v55, -1e+09  ;;  %v13049_v22 = vld [vmem:[#allocation80_spill] sm:$0xff] }
 0x39a   : > { %v4158_v62 = vmax.f32 %v4157_v16, %v4006_v20  ;;  %v3967_v53 = vsel %vm3884_vm10, %v13046_v12, -1e+09  ;;  %v3968_v7 = vsel %vm3884_vm10, %v13047_v39, -1e+09  ;;  %v3969_v51 = vsel %vm3884_vm10, %v13048_v24, -1e+09 }
 0x39b   : > { %v4048_v23 = vmax.f32 %v4047_v25, %v3967_v53  ;;  %v4085_v4 = vmax.f32 %v4084_v11, %v3968_v7  ;;  %v4122_v1 = vmax.f32 %v4121_v60, %v3969_v51  ;;  %v3970_v46 = vsel %vm3884_vm10, %v13049_v22, -1e+09  ;;  %v13051_v25 = vld [vmem:[#allocation161_spill] sm:$0xff]  ;;  %v13052_v11 = vld [vmem:[#allocation79_spill] sm:$0xff] }
 0x39c   : > { %v4159_v16 = vmax.f32 %v4158_v62, %v3970_v46  ;;  %v4303_v48 = vsel %vm4271_vm11, %v12986_v15, -1e+09  ;;  %v4304_v20 = vsel %vm4271_vm11, %v12987_v2, -1e+09  ;;  %v4305_v55 = vsel %vm4271_vm11, %v12988_v31, -1e+09 }
 0x39d   : > { %v4306_v51 = vsel %vm4271_vm11, %v12990_v58, -1e+09  ;;  %vm3886_vm12 = vcmp.eq.s32.totalorder %v10642_v28, 1  ;;  %vm4274_vm13 = vcmp.eq.s32.totalorder %v10719_v56, 1  ;;  %vm3888_vm14 = vcmp.eq.s32.totalorder %v10669_v40, 1  ;;  %v13050_v15 = vld [vmem:[#allocation55_spill] sm:$0xff]  ;;  %v10852_v58 = vpop.permute.xlu1 %4188 }
 0x39e   : > { %v3975_v7 = vsel %vm3886_vm12, %v13050_v15, -1e+09  ;;  %v3976_v2 = vsel %vm3886_vm12, %v13051_v25, -1e+09  ;;  %v3977_v60 = vsel %vm3886_vm12, %v13052_v11, -1e+09 }
 0x39f   : > { %v4049_v62 = vmax.f32 %v4048_v23, %v3975_v7  ;;  %v4086_v31 = vmax.f32 %v4085_v4, %v3976_v2  ;;  %v4123_v53 = vmax.f32 %v4122_v1, %v3977_v60  ;;  %v13053_v46 = vld [vmem:[#allocation50_spill] sm:$0xff]  ;;  %v4315_v41 = vsel %vm4274_vm13, %v13002_v47, -1e+09  ;;  %v13054_v2 = vld [vmem:[#allocation83_spill] sm:$0xff] }
 0x3a0   : > { %v3978_v14 = vsel %vm3886_vm12, %v13053_v46, -1e+09  ;;  %v4316_v15 = vsel %vm4274_vm13, %v13003_v27, -1e+09  ;;  %v4317_v11 = vsel %vm4274_vm13, %v13004_v37, -1e+09  ;;  %v4431_v23 = vmax.f32 %v4303_v48, %v4315_v41 }
 0x3a1   : > { %v4160_v28 = vmax.f32 %v4159_v16, %v3978_v14  ;;  %v4468_v4 = vmax.f32 %v4304_v20, %v4316_v15  ;;  %v4505_v1 = vmax.f32 %v4305_v55, %v4317_v11  ;;  %v4318_v7 = vsel %vm4274_vm13, %v13005_v61, -1e+09  ;;  %v13055_v60 = vld [vmem:[#allocation167_spill] sm:$0xff]  ;;  %v13057_v20 = vld [vmem:[#allocation57_spill] sm:$0xff]  ;;  %v10878_v61 = vpop.permute.xlu0 %4215 }
 0x3a2   : > { %v4542_v16 = vmax.f32 %v4306_v51, %v4318_v7  ;;  %v3983_v47 = vsel %vm3888_vm14, %v13054_v2, -1e+09  ;;  %v3984_v27 = vsel %vm3888_vm14, %v13055_v60, -1e+09  ;;  %v13056_v14 = vld [vmem:[#allocation123_spill] sm:$0xff]  ;;  %vm4276_vm15 = vcmp.eq.s32.totalorder %v10745_v29, 1 }
 0x3a3   : > { %v3985_v37 = vsel %vm3888_vm14, %v13056_v14, -1e+09  ;;  %v4050_v41 = vmax.f32 %v4049_v62, %v3983_v47  ;;  %v4087_v48 = vmax.f32 %v4086_v31, %v3984_v27  ;;  %v3986_v56 = vsel %vm3888_vm14, %v13057_v20, -1e+09  ;;  %v10886_v31 = vpop.permute.xlu1 %4194  ;;  %v13058_v27 = vld [vmem:[#allocation74_spill] sm:$0xff] }
 0x3a4   : > { %v4124_v55 = vmax.f32 %v4123_v53, %v3985_v37  ;;  %v4161_v51 = vmax.f32 %v4160_v28, %v3986_v56  ;;  %vm3890_vm0 = vcmp.eq.s32.totalorder %v10701_v17, 1  ;;  %vm4278_vm1 = vcmp.eq.s32.totalorder %v10779_v35, 1  ;;  %v13059_v37 = vld [vmem:[#allocation175_spill] sm:$0xff]  ;;  %v13060_v56 = vld [vmem:[#allocation174_spill] sm:$0xff] }
 0x3a5   : > { %v4323_v15 = vsel %vm4276_vm15, %v13009_v26, -1e+09  ;;  %v4324_v11 = vsel %vm4276_vm15, %v13010_v38, -1e+09  ;;  %v4325_v62 = vsel %vm4276_vm15, %v13011_v13, -1e+09 }
 0x3a6   : > { %v4432_v53 = vmax.f32 %v4431_v23, %v4323_v15  ;;  %v4469_v40 = vmax.f32 %v4468_v4, %v4324_v11  ;;  %v4506_v7 = vmax.f32 %v4505_v1, %v4325_v62  ;;  %v4326_v47 = vsel %vm4276_vm15, %v13012_v10, -1e+09  ;;  %v13061_v4 = vld [vmem:[#allocation60_spill] sm:$0xff]  ;;  %v13065_v35 = vld [vmem:[#allocation103_spill] sm:$0xff] }
 0x3a7   : > { %v4543_v28 = vmax.f32 %v4542_v16, %v4326_v47  ;;  %v3991_v29 = vsel %vm3890_vm0, %v13058_v27, -1e+09  ;;  %v3992_v26 = vsel %vm3890_vm0, %v13059_v37, -1e+09  ;;  %v3993_v13 = vsel %vm3890_vm0, %v13060_v56, -1e+09 }
 0x3a8   : > { %v4051_v38 = vmax.f32 %v4050_v41, %v3991_v29  ;;  %v4088_v20 = vmax.f32 %v4087_v48, %v3992_v26  ;;  %v4125_v23 = vmax.f32 %v4124_v55, %v3993_v13  ;;  %v3994_v10 = vsel %vm3890_vm0, %v13061_v4, -1e+09  ;;  %v10910_v41 = vpop.permute.xlu0 %4221  ;;  %v13063_v47 = vld [vmem:[#allocation82_spill] sm:$0xff] }
 0x3a9   : > { %v4162_v1 = vmax.f32 %v4161_v51, %v3994_v10  ;;  %v4331_v16 = vsel %vm4278_vm1, %v13016_v34, -1e+09  ;;  %v4332_v15 = vsel %vm4278_vm1, %v13017_v33, -1e+09  ;;  %v4333_v11 = vsel %vm4278_vm1, %v13018_v45, -1e+09  ;;  %v10918_v33 = vpop.permute.xlu1 %4200 }
 0x3aa   : > { %v4433_v48 = vmax.f32 %v4432_v53, %v4331_v16  ;;  %v4470_v55 = vmax.f32 %v4469_v40, %v4332_v15  ;;  %v4507_v62 = vmax.f32 %v4506_v7, %v4333_v11  ;;  %v4334_v17 = vsel %vm4278_vm1, %v13019_v18, -1e+09  ;;  %v13062_v34 = vld [vmem:[#allocation178_spill] sm:$0xff]  ;;  %v13064_v53 = vld [vmem:[#allocation59_spill] sm:$0xff] }
 0x3ab   : > { %v4544_v51 = vmax.f32 %v4543_v28, %v4334_v17  ;;  %vm3892_vm2 = vcmp.eq.s32.totalorder %v10733_v21, 1  ;;  %vm4280_vm3 = vcmp.eq.s32.totalorder %v10811_v5, 1  ;;  %vm3894_vm4 = vcmp.eq.s32.totalorder %v10759_v63, 1  ;;  %v13067_v17 = vld [vmem:[#allocation62_spill] sm:$0xff] }
 0x3ac   : > { %v3999_v45 = vsel %vm3892_vm2, %v13062_v34, -1e+09  ;;  %v4000_v29 = vsel %vm3892_vm2, %v13063_v47, -1e+09  ;;  %v4001_v40 = vsel %vm3892_vm2, %v13064_v53, -1e+09  ;;  %v10944_v15 = vpop.permute.xlu0 %4227 }
 0x3ad   : > { %v10923_v7 = vmax.f32 %v4051_v38, %v3999_v45  ;;  %v10925_v26 = vmax.f32 %v4088_v20, %v4000_v29  ;;  %v10927_v18 = vmax.f32 %v4125_v23, %v4001_v40  ;;  %v4002_v21 = vsel %vm3892_vm2, %v13065_v35, -1e+09  ;;  %v10972_v29 = vpop.permute.xlu1 %4206  ;;  %v13073_v40 = vld [vmem:[#allocation101_spill] sm:$0xff] }
 0x3ae   : > { %v10930_v28 = vmax.f32 %v4162_v1, %v4002_v21  ;;  %v4339_v13 = vsel %vm4280_vm3, %v13024_v36, -1e+09  ;;  %v4340_v10 = vsel %vm4280_vm3, %v13025_v0, -1e+09  ;;  %v4341_v38 = vsel %vm4280_vm3, %v13026_v8, -1e+09 }
 0x3af   : > { %v4434_v20 = vmax.f32 %v4433_v48, %v4339_v13  ;;  %v4471_v16 = vmax.f32 %v4470_v55, %v4340_v10  ;;  %v4508_v23 = vmax.f32 %v4507_v62, %v4341_v38  ;;  %v4342_v1 = vsel %vm4280_vm3, %v13027_v30, -1e+09  ;;  %v13068_v0 = vld [vmem:[#allocation184_spill] sm:$0xff]  ;;  %v13069_v8 = vld [vmem:[#allocation87_spill] sm:$0xff]  ;;  %v13070_v62 = vld [vmem:[#allocation185_spill] sm:$0xff] }
 0x3b0   : > { %13066 = vst [vmem:[#allocation16_spill] sm:$0xff] %v10930_v28  ;;  %v4545_v11 = vmax.f32 %v4544_v51, %v4342_v1  ;;  %v10949_v36 = vsel %vm3894_vm4, %v13067_v17, -1e+09  ;;  %v10954_v45 = vsel %vm3894_vm4, %v13068_v0, -1e+09  ;;  %vm4282_vm5 = vcmp.eq.s32.totalorder %v10846_v52, 1 }
 0x3b1   : > { %v10959_v48 = vsel %vm3894_vm4, %v13069_v8, -1e+09  ;;  %v10970_v51 = vsel %vm3894_vm4, %v13070_v62, -1e+09  ;;  %vm4272_vm6 = vcmp.eq.s32.totalorder %v10791_v57, 1  ;;  %vm4284_vm7 = vcmp.eq.s32.totalorder %v10878_v61, 1 }
 0x3b2   : > { %13071 = vst [vmem:[#allocation15_spill] sm:$0xff] %v10970_v51  ;;  %v4347_v21 = vsel %vm4282_vm5, %v13031_v6, -1e+09  ;;  %v4348_v13 = vsel %vm4282_vm5, %v13032_v50, -1e+09  ;;  %v13072_v30 = vld [vmem:[#allocation99_spill] sm:$0xff]  ;;  %v10992_v50 = vpop.permute.xlu0 %4233 }
 0x3b3   : > { %v4349_v10 = vsel %vm4282_vm5, %v13033_v44, -1e+09  ;;  %v4435_v63 = vmax.f32 %v4434_v20, %v4347_v21  ;;  %v4472_v38 = vmax.f32 %v4471_v16, %v4348_v13  ;;  %v4350_v55 = vsel %vm4282_vm5, %v13034_v59, -1e+09  ;;  %v13074_v28 = vld [vmem:[#allocation100_spill] sm:$0xff] }
 0x3b4   : > { %v4509_v1 = vmax.f32 %v4508_v23, %v4349_v10  ;;  %v4546_v5 = vmax.f32 %v4545_v11, %v4350_v55  ;;  %v4307_v52 = vsel %vm4272_vm6, %v13072_v30, -1e+09  ;;  %v4308_v51 = vsel %vm4272_vm6, %v13073_v40, -1e+09  ;;  %v13075_v23 = vld [vmem:[#allocation102_spill] sm:$0xff]  ;;  %v11006_v40 = vpop.permute.xlu1 %4212  ;;  %v13077_v10 = vld [vmem:[#allocation105_spill] sm:$0xff] }
 0x3b5   : > { %v4309_v6 = vsel %vm4272_vm6, %v13074_v28, -1e+09  ;;  %v4436_v44 = vmax.f32 %v4435_v63, %v4307_v52  ;;  %v4473_v20 = vmax.f32 %v4472_v38, %v4308_v51  ;;  %v4310_v59 = vsel %vm4272_vm6, %v13075_v23, -1e+09 }
 0x3b6   : > { %v4510_v16 = vmax.f32 %v4509_v1, %v4309_v6  ;;  %v4547_v11 = vmax.f32 %v4546_v5, %v4310_v59  ;;  %v4355_v30 = vsel %vm4284_vm7, %v13035_v43, -1e+09  ;;  %v4356_v55 = vsel %vm4284_vm7, %v13036_v54, -1e+09  ;;  %v13076_v54 = vld [vmem:[#allocation106_spill] sm:$0xff]  ;;  %v13078_v6 = vld [vmem:[#allocation107_spill] sm:$0xff]  ;;  %v11018_v61 = vpop.permute.xlu0 %4239 }
 0x3b7   : > { %v4357_v28 = vsel %vm4284_vm7, %v13037_v19, -1e+09  ;;  %v4437_v51 = vmax.f32 %v4436_v44, %v4355_v30  ;;  %v4474_v21 = vmax.f32 %v4473_v20, %v4356_v55  ;;  %v4358_v57 = vsel %vm4284_vm7, %v13038_v32, -1e+09  ;;  %v13079_v20 = vld [vmem:[#allocation143_spill] sm:$0xff] }
 0x3b8   : > { %v4511_v13 = vmax.f32 %v4510_v16, %v4357_v28  ;;  %v4548_v5 = vmax.f32 %v4547_v11, %v4358_v57  ;;  %vm4273_vm8 = vcmp.eq.s32.totalorder %v10817_v42, 1  ;;  %vm4286_vm9 = vcmp.eq.s32.totalorder %v10910_v41, 1  ;;  %v13080_v30 = vld [vmem:[#allocation199_spill] sm:$0xff]  ;;  %v11032_v28 = vpop.permute.xlu1 %4218  ;;  %v13084_v41 = vld [vmem:[#allocation117_spill] sm:$0xff] }
 0x3b9   : > { %vm4275_vm10 = vcmp.eq.s32.totalorder %v10852_v58, 1  ;;  %v4311_v43 = vsel %vm4273_vm8, %v12994_v9, -1e+09  ;;  %v4312_v19 = vsel %vm4273_vm8, %v13076_v54, -1e+09  ;;  %v13083_v57 = vld [vmem:[#allocation115_spill] sm:$0xff] }
 0x3ba   : > { %v4313_v63 = vsel %vm4273_vm8, %v13077_v10, -1e+09  ;;  %v4438_v38 = vmax.f32 %v4437_v51, %v4311_v43  ;;  %v4475_v1 = vmax.f32 %v4474_v21, %v4312_v19  ;;  %v4314_v44 = vsel %vm4273_vm8, %v13078_v6, -1e+09  ;;  %v13081_v21 = vld [vmem:[#allocation114_spill] sm:$0xff]  ;;  %v11052_v6 = vpop.permute.xlu0 %4245 }
 0x3bb   : > { %v4512_v52 = vmax.f32 %v4511_v13, %v4313_v63  ;;  %v4549_v32 = vmax.f32 %v4548_v5, %v4314_v44  ;;  %v4363_v42 = vsel %vm4286_vm9, %v13040_v49, -1e+09  ;;  %v4364_v9 = vsel %vm4286_vm9, %v13041_v3, -1e+09  ;;  %v13082_v13 = vld [vmem:[#allocation116_spill] sm:$0xff] }
 0x3bc   : > { %v4365_v16 = vsel %vm4286_vm9, %v13079_v20, -1e+09  ;;  %v4439_v23 = vmax.f32 %v4438_v38, %v4363_v42  ;;  %v4476_v59 = vmax.f32 %v4475_v1, %v4364_v9  ;;  %v4366_v55 = vsel %vm4286_vm9, %v13080_v30, -1e+09  ;;  %v13085_v20 = vld [vmem:[#allocation126_spill] sm:$0xff] }
 0x3bd   : > { %v4513_v11 = vmax.f32 %v4512_v52, %v4365_v16  ;;  %v4550_v51 = vmax.f32 %v4549_v32, %v4366_v55  ;;  %v4319_v49 = vsel %vm4275_vm10, %v13081_v21, -1e+09  ;;  %v4320_v3 = vsel %vm4275_vm10, %v13082_v13, -1e+09  ;;  %v13086_v16 = vld [vmem:[#allocation128_spill] sm:$0xff]  ;;  %v13088_v55 = vld [vmem:[#allocation93_spill] sm:$0xff] }
 0x3be   : > { %v4321_v5 = vsel %vm4275_vm10, %v13083_v57, -1e+09  ;;  %v4440_v43 = vmax.f32 %v4439_v23, %v4319_v49  ;;  %v4477_v54 = vmax.f32 %v4476_v59, %v4320_v3  ;;  %v4322_v10 = vsel %vm4275_vm10, %v13084_v41, -1e+09  ;;  %v13087_v23 = vld [vmem:[#allocation127_spill] sm:$0xff]  ;;  %v4252_v41 = vpop.permute.xlu0 %4251 }
 0x3bf   : > { %v4514_v19 = vmax.f32 %v4513_v11, %v4321_v5  ;;  %v4551_v63 = vmax.f32 %v4550_v51, %v4322_v10  ;;  %vm4288_vm11 = vcmp.eq.s32.totalorder %v10944_v15, 1  ;;  %vm4277_vm12 = vcmp.eq.s32.totalorder %v10886_v31, 1  ;;  %v13089_v21 = vld [vmem:[#allocation55_spill] sm:$0xff] }
 0x3c0   : > { %vm4290_vm13 = vcmp.eq.s32.totalorder %v10992_v50, 1  ;;  %v4371_v38 = vsel %vm4288_vm11, %v13046_v12, -1e+09  ;;  %v4372_v1 = vsel %vm4288_vm11, %v13047_v39, -1e+09  ;;  %v11064_v39 = vpop.permute.xlu1 %4224  ;;  %v13090_v3 = vld [vmem:[#allocation79_spill] sm:$0xff] }
 0x3c1   : > { %v4373_v52 = vsel %vm4288_vm11, %v13048_v24, -1e+09  ;;  %v4441_v44 = vmax.f32 %v4440_v43, %v4371_v38  ;;  %v4478_v32 = vmax.f32 %v4477_v54, %v4372_v1  ;;  %v4374_v58 = vsel %vm4288_vm11, %v13049_v22, -1e+09  ;;  %v13093_v1 = vld [vmem:[#allocation138_spill] sm:$0xff] }
 0x3c2   : > { %v4515_v42 = vmax.f32 %v4514_v19, %v4373_v52  ;;  %v4552_v9 = vmax.f32 %v4551_v63, %v4374_v58  ;;  %v4327_v15 = vsel %vm4277_vm12, %v13085_v20, -1e+09  ;;  %v4328_v12 = vsel %vm4277_vm12, %v13086_v16, -1e+09  ;;  %v13092_v63 = vld [vmem:[#allocation45_spill] sm:$0xff]  ;;  %v13094_v58 = vld [vmem:[#allocation98_spill] sm:$0xff] }
 0x3c3   : > { %v4329_v24 = vsel %vm4277_vm12, %v13087_v23, -1e+09  ;;  %v4442_v59 = vmax.f32 %v4441_v44, %v4327_v15  ;;  %v4479_v11 = vmax.f32 %v4478_v32, %v4328_v12  ;;  %v4330_v22 = vsel %vm4277_vm12, %v13088_v55, -1e+09  ;;  %v13097_v55 = vld [vmem:[#allocation149_spill] sm:$0xff] }
 0x3c4   : > { %v4516_v30 = vmax.f32 %v4515_v42, %v4329_v24  ;;  %v4553_v51 = vmax.f32 %v4552_v9, %v4330_v22  ;;  %v4379_v49 = vsel %vm4290_vm13, %v13089_v21, -1e+09  ;;  %v4380_v13 = vsel %vm4290_vm13, %v13051_v25, -1e+09  ;;  %v13091_v25 = vld [vmem:[#allocation137_spill] sm:$0xff]  ;;  %v13098_v22 = vld [vmem:[#allocation148_spill] sm:$0xff] }
 0x3c5   : > { %v4381_v57 = vsel %vm4290_vm13, %v13090_v3, -1e+09  ;;  %v4443_v5 = vmax.f32 %v4442_v59, %v4379_v49  ;;  %v4480_v43 = vmax.f32 %v4479_v11, %v4380_v13  ;;  %v4382_v31 = vsel %vm4290_vm13, %v13053_v46, -1e+09  ;;  %v11088_v46 = vpop.permute.xlu1 %4230  ;;  %v13095_v24 = vld [vmem:[#allocation57_spill] sm:$0xff]  ;;  %v13099_v13 = vld [vmem:[#allocation150_spill] sm:$0xff]  ;;  %v4258_v3 = vpop.permute.xlu0 %4257 }
 0x3c6   : > { %v4517_v54 = vmax.f32 %v4516_v30, %v4381_v57  ;;  %v4554_v19 = vmax.f32 %v4553_v51, %v4382_v31  ;;  %vm4279_vm14 = vcmp.eq.s32.totalorder %v10918_v33, 1  ;;  %vm4292_vm15 = vcmp.eq.s32.totalorder %v11018_v61, 1  ;;  %v13096_v30 = vld [vmem:[#allocation147_spill] sm:$0xff] }
 0x3c7   : > { %vm4281_vm0 = vcmp.eq.s32.totalorder %v10972_v29, 1  ;;  %v4335_v10 = vsel %vm4279_vm14, %v13091_v25, -1e+09  ;;  %v4336_v38 = vsel %vm4279_vm14, %v13092_v63, -1e+09  ;;  %vm4294_vm1 = vcmp.eq.s32.totalorder %v11052_v6, 1 }
 0x3c8   : > { %v4337_v52 = vsel %vm4279_vm14, %v13093_v1, -1e+09  ;;  %v4444_v44 = vmax.f32 %v4443_v5, %v4335_v10  ;;  %v4481_v32 = vmax.f32 %v4480_v43, %v4336_v38  ;;  %v4338_v50 = vsel %vm4279_vm14, %v13094_v58, -1e+09  ;;  %v13100_v38 = vld [vmem:[#allocation133_spill] sm:$0xff]  ;;  %v13101_v1 = vld [vmem:[#allocation170_spill] sm:$0xff] }
 0x3c9   : > { %v4518_v42 = vmax.f32 %v4517_v54, %v4337_v52  ;;  %v4555_v9 = vmax.f32 %v4554_v19, %v4338_v50  ;;  %v4387_v33 = vsel %vm4292_vm15, %v13054_v2, -1e+09  ;;  %v4388_v20 = vsel %vm4292_vm15, %v13055_v60, -1e+09  ;;  %v11119_v31 = vpop.permute.xlu1 %4236  ;;  %v13102_v52 = vld [vmem:[#allocation134_spill] sm:$0xff] }
 0x3ca   : > { %v4389_v15 = vsel %vm4292_vm15, %v13056_v14, -1e+09  ;;  %v4445_v16 = vmax.f32 %v4444_v44, %v4387_v33  ;;  %v4482_v12 = vmax.f32 %v4481_v32, %v4388_v20  ;;  %v4390_v59 = vsel %vm4292_vm15, %v13095_v24, -1e+09  ;;  %v4261_v20 = vpop.permute.xlu0 %4260 }
 0x3cb   : > { %v4519_v23 = vmax.f32 %v4518_v42, %v4389_v15  ;;  %v4556_v11 = vmax.f32 %v4555_v9, %v4390_v59  ;;  %v4343_v2 = vsel %vm4281_vm0, %v13096_v30, -1e+09  ;;  %v4344_v60 = vsel %vm4281_vm0, %v13097_v55, -1e+09  ;;  %v13103_v42 = vld [vmem:[#allocation171_spill] sm:$0xff] }
 0x3cc   : > { %v4345_v14 = vsel %vm4281_vm0, %v13098_v22, -1e+09  ;;  %v4446_v51 = vmax.f32 %v4445_v16, %v4343_v2  ;;  %v4483_v21 = vmax.f32 %v4482_v12, %v4344_v60  ;;  %v4346_v61 = vsel %vm4281_vm0, %v13099_v13, -1e+09  ;;  %v13105_v59 = vld [vmem:[#allocation51_spill] sm:$0xff]  ;;  %v13107_v22 = vld [vmem:[#allocation76_spill] sm:$0xff] }
 0x3cd   : > { %v4520_v49 = vmax.f32 %v4519_v23, %v4345_v14  ;;  %v4557_v57 = vmax.f32 %v4556_v11, %v4346_v61  ;;  %vm4283_vm2 = vcmp.eq.s32.totalorder %v11006_v40, 1  ;;  %vm4296_vm3 = vcmp.eq.s32.totalorder %v4252_v41, 1  ;;  %v13104_v40 = vld [vmem:[#allocation139_spill] sm:$0xff] }
 0x3ce   : > { %v4395_v5 = vsel %vm4294_vm1, %v13058_v27, -1e+09  ;;  %v4396_v43 = vsel %vm4294_vm1, %v13059_v37, -1e+09  ;;  %v4397_v54 = vsel %vm4294_vm1, %v13060_v56, -1e+09 }
 0x3cf   : > { %v4447_v19 = vmax.f32 %v4446_v51, %v4395_v5  ;;  %v4484_v25 = vmax.f32 %v4483_v21, %v4396_v43  ;;  %v4521_v10 = vmax.f32 %v4520_v49, %v4397_v54  ;;  %v4398_v29 = vsel %vm4294_vm1, %v13061_v4, -1e+09  ;;  %v13108_v43 = vld [vmem:[#allocation145_spill] sm:$0xff] }
 0x3d0   : > { %v4558_v63 = vmax.f32 %v4557_v57, %v4398_v29  ;;  %v4351_v6 = vsel %vm4283_vm2, %v13100_v38, -1e+09  ;;  %v4352_v27 = vsel %vm4283_vm2, %v13101_v1, -1e+09  ;;  %v4353_v37 = vsel %vm4283_vm2, %v13102_v52, -1e+09  ;;  %v4264_v57 = vpop.permute.xlu0 %4263 }
 0x3d1   : > { %v4448_v56 = vmax.f32 %v4447_v19, %v4351_v6  ;;  %v4485_v44 = vmax.f32 %v4484_v25, %v4352_v27  ;;  %v4522_v32 = vmax.f32 %v4521_v10, %v4353_v37  ;;  %v4354_v4 = vsel %vm4283_vm2, %v13103_v42, -1e+09  ;;  %v13109_v19 = vld [vmem:[#allocation77_spill] sm:$0xff]  ;;  %v13113_v27 = vld [vmem:[#allocation72_spill] sm:$0xff] }
 0x3d2   : > { %v4559_v58 = vmax.f32 %v4558_v63, %v4354_v4  ;;  %v4403_v50 = vsel %vm4296_vm3, %v13062_v34, -1e+09  ;;  %v4404_v9 = vsel %vm4296_vm3, %v13063_v47, -1e+09  ;;  %v4405_v33 = vsel %vm4296_vm3, %v13064_v53, -1e+09  ;;  %v11144_v34 = vpop.permute.xlu1 %4242 }
 0x3d3   : > { %v4449_v15 = vmax.f32 %v4448_v56, %v4403_v50  ;;  %v4486_v16 = vmax.f32 %v4485_v44, %v4404_v9  ;;  %v4523_v12 = vmax.f32 %v4522_v32, %v4405_v33  ;;  %v4406_v23 = vsel %vm4296_vm3, %v13065_v35, -1e+09  ;;  %v13106_v53 = vld [vmem:[#allocation191_spill] sm:$0xff]  ;;  %v13111_v63 = vld [vmem:[#allocation130_spill] sm:$0xff]  ;;  %v13112_v6 = vld [vmem:[#allocation61_spill] sm:$0xff] }
 0x3d4   : > { %v4560_v24 = vmax.f32 %v4559_v58, %v4406_v23  ;;  %vm4285_vm4 = vcmp.eq.s32.totalorder %v11032_v28, 1  ;;  %vm4298_vm5 = vcmp.eq.s32.totalorder %v4258_v3, 1  ;;  %vm4287_vm6 = vcmp.eq.s32.totalorder %v11064_v39, 1  ;;  %v13114_v37 = vld [vmem:[#allocation84_spill] sm:$0xff]  ;;  %v13115_v4 = vld [vmem:[#allocation186_spill] sm:$0xff] }
 0x3d5   : > { %v4359_v47 = vsel %vm4285_vm4, %v13104_v40, -1e+09  ;;  %v4360_v11 = vsel %vm4285_vm4, %v13105_v59, -1e+09  ;;  %v4361_v30 = vsel %vm4285_vm4, %v13106_v53, -1e+09  ;;  %v4267_v59 = vpop.permute.xlu0 %4266 }
 0x3d6   : > { %v4450_v2 = vmax.f32 %v4449_v15, %v4359_v47  ;;  %v4487_v55 = vmax.f32 %v4486_v16, %v4360_v11  ;;  %v4524_v60 = vmax.f32 %v4523_v12, %v4361_v30  ;;  %v4362_v41 = vsel %vm4285_vm4, %v13107_v22, -1e+09  ;;  %v11170_v3 = vpop.permute.xlu1 %4248  ;;  %v13116_v50 = vld [vmem:[#allocation154_spill] sm:$0xff]  ;;  %v13118_v15 = vld [vmem:[#allocation155_spill] sm:$0xff]  ;;  %v13119_v40 = vld [vmem:[#allocation157_spill] sm:$0xff] }
 0x3d7   : > { %v4561_v35 = vmax.f32 %v4560_v24, %v4362_v41  ;;  %v4411_v28 = vsel %vm4298_vm5, %v13067_v17, -1e+09  ;;  %v4412_v14 = vsel %vm4298_vm5, %v13068_v0, -1e+09  ;;  %v4413_v51 = vsel %vm4298_vm5, %v13069_v8, -1e+09 }
 0x3d8   : > { %v4451_v21 = vmax.f32 %v4450_v2, %v4411_v28  ;;  %v4488_v49 = vmax.f32 %v4487_v55, %v4412_v14  ;;  %v4525_v13 = vmax.f32 %v4524_v60, %v4413_v51  ;;  %v4414_v61 = vsel %vm4298_vm5, %v13070_v62, -1e+09  ;;  %v13110_v0 = vld [vmem:[#allocation53_spill] sm:$0xff]  ;;  %v13117_v33 = vld [vmem:[#allocation118_spill] sm:$0xff]  ;;  %v13120_v53 = vld [vmem:[#allocation188_spill] sm:$0xff] }
 0x3d9   : > { %v4562_v5 = vmax.f32 %v4561_v35, %v4414_v61  ;;  %v4367_v54 = vsel %vm4287_vm6, %v13108_v43, -1e+09  ;;  %v4368_v17 = vsel %vm4287_vm6, %v13109_v19, -1e+09  ;;  %v4369_v8 = vsel %vm4287_vm6, %v13110_v0, -1e+09 }
 0x3da   : > { %v4452_v25 = vmax.f32 %v4451_v21, %v4367_v54  ;;  %v4489_v10 = vmax.f32 %v4488_v49, %v4368_v17  ;;  %v4526_v29 = vmax.f32 %v4525_v13, %v4369_v8  ;;  %v4370_v62 = vsel %vm4287_vm6, %v13111_v63, -1e+09  ;;  %v13121_v2 = vld [vmem:[#allocation89_spill] sm:$0xff]  ;;  %v13122_v60 = vld [vmem:[#allocation64_spill] sm:$0xff]  ;;  %v11195_v41 = vpop.permute.xlu1 %4254  ;;  %v13125_v61 = vld [vmem:[#allocation166_spill] sm:$0xff] }
 0x3db   : > { %v4563_v38 = vmax.f32 %v4562_v5, %v4370_v62  ;;  %vm4299_vm7 = vcmp.eq.s32.totalorder %v4261_v20, 1  ;;  %vm4289_vm8 = vcmp.eq.s32.totalorder %v11088_v46, 1  ;;  %vm4300_vm9 = vcmp.eq.s32.totalorder %v4264_v57, 1  ;;  %v13123_v51 = vld [vmem:[#allocation192_spill] sm:$0xff]  ;;  %v13124_v49 = vld [vmem:[#allocation73_spill] sm:$0xff]  ;;  %v13127_v8 = vld [vmem:[#allocation58_spill] sm:$0xff] }
 0x3dc   : > { %v4415_v1 = vsel %vm4299_vm7, %v13112_v6, -1e+09  ;;  %v4416_v52 = vsel %vm4299_vm7, %v13113_v27, -1e+09  ;;  %v4417_v56 = vsel %vm4299_vm7, %v13114_v37, -1e+09 }
 0x3dd   : > { %v4453_v44 = vmax.f32 %v4452_v25, %v4415_v1  ;;  %v4490_v32 = vmax.f32 %v4489_v10, %v4416_v52  ;;  %v4527_v42 = vmax.f32 %v4526_v29, %v4417_v56  ;;  %v4418_v58 = vsel %vm4299_vm7, %v13115_v4, -1e+09  ;;  %v13126_v43 = vld [vmem:[#allocation165_spill] sm:$0xff]  ;;  %v13128_v57 = vld [vmem:[#allocation91_spill] sm:$0xff] }
 0x3de   : > { %v4564_v39 = vmax.f32 %v4563_v38, %v4418_v58  ;;  %v4375_v9 = vsel %vm4289_vm8, %v13116_v50, -1e+09  ;;  %v4376_v20 = vsel %vm4289_vm8, %v13117_v33, -1e+09  ;;  %v4377_v16 = vsel %vm4289_vm8, %v13118_v15, -1e+09  ;;  %v3857_v58 = vpop.permute.xlu1 %3856 }
 0x3df   : > { %v4454_v12 = vmax.f32 %v4453_v44, %v4375_v9  ;;  %v4491_v23 = vmax.f32 %v4490_v32, %v4376_v20  ;;  %v4528_v24 = vmax.f32 %v4527_v42, %v4377_v16  ;;  %v4378_v47 = vsel %vm4289_vm8, %v13119_v40, -1e+09  ;;  %v13129_v63 = vld [vmem:[#allocation47_spill] sm:$0xff]  ;;  %v13130_v62 = vld [vmem:[#allocation141_spill] sm:$0xff]  ;;  %v13131_v44 = vld [vmem:[#allocation152_spill] sm:$0xff]  ;;  %v4270_v42 = vpop.permute.xlu0 %4269 }
 0x3e0   : > { %v4565_v11 = vmax.f32 %v4564_v39, %v4378_v47  ;;  %v4419_v30 = vsel %vm4300_vm9, %v13120_v53, -1e+09  ;;  %v4420_v55 = vsel %vm4300_vm9, %v13121_v2, -1e+09  ;;  %v4421_v22 = vsel %vm4300_vm9, %v13122_v60, -1e+09 }
 0x3e1   : > { %v4455_v35 = vmax.f32 %v4454_v12, %v4419_v30  ;;  %v4492_v28 = vmax.f32 %v4491_v23, %v4420_v55  ;;  %v4529_v14 = vmax.f32 %v4528_v24, %v4421_v22  ;;  %v4422_v46 = vsel %vm4300_vm9, %v13123_v51, -1e+09  ;;  %v13132_v50 = vld [vmem:[#allocation81_spill] sm:$0xff]  ;;  %v13133_v33 = vld [vmem:[#allocation168_spill] sm:$0xff] }
 0x3e2   : > { %v4566_v21 = vmax.f32 %v4565_v11, %v4422_v46  ;;  %vm4291_vm10 = vcmp.eq.s32.totalorder %v11119_v31, 1  ;;  %vm4301_vm11 = vcmp.eq.s32.totalorder %v4267_v59, 1  ;;  %vm4293_vm12 = vcmp.eq.s32.totalorder %v11144_v34, 1  ;;  %v13134_v15 = vld [vmem:[#allocation140_spill] sm:$0xff]  ;;  %v13135_v40 = vld [vmem:[#allocation49_spill] sm:$0xff] }
 0x3e3   : > { %v4383_v13 = vsel %vm4291_vm10, %v13124_v49, -1e+09  ;;  %v4384_v5 = vsel %vm4291_vm10, %v13125_v61, -1e+09  ;;  %v4385_v54 = vsel %vm4291_vm10, %v13126_v43, -1e+09 }
 0x3e4   : > { %v4456_v19 = vmax.f32 %v4455_v35, %v4383_v13  ;;  %v4493_v17 = vmax.f32 %v4492_v28, %v4384_v5  ;;  %v4530_v0 = vmax.f32 %v4529_v14, %v4385_v54  ;;  %v4386_v25 = vsel %vm4291_vm10, %v13127_v8, -1e+09  ;;  %v13136_v11 = vld [vmem:[#allocation197_spill] sm:$0xff]  ;;  %v13138_v22 = vld [vmem:[#allocation68_spill] sm:$0xff]  ;;  %v13141_v61 = vld [vmem:[#allocation135_spill] sm:$0xff] }
 0x3e5   : > { %v4567_v10 = vmax.f32 %v4566_v21, %v4386_v25  ;;  %v4423_v29 = vsel %vm4301_vm11, %v13128_v57, -1e+09  ;;  %v4424_v31 = vsel %vm4301_vm11, %v13129_v63, -1e+09  ;;  %v4425_v38 = vsel %vm4301_vm11, %v13130_v62, -1e+09 }
 0x3e6   : > { %v4457_v1 = vmax.f32 %v4456_v19, %v4423_v29  ;;  %v4494_v52 = vmax.f32 %v4493_v17, %v4424_v31  ;;  %v4531_v56 = vmax.f32 %v4530_v0, %v4425_v38  ;;  %v4426_v32 = vsel %vm4301_vm11, %v13131_v44, -1e+09  ;;  %v13139_v28 = vld [vmem:[#allocation144_spill] sm:$0xff]  ;;  %v13142_v54 = vld [vmem:[#allocation85_spill] sm:$0xff] }
 0x3e7   : > { %v4568_v39 = vmax.f32 %v4567_v10, %v4426_v32  ;;  %v4391_v9 = vsel %vm4293_vm12, %v13132_v50, -1e+09  ;;  %v4392_v20 = vsel %vm4293_vm12, %v13133_v33, -1e+09  ;;  %v4393_v16 = vsel %vm4293_vm12, %v13134_v15, -1e+09  ;;  %v3860_v10 = vpop.permute.xlu1 %3859 }
 0x3e8   : > { %v4458_v12 = vmax.f32 %v4457_v1, %v4391_v9  ;;  %v4495_v23 = vmax.f32 %v4494_v52, %v4392_v20  ;;  %v4532_v24 = vmax.f32 %v4531_v56, %v4393_v16  ;;  %v4394_v47 = vsel %vm4293_vm12, %v13135_v40, -1e+09  ;;  %v13140_v46 = vld [vmem:[#allocation92_spill] sm:$0xff]  ;;  %v13143_v17 = vld [vmem:[#allocation177_spill] sm:$0xff]  ;;  %v13146_v32 = vld [vmem:[#allocation179_spill] sm:$0xff] }
 0x3e9   : > { %v4569_v59 = vmax.f32 %v4568_v39, %v4394_v47  ;;  %vm4302_vm13 = vcmp.eq.s32.totalorder %v4270_v42, 1  ;;  %vm4295_vm14 = vcmp.eq.s32.totalorder %v11170_v3, 1  ;;  %vm4297_vm15 = vcmp.eq.s32.totalorder %v11195_v41, 1  ;;  %v13144_v8 = vld [vmem:[#allocation176_spill] sm:$0xff]  ;;  %v13145_v1 = vld [vmem:[#allocation125_spill] sm:$0xff]  ;;  %v13150_v40 = vld [vmem:[#allocation195_spill] sm:$0xff] }
 0x3ea   : > { %v13137_v30 = vrot.slane %v13136_v11, 2  ;;  %v4427_v35 = vsel %vm4302_vm13, %v13138_v22, -1e+09  ;;  %v4428_v14 = vsel %vm4302_vm13, %v13139_v28, -1e+09  ;;  %v13147_v39 = vld [vmem:[#allocation181_spill] sm:$0xff] }
 0x3eb   : > { %v4429_v21 = vsel %vm4302_vm13, %v13140_v46, -1e+09  ;;  %v4459_v49 = vmax.f32 %v4458_v12, %v4427_v35  ;;  %v4496_v13 = vmax.f32 %v4495_v23, %v4428_v14  ;;  %v4430_v5 = vsel %vm4302_vm13, %v13141_v61, -1e+09  ;;  %v13148_v9 = vld [vmem:[#allocation180_spill] sm:$0xff]  ;;  %v13149_v12 = vld [vmem:[#allocation183_spill] sm:$0xff] }
 0x3ec   : > { %v3657_v55 = vmax.f32 %v13136_v11, %v13137_v30  ;;  %v4533_v34 = vmax.f32 %v4532_v24, %v4429_v21  ;;  %v4570_v43 = vmax.f32 %v4569_v59, %v4430_v5  ;;  %v4399_v19 = vsel %vm4295_vm14, %v13142_v54, -1e+09  ;;  %v3863_v21 = vpop.permute.xlu1 %3862 }
 0x3ed   : > { %v4400_v0 = vsel %vm4295_vm14, %v13143_v17, -1e+09  ;;  %v4401_v25 = vsel %vm4295_vm14, %v13144_v8, -1e+09  ;;  %v4460_v29 = vmax.f32 %v4459_v49, %v4399_v19  ;;  %v4402_v52 = vsel %vm4295_vm14, %v13145_v1, -1e+09 }
 0x3ee   : > { %v4497_v31 = vmax.f32 %v4496_v13, %v4400_v0  ;;  %v4534_v38 = vmax.f32 %v4533_v34, %v4401_v25  ;;  %v4571_v56 = vmax.f32 %v4570_v43, %v4402_v52  ;;  %v4407_v42 = vsel %vm4297_vm15, %v13146_v32, -1e+09  ;;  %v13153_v49 = vld [vmem:[#allocation113_spill] sm:$0xff]  ;;  %v13159_v8 = vld [vmem:[#allocation16_spill] sm:$0xff]  ;;  %v13160_v25 = vld [vmem:[#allocation15_spill] sm:$0xff] }
 0x3ef   : > { %v4408_v50 = vsel %vm4297_vm15, %v13147_v39, -1e+09  ;;  %v4409_v33 = vsel %vm4297_vm15, %v13148_v9, -1e+09  ;;  %v4461_v20 = vmax.f32 %v4460_v29, %v4407_v42  ;;  %v4410_v3 = vsel %vm4297_vm15, %v13149_v12, -1e+09 }
 0x3f0   : > { %v4498_v15 = vmax.f32 %v4497_v31, %v4408_v50  ;;  %v4535_v16 = vmax.f32 %v4534_v38, %v4409_v33  ;;  %v4572_v23 = vmax.f32 %v4571_v56, %v4410_v3  ;;  %vm3895_vm0 = vcmp.eq.s32.totalorder %v3857_v58, 1 }
 0x3f1   : > { %v4011_v24 = vsel %vm3895_vm0, %v13112_v6, -1e+09  ;;  %vm3896_vm1 = vcmp.eq.s32.totalorder %v3860_v10, 1  ;;  %v13151_v47 = vrot.slane %v13150_v40, 2  ;;  %v13152_v11 = vmax.f32 %v10923_v7, %v10949_v36  ;;  %v13155_v6 = vld [vmem:[#allocation14_spill] sm:$0xff] }
 0x3f2   : > { %v4012_v35 = vsel %vm3895_vm0, %v13113_v27, -1e+09  ;;  %v4013_v14 = vsel %vm3895_vm0, %v13114_v37, -1e+09  ;;  %v3658_v41 = vrot.slane %v3657_v55, 1  ;;  %v13154_v13 = vrot.slane %v13153_v49, 2 }
 0x3f3   : > { %v3694_v59 = vmax.f32 %v13150_v40, %v13151_v47  ;;  %v4054_v30 = vmax.f32 %v13152_v11, %v4011_v24  ;;  %v13156_v34 = vrot.slane %v13155_v6, 2  ;;  %v13157_v43 = vmax.f32 %v10925_v26, %v10954_v45 }
 0x3f4   : > { %v3731_v58 = vmax.f32 %v13153_v49, %v13154_v13  ;;  %v4462_v7 = vrot.slane %v4461_v20, 4  ;;  %v13158_v36 = vmax.f32 %v10927_v18, %v10959_v48  ;;  %v4014_v37 = vsel %vm3895_vm0, %v13115_v4, -1e+09  ;;  %v13163_v49 = vld [vmem:[#allocation194_spill] sm:$0xff] }
 0x3f5   : > { %v3768_v5 = vmax.f32 %v13155_v6, %v13156_v34  ;;  %v4091_v54 = vmax.f32 %v13157_v43, %v4012_v35  ;;  %v4015_v19 = vsel %vm3896_vm1, %v13120_v53, -1e+09  ;;  %v4499_v17 = vrot.slane %v4498_v15, 4 }
 0x3f6   : > { %v4128_v27 = vmax.f32 %v13158_v36, %v4013_v14  ;;  %v4536_v0 = vrot.slane %v4535_v16, 4  ;;  %v13161_v29 = vmax.f32 %v13159_v8, %v13160_v25  ;;  %vm3897_vm2 = vcmp.eq.s32.totalorder %v3863_v21, 1 }
 0x3f7   : > { %v3695_v38 = vrot.slane %v3694_v59, 1  ;;  %v4055_v26 = vmax.f32 %v4054_v30, %v4015_v19  ;;  %v4016_v45 = vsel %vm3896_vm1, %v13121_v2, -1e+09  ;;  %v4017_v18 = vsel %vm3896_vm1, %v13122_v60, -1e+09  ;;  %v13162_v30 = vld [vmem:[#allocation66_spill] sm:$0xff] }
 0x3f8   : > { %v4165_v31 = vmax.f32 %v13161_v29, %v4014_v37  ;;  %v3732_v48 = vrot.slane %v3731_v58, 1  ;;  %v3769_v4 = vrot.slane %v3768_v5, 1  ;;  %v4573_v1 = vrot.slane %v4572_v23, 4 }
 0x3f9   : > { %v4092_v52 = vmax.f32 %v4091_v54, %v4016_v45  ;;  %v4463_v53 = vmax.f32 %v4461_v20, %v4462_v7  ;;  %v4129_v56 = vmax.f32 %v4128_v27, %v4017_v18  ;;  %v4018_v32 = vsel %vm3896_vm1, %v13123_v51, -1e+09  ;;  %v3866_v20 = vpop.permute.xlu1 %3865 }
 0x3fa   : > { %v4019_v42 = vsel %vm3897_vm2, %v13128_v57, -1e+09  ;;  %v3659_v39 = vmax.f32 %v3657_v55, %v3658_v41  ;;  %v4500_v50 = vmax.f32 %v4498_v15, %v4499_v17  ;;  %v4537_v9 = vmax.f32 %v4535_v16, %v4536_v0 }
 0x3fb   : > { %v4166_v33 = vmax.f32 %v4165_v31, %v4018_v32  ;;  %v3696_v2 = vmax.f32 %v3694_v59, %v3695_v38  ;;  %v4056_v12 = vmax.f32 %v4055_v26, %v4019_v42  ;;  %v4020_v60 = vsel %vm3897_vm2, %v13129_v63, -1e+09 }
 0x3fc   : > { %v4021_v3 = vsel %vm3897_vm2, %v13130_v62, -1e+09  ;;  %v3733_v24 = vmax.f32 %v3731_v58, %v3732_v48  ;;  %v3770_v40 = vmax.f32 %v3768_v5, %v3769_v4  ;;  %v4574_v10 = vmax.f32 %v4572_v23, %v4573_v1  ;;  %v13164_v58 = vld [vmem:[#allocation109_spill] sm:$0xff] }
 0x3fd   : > { %v4093_v51 = vmax.f32 %v4092_v52, %v4020_v60  ;;  %v4464_v47 = vrot.slane %v4463_v53, 2  ;;  %v4130_v11 = vmax.f32 %v4129_v56, %v4021_v3  ;;  %v4022_v57 = vsel %vm3897_vm2, %v13131_v44, -1e+09  ;;  %v4614_v60 = vld [vmem:[#allocation2] sm:$0xff]  ;;  %v4615_v3 = vld [vmem:[#allocation2 + $0x8] sm:$0xff] }
 0x3fe   : > { %vm4599_vm3 = vcmask 1044480   ;;  %v4501_v55 = vrot.slane %v4500_v50, 2  ;;  %v4538_v15 = vrot.slane %v4537_v9, 2  ;;  %v4167_v16 = vmax.f32 %v4166_v33, %v4022_v57 }
 0x3ff   : > { %vm3898_vm4 = vcmp.eq.s32.totalorder %v3866_v20, 1  ;;  %v4600_v23 = vsel %vm4599_vm3, %v13162_v30, %v3659_v39  ;;  %v4601_v13 = vsel %vm4599_vm3, %v13163_v49, %v3696_v2  ;;  %v4602_v6 = vsel %vm4599_vm3, %v13164_v58, %v3733_v24  ;;  %v4616_v20 = vld [vmem:[#allocation2 + $0x10] sm:$0xff] }
 0x400   : > { %v4023_v63 = vsel %vm3898_vm4, %v13138_v22, -1e+09  ;;  %v4024_v59 = vsel %vm3898_vm4, %v13139_v28, -1e+09  ;;  %v4025_v62 = vsel %vm3898_vm4, %v13140_v46, -1e+09  ;;  %v4465_v37 = vmax.f32 %v4463_v53, %v4464_v47 }
 0x401   : > { %v4057_v35 = vmax.f32 %v4056_v12, %v4023_v63  ;;  %v4094_v14 = vmax.f32 %v4093_v51, %v4024_v59  ;;  %v4131_v41 = vmax.f32 %v4130_v11, %v4025_v62  ;;  %v4026_v21 = vsel %vm3898_vm4, %v13141_v61, -1e+09  ;;  %v13165_v22 = vld [vmem:[#allocation193_spill] sm:$0xff] }
 0x402   : > { %v4168_v44 = vmax.f32 %v4167_v16, %v4026_v21  ;;  %v4603_v28 = vsel %vm4599_vm3, %v13165_v22, %v3770_v40  ;;  %v4575_v34 = vrot.slane %v4574_v10, 2  ;;  %v4502_v61 = vmax.f32 %v4500_v50, %v4501_v55 }
 0x403   : > { %v4058_v46 = vrot.slane %v4057_v35, 4  ;;  %v4095_v5 = vrot.slane %v4094_v14, 4  ;;  %v4132_v43 = vrot.slane %v4131_v41, 4  ;;  %v4539_v19 = vmax.f32 %v4537_v9, %v4538_v15 }
 0x404   : > { %v4169_v54 = vrot.slane %v4168_v44, 4  ;;  %v4576_v0 = vmax.f32 %v4574_v10, %v4575_v34  ;;  %v4466_v18 = vrot.slane %v4465_v37, 1  ;;  %v4503_v48 = vrot.slane %v4502_v61, 1  ;;  %v4617_v10 = vld [vmem:[#allocation2 + $0x18] sm:$0xff] }
 0x405   : > { %v4059_v7 = vmax.f32 %v4057_v35, %v4058_v46  ;;  %v4096_v36 = vmax.f32 %v4094_v14, %v4095_v5  ;;  %v4133_v27 = vmax.f32 %v4131_v41, %v4132_v43  ;;  %v4540_v4 = vrot.slane %v4539_v19, 1  ;;  %v4662_v14 = vld [vmem:[%s5661_s1 + $0x8] sm:$0xff] (!%p5144_p1)  ;;  %v4630_v5 = vld [vmem:[%s5651_s9] sm:$0xf] (!%p5144_p1) }
 0x406   : > { %v4170_v17 = vmax.f32 %v4168_v44, %v4169_v54  ;;  %v4577_v52 = vrot.slane %v4576_v0, 1  ;;  %vm4604_vm5 = vcmask 1045504   ;;  %vm4609_vm6 = vcmask 1046528  }
 0x407   : > { %v4060_v8 = vrot.slane %v4059_v7, 2  ;;  %v4097_v25 = vrot.slane %v4096_v36, 2  ;;  %v4134_v29 = vrot.slane %v4133_v27, 2  ;;  %v4467_v33 = vmax.f32 %v4465_v37, %v4466_v18 }
 0x408   : > { %v4171_v31 = vrot.slane %v4170_v17, 2  ;;  %v4504_v2 = vmax.f32 %v4502_v61, %v4503_v48  ;;  %v4541_v12 = vmax.f32 %v4539_v19, %v4540_v4  ;;  %v4578_v40 = vmax.f32 %v4576_v0, %v4577_v52 }
 0x409   : > { %v4061_v38 = vmax.f32 %v4059_v7, %v4060_v8  ;;  %v4098_v26 = vmax.f32 %v4096_v36, %v4097_v25  ;;  %v4135_v45 = vmax.f32 %v4133_v27, %v4134_v29  ;;  %v5522_v41 = vmov (!%p5144_p1), 1  }
 0x40a   : > { %v4172_v1 = vmax.f32 %v4170_v17, %v4171_v31  ;;  %5405 = vset.pattern.permute.xlu1 (!%p5144_p1), %v5522_v41  ;;  %vm4664_vm8 = vcmp.gt.f32.partialorder (!%p5144_p1), %v4662_v14, 0.0  ;;  %v5523_v21 = vmov (!%p5144_p1), 0   ;;  %v5525_v58 = vmov (!%p5144_p1), 3  }
 0x40b   : > { %v4062_v56 = vrot.slane %v4061_v38, 1  ;;  %v4099_v32 = vrot.slane %v4098_v26, 1  ;;  %v4136_v42 = vrot.slane %v4135_v45, 1  ;;  %5404 = vset.pattern.permute.xlu0 (!%p5144_p1), %v5523_v21  ;;  %v4666_v49 = vsel (!%p5144_p1), %vm4664_vm8, 1, %v5523_v21 }
 0x40c   : > { %v4173_v53 = vrot.slane %v4172_v1, 1  ;;  %v5527_v22 = vmov (!%p5144_p1), 5   ;;  %v5529_v34 = vmov (!%p5144_p1), 7   ;;  %v4637_v46 = vlaneseq (!%p5144_p1) }
 0x40d   : > { %v4063_v39 = vmax.f32 %v4061_v38, %v4062_v56  ;;  %v4100_v50 = vmax.f32 %v4098_v26, %v4099_v32  ;;  %v4137_v9 = vmax.f32 %v4135_v45, %v4136_v42  ;;  %vm4631_vm9 = vcmp.gt.f32.partialorder (!%p5144_p1), %v4630_v5, 0.0 }
 0x40e   : > { %v4174_v24 = vmax.f32 %v4172_v1, %v4173_v53  ;;  %4629 = sbr.rel (%p5144_p1) target bundleno = 1218 (0x4c2), region = 48  ;;  %v4638_v43 = vshrl.u32 (!%p5144_p1), %v4637_v46, 7  ;;  %v4636_v61 = vsel (!%p5144_p1), %vm4631_vm9, 1, %v5523_v21 }
 0x40f   : > { %v4605_v51 = vsel %vm4604_vm5, %v4600_v23, %v4063_v39  ;;  %v4606_v47 = vsel %vm4604_vm5, %v4601_v13, %v4100_v50  ;;  %v4607_v11 = vsel %vm4604_vm5, %v4602_v6, %v4137_v9  ;;  %v4661_v23 = vld [vmem:[%s5661_s1] sm:$0xff] (!%p5144_p1)  ;;  %v5524_v13 = vmov (!%p5144_p1), 2  }
 0x410   : > { %v4608_v57 = vsel %vm4604_vm5, %v4603_v28, %v4174_v24  ;;  %v4610_v55 = vsel %vm4609_vm6, %v4605_v51, %v4467_v33  ;;  %v4611_v15 = vsel %vm4609_vm6, %v4606_v47, %v4504_v2  ;;  %v4612_v16 = vsel %vm4609_vm6, %v4607_v11, %v4541_v12 }
 0x411   : > { %v4613_v63 = vsel %vm4609_vm6, %v4608_v57, %v4578_v40  ;;  %v4618_v59 = vmax.f32 %v4614_v60, %v4610_v55  ;;  %v4619_v62 = vmax.f32 %v4615_v3, %v4611_v15  ;;  %v4620_v30 = vmax.f32 %v4616_v20, %v4612_v16 }
 0x412   : > { %v4621_v35 = vmax.f32 %v4617_v10, %v4613_v63  ;;  %vm4663_vm7 = vcmp.gt.f32.partialorder (!%p5144_p1), %v4661_v23, 0.0  ;;  %v5526_v6 = vmov (!%p5144_p1), 4   ;;  %v5528_v28 = vmov (!%p5144_p1), 6  }
 0x413   : > { %4622 = vst [vmem:[#allocation2] sm:$0xff] %v4618_v59  ;;  %4623 = vst [vmem:[#allocation2 + $0x8] sm:$0xff] %v4619_v62  ;;  %v4665_v44 = vsel (!%p5144_p1), %vm4663_vm7, 1, %v5523_v21  ;;  %v4639_v54 = vsub.s32 (!%p5144_p1), 0, %v4638_v43  ;;  %v4643_v7 = vsub.s32 (!%p5144_p1), 1, %v4638_v43  ;;  %v4647_v36 = vsub.s32 (!%p5144_p1), 2, %v4638_v43 }
 0x414   : > { %4624 = vst [vmem:[#allocation2 + $0x10] sm:$0xff] %v4620_v30  ;;  %4625 = vst [vmem:[#allocation2 + $0x18] sm:$0xff] %v4621_v35  ;;  %4700 = vperm.xlu1 (!%p5144_p1), %5405, %v4665_v44   ;;  %4668 = vperm.xlu0 (!%p5144_p1), %5404, %v4665_v44   ;;  %v4651_v37 = vsub.s32 (!%p5144_p1), 3, %v4638_v43  ;;  %v4805_v2 = vsub.s32 (!%p5144_p1), 4, %v4638_v43  ;;  %v4837_v20 = vsub.s32 (!%p5144_p1), 5, %v4638_v43  ;;  %v4869_v51 = vsub.s32 (!%p5144_p1), 6, %v4638_v43 }
 0x415   : > { %v4640_v19 = vrot.slane %v4636_v61, %v4639_v54  ;;  %v4644_v17 = vrot.slane %v4636_v61, %v4643_v7  ;;  %v4648_v0 = vrot.slane %v4636_v61, %v4647_v36  ;;  %v4901_v55 = vsub.s32 7, %v4638_v43 }
 0x416   : > { %v4652_v25 = vrot.slane %v4636_v61, %v4651_v37 }
 0x417   : > { %vm4653_vm10 = vcmp.eq.s32.totalorder %v4640_v19, 1  ;;  %vm4654_vm11 = vcmp.eq.s32.totalorder %v4644_v17, 1  ;;  %vm4655_vm12 = vcmp.eq.s32.totalorder %v4648_v0, 1 }
 0x418   : > { %4703 = vperm.xlu1 %5405, %v4666_v49   ;;  %4671 = vperm.xlu0 %5404, %v4666_v49   ;;  %vm4656_vm13 = vcmp.eq.s32.totalorder %v4652_v25, 1 }
 0x41a   : > { %v4632_v31 = vld [vmem:[#allocation2] sm:$0xff]  ;;  %v4633_v38 = vld [vmem:[#allocation2 + $0x8] sm:$0xff] }
 0x41b   : > { %v4634_v26 = vld [vmem:[#allocation2 + $0x10] sm:$0xff]  ;;  %v4635_v45 = vld [vmem:[#allocation2 + $0x18] sm:$0xff]  ;;  %v4657_v48 = vsel %vm4653_vm10, %v4632_v31, -1e+09  ;;  %v4658_v4 = vsel %vm4654_vm11, %v4633_v38, -1e+09 }
 0x41c   : > { %5407 = vset.pattern.permute.xlu1 %v5524_v13  ;;  %5406 = vset.pattern.permute.xlu0 %v5524_v13  ;;  %v4659_v1 = vsel %vm4655_vm12, %v4634_v26, -1e+09  ;;  %v4660_v52 = vsel %vm4656_vm13, %v4635_v45, -1e+09  ;;  %v4678_v32 = vrot.slane %v4657_v48, %v4639_v54  ;;  %v4682_v42 = vrot.slane %v4658_v4, %v4639_v54 }
 0x41d   : > { %4735 = vperm.xlu1 %5407, %v4666_v49   ;;  %4732 = vperm.xlu0 %5406, %v4665_v44   ;;  %v4686_v53 = vrot.slane %v4659_v1, %v4639_v54  ;;  %v4690_v50 = vrot.slane %v4660_v52, %v4639_v54  ;;  %v4710_v9 = vrot.slane %v4657_v48, %v4643_v7 }
 0x41e   : > { %v4714_v33 = vrot.slane %v4658_v4, %v4643_v7  ;;  %v4718_v12 = vrot.slane %v4659_v1, %v4643_v7  ;;  %v4722_v60 = vrot.slane %v4660_v52, %v4643_v7  ;;  %v4742_v3 = vrot.slane %v4657_v48, %v4647_v36 }
 0x41f   : > { %v4746_v24 = vrot.slane %v4658_v4, %v4647_v36  ;;  %v4750_v40 = vrot.slane %v4659_v1, %v4647_v36  ;;  %v11331_v10 = vrot.slane %v4660_v52, %v4647_v36  ;;  %v11333_v47 = vrot.slane %v4657_v48, %v4651_v37 }
 0x420   : > { %v11335_v11 = vrot.slane %v4658_v4, %v4651_v37  ;;  %v11337_v57 = vrot.slane %v4659_v1, %v4651_v37  ;;  %v11339_v16 = vrot.slane %v4660_v52, %v4651_v37  ;;  %v11343_v59 = vrot.slane %v4657_v48, %v4805_v2 }
 0x421   : > { %5408 = vset.pattern.permute.xlu1 %v5525_v58  ;;  %5409 = vset.pattern.permute.xlu0 %v5525_v58  ;;  %v11345_v62 = vrot.slane %v4658_v4, %v4805_v2  ;;  %v11347_v30 = vrot.slane %v4659_v1, %v4805_v2  ;;  %v11349_v35 = vrot.slane %v4660_v52, %v4805_v2 }
 0x422   : > { %4764 = vperm.xlu1 %5408, %v4665_v44   ;;  %4767 = vperm.xlu0 %5409, %v4666_v49   ;;  %v11351_v23 = vrot.slane %v4657_v48, %v4837_v20  ;;  %v11353_v14 = vrot.slane %v4658_v4, %v4837_v20  ;;  %v11355_v41 = vrot.slane %v4659_v1, %v4837_v20 }
 0x423   : > { %v11357_v21 = vrot.slane %v4660_v52, %v4837_v20  ;;  %v11363_v13 = vrot.slane %v4659_v1, %v4869_v51  ;;  %v11365_v58 = vrot.slane %v4660_v52, %v4869_v51  ;;  %v11372_v46 = vrot.slane %v4658_v4, %v4901_v55 }
 0x424   : > { %v11381_v19 = vrot.slane %v4659_v1, %v4901_v55  ;;  %v11388_v25 = vrot.slane %v4660_v52, %v4901_v55 }
 0x426   : > { %5410 = vset.pattern.permute.xlu1 %v5526_v6  ;;  %5411 = vset.pattern.permute.xlu0 %v5527_v22  ;;  %v11367_v6 = vrot.slane %v4657_v48, %v4901_v55 }
 0x427   : > { %4796 = vperm.xlu1 %5410, %v4665_v44   ;;  %4828 = vperm.xlu0 %5411, %v4665_v44  }
 0x42b   : > { %4799 = vperm.xlu1 %5410, %v4666_v49   ;;  %5414 = vset.pattern.permute.xlu0 %v5528_v28 }
 0x42c   : > { %4863 = vperm.xlu0 %5414, %v4666_v49  }
 0x42f   : > { %5412 = vset.pattern.permute.xlu1 %v5527_v22 }
 0x430   : > { %4831 = vperm.xlu1 %5412, %v4666_v49   ;;  %5416 = vset.pattern.permute.xlu0 %v5529_v34 }
 0x434   : > { %5413 = vset.pattern.permute.xlu1 %v5528_v28 }
 0x435   : > { %4860 = vperm.xlu1 %5413, %v4665_v44  }
 0x439   : > { %5415 = vset.pattern.permute.xlu1 %v5529_v34 }
 0x43a   : > { %4892 = vperm.xlu1 %5415, %v4665_v44   ;;  %v11359_v44 = vrot.slane %v4657_v48, %v4869_v51 }
 0x43e   : > { %4895 = vperm.xlu1 %5415, %v4666_v49   ;;  %v11361_v49 = vrot.slane %v4658_v4, %v4869_v51 }
 0x493   : > { %v11323_v27 = vpop.permute.xlu1 %4700  ;;  %v4669_v29 = vpop.permute.xlu0 %4668 }
 0x494   : > { %vm4673_vm14 = vcmp.eq.s32.totalorder %v4669_v29, 1  ;;  %vm4705_vm0 = vcmp.eq.s32.totalorder %v11323_v27, 1 }
 0x495   : > { %v4691_v22 = vsel %vm4673_vm14, %v4678_v32, 0.0  ;;  %v4692_v28 = vsel %vm4673_vm14, %v4682_v42, 0.0  ;;  %v4693_v5 = vsel %vm4673_vm14, %v4686_v53, 0.0  ;;  %v4694_v43 = vsel %vm4673_vm14, %v4690_v50, 0.0 }
 0x496   : > { %v4723_v17 = vsel %vm4705_vm0, %v4710_v9, %v4691_v22  ;;  %v4724_v0 = vsel %vm4705_vm0, %v4714_v33, %v4692_v28  ;;  %v4725_v31 = vsel %vm4705_vm0, %v4718_v12, %v4693_v5  ;;  %v4726_v38 = vsel %vm4705_vm0, %v4722_v60, %v4694_v43 }
 0x497   : > { %v11325_v8 = vpop.permute.xlu1 %4703  ;;  %v4672_v56 = vpop.permute.xlu0 %4671 }
 0x498   : > { %vm4674_vm15 = vcmp.eq.s32.totalorder %v4672_v56, 1  ;;  %vm4706_vm1 = vcmp.eq.s32.totalorder %v11325_v8, 1 }
 0x499   : > { %v4695_v54 = vsel %vm4674_vm15, %v4678_v32, 0.0  ;;  %v4696_v7 = vsel %vm4674_vm15, %v4682_v42, 0.0  ;;  %v4697_v36 = vsel %vm4674_vm15, %v4686_v53, 0.0  ;;  %v4698_v37 = vsel %vm4674_vm15, %v4690_v50, 0.0 }
 0x49a   : > { %v4727_v29 = vsel %vm4706_vm1, %v4710_v9, %v4695_v54  ;;  %v4728_v26 = vsel %vm4706_vm1, %v4714_v33, %v4696_v7  ;;  %v4729_v45 = vsel %vm4706_vm1, %v4718_v12, %v4697_v36  ;;  %v4730_v48 = vsel %vm4706_vm1, %v4722_v60, %v4698_v37 }
 0x49c   : > { %v11327_v18 = vpop.permute.xlu1 %4735  ;;  %v4733_v15 = vpop.permute.xlu0 %4732 }
 0x49d   : > { %vm4738_vm2 = vcmp.eq.s32.totalorder %v11327_v18, 1  ;;  %vm4737_vm3 = vcmp.eq.s32.totalorder %v4733_v15, 1 }
 0x49e   : > { %v4759_v1 = vsel %vm4738_vm2, %v4742_v3, %v4727_v29  ;;  %v4760_v27 = vsel %vm4738_vm2, %v4746_v24, %v4728_v26  ;;  %v4761_v52 = vsel %vm4738_vm2, %v4750_v40, %v4729_v45  ;;  %v4755_v32 = vsel %vm4737_vm3, %v4742_v3, %v4723_v17 }
 0x49f   : > { %v4756_v42 = vsel %vm4737_vm3, %v4746_v24, %v4724_v0  ;;  %v4757_v53 = vsel %vm4737_vm3, %v4750_v40, %v4725_v31  ;;  %v4758_v8 = vsel %vm4737_vm3, %v11331_v10, %v4726_v38  ;;  %v4762_v60 = vsel %vm4738_vm2, %v11331_v10, %v4730_v48 }
 0x4a1   : > { %v11329_v39 = vpop.permute.xlu1 %4764  ;;  %v4768_v61 = vpop.permute.xlu0 %4767 }
 0x4a2   : > { %vm4769_vm4 = vcmp.eq.s32.totalorder %v11329_v39, 1  ;;  %vm4770_vm6 = vcmp.eq.s32.totalorder %v4768_v61, 1 }
 0x4a3   : > { %v4787_v39 = vsel %vm4769_vm4, %v11333_v47, %v4755_v32  ;;  %v4788_v50 = vsel %vm4769_vm4, %v11335_v11, %v4756_v42  ;;  %v4789_v9 = vsel %vm4769_vm4, %v11337_v57, %v4757_v53  ;;  %v4790_v33 = vsel %vm4769_vm4, %v11339_v16, %v4758_v8 }
 0x4a4   : > { %v4791_v40 = vsel %vm4770_vm6, %v11333_v47, %v4759_v1  ;;  %v4792_v51 = vsel %vm4770_vm6, %v11335_v11, %v4760_v27  ;;  %v4793_v55 = vsel %vm4770_vm6, %v11337_v57, %v4761_v52  ;;  %v4794_v18 = vsel %vm4770_vm6, %v11339_v16, %v4762_v60 }
 0x4a6   : > { %v11341_v63 = vpop.permute.xlu1 %4796  ;;  %v4829_v56 = vpop.permute.xlu0 %4828 }
 0x4a7   : > { %vm4801_vm5 = vcmp.eq.s32.totalorder %v11341_v63, 1  ;;  %vm4833_vm7 = vcmp.eq.s32.totalorder %v4829_v56, 1 }
 0x4a8   : > { %v4819_v2 = vsel %vm4801_vm5, %v11343_v59, %v4787_v39  ;;  %v4820_v12 = vsel %vm4801_vm5, %v11345_v62, %v4788_v50  ;;  %v4821_v3 = vsel %vm4801_vm5, %v11347_v30, %v4789_v9  ;;  %v4822_v20 = vsel %vm4801_vm5, %v11349_v35, %v4790_v33 }
 0x4a9   : > { %v4851_v10 = vsel %vm4833_vm7, %v11351_v23, %v4819_v2  ;;  %v4852_v22 = vsel %vm4833_vm7, %v11353_v14, %v4820_v12  ;;  %v4853_v63 = vsel %vm4833_vm7, %v11355_v41, %v4821_v3  ;;  %v4854_v47 = vsel %vm4833_vm7, %v11357_v21, %v4822_v20 }
 0x4aa   : > { %v4800_v34 = vpop.permute.xlu1 %4799 }
 0x4ab   : > { %vm4802_vm8 = vcmp.eq.s32.totalorder %v4800_v34, 1  ;;  %v4864_v15 = vpop.permute.xlu0 %4863 }
 0x4ac   : > { %v4823_v11 = vsel %vm4802_vm8, %v11343_v59, %v4791_v40  ;;  %v4824_v57 = vsel %vm4802_vm8, %v11345_v62, %v4792_v51  ;;  %v4825_v16 = vsel %vm4802_vm8, %v11347_v30, %v4793_v55  ;;  %v4826_v28 = vsel %vm4802_vm8, %v11349_v35, %v4794_v18 }
 0x4ad   : > { %vm4866_vm11 = vcmp.eq.s32.totalorder %v4864_v15, 1 }
 0x4af   : > { %v4832_v4 = vpop.permute.xlu1 %4831 }
 0x4b0   : > { %vm4834_vm9 = vcmp.eq.s32.totalorder %v4832_v4, 1 }
 0x4b1   : > { %v4855_v5 = vsel %vm4834_vm9, %v11351_v23, %v4823_v11  ;;  %v4856_v43 = vsel %vm4834_vm9, %v11353_v14, %v4824_v57  ;;  %v4857_v59 = vsel %vm4834_vm9, %v11355_v41, %v4825_v16  ;;  %v4858_v62 = vsel %vm4834_vm9, %v11357_v21, %v4826_v28 }
 0x4b2   : > { %v4887_v36 = vsel %vm4866_vm11, %v11359_v44, %v4855_v5  ;;  %v4888_v61 = vsel %vm4866_vm11, %v11361_v49, %v4856_v43  ;;  %v4889_v17 = vsel %vm4866_vm11, %v11363_v13, %v4857_v59  ;;  %v4890_v0 = vsel %vm4866_vm11, %v11365_v58, %v4858_v62 }
 0x4b4   : > { %v4861_v24 = vpop.permute.xlu1 %4860 }
 0x4b5   : > { %vm4865_vm10 = vcmp.eq.s32.totalorder %v4861_v24, 1 }
 0x4b6   : > { %v4883_v30 = vsel %vm4865_vm10, %v11359_v44, %v4851_v10  ;;  %v4884_v23 = vsel %vm4865_vm10, %v11361_v49, %v4852_v22  ;;  %v4885_v34 = vsel %vm4865_vm10, %v11363_v13, %v4853_v63  ;;  %v4886_v14 = vsel %vm4865_vm10, %v11365_v58, %v4854_v47 }
 0x4b9   : > { %v4893_v35 = vpop.permute.xlu1 %4892 }
 0x4ba   : > { %vm4897_vm12 = vcmp.eq.s32.totalorder %v4893_v35, 1 }
 0x4bb   : > { %v4915_v54 = vsel %vm4897_vm12, %v11367_v6, %v4883_v30  ;;  %v4916_v41 = vsel %vm4897_vm12, %v11372_v46, %v4884_v23  ;;  %v4917_v21 = vsel %vm4897_vm12, %v11381_v19, %v4885_v34  ;;  %v4918_v7 = vsel %vm4897_vm12, %v11388_v25, %v4886_v14 }
 0x4bc   : > { %4923 = vst [vmem:[%s5663_s28] sm:$0xff] %v4915_v54  ;;  %4924 = vst [vmem:[%s5663_s28 + $0x8] sm:$0xff] %v4916_v41 }
 0x4bd   : > { %4925 = vst [vmem:[%s5663_s28 + $0x10] sm:$0xff] %v4917_v21  ;;  %4926 = vst [vmem:[%s5663_s28 + $0x18] sm:$0xff] %v4918_v7  ;;  %v4896_v37 = vpop.permute.xlu1 %4895 }
 0x4be   : > { %vm4898_vm13 = vcmp.eq.s32.totalorder %v4896_v37, 1 }
 0x4bf   : > { %v4919_v29 = vsel %vm4898_vm13, %v11367_v6, %v4887_v36  ;;  %v4920_v31 = vsel %vm4898_vm13, %v11372_v46, %v4888_v61  ;;  %v4921_v38 = vsel %vm4898_vm13, %v11381_v19, %v4889_v17  ;;  %v4922_v26 = vsel %vm4898_vm13, %v11388_v25, %v4890_v0 }
 0x4c0   : > { %4927 = vst [vmem:[%s5663_s28 + $0x20] sm:$0xff] %v4919_v29  ;;  %4928 = vst [vmem:[%s5663_s28 + $0x28] sm:$0xff] %v4920_v31 }
 0x4c1   : > { %4929 = vst [vmem:[%s5663_s28 + $0x30] sm:$0xff] %v4921_v38  ;;  %4930 = vst [vmem:[%s5663_s28 + $0x38] sm:$0xff] %v4922_v26 }
 0x4c2 PF: > { %s5152_s1 = sshll.u32 %s5499_s22, 10  ;;  %s4945_s24 = sshll.u32 %s5663_s28, 4  ;;  %s11497_s24 = int_to_ptr.vmem [resolvable:$true] %s4945_s24 }
 0x4c3   : > { %s11494_s23 = scalar_lea.hbm %s11558_s5, %s5152_s1  ;;  %s13166_s29 = sand.u32 1, %s5487_s19  }
 0x4c4   : > { %s11501_s6 = scalar_lea.sflag [#allocation4], %s13166_s29  ;;  %s5417_s9 = scalar_lea.vmem %s11497_s24, 1024 }
 0x4c5   : > { %p5418_p2 = scmp.ne.s32.totalorder %s11497_s24, %s5417_s9  ;;  %s5530_s22 = smov [#allocation3]  }
 0x4c6   : > { %s5421_s10 = sshll.u32 %s5530_s22, 4  ;;  %s5422_s10 = int_to_ptr.vmem [resolvable:$false] %s5421_s10 }
 0x4c7   : > { %p5419_p4 = pnand %p5418_p2, %p5612_p3  ;;  %s5423_s12 = scalar_lea.vmem %s5422_s10, 2048 }
 0x4c8   : > { %p5424_p6 = scmp.lt.s32.totalorder %s11497_s24, %s5422_s10  ;;  %p5425_p7 = scmp.lt.s32.totalorder %s5423_s12, %s5417_s9 }
 0x4c9   : > { %p5420_p5 = pneg %p5419_p4 }
 0x4ca   : > { %p5426_p8 = por %p5425_p7, %p5424_p6 }
 0x4cc   : > { %p5427_p10 = pnand %p5426_p8, %p5420_p5 }
 0x4ce   : > { %5430 = shalt.err (!%p5427_p10)
}
 0x4cf   : > { %s5431_s13 = scalar_lea.hbm %s11494_s23, 1024  ;;  %s5435_s7 = scalar_lea.hbm %s11558_s5, 2048 }
 0x4d0   : > { %p5432_p11 = scmp.ne.s32.totalorder %s11494_s23, %s5431_s13  ;;  %p5436_p0 = scmp.lt.u32.totalorder %s11494_s23, %s11558_s5 }
 0x4d1   : > { %p5437_p1 = scmp.lt.u32.totalorder %s5435_s7, %s5431_s13  ;;  %p5439_p4 = scmp.lt.u32.totalorder %s5431_s13, %s11494_s23 }
 0x4d2   : > { %p5433_p12 = pnand %p5432_p11, %p5612_p3 }
 0x4d3   : > { %p5438_p2 = por %p5437_p1, %p5436_p0 }
 0x4d4   : > { %p5434_p13 = pneg %p5433_p12 }
 0x4d5   : > { %p5440_p5 = por %p5439_p4, %p5438_p2 }
 0x4d7   : > { %p5441_p6 = pnand %p5440_p5, %p5434_p13 }
 0x4d9   : > { %5444 = shalt.err (!%p5441_p6)
}
 0x4da   : > { %s5531_s14 = smov 512   ;;  %s5532_s17 = smov 32  }
 0x4db   : > { %5249 = dma.vmem_to_hbm [thread:$0]  (%p5612_p3), %s11497_s24, 1024, %s11494_s23, %s11501_s6, %s5531_s14, %s5531_s14, %s5532_s17  }
 0x4dc PF: > { %p5255_p7 = scmp.ge.s32.totalorder %s5511_s25, 2  ;;  %s4960_s26 = sand.u32 1, %s5483_s18  }
 0x4dd   : > { %s4961_s28 = scalar_lea.sflag [#allocation4], %s4960_s26 }
 0x4de   : > { %p5252_p8 = pnand %p5255_p7, %p5622_p9 }
 0x4e0   : > { %5478 = dma.done.wait (!%p5252_p8), %s4961_s28, 1024  }
 0x4e1   : > { %5480 = vsyncadd (!%p5252_p8), %s4961_s28, 4294966272  ;;  %s18_s25 = sadd.s32 1, %s5511_s25   ;;  %s13168_s1 = sld [smem:[#allocation6_spill]] }
 0x4e2   : > { %p15_p10 = scmp.ge.s32.totalorder %s18_s25, 6   ;;  %s13169_s20 = sld [smem:[#allocation12_spill]] }
 0x4e3   : > { %s13170_s21 = sld [smem:[#allocation7_spill]]  ;;  %s13171_s22 = sld [smem:[#allocation8_spill]] }
 0x4e4   : > { %s13172_s23 = sld [smem:[#allocation9_spill]]  ;;  %s13173_s24 = sld [smem:[#allocation10_spill]] }
 0x4e5   : > { %s13174_s18 = smov %s5487_s19  ;;  %17 = sbr.rel (!%p15_p10) target bundleno = 7 (0x7), region = 95 }
 0x4e7   : > { %s13175_s19 = smov %s13168_s1 }
 0x4ec   :  { %4966 = vsyncpa [#allocation4], 1 }
 0x4ed   :  { %4968 = vsyncpa [#allocation4 + $0x1], 1 }

</bundles_post_ra>
